<compile_context>
chip_gen: v7x
topology: tpu7x:2x2x1
jax: 0.10.0
libtpu: 0.0.40
codegen_flags: <defaults>
</compile_context>

<pallas_src>
import functools

import jax
import jax.numpy as jnp
from jax.experimental import pallas as pl
from jax.experimental.pallas import tpu as pltpu


def _round_up(x, m):
    return ((x + m - 1) // m) * m


# -----------------------------------------------------------------------------
# Fused encoder: Conv3d(1->C, k3, p1) + ReLU + Conv3d(C->C, k3, p1).
# One grid step per batch element; whole volume resident in VMEM; no im2col in
# HBM — the 27 taps are flat-offset slices of zero-haloed slabs, masked for
# w/d wrap-around (h overflow lands in the zero halo automatically).
# -----------------------------------------------------------------------------
def _encoder_kernel(xpad_ref, idx_ref, w1_ref, b1_ref, w2_ref, b2_ref,
                    fm32_ref, fm16_ref, *, h, w, d, halo_a):
    S = h * w * d
    C1 = w1_ref.shape[0]

    x = xpad_ref[0]                       # (1, S + 2*halo_a) f32, zero halo
    w_idx = idx_ref[0:1, :]               # (1, S) int32  (w coord of flat pos)
    d_idx = idx_ref[1:2, :]               # (1, S) int32  (d coord of flat pos)

    def axis_mask(idx, delta, size):
        v = idx + delta
        return ((v >= 0) & (v < size)).astype(jnp.float32)

    wmask = [axis_mask(w_idx, dw, w) for dw in (-1, 0, 1)]
    dmask = [axis_mask(d_idx, dd, d) for dd in (-1, 0, 1)]
    offs = [(dh, dw, dd)
            for dh in (-1, 0, 1) for dw in (-1, 0, 1) for dd in (-1, 0, 1)]

    # ---- conv1 (1 -> C1): masked 27-row im2col built in VMEM, one MXU matmul.
    rows = []
    for (dh, dw, dd) in offs:
        off = dh * (w * d) + dw * d + dd
        sl = x[:, halo_a + off: halo_a + off + S]                 # (1, S)
        rows.append(sl * (wmask[dw + 1] * dmask[dd + 1]))
    cols1 = jnp.concatenate(rows, axis=0)                         # (27, S) f32
    a1 = jnp.dot(w1_ref[...], cols1.astype(jnp.bfloat16),
                 preferred_element_type=jnp.float32)
    a1 = jnp.maximum(a1 + b1_ref[...], 0.0)                       # (C1, S)

    # ---- zero-haloed slab of conv1 activations (stays in VMEM).
    zpad = jnp.zeros((C1, halo_a), jnp.float32)
    a1p = jnp.concatenate([zpad, a1, zpad], axis=-1)              # (C1, S+2*halo_a)

    # ---- conv2 (C1 -> C2): 27 tap matmuls accumulated in f32.
    C2 = w2_ref.shape[1]
    acc = jnp.zeros((C2, S), jnp.float32)
    for t, (dh, dw, dd) in enumerate(offs):
        off = dh * (w * d) + dw * d + dd
        sl = a1p[:, halo_a + off: halo_a + off + S]               # (C1, S)
        sl = sl * (wmask[dw + 1] * dmask[dd + 1])
        acc = acc + jnp.dot(w2_ref[t], sl.astype(jnp.bfloat16),
                            preferred_element_type=jnp.float32)
    acc = acc + b2_ref[...]

    fm32_ref[0] = acc                                             # module output
    fm16_ref[0] = acc.astype(jnp.bfloat16)                        # sampling input


def encoder_pallas(img_lr, w1, b1, w2, b2, *, vmem_limit=48 * 1024 * 1024):
    # img_lr: (N, 1, h, w, d); w1: (C1, 1, 3,3,3); w2: (C2, C1, 3,3,3)
    N, Cin, h, w, d = img_lr.shape
    assert Cin == 1
    S = h * w * d
    C1 = w1.shape[0]
    C2 = w2.shape[0]
    halo = w * d + d + 1                       # max |flat offset| of a 3x3x3 tap
    halo_a = _round_up(halo, 128)              # lane-aligned halo

    x_flat = img_lr.reshape(N, 1, S).astype(jnp.float32)
    xpad = jnp.pad(x_flat, ((0, 0), (0, 0), (halo_a, halo_a)))

    s = jnp.arange(S, dtype=jnp.int32)
    idx = jnp.stack([(s // d) % w, s % d], axis=0)                # (2, S) int32

    w1m = w1.reshape(C1, 27).astype(jnp.bfloat16)
    b1m = b1.reshape(C1, 1).astype(jnp.float32)
    w2m = jnp.transpose(w2, (2, 3, 4, 0, 1)).reshape(27, C2, C1).astype(jnp.bfloat16)
    b2m = b2.reshape(C2, 1).astype(jnp.float32)

    fm32, fm16 = pl.pallas_call(
        functools.partial(_encoder_kernel, h=h, w=w, d=d, halo_a=halo_a),
        out_shape=(jax.ShapeDtypeStruct((N, C2, S), jnp.float32),
                   jax.ShapeDtypeStruct((N, C2, S), jnp.bfloat16)),
        grid=(N,),
        in_specs=[
            pl.BlockSpec((1, 1, S + 2 * halo_a), lambda n: (n, 0, 0)),
            pl.BlockSpec((2, S), lambda n: (0, 0)),
            pl.BlockSpec((C1, 27), lambda n: (0, 0)),
            pl.BlockSpec((C1, 1), lambda n: (0, 0)),
            pl.BlockSpec((27, C2, C1), lambda n: (0, 0, 0)),
            pl.BlockSpec((C2, 1), lambda n: (0, 0)),
        ],
        out_specs=(pl.BlockSpec((1, C2, S), lambda n: (n, 0, 0)),
                   pl.BlockSpec((1, C2, S), lambda n: (n, 0, 0))),
        compiler_params=pltpu.CompilerParams(
            dimension_semantics=("parallel",),
            vmem_limit_bytes=vmem_limit),
    )(xpad, idx, w1m, b1m, w2m, b2m)
    return fm32, fm16                                             # (N, C2, S) x2


# -----------------------------------------------------------------------------
# grid_sample (trilinear, align_corners=False, zeros) as an 8-tap gather
# + fused decoder MLP.  Tap indices/weights are computed ONCE per query in the
# wrapper; the Pallas kernel does the f32 weighted sum and the whole decoder,
# writing only the final lane-dense (N, 1, K) result to HBM.
# -----------------------------------------------------------------------------
def _trilinear_taps_and_weights(fmap16, xyz, h, w, d):
    # fmap16: (N, C, S) bf16; xyz: (N, K, 3), columns = (h, w, d) coords.
    N, C, S = fmap16.shape

    def prep(coord, size):
        # align_corners=False: pix = ((c + 1) * size - 1) / 2
        pix = ((coord + 1.0) * size - 1.0) * 0.5
        f = jnp.floor(pix)
        i0 = f.astype(jnp.int32)
        i1 = i0 + 1
        t = pix - f
        v0 = ((i0 >= 0) & (i0 < size)).astype(jnp.float32)
        v1 = ((i1 >= 0) & (i1 < size)).astype(jnp.float32)
        return ((jnp.clip(i0, 0, size - 1), jnp.clip(i1, 0, size - 1)),
                ((1.0 - t) * v0, t * v1))

    ih, wh_ = prep(xyz[..., 0].astype(jnp.float32), h)
    iw, ww_ = prep(xyz[..., 1].astype(jnp.float32), w)
    idd, wd_ = prep(xyz[..., 2].astype(jnp.float32), d)

    idx_l, wt_l = [], []
    for a in (0, 1):
        for b in (0, 1):
            for c in (0, 1):
                idx_l.append(ih[a] * (w * d) + iw[b] * d + idd[c])
                wt_l.append(wh_[a] * ww_[b] * wd_[c])
    idx8 = jnp.stack(idx_l, axis=1)                               # (N, 8, K) int32
    wt8 = jnp.stack(wt_l, axis=1)                                 # (N, 8, K) f32

    # TODO(synk): move this gather in-kernel (Mosaic dynamic gather) to avoid
    # the (N, 8, C, K) bf16 round trip through HBM.
    def per_n(f, idx):                                            # f (C,S), idx (8,K)
        return jax.vmap(lambda i: jnp.take(f, i, axis=1))(idx)    # (8, C, K)
    taps = jax.vmap(per_n)(fmap16, idx8)                          # (N, 8, C, K) bf16
    return taps, wt8


def _decoder_kernel(xyzT_ref, wt_ref, taps_ref, w0_ref, b0_ref, w1_ref, b1_ref,
                    w2_ref, b2_ref, w3_ref, b3_ref, o_ref):
    # taps_ref: (1, 8, C, tk) bf16 ; wt_ref: (1, 8, tk) f32 ; xyzT_ref: (1, 3, tk)
    wt = wt_ref[0]                                                # (8, tk) f32

    # Trilinear weighted sum of the 8 gathered taps, f32 on the VPU.
    fv = wt[0:1, :] * taps_ref[0, 0].astype(jnp.float32)
    for t in range(1, 8):
        fv = fv + wt[t:t + 1, :] * taps_ref[0, t].astype(jnp.float32)   # (C, tk)

    # Layer 0 on the MXU with xyz folded in: (H, C+3) @ (C+3, tk).
    fx = jnp.concatenate([fv, xyzT_ref[0]], axis=0).astype(jnp.bfloat16)
    a = jnp.dot(w0_ref[...], fx, preferred_element_type=jnp.float32) + b0_ref[...]
    a = jnp.maximum(a, 0.0)
    a = jnp.dot(w1_ref[...], a.astype(jnp.bfloat16),
                preferred_element_type=jnp.float32) + b1_ref[...]
    a = jnp.maximum(a, 0.0)
    a = jnp.dot(w2_ref[...], a.astype(jnp.bfloat16),
                preferred_element_type=jnp.float32) + b2_ref[...]
    a = jnp.maximum(a, 0.0)
    # Final scalar layer as a sublane reduction -> lane-dense (1, tk).
    y = jnp.sum(a * w3_ref[...], axis=0, keepdims=True) + b3_ref[...]
    o_ref[0] = y.astype(o_ref.dtype)


def sample_and_decode_pallas(fmap16, xyz_hr, params, *, h, w, d,
                             k_tile=1024, vmem_limit=48 * 1024 * 1024):
    # fmap16: (N, C, S) bf16; xyz_hr: (N, K, 3) -> (N, 1, K) f32.
    N, C, S = fmap16.shape
    K = xyz_hr.shape[1]
    H = params["dec_w1"].shape[0]

    taps, wt8 = _trilinear_taps_and_weights(fmap16, xyz_hr, h, w, d)
    xyzT = jnp.transpose(xyz_hr, (0, 2, 1)).astype(jnp.float32)   # (N, 3, K), tiny

    tk = min(k_tile, _round_up(K, 128))
    Kp = _round_up(K, tk)
    if Kp != K:
        pad = Kp - K
        taps = jnp.pad(taps, ((0, 0), (0, 0), (0, 0), (0, pad)))
        wt8 = jnp.pad(wt8, ((0, 0), (0, 0), (0, pad)))
        xyzT = jnp.pad(xyzT, ((0, 0), (0, 0), (0, pad)))

    w0 = params["dec_w0"].T.astype(jnp.bfloat16)                  # (H, C+3)
    b0 = params["dec_b0"].reshape(H, 1).astype(jnp.float32)
    w1 = params["dec_w1"].T.astype(jnp.bfloat16)                  # (H, H)
    b1 = params["dec_b1"].reshape(H, 1).astype(jnp.float32)
    w2 = params["dec_w2"].T.astype(jnp.bfloat16)                  # (H, H)
    b2 = params["dec_b2"].reshape(H, 1).astype(jnp.float32)
    w3 = params["dec_w3"].reshape(H, 1).astype(jnp.float32)
    b3 = params["dec_b3"].reshape(1, 1).astype(jnp.float32)

    out = pl.pallas_call(
        _decoder_kernel,
        out_shape=jax.ShapeDtypeStruct((N, 1, Kp), jnp.float32),
        grid=(N, Kp // tk),
        in_specs=[
            pl.BlockSpec((1, 3, tk), lambda n, k: (n, 0, k)),
            pl.BlockSpec((1, 8, tk), lambda n, k: (n, 0, k)),
            pl.BlockSpec((1, 8, C, tk), lambda n, k: (n, 0, 0, k)),
            pl.BlockSpec((H, C + 3), lambda n, k: (0, 0)),
            pl.BlockSpec((H, 1), lambda n, k: (0, 0)),
            pl.BlockSpec((H, H), lambda n, k: (0, 0)),
            pl.BlockSpec((H, 1), lambda n, k: (0, 0)),
            pl.BlockSpec((H, H), lambda n, k: (0, 0)),
            pl.BlockSpec((H, 1), lambda n, k: (0, 0)),
            pl.BlockSpec((H, 1), lambda n, k: (0, 0)),
            pl.BlockSpec((1, 1), lambda n, k: (0, 0)),
        ],
        out_specs=pl.BlockSpec((1, 1, tk), lambda n, k: (n, 0, k)),
        compiler_params=pltpu.CompilerParams(
            dimension_semantics=("parallel", "parallel"),
            vmem_limit_bytes=vmem_limit),
    )(xyzT, wt8, taps, w0, b0, w1, b1, w2, b2, w3, b3)
    if Kp != K:
        out = out[:, :, :K]
    return out                                                    # (N, 1, K)


# -----------------------------------------------------------------------------
# ArSSR forward
# -----------------------------------------------------------------------------
def arssr_forward(img_lr, xyz_hr, params):
    N, _, h, w, d = img_lr.shape
    K = xyz_hr.shape[1]
    C = params["enc_w2"].shape[0]

    # Encoder (RDN stand-in): fused Conv3d(1->C)+ReLU+Conv3d(C->C), one kernel.
    fm32, fm16 = encoder_pallas(img_lr, params["enc_w1"], params["enc_b1"],
                                params["enc_w2"], params["enc_b2"])
    feature_map = fm32.reshape(N, C, h, w, d)

    # grid_sample(feature_map, xyz.flip(-1)[:,None,None], bilinear,
    #             align_corners=False)[:, :, 0, 0, :] fused with the decoder MLP.
    img_sr = sample_and_decode_pallas(fm16, xyz_hr, params, h=h, w=w, d=d)

    # Robust cube-root (avoids float-rounding fragility of round(K**(1/3))).
    hh = int(round(K ** (1.0 / 3.0)))
    while hh ** 3 < K:
        hh += 1
    while hh ** 3 > K:
        hh -= 1
    assert hh ** 3 == K, "K must be a perfect cube to reshape the SR output"
    img_sr = img_sr.reshape(N, 1, hh, hh, hh)
    return img_sr, feature_map


def init_params(key, C=32, H=64):
    ks = jax.random.split(key, 12)

    def w_init(k, shape, fan_in):
        return (jax.random.normal(k, shape, jnp.float32)
                / jnp.sqrt(fan_in)).astype(jnp.float32)

    return {
        "enc_w1": w_init(ks[0], (C, 1, 3, 3, 3), 27.0),
        "enc_b1": jnp.zeros((C,), jnp.float32),
        "enc_w2": w_init(ks[1], (C, C, 3, 3, 3), 27.0 * C),
        "enc_b2": jnp.zeros((C,), jnp.float32),
        "dec_w0": w_init(ks[2], (C + 3, H), C + 3.0),
        "dec_b0": jnp.zeros((H,), jnp.float32),
        "dec_w1": w_init(ks[3], (H, H), float(H)),
        "dec_b1": jnp.zeros((H,), jnp.float32),
        "dec_w2": w_init(ks[4], (H, H), float(H)),
        "dec_b2": jnp.zeros((H,), jnp.float32),
        "dec_w3": w_init(ks[5], (H, 1), float(H)),
        "dec_b3": jnp.zeros((1,), jnp.float32),
    }


if __name__ == "__main__":
    key = jax.random.PRNGKey(0)
    k1, k2, k3 = jax.random.split(key, 3)

    N, C, H = 2, 32, 64
    h = w = d = 8
    K = 8 ** 3  # 512 HR query coordinates -> 8x8x8 SR cube

    img_lr = jax.random.normal(k1, (N, 1, h, w, d), jnp.float32)
    xyz_hr = jax.random.uniform(k2, (N, K, 3), jnp.float32, minval=-1.0, maxval=1.0)
    params = init_params(k3, C=C, H=H)

    img_sr, feature_map = jax.jit(arssr_forward)(img_lr, xyz_hr, params)
    jax.block_until_ready((img_sr, feature_map))

    assert img_sr.shape == (N, 1, 8, 8, 8)
    assert feature_map.shape == (N, C, h, w, d)
    assert bool(jnp.all(jnp.isfinite(img_sr)))
    assert bool(jnp.all(jnp.isfinite(feature_map)))
    print("KERNEL_OK")
</pallas_src>

<mosaic_0001>
module attributes {stable_mosaic.version = 11 : i64} {
  func.func @_encoder_kernel(%arg0: i32, %arg1: memref<1x1x768xf32, #tpu.memory_space<vmem>>, %arg2: memref<2x512xi32, #tpu.memory_space<vmem>>, %arg3: memref<32x27xbf16, #tpu.memory_space<vmem>>, %arg4: memref<32x1xf32, #tpu.memory_space<vmem>>, %arg5: memref<27x32x32xbf16, #tpu.memory_space<vmem>>, %arg6: memref<32x1xf32, #tpu.memory_space<vmem>>, %arg7: memref<1x32x512xf32, #tpu.memory_space<vmem>>, %arg8: memref<1x32x512xbf16, #tpu.memory_space<vmem>>) attributes {dimension_semantics = [#tpu.dimension_semantics<parallel>], iteration_bounds = array<i64: 2>, scalar_prefetch = 0 : i64, scratch_operands = 0 : i64, tpu.core_type = #tpu.core_type<tc>, window_params = [{transform_indices = @transform_0, window_bounds = array<i64: 1, 1, 768>}, {pipeline_mode = #tpu.pipeline_mode<synchronous>, transform_indices = @transform_1, window_bounds = array<i64: 2, 512>}, {pipeline_mode = #tpu.pipeline_mode<synchronous>, transform_indices = @transform_2, window_bounds = array<i64: 32, 27>}, {pipeline_mode = #tpu.pipeline_mode<synchronous>, transform_indices = @transform_3, window_bounds = array<i64: 32, 1>}, {pipeline_mode = #tpu.pipeline_mode<synchronous>, transform_indices = @transform_4, window_bounds = array<i64: 27, 32, 32>}, {pipeline_mode = #tpu.pipeline_mode<synchronous>, transform_indices = @transform_5, window_bounds = array<i64: 32, 1>}, {transform_indices = @transform_6, window_bounds = array<i64: 1, 32, 512>}, {transform_indices = @transform_7, window_bounds = array<i64: 1, 32, 512>}]} {
    %c0 = arith.constant 0 : index
    %c0_0 = arith.constant 0 : index
    %c0_1 = arith.constant 0 : index
    %0 = vector.load %arg1[%c0, %c0_0, %c0_1] : memref<1x1x768xf32, #tpu.memory_space<vmem>>, vector<1x1x768xf32>
    %1 = vector.shape_cast %0 : vector<1x1x768xf32> to vector<1x768xf32>
    %c0_2 = arith.constant 0 : index
    %c0_3 = arith.constant 0 : index
    %2 = vector.load %arg2[%c0_2, %c0_3] : memref<2x512xi32, #tpu.memory_space<vmem>>, vector<1x512xi32>
    %c1 = arith.constant 1 : index
    %c0_4 = arith.constant 0 : index
    %3 = vector.load %arg2[%c1, %c0_4] : memref<2x512xi32, #tpu.memory_space<vmem>>, vector<1x512xi32>
    %c-1_i32 = arith.constant -1 : i32
    %4 = vector.broadcast %c-1_i32 : i32 to vector<1x512xi32>
    %5 = arith.addi %2, %4 : vector<1x512xi32>
    %c0_i32 = arith.constant 0 : i32
    %6 = vector.broadcast %c0_i32 : i32 to vector<1x512xi32>
    %7 = arith.cmpi sge, %5, %6 : vector<1x512xi32>
    %c8_i32 = arith.constant 8 : i32
    %8 = vector.broadcast %c8_i32 : i32 to vector<1x512xi32>
    %9 = arith.cmpi slt, %5, %8 : vector<1x512xi32>
    %10 = arith.andi %7, %9 : vector<1x512xi1>
    %11 = arith.extui %10 : vector<1x512xi1> to vector<1x512xi32>
    %12 = arith.sitofp %11 : vector<1x512xi32> to vector<1x512xf32>
    %c0_i32_5 = arith.constant 0 : i32
    %13 = vector.broadcast %c0_i32_5 : i32 to vector<1x512xi32>
    %14 = arith.addi %2, %13 : vector<1x512xi32>
    %c0_i32_6 = arith.constant 0 : i32
    %15 = vector.broadcast %c0_i32_6 : i32 to vector<1x512xi32>
    %16 = arith.cmpi sge, %14, %15 : vector<1x512xi32>
    %c8_i32_7 = arith.constant 8 : i32
    %17 = vector.broadcast %c8_i32_7 : i32 to vector<1x512xi32>
    %18 = arith.cmpi slt, %14, %17 : vector<1x512xi32>
    %19 = arith.andi %16, %18 : vector<1x512xi1>
    %20 = arith.extui %19 : vector<1x512xi1> to vector<1x512xi32>
    %21 = arith.sitofp %20 : vector<1x512xi32> to vector<1x512xf32>
    %c1_i32 = arith.constant 1 : i32
    %22 = vector.broadcast %c1_i32 : i32 to vector<1x512xi32>
    %23 = arith.addi %2, %22 : vector<1x512xi32>
    %c0_i32_8 = arith.constant 0 : i32
    %24 = vector.broadcast %c0_i32_8 : i32 to vector<1x512xi32>
    %25 = arith.cmpi sge, %23, %24 : vector<1x512xi32>
    %c8_i32_9 = arith.constant 8 : i32
    %26 = vector.broadcast %c8_i32_9 : i32 to vector<1x512xi32>
    %27 = arith.cmpi slt, %23, %26 : vector<1x512xi32>
    %28 = arith.andi %25, %27 : vector<1x512xi1>
    %29 = arith.extui %28 : vector<1x512xi1> to vector<1x512xi32>
    %30 = arith.sitofp %29 : vector<1x512xi32> to vector<1x512xf32>
    %c-1_i32_10 = arith.constant -1 : i32
    %31 = vector.broadcast %c-1_i32_10 : i32 to vector<1x512xi32>
    %32 = arith.addi %3, %31 : vector<1x512xi32>
    %c0_i32_11 = arith.constant 0 : i32
    %33 = vector.broadcast %c0_i32_11 : i32 to vector<1x512xi32>
    %34 = arith.cmpi sge, %32, %33 : vector<1x512xi32>
    %c8_i32_12 = arith.constant 8 : i32
    %35 = vector.broadcast %c8_i32_12 : i32 to vector<1x512xi32>
    %36 = arith.cmpi slt, %32, %35 : vector<1x512xi32>
    %37 = arith.andi %34, %36 : vector<1x512xi1>
    %38 = arith.extui %37 : vector<1x512xi1> to vector<1x512xi32>
    %39 = arith.sitofp %38 : vector<1x512xi32> to vector<1x512xf32>
    %c0_i32_13 = arith.constant 0 : i32
    %40 = vector.broadcast %c0_i32_13 : i32 to vector<1x512xi32>
    %41 = arith.addi %3, %40 : vector<1x512xi32>
    %c0_i32_14 = arith.constant 0 : i32
    %42 = vector.broadcast %c0_i32_14 : i32 to vector<1x512xi32>
    %43 = arith.cmpi sge, %41, %42 : vector<1x512xi32>
    %c8_i32_15 = arith.constant 8 : i32
    %44 = vector.broadcast %c8_i32_15 : i32 to vector<1x512xi32>
    %45 = arith.cmpi slt, %41, %44 : vector<1x512xi32>
    %46 = arith.andi %43, %45 : vector<1x512xi1>
    %47 = arith.extui %46 : vector<1x512xi1> to vector<1x512xi32>
    %48 = arith.sitofp %47 : vector<1x512xi32> to vector<1x512xf32>
    %c1_i32_16 = arith.constant 1 : i32
    %49 = vector.broadcast %c1_i32_16 : i32 to vector<1x512xi32>
    %50 = arith.addi %3, %49 : vector<1x512xi32>
    %c0_i32_17 = arith.constant 0 : i32
    %51 = vector.broadcast %c0_i32_17 : i32 to vector<1x512xi32>
    %52 = arith.cmpi sge, %50, %51 : vector<1x512xi32>
    %c8_i32_18 = arith.constant 8 : i32
    %53 = vector.broadcast %c8_i32_18 : i32 to vector<1x512xi32>
    %54 = arith.cmpi slt, %50, %53 : vector<1x512xi32>
    %55 = arith.andi %52, %54 : vector<1x512xi1>
    %56 = arith.extui %55 : vector<1x512xi1> to vector<1x512xi32>
    %57 = arith.sitofp %56 : vector<1x512xi32> to vector<1x512xf32>
    %58 = vector.extract_strided_slice %1 {offsets = [0, 55], sizes = [1, 512], strides = [1, 1]} : vector<1x768xf32> to vector<1x512xf32>
    %59 = arith.mulf %12, %39 : vector<1x512xf32>
    %60 = arith.mulf %58, %59 : vector<1x512xf32>
    %61 = vector.extract_strided_slice %1 {offsets = [0, 56], sizes = [1, 512], strides = [1, 1]} : vector<1x768xf32> to vector<1x512xf32>
    %62 = arith.mulf %12, %48 : vector<1x512xf32>
    %63 = arith.mulf %61, %62 : vector<1x512xf32>
    %64 = vector.extract_strided_slice %1 {offsets = [0, 57], sizes = [1, 512], strides = [1, 1]} : vector<1x768xf32> to vector<1x512xf32>
    %65 = arith.mulf %12, %57 : vector<1x512xf32>
    %66 = arith.mulf %64, %65 : vector<1x512xf32>
    %67 = vector.extract_strided_slice %1 {offsets = [0, 63], sizes = [1, 512], strides = [1, 1]} : vector<1x768xf32> to vector<1x512xf32>
    %68 = arith.mulf %21, %39 : vector<1x512xf32>
    %69 = arith.mulf %67, %68 : vector<1x512xf32>
    %70 = vector.extract_strided_slice %1 {offsets = [0, 64], sizes = [1, 512], strides = [1, 1]} : vector<1x768xf32> to vector<1x512xf32>
    %71 = arith.mulf %21, %48 : vector<1x512xf32>
    %72 = arith.mulf %70, %71 : vector<1x512xf32>
    %73 = vector.extract_strided_slice %1 {offsets = [0, 65], sizes = [1, 512], strides = [1, 1]} : vector<1x768xf32> to vector<1x512xf32>
    %74 = arith.mulf %21, %57 : vector<1x512xf32>
    %75 = arith.mulf %73, %74 : vector<1x512xf32>
    %76 = vector.extract_strided_slice %1 {offsets = [0, 71], sizes = [1, 512], strides = [1, 1]} : vector<1x768xf32> to vector<1x512xf32>
    %77 = arith.mulf %30, %39 : vector<1x512xf32>
    %78 = arith.mulf %76, %77 : vector<1x512xf32>
    %79 = vector.extract_strided_slice %1 {offsets = [0, 72], sizes = [1, 512], strides = [1, 1]} : vector<1x768xf32> to vector<1x512xf32>
    %80 = arith.mulf %30, %48 : vector<1x512xf32>
    %81 = arith.mulf %79, %80 : vector<1x512xf32>
    %82 = vector.extract_strided_slice %1 {offsets = [0, 73], sizes = [1, 512], strides = [1, 1]} : vector<1x768xf32> to vector<1x512xf32>
    %83 = arith.mulf %30, %57 : vector<1x512xf32>
    %84 = arith.mulf %82, %83 : vector<1x512xf32>
    %85 = vector.extract_strided_slice %1 {offsets = [0, 119], sizes = [1, 512], strides = [1, 1]} : vector<1x768xf32> to vector<1x512xf32>
    %86 = arith.mulf %12, %39 : vector<1x512xf32>
    %87 = arith.mulf %85, %86 : vector<1x512xf32>
    %88 = vector.extract_strided_slice %1 {offsets = [0, 120], sizes = [1, 512], strides = [1, 1]} : vector<1x768xf32> to vector<1x512xf32>
    %89 = arith.mulf %12, %48 : vector<1x512xf32>
    %90 = arith.mulf %88, %89 : vector<1x512xf32>
    %91 = vector.extract_strided_slice %1 {offsets = [0, 121], sizes = [1, 512], strides = [1, 1]} : vector<1x768xf32> to vector<1x512xf32>
    %92 = arith.mulf %12, %57 : vector<1x512xf32>
    %93 = arith.mulf %91, %92 : vector<1x512xf32>
    %94 = vector.extract_strided_slice %1 {offsets = [0, 127], sizes = [1, 512], strides = [1, 1]} : vector<1x768xf32> to vector<1x512xf32>
    %95 = arith.mulf %21, %39 : vector<1x512xf32>
    %96 = arith.mulf %94, %95 : vector<1x512xf32>
    %97 = vector.extract_strided_slice %1 {offsets = [0, 128], sizes = [1, 512], strides = [1, 1]} : vector<1x768xf32> to vector<1x512xf32>
    %98 = arith.mulf %21, %48 : vector<1x512xf32>
    %99 = arith.mulf %97, %98 : vector<1x512xf32>
    %100 = vector.extract_strided_slice %1 {offsets = [0, 129], sizes = [1, 512], strides = [1, 1]} : vector<1x768xf32> to vector<1x512xf32>
    %101 = arith.mulf %21, %57 : vector<1x512xf32>
    %102 = arith.mulf %100, %101 : vector<1x512xf32>
    %103 = vector.extract_strided_slice %1 {offsets = [0, 135], sizes = [1, 512], strides = [1, 1]} : vector<1x768xf32> to vector<1x512xf32>
    %104 = arith.mulf %30, %39 : vector<1x512xf32>
    %105 = arith.mulf %103, %104 : vector<1x512xf32>
    %106 = vector.extract_strided_slice %1 {offsets = [0, 136], sizes = [1, 512], strides = [1, 1]} : vector<1x768xf32> to vector<1x512xf32>
    %107 = arith.mulf %30, %48 : vector<1x512xf32>
    %108 = arith.mulf %106, %107 : vector<1x512xf32>
    %109 = vector.extract_strided_slice %1 {offsets = [0, 137], sizes = [1, 512], strides = [1, 1]} : vector<1x768xf32> to vector<1x512xf32>
    %110 = arith.mulf %30, %57 : vector<1x512xf32>
    %111 = arith.mulf %109, %110 : vector<1x512xf32>
    %112 = vector.extract_strided_slice %1 {offsets = [0, 183], sizes = [1, 512], strides = [1, 1]} : vector<1x768xf32> to vector<1x512xf32>
    %113 = arith.mulf %12, %39 : vector<1x512xf32>
    %114 = arith.mulf %112, %113 : vector<1x512xf32>
    %115 = vector.extract_strided_slice %1 {offsets = [0, 184], sizes = [1, 512], strides = [1, 1]} : vector<1x768xf32> to vector<1x512xf32>
    %116 = arith.mulf %12, %48 : vector<1x512xf32>
    %117 = arith.mulf %115, %116 : vector<1x512xf32>
    %118 = vector.extract_strided_slice %1 {offsets = [0, 185], sizes = [1, 512], strides = [1, 1]} : vector<1x768xf32> to vector<1x512xf32>
    %119 = arith.mulf %12, %57 : vector<1x512xf32>
    %120 = arith.mulf %118, %119 : vector<1x512xf32>
    %121 = vector.extract_strided_slice %1 {offsets = [0, 191], sizes = [1, 512], strides = [1, 1]} : vector<1x768xf32> to vector<1x512xf32>
    %122 = arith.mulf %21, %39 : vector<1x512xf32>
    %123 = arith.mulf %121, %122 : vector<1x512xf32>
    %124 = vector.extract_strided_slice %1 {offsets = [0, 192], sizes = [1, 512], strides = [1, 1]} : vector<1x768xf32> to vector<1x512xf32>
    %125 = arith.mulf %21, %48 : vector<1x512xf32>
    %126 = arith.mulf %124, %125 : vector<1x512xf32>
    %127 = vector.extract_strided_slice %1 {offsets = [0, 193], sizes = [1, 512], strides = [1, 1]} : vector<1x768xf32> to vector<1x512xf32>
    %128 = arith.mulf %21, %57 : vector<1x512xf32>
    %129 = arith.mulf %127, %128 : vector<1x512xf32>
    %130 = vector.extract_strided_slice %1 {offsets = [0, 199], sizes = [1, 512], strides = [1, 1]} : vector<1x768xf32> to vector<1x512xf32>
    %131 = arith.mulf %30, %39 : vector<1x512xf32>
    %132 = arith.mulf %130, %131 : vector<1x512xf32>
    %133 = vector.extract_strided_slice %1 {offsets = [0, 200], sizes = [1, 512], strides = [1, 1]} : vector<1x768xf32> to vector<1x512xf32>
    %134 = arith.mulf %30, %48 : vector<1x512xf32>
    %135 = arith.mulf %133, %134 : vector<1x512xf32>
    %136 = vector.extract_strided_slice %1 {offsets = [0, 201], sizes = [1, 512], strides = [1, 1]} : vector<1x768xf32> to vector<1x512xf32>
    %137 = arith.mulf %30, %57 : vector<1x512xf32>
    %138 = arith.mulf %136, %137 : vector<1x512xf32>
    %139 = tpu.concatenate %60, %63, %66, %69, %72, %75, %78, %81, %84, %87, %90, %93, %96, %99, %102, %105 in 0 : vector<1x512xf32>, vector<1x512xf32>, vector<1x512xf32>, vector<1x512xf32>, vector<1x512xf32>, vector<1x512xf32>, vector<1x512xf32>, vector<1x512xf32>, vector<1x512xf32>, vector<1x512xf32>, vector<1x512xf32>, vector<1x512xf32>, vector<1x512xf32>, vector<1x512xf32>, vector<1x512xf32>, vector<1x512xf32> -> vector<16x512xf32>
    %140 = tpu.concatenate %108, %111, %114, %117, %120, %123, %126, %129, %132, %135, %138 in 0 : vector<1x512xf32>, vector<1x512xf32>, vector<1x512xf32>, vector<1x512xf32>, vector<1x512xf32>, vector<1x512xf32>, vector<1x512xf32>, vector<1x512xf32>, vector<1x512xf32>, vector<1x512xf32>, vector<1x512xf32> -> vector<11x512xf32>
    %141 = tpu.concatenate %139, %140 in 0 : vector<16x512xf32>, vector<11x512xf32> -> vector<27x512xf32>
    %c0_19 = arith.constant 0 : index
    %c0_20 = arith.constant 0 : index
    %142 = vector.load %arg3[%c0_19, %c0_20] : memref<32x27xbf16, #tpu.memory_space<vmem>>, vector<32x27xbf16>
    %143 = arith.truncf %141 : vector<27x512xf32> to vector<27x512xbf16>
    %cst = arith.constant dense<0.000000e+00> : vector<32x512xf32>
    %144 = tpu.matmul %142, %143, %cst {dimension_numbers = #tpu.dot_dimension_numbers<[1], [0], [0], [1], [0, 0, 1, 1], [], []>} : vector<32x27xbf16>, vector<27x512xbf16>, vector<32x512xf32> -> vector<32x512xf32>
    %c0_21 = arith.constant 0 : index
    %c0_22 = arith.constant 0 : index
    %145 = vector.load %arg4[%c0_21, %c0_22] : memref<32x1xf32, #tpu.memory_space<vmem>>, vector<32x1xf32>
    %146 = vector.broadcast %145 : vector<32x1xf32> to vector<32x512xf32>
    %147 = arith.addf %144, %146 : vector<32x512xf32>
    %cst_23 = arith.constant 0.000000e+00 : f32
    %148 = vector.broadcast %cst_23 : f32 to vector<32x512xf32>
    %149 = arith.maximumf %147, %148 : vector<32x512xf32>
    %cst_24 = arith.constant 0.000000e+00 : f32
    %150 = vector.broadcast %cst_24 : f32 to vector<32x128xf32>
    %151 = tpu.concatenate %150, %149, %150 in 1 : vector<32x128xf32>, vector<32x512xf32>, vector<32x128xf32> -> vector<32x768xf32>
    %cst_25 = arith.constant 0.000000e+00 : f32
    %152 = vector.broadcast %cst_25 : f32 to vector<32x512xf32>
    %153 = vector.extract_strided_slice %151 {offsets = [0, 55], sizes = [32, 512], strides = [1, 1]} : vector<32x768xf32> to vector<32x512xf32>
    %154 = arith.mulf %12, %39 : vector<1x512xf32>
    %155 = vector.broadcast %154 : vector<1x512xf32> to vector<32x512xf32>
    %156 = arith.mulf %153, %155 : vector<32x512xf32>
    %c0_26 = arith.constant 0 : index
    %c0_27 = arith.constant 0 : index
    %c0_28 = arith.constant 0 : index
    %157 = vector.load %arg5[%c0_26, %c0_27, %c0_28] : memref<27x32x32xbf16, #tpu.memory_space<vmem>>, vector<1x32x32xbf16>
    %158 = vector.shape_cast %157 : vector<1x32x32xbf16> to vector<32x32xbf16>
    %159 = arith.truncf %156 : vector<32x512xf32> to vector<32x512xbf16>
    %cst_29 = arith.constant dense<0.000000e+00> : vector<32x512xf32>
    %160 = tpu.matmul %158, %159, %cst_29 {dimension_numbers = #tpu.dot_dimension_numbers<[1], [0], [0], [1], [0, 0, 1, 1], [], []>} : vector<32x32xbf16>, vector<32x512xbf16>, vector<32x512xf32> -> vector<32x512xf32>
    %161 = arith.addf %152, %160 : vector<32x512xf32>
    %162 = vector.extract_strided_slice %151 {offsets = [0, 56], sizes = [32, 512], strides = [1, 1]} : vector<32x768xf32> to vector<32x512xf32>
    %163 = arith.mulf %12, %48 : vector<1x512xf32>
    %164 = vector.broadcast %163 : vector<1x512xf32> to vector<32x512xf32>
    %165 = arith.mulf %162, %164 : vector<32x512xf32>
    %c1_30 = arith.constant 1 : index
    %c0_31 = arith.constant 0 : index
    %c0_32 = arith.constant 0 : index
    %166 = vector.load %arg5[%c1_30, %c0_31, %c0_32] : memref<27x32x32xbf16, #tpu.memory_space<vmem>>, vector<1x32x32xbf16>
    %167 = vector.shape_cast %166 : vector<1x32x32xbf16> to vector<32x32xbf16>
    %168 = arith.truncf %165 : vector<32x512xf32> to vector<32x512xbf16>
    %cst_33 = arith.constant dense<0.000000e+00> : vector<32x512xf32>
    %169 = tpu.matmul %167, %168, %cst_33 {dimension_numbers = #tpu.dot_dimension_numbers<[1], [0], [0], [1], [0, 0, 1, 1], [], []>} : vector<32x32xbf16>, vector<32x512xbf16>, vector<32x512xf32> -> vector<32x512xf32>
    %170 = arith.addf %161, %169 : vector<32x512xf32>
    %171 = vector.extract_strided_slice %151 {offsets = [0, 57], sizes = [32, 512], strides = [1, 1]} : vector<32x768xf32> to vector<32x512xf32>
    %172 = arith.mulf %12, %57 : vector<1x512xf32>
    %173 = vector.broadcast %172 : vector<1x512xf32> to vector<32x512xf32>
    %174 = arith.mulf %171, %173 : vector<32x512xf32>
    %c2 = arith.constant 2 : index
    %c0_34 = arith.constant 0 : index
    %c0_35 = arith.constant 0 : index
    %175 = vector.load %arg5[%c2, %c0_34, %c0_35] : memref<27x32x32xbf16, #tpu.memory_space<vmem>>, vector<1x32x32xbf16>
    %176 = vector.shape_cast %175 : vector<1x32x32xbf16> to vector<32x32xbf16>
    %177 = arith.truncf %174 : vector<32x512xf32> to vector<32x512xbf16>
    %cst_36 = arith.constant dense<0.000000e+00> : vector<32x512xf32>
    %178 = tpu.matmul %176, %177, %cst_36 {dimension_numbers = #tpu.dot_dimension_numbers<[1], [0], [0], [1], [0, 0, 1, 1], [], []>} : vector<32x32xbf16>, vector<32x512xbf16>, vector<32x512xf32> -> vector<32x512xf32>
    %179 = arith.addf %170, %178 : vector<32x512xf32>
    %180 = vector.extract_strided_slice %151 {offsets = [0, 63], sizes = [32, 512], strides = [1, 1]} : vector<32x768xf32> to vector<32x512xf32>
    %181 = arith.mulf %21, %39 : vector<1x512xf32>
    %182 = vector.broadcast %181 : vector<1x512xf32> to vector<32x512xf32>
    %183 = arith.mulf %180, %182 : vector<32x512xf32>
    %c3 = arith.constant 3 : index
    %c0_37 = arith.constant 0 : index
    %c0_38 = arith.constant 0 : index
    %184 = vector.load %arg5[%c3, %c0_37, %c0_38] : memref<27x32x32xbf16, #tpu.memory_space<vmem>>, vector<1x32x32xbf16>
    %185 = vector.shape_cast %184 : vector<1x32x32xbf16> to vector<32x32xbf16>
    %186 = arith.truncf %183 : vector<32x512xf32> to vector<32x512xbf16>
    %cst_39 = arith.constant dense<0.000000e+00> : vector<32x512xf32>
    %187 = tpu.matmul %185, %186, %cst_39 {dimension_numbers = #tpu.dot_dimension_numbers<[1], [0], [0], [1], [0, 0, 1, 1], [], []>} : vector<32x32xbf16>, vector<32x512xbf16>, vector<32x512xf32> -> vector<32x512xf32>
    %188 = arith.addf %179, %187 : vector<32x512xf32>
    %189 = vector.extract_strided_slice %151 {offsets = [0, 64], sizes = [32, 512], strides = [1, 1]} : vector<32x768xf32> to vector<32x512xf32>
    %190 = arith.mulf %21, %48 : vector<1x512xf32>
    %191 = vector.broadcast %190 : vector<1x512xf32> to vector<32x512xf32>
    %192 = arith.mulf %189, %191 : vector<32x512xf32>
    %c4 = arith.constant 4 : index
    %c0_40 = arith.constant 0 : index
    %c0_41 = arith.constant 0 : index
    %193 = vector.load %arg5[%c4, %c0_40, %c0_41] : memref<27x32x32xbf16, #tpu.memory_space<vmem>>, vector<1x32x32xbf16>
    %194 = vector.shape_cast %193 : vector<1x32x32xbf16> to vector<32x32xbf16>
    %195 = arith.truncf %192 : vector<32x512xf32> to vector<32x512xbf16>
    %cst_42 = arith.constant dense<0.000000e+00> : vector<32x512xf32>
    %196 = tpu.matmul %194, %195, %cst_42 {dimension_numbers = #tpu.dot_dimension_numbers<[1], [0], [0], [1], [0, 0, 1, 1], [], []>} : vector<32x32xbf16>, vector<32x512xbf16>, vector<32x512xf32> -> vector<32x512xf32>
    %197 = arith.addf %188, %196 : vector<32x512xf32>
    %198 = vector.extract_strided_slice %151 {offsets = [0, 65], sizes = [32, 512], strides = [1, 1]} : vector<32x768xf32> to vector<32x512xf32>
    %199 = arith.mulf %21, %57 : vector<1x512xf32>
    %200 = vector.broadcast %199 : vector<1x512xf32> to vector<32x512xf32>
    %201 = arith.mulf %198, %200 : vector<32x512xf32>
    %c5 = arith.constant 5 : index
    %c0_43 = arith.constant 0 : index
    %c0_44 = arith.constant 0 : index
    %202 = vector.load %arg5[%c5, %c0_43, %c0_44] : memref<27x32x32xbf16, #tpu.memory_space<vmem>>, vector<1x32x32xbf16>
    %203 = vector.shape_cast %202 : vector<1x32x32xbf16> to vector<32x32xbf16>
    %204 = arith.truncf %201 : vector<32x512xf32> to vector<32x512xbf16>
    %cst_45 = arith.constant dense<0.000000e+00> : vector<32x512xf32>
    %205 = tpu.matmul %203, %204, %cst_45 {dimension_numbers = #tpu.dot_dimension_numbers<[1], [0], [0], [1], [0, 0, 1, 1], [], []>} : vector<32x32xbf16>, vector<32x512xbf16>, vector<32x512xf32> -> vector<32x512xf32>
    %206 = arith.addf %197, %205 : vector<32x512xf32>
    %207 = vector.extract_strided_slice %151 {offsets = [0, 71], sizes = [32, 512], strides = [1, 1]} : vector<32x768xf32> to vector<32x512xf32>
    %208 = arith.mulf %30, %39 : vector<1x512xf32>
    %209 = vector.broadcast %208 : vector<1x512xf32> to vector<32x512xf32>
    %210 = arith.mulf %207, %209 : vector<32x512xf32>
    %c6 = arith.constant 6 : index
    %c0_46 = arith.constant 0 : index
    %c0_47 = arith.constant 0 : index
    %211 = vector.load %arg5[%c6, %c0_46, %c0_47] : memref<27x32x32xbf16, #tpu.memory_space<vmem>>, vector<1x32x32xbf16>
    %212 = vector.shape_cast %211 : vector<1x32x32xbf16> to vector<32x32xbf16>
    %213 = arith.truncf %210 : vector<32x512xf32> to vector<32x512xbf16>
    %cst_48 = arith.constant dense<0.000000e+00> : vector<32x512xf32>
    %214 = tpu.matmul %212, %213, %cst_48 {dimension_numbers = #tpu.dot_dimension_numbers<[1], [0], [0], [1], [0, 0, 1, 1], [], []>} : vector<32x32xbf16>, vector<32x512xbf16>, vector<32x512xf32> -> vector<32x512xf32>
    %215 = arith.addf %206, %214 : vector<32x512xf32>
    %216 = vector.extract_strided_slice %151 {offsets = [0, 72], sizes = [32, 512], strides = [1, 1]} : vector<32x768xf32> to vector<32x512xf32>
    %217 = arith.mulf %30, %48 : vector<1x512xf32>
    %218 = vector.broadcast %217 : vector<1x512xf32> to vector<32x512xf32>
    %219 = arith.mulf %216, %218 : vector<32x512xf32>
    %c7 = arith.constant 7 : index
    %c0_49 = arith.constant 0 : index
    %c0_50 = arith.constant 0 : index
    %220 = vector.load %arg5[%c7, %c0_49, %c0_50] : memref<27x32x32xbf16, #tpu.memory_space<vmem>>, vector<1x32x32xbf16>
    %221 = vector.shape_cast %220 : vector<1x32x32xbf16> to vector<32x32xbf16>
    %222 = arith.truncf %219 : vector<32x512xf32> to vector<32x512xbf16>
    %cst_51 = arith.constant dense<0.000000e+00> : vector<32x512xf32>
    %223 = tpu.matmul %221, %222, %cst_51 {dimension_numbers = #tpu.dot_dimension_numbers<[1], [0], [0], [1], [0, 0, 1, 1], [], []>} : vector<32x32xbf16>, vector<32x512xbf16>, vector<32x512xf32> -> vector<32x512xf32>
    %224 = arith.addf %215, %223 : vector<32x512xf32>
    %225 = vector.extract_strided_slice %151 {offsets = [0, 73], sizes = [32, 512], strides = [1, 1]} : vector<32x768xf32> to vector<32x512xf32>
    %226 = arith.mulf %30, %57 : vector<1x512xf32>
    %227 = vector.broadcast %226 : vector<1x512xf32> to vector<32x512xf32>
    %228 = arith.mulf %225, %227 : vector<32x512xf32>
    %c8 = arith.constant 8 : index
    %c0_52 = arith.constant 0 : index
    %c0_53 = arith.constant 0 : index
    %229 = vector.load %arg5[%c8, %c0_52, %c0_53] : memref<27x32x32xbf16, #tpu.memory_space<vmem>>, vector<1x32x32xbf16>
    %230 = vector.shape_cast %229 : vector<1x32x32xbf16> to vector<32x32xbf16>
    %231 = arith.truncf %228 : vector<32x512xf32> to vector<32x512xbf16>
    %cst_54 = arith.constant dense<0.000000e+00> : vector<32x512xf32>
    %232 = tpu.matmul %230, %231, %cst_54 {dimension_numbers = #tpu.dot_dimension_numbers<[1], [0], [0], [1], [0, 0, 1, 1], [], []>} : vector<32x32xbf16>, vector<32x512xbf16>, vector<32x512xf32> -> vector<32x512xf32>
    %233 = arith.addf %224, %232 : vector<32x512xf32>
    %234 = vector.extract_strided_slice %151 {offsets = [0, 119], sizes = [32, 512], strides = [1, 1]} : vector<32x768xf32> to vector<32x512xf32>
    %235 = arith.mulf %12, %39 : vector<1x512xf32>
    %236 = vector.broadcast %235 : vector<1x512xf32> to vector<32x512xf32>
    %237 = arith.mulf %234, %236 : vector<32x512xf32>
    %c9 = arith.constant 9 : index
    %c0_55 = arith.constant 0 : index
    %c0_56 = arith.constant 0 : index
    %238 = vector.load %arg5[%c9, %c0_55, %c0_56] : memref<27x32x32xbf16, #tpu.memory_space<vmem>>, vector<1x32x32xbf16>
    %239 = vector.shape_cast %238 : vector<1x32x32xbf16> to vector<32x32xbf16>
    %240 = arith.truncf %237 : vector<32x512xf32> to vector<32x512xbf16>
    %cst_57 = arith.constant dense<0.000000e+00> : vector<32x512xf32>
    %241 = tpu.matmul %239, %240, %cst_57 {dimension_numbers = #tpu.dot_dimension_numbers<[1], [0], [0], [1], [0, 0, 1, 1], [], []>} : vector<32x32xbf16>, vector<32x512xbf16>, vector<32x512xf32> -> vector<32x512xf32>
    %242 = arith.addf %233, %241 : vector<32x512xf32>
    %243 = vector.extract_strided_slice %151 {offsets = [0, 120], sizes = [32, 512], strides = [1, 1]} : vector<32x768xf32> to vector<32x512xf32>
    %244 = arith.mulf %12, %48 : vector<1x512xf32>
    %245 = vector.broadcast %244 : vector<1x512xf32> to vector<32x512xf32>
    %246 = arith.mulf %243, %245 : vector<32x512xf32>
    %c10 = arith.constant 10 : index
    %c0_58 = arith.constant 0 : index
    %c0_59 = arith.constant 0 : index
    %247 = vector.load %arg5[%c10, %c0_58, %c0_59] : memref<27x32x32xbf16, #tpu.memory_space<vmem>>, vector<1x32x32xbf16>
    %248 = vector.shape_cast %247 : vector<1x32x32xbf16> to vector<32x32xbf16>
    %249 = arith.truncf %246 : vector<32x512xf32> to vector<32x512xbf16>
    %cst_60 = arith.constant dense<0.000000e+00> : vector<32x512xf32>
    %250 = tpu.matmul %248, %249, %cst_60 {dimension_numbers = #tpu.dot_dimension_numbers<[1], [0], [0], [1], [0, 0, 1, 1], [], []>} : vector<32x32xbf16>, vector<32x512xbf16>, vector<32x512xf32> -> vector<32x512xf32>
    %251 = arith.addf %242, %250 : vector<32x512xf32>
    %252 = vector.extract_strided_slice %151 {offsets = [0, 121], sizes = [32, 512], strides = [1, 1]} : vector<32x768xf32> to vector<32x512xf32>
    %253 = arith.mulf %12, %57 : vector<1x512xf32>
    %254 = vector.broadcast %253 : vector<1x512xf32> to vector<32x512xf32>
    %255 = arith.mulf %252, %254 : vector<32x512xf32>
    %c11 = arith.constant 11 : index
    %c0_61 = arith.constant 0 : index
    %c0_62 = arith.constant 0 : index
    %256 = vector.load %arg5[%c11, %c0_61, %c0_62] : memref<27x32x32xbf16, #tpu.memory_space<vmem>>, vector<1x32x32xbf16>
    %257 = vector.shape_cast %256 : vector<1x32x32xbf16> to vector<32x32xbf16>
    %258 = arith.truncf %255 : vector<32x512xf32> to vector<32x512xbf16>
    %cst_63 = arith.constant dense<0.000000e+00> : vector<32x512xf32>
    %259 = tpu.matmul %257, %258, %cst_63 {dimension_numbers = #tpu.dot_dimension_numbers<[1], [0], [0], [1], [0, 0, 1, 1], [], []>} : vector<32x32xbf16>, vector<32x512xbf16>, vector<32x512xf32> -> vector<32x512xf32>
    %260 = arith.addf %251, %259 : vector<32x512xf32>
    %261 = vector.extract_strided_slice %151 {offsets = [0, 127], sizes = [32, 512], strides = [1, 1]} : vector<32x768xf32> to vector<32x512xf32>
    %262 = arith.mulf %21, %39 : vector<1x512xf32>
    %263 = vector.broadcast %262 : vector<1x512xf32> to vector<32x512xf32>
    %264 = arith.mulf %261, %263 : vector<32x512xf32>
    %c12 = arith.constant 12 : index
    %c0_64 = arith.constant 0 : index
    %c0_65 = arith.constant 0 : index
    %265 = vector.load %arg5[%c12, %c0_64, %c0_65] : memref<27x32x32xbf16, #tpu.memory_space<vmem>>, vector<1x32x32xbf16>
    %266 = vector.shape_cast %265 : vector<1x32x32xbf16> to vector<32x32xbf16>
    %267 = arith.truncf %264 : vector<32x512xf32> to vector<32x512xbf16>
    %cst_66 = arith.constant dense<0.000000e+00> : vector<32x512xf32>
    %268 = tpu.matmul %266, %267, %cst_66 {dimension_numbers = #tpu.dot_dimension_numbers<[1], [0], [0], [1], [0, 0, 1, 1], [], []>} : vector<32x32xbf16>, vector<32x512xbf16>, vector<32x512xf32> -> vector<32x512xf32>
    %269 = arith.addf %260, %268 : vector<32x512xf32>
    %270 = vector.extract_strided_slice %151 {offsets = [0, 128], sizes = [32, 512], strides = [1, 1]} : vector<32x768xf32> to vector<32x512xf32>
    %271 = arith.mulf %21, %48 : vector<1x512xf32>
    %272 = vector.broadcast %271 : vector<1x512xf32> to vector<32x512xf32>
    %273 = arith.mulf %270, %272 : vector<32x512xf32>
    %c13 = arith.constant 13 : index
    %c0_67 = arith.constant 0 : index
    %c0_68 = arith.constant 0 : index
    %274 = vector.load %arg5[%c13, %c0_67, %c0_68] : memref<27x32x32xbf16, #tpu.memory_space<vmem>>, vector<1x32x32xbf16>
    %275 = vector.shape_cast %274 : vector<1x32x32xbf16> to vector<32x32xbf16>
    %276 = arith.truncf %273 : vector<32x512xf32> to vector<32x512xbf16>
    %cst_69 = arith.constant dense<0.000000e+00> : vector<32x512xf32>
    %277 = tpu.matmul %275, %276, %cst_69 {dimension_numbers = #tpu.dot_dimension_numbers<[1], [0], [0], [1], [0, 0, 1, 1], [], []>} : vector<32x32xbf16>, vector<32x512xbf16>, vector<32x512xf32> -> vector<32x512xf32>
    %278 = arith.addf %269, %277 : vector<32x512xf32>
    %279 = vector.extract_strided_slice %151 {offsets = [0, 129], sizes = [32, 512], strides = [1, 1]} : vector<32x768xf32> to vector<32x512xf32>
    %280 = arith.mulf %21, %57 : vector<1x512xf32>
    %281 = vector.broadcast %280 : vector<1x512xf32> to vector<32x512xf32>
    %282 = arith.mulf %279, %281 : vector<32x512xf32>
    %c14 = arith.constant 14 : index
    %c0_70 = arith.constant 0 : index
    %c0_71 = arith.constant 0 : index
    %283 = vector.load %arg5[%c14, %c0_70, %c0_71] : memref<27x32x32xbf16, #tpu.memory_space<vmem>>, vector<1x32x32xbf16>
    %284 = vector.shape_cast %283 : vector<1x32x32xbf16> to vector<32x32xbf16>
    %285 = arith.truncf %282 : vector<32x512xf32> to vector<32x512xbf16>
    %cst_72 = arith.constant dense<0.000000e+00> : vector<32x512xf32>
    %286 = tpu.matmul %284, %285, %cst_72 {dimension_numbers = #tpu.dot_dimension_numbers<[1], [0], [0], [1], [0, 0, 1, 1], [], []>} : vector<32x32xbf16>, vector<32x512xbf16>, vector<32x512xf32> -> vector<32x512xf32>
    %287 = arith.addf %278, %286 : vector<32x512xf32>
    %288 = vector.extract_strided_slice %151 {offsets = [0, 135], sizes = [32, 512], strides = [1, 1]} : vector<32x768xf32> to vector<32x512xf32>
    %289 = arith.mulf %30, %39 : vector<1x512xf32>
    %290 = vector.broadcast %289 : vector<1x512xf32> to vector<32x512xf32>
    %291 = arith.mulf %288, %290 : vector<32x512xf32>
    %c15 = arith.constant 15 : index
    %c0_73 = arith.constant 0 : index
    %c0_74 = arith.constant 0 : index
    %292 = vector.load %arg5[%c15, %c0_73, %c0_74] : memref<27x32x32xbf16, #tpu.memory_space<vmem>>, vector<1x32x32xbf16>
    %293 = vector.shape_cast %292 : vector<1x32x32xbf16> to vector<32x32xbf16>
    %294 = arith.truncf %291 : vector<32x512xf32> to vector<32x512xbf16>
    %cst_75 = arith.constant dense<0.000000e+00> : vector<32x512xf32>
    %295 = tpu.matmul %293, %294, %cst_75 {dimension_numbers = #tpu.dot_dimension_numbers<[1], [0], [0], [1], [0, 0, 1, 1], [], []>} : vector<32x32xbf16>, vector<32x512xbf16>, vector<32x512xf32> -> vector<32x512xf32>
    %296 = arith.addf %287, %295 : vector<32x512xf32>
    %297 = vector.extract_strided_slice %151 {offsets = [0, 136], sizes = [32, 512], strides = [1, 1]} : vector<32x768xf32> to vector<32x512xf32>
    %298 = arith.mulf %30, %48 : vector<1x512xf32>
    %299 = vector.broadcast %298 : vector<1x512xf32> to vector<32x512xf32>
    %300 = arith.mulf %297, %299 : vector<32x512xf32>
    %c16 = arith.constant 16 : index
    %c0_76 = arith.constant 0 : index
    %c0_77 = arith.constant 0 : index
    %301 = vector.load %arg5[%c16, %c0_76, %c0_77] : memref<27x32x32xbf16, #tpu.memory_space<vmem>>, vector<1x32x32xbf16>
    %302 = vector.shape_cast %301 : vector<1x32x32xbf16> to vector<32x32xbf16>
    %303 = arith.truncf %300 : vector<32x512xf32> to vector<32x512xbf16>
    %cst_78 = arith.constant dense<0.000000e+00> : vector<32x512xf32>
    %304 = tpu.matmul %302, %303, %cst_78 {dimension_numbers = #tpu.dot_dimension_numbers<[1], [0], [0], [1], [0, 0, 1, 1], [], []>} : vector<32x32xbf16>, vector<32x512xbf16>, vector<32x512xf32> -> vector<32x512xf32>
    %305 = arith.addf %296, %304 : vector<32x512xf32>
    %306 = vector.extract_strided_slice %151 {offsets = [0, 137], sizes = [32, 512], strides = [1, 1]} : vector<32x768xf32> to vector<32x512xf32>
    %307 = arith.mulf %30, %57 : vector<1x512xf32>
    %308 = vector.broadcast %307 : vector<1x512xf32> to vector<32x512xf32>
    %309 = arith.mulf %306, %308 : vector<32x512xf32>
    %c17 = arith.constant 17 : index
    %c0_79 = arith.constant 0 : index
    %c0_80 = arith.constant 0 : index
    %310 = vector.load %arg5[%c17, %c0_79, %c0_80] : memref<27x32x32xbf16, #tpu.memory_space<vmem>>, vector<1x32x32xbf16>
    %311 = vector.shape_cast %310 : vector<1x32x32xbf16> to vector<32x32xbf16>
    %312 = arith.truncf %309 : vector<32x512xf32> to vector<32x512xbf16>
    %cst_81 = arith.constant dense<0.000000e+00> : vector<32x512xf32>
    %313 = tpu.matmul %311, %312, %cst_81 {dimension_numbers = #tpu.dot_dimension_numbers<[1], [0], [0], [1], [0, 0, 1, 1], [], []>} : vector<32x32xbf16>, vector<32x512xbf16>, vector<32x512xf32> -> vector<32x512xf32>
    %314 = arith.addf %305, %313 : vector<32x512xf32>
    %315 = vector.extract_strided_slice %151 {offsets = [0, 183], sizes = [32, 512], strides = [1, 1]} : vector<32x768xf32> to vector<32x512xf32>
    %316 = arith.mulf %12, %39 : vector<1x512xf32>
    %317 = vector.broadcast %316 : vector<1x512xf32> to vector<32x512xf32>
    %318 = arith.mulf %315, %317 : vector<32x512xf32>
    %c18 = arith.constant 18 : index
    %c0_82 = arith.constant 0 : index
    %c0_83 = arith.constant 0 : index
    %319 = vector.load %arg5[%c18, %c0_82, %c0_83] : memref<27x32x32xbf16, #tpu.memory_space<vmem>>, vector<1x32x32xbf16>
    %320 = vector.shape_cast %319 : vector<1x32x32xbf16> to vector<32x32xbf16>
    %321 = arith.truncf %318 : vector<32x512xf32> to vector<32x512xbf16>
    %cst_84 = arith.constant dense<0.000000e+00> : vector<32x512xf32>
    %322 = tpu.matmul %320, %321, %cst_84 {dimension_numbers = #tpu.dot_dimension_numbers<[1], [0], [0], [1], [0, 0, 1, 1], [], []>} : vector<32x32xbf16>, vector<32x512xbf16>, vector<32x512xf32> -> vector<32x512xf32>
    %323 = arith.addf %314, %322 : vector<32x512xf32>
    %324 = vector.extract_strided_slice %151 {offsets = [0, 184], sizes = [32, 512], strides = [1, 1]} : vector<32x768xf32> to vector<32x512xf32>
    %325 = arith.mulf %12, %48 : vector<1x512xf32>
    %326 = vector.broadcast %325 : vector<1x512xf32> to vector<32x512xf32>
    %327 = arith.mulf %324, %326 : vector<32x512xf32>
    %c19 = arith.constant 19 : index
    %c0_85 = arith.constant 0 : index
    %c0_86 = arith.constant 0 : index
    %328 = vector.load %arg5[%c19, %c0_85, %c0_86] : memref<27x32x32xbf16, #tpu.memory_space<vmem>>, vector<1x32x32xbf16>
    %329 = vector.shape_cast %328 : vector<1x32x32xbf16> to vector<32x32xbf16>
    %330 = arith.truncf %327 : vector<32x512xf32> to vector<32x512xbf16>
    %cst_87 = arith.constant dense<0.000000e+00> : vector<32x512xf32>
    %331 = tpu.matmul %329, %330, %cst_87 {dimension_numbers = #tpu.dot_dimension_numbers<[1], [0], [0], [1], [0, 0, 1, 1], [], []>} : vector<32x32xbf16>, vector<32x512xbf16>, vector<32x512xf32> -> vector<32x512xf32>
    %332 = arith.addf %323, %331 : vector<32x512xf32>
    %333 = vector.extract_strided_slice %151 {offsets = [0, 185], sizes = [32, 512], strides = [1, 1]} : vector<32x768xf32> to vector<32x512xf32>
    %334 = arith.mulf %12, %57 : vector<1x512xf32>
    %335 = vector.broadcast %334 : vector<1x512xf32> to vector<32x512xf32>
    %336 = arith.mulf %333, %335 : vector<32x512xf32>
    %c20 = arith.constant 20 : index
    %c0_88 = arith.constant 0 : index
    %c0_89 = arith.constant 0 : index
    %337 = vector.load %arg5[%c20, %c0_88, %c0_89] : memref<27x32x32xbf16, #tpu.memory_space<vmem>>, vector<1x32x32xbf16>
    %338 = vector.shape_cast %337 : vector<1x32x32xbf16> to vector<32x32xbf16>
    %339 = arith.truncf %336 : vector<32x512xf32> to vector<32x512xbf16>
    %cst_90 = arith.constant dense<0.000000e+00> : vector<32x512xf32>
    %340 = tpu.matmul %338, %339, %cst_90 {dimension_numbers = #tpu.dot_dimension_numbers<[1], [0], [0], [1], [0, 0, 1, 1], [], []>} : vector<32x32xbf16>, vector<32x512xbf16>, vector<32x512xf32> -> vector<32x512xf32>
    %341 = arith.addf %332, %340 : vector<32x512xf32>
    %342 = vector.extract_strided_slice %151 {offsets = [0, 191], sizes = [32, 512], strides = [1, 1]} : vector<32x768xf32> to vector<32x512xf32>
    %343 = arith.mulf %21, %39 : vector<1x512xf32>
    %344 = vector.broadcast %343 : vector<1x512xf32> to vector<32x512xf32>
    %345 = arith.mulf %342, %344 : vector<32x512xf32>
    %c21 = arith.constant 21 : index
    %c0_91 = arith.constant 0 : index
    %c0_92 = arith.constant 0 : index
    %346 = vector.load %arg5[%c21, %c0_91, %c0_92] : memref<27x32x32xbf16, #tpu.memory_space<vmem>>, vector<1x32x32xbf16>
    %347 = vector.shape_cast %346 : vector<1x32x32xbf16> to vector<32x32xbf16>
    %348 = arith.truncf %345 : vector<32x512xf32> to vector<32x512xbf16>
    %cst_93 = arith.constant dense<0.000000e+00> : vector<32x512xf32>
    %349 = tpu.matmul %347, %348, %cst_93 {dimension_numbers = #tpu.dot_dimension_numbers<[1], [0], [0], [1], [0, 0, 1, 1], [], []>} : vector<32x32xbf16>, vector<32x512xbf16>, vector<32x512xf32> -> vector<32x512xf32>
    %350 = arith.addf %341, %349 : vector<32x512xf32>
    %351 = vector.extract_strided_slice %151 {offsets = [0, 192], sizes = [32, 512], strides = [1, 1]} : vector<32x768xf32> to vector<32x512xf32>
    %352 = arith.mulf %21, %48 : vector<1x512xf32>
    %353 = vector.broadcast %352 : vector<1x512xf32> to vector<32x512xf32>
    %354 = arith.mulf %351, %353 : vector<32x512xf32>
    %c22 = arith.constant 22 : index
    %c0_94 = arith.constant 0 : index
    %c0_95 = arith.constant 0 : index
    %355 = vector.load %arg5[%c22, %c0_94, %c0_95] : memref<27x32x32xbf16, #tpu.memory_space<vmem>>, vector<1x32x32xbf16>
    %356 = vector.shape_cast %355 : vector<1x32x32xbf16> to vector<32x32xbf16>
    %357 = arith.truncf %354 : vector<32x512xf32> to vector<32x512xbf16>
    %cst_96 = arith.constant dense<0.000000e+00> : vector<32x512xf32>
    %358 = tpu.matmul %356, %357, %cst_96 {dimension_numbers = #tpu.dot_dimension_numbers<[1], [0], [0], [1], [0, 0, 1, 1], [], []>} : vector<32x32xbf16>, vector<32x512xbf16>, vector<32x512xf32> -> vector<32x512xf32>
    %359 = arith.addf %350, %358 : vector<32x512xf32>
    %360 = vector.extract_strided_slice %151 {offsets = [0, 193], sizes = [32, 512], strides = [1, 1]} : vector<32x768xf32> to vector<32x512xf32>
    %361 = arith.mulf %21, %57 : vector<1x512xf32>
    %362 = vector.broadcast %361 : vector<1x512xf32> to vector<32x512xf32>
    %363 = arith.mulf %360, %362 : vector<32x512xf32>
    %c23 = arith.constant 23 : index
    %c0_97 = arith.constant 0 : index
    %c0_98 = arith.constant 0 : index
    %364 = vector.load %arg5[%c23, %c0_97, %c0_98] : memref<27x32x32xbf16, #tpu.memory_space<vmem>>, vector<1x32x32xbf16>
    %365 = vector.shape_cast %364 : vector<1x32x32xbf16> to vector<32x32xbf16>
    %366 = arith.truncf %363 : vector<32x512xf32> to vector<32x512xbf16>
    %cst_99 = arith.constant dense<0.000000e+00> : vector<32x512xf32>
    %367 = tpu.matmul %365, %366, %cst_99 {dimension_numbers = #tpu.dot_dimension_numbers<[1], [0], [0], [1], [0, 0, 1, 1], [], []>} : vector<32x32xbf16>, vector<32x512xbf16>, vector<32x512xf32> -> vector<32x512xf32>
    %368 = arith.addf %359, %367 : vector<32x512xf32>
    %369 = vector.extract_strided_slice %151 {offsets = [0, 199], sizes = [32, 512], strides = [1, 1]} : vector<32x768xf32> to vector<32x512xf32>
    %370 = arith.mulf %30, %39 : vector<1x512xf32>
    %371 = vector.broadcast %370 : vector<1x512xf32> to vector<32x512xf32>
    %372 = arith.mulf %369, %371 : vector<32x512xf32>
    %c24 = arith.constant 24 : index
    %c0_100 = arith.constant 0 : index
    %c0_101 = arith.constant 0 : index
    %373 = vector.load %arg5[%c24, %c0_100, %c0_101] : memref<27x32x32xbf16, #tpu.memory_space<vmem>>, vector<1x32x32xbf16>
    %374 = vector.shape_cast %373 : vector<1x32x32xbf16> to vector<32x32xbf16>
    %375 = arith.truncf %372 : vector<32x512xf32> to vector<32x512xbf16>
    %cst_102 = arith.constant dense<0.000000e+00> : vector<32x512xf32>
    %376 = tpu.matmul %374, %375, %cst_102 {dimension_numbers = #tpu.dot_dimension_numbers<[1], [0], [0], [1], [0, 0, 1, 1], [], []>} : vector<32x32xbf16>, vector<32x512xbf16>, vector<32x512xf32> -> vector<32x512xf32>
    %377 = arith.addf %368, %376 : vector<32x512xf32>
    %378 = vector.extract_strided_slice %151 {offsets = [0, 200], sizes = [32, 512], strides = [1, 1]} : vector<32x768xf32> to vector<32x512xf32>
    %379 = arith.mulf %30, %48 : vector<1x512xf32>
    %380 = vector.broadcast %379 : vector<1x512xf32> to vector<32x512xf32>
    %381 = arith.mulf %378, %380 : vector<32x512xf32>
    %c25 = arith.constant 25 : index
    %c0_103 = arith.constant 0 : index
    %c0_104 = arith.constant 0 : index
    %382 = vector.load %arg5[%c25, %c0_103, %c0_104] : memref<27x32x32xbf16, #tpu.memory_space<vmem>>, vector<1x32x32xbf16>
    %383 = vector.shape_cast %382 : vector<1x32x32xbf16> to vector<32x32xbf16>
    %384 = arith.truncf %381 : vector<32x512xf32> to vector<32x512xbf16>
    %cst_105 = arith.constant dense<0.000000e+00> : vector<32x512xf32>
    %385 = tpu.matmul %383, %384, %cst_105 {dimension_numbers = #tpu.dot_dimension_numbers<[1], [0], [0], [1], [0, 0, 1, 1], [], []>} : vector<32x32xbf16>, vector<32x512xbf16>, vector<32x512xf32> -> vector<32x512xf32>
    %386 = arith.addf %377, %385 : vector<32x512xf32>
    %387 = vector.extract_strided_slice %151 {offsets = [0, 201], sizes = [32, 512], strides = [1, 1]} : vector<32x768xf32> to vector<32x512xf32>
    %388 = arith.mulf %30, %57 : vector<1x512xf32>
    %389 = vector.broadcast %388 : vector<1x512xf32> to vector<32x512xf32>
    %390 = arith.mulf %387, %389 : vector<32x512xf32>
    %c26 = arith.constant 26 : index
    %c0_106 = arith.constant 0 : index
    %c0_107 = arith.constant 0 : index
    %391 = vector.load %arg5[%c26, %c0_106, %c0_107] : memref<27x32x32xbf16, #tpu.memory_space<vmem>>, vector<1x32x32xbf16>
    %392 = vector.shape_cast %391 : vector<1x32x32xbf16> to vector<32x32xbf16>
    %393 = arith.truncf %390 : vector<32x512xf32> to vector<32x512xbf16>
    %cst_108 = arith.constant dense<0.000000e+00> : vector<32x512xf32>
    %394 = tpu.matmul %392, %393, %cst_108 {dimension_numbers = #tpu.dot_dimension_numbers<[1], [0], [0], [1], [0, 0, 1, 1], [], []>} : vector<32x32xbf16>, vector<32x512xbf16>, vector<32x512xf32> -> vector<32x512xf32>
    %395 = arith.addf %386, %394 : vector<32x512xf32>
    %c0_109 = arith.constant 0 : index
    %c0_110 = arith.constant 0 : index
    %396 = vector.load %arg6[%c0_109, %c0_110] : memref<32x1xf32, #tpu.memory_space<vmem>>, vector<32x1xf32>
    %397 = vector.broadcast %396 : vector<32x1xf32> to vector<32x512xf32>
    %398 = arith.addf %395, %397 : vector<32x512xf32>
    %c0_111 = arith.constant 0 : index
    %c0_112 = arith.constant 0 : index
    %c0_113 = arith.constant 0 : index
    %399 = vector.load %arg7[%c0_111, %c0_112, %c0_113] : memref<1x32x512xf32, #tpu.memory_space<vmem>>, vector<1x32x512xf32>
    %400 = vector.shape_cast %399 : vector<1x32x512xf32> to vector<32x512xf32>
    %401 = vector.shape_cast %398 : vector<32x512xf32> to vector<1x32x512xf32>
    tpu.vector_store %arg7[%c0_111, %c0_112, %c0_113], %401 {strides = array<i32>} : memref<1x32x512xf32, #tpu.memory_space<vmem>>, vector<1x32x512xf32>,
    %402 = arith.truncf %398 : vector<32x512xf32> to vector<32x512xbf16>
    %c0_114 = arith.constant 0 : index
    %c0_115 = arith.constant 0 : index
    %c0_116 = arith.constant 0 : index
    %403 = vector.load %arg8[%c0_114, %c0_115, %c0_116] : memref<1x32x512xbf16, #tpu.memory_space<vmem>>, vector<1x32x512xbf16>
    %404 = vector.shape_cast %403 : vector<1x32x512xbf16> to vector<32x512xbf16>
    %405 = vector.shape_cast %402 : vector<32x512xbf16> to vector<1x32x512xbf16>
    tpu.vector_store %arg8[%c0_114, %c0_115, %c0_116], %405 {strides = array<i32>} : memref<1x32x512xbf16, #tpu.memory_space<vmem>>, vector<1x32x512xbf16>,
    return
  }
  func.func @transform_0(%arg0: i32) -> (i32, i32, i32) {
    %c0_i32 = arith.constant 0 : i32
    %c0_i32_0 = arith.constant 0 : i32
    %c0_i32_1 = arith.constant 0 : i32
    return %arg0, %c0_i32, %c0_i32_0 : i32, i32, i32
  }
  func.func @transform_1(%arg0: i32) -> (i32, i32) {
    %c0_i32 = arith.constant 0 : i32
    %c0_i32_0 = arith.constant 0 : i32
    %c0_i32_1 = arith.constant 0 : i32
    return %c0_i32, %c0_i32_0 : i32, i32
  }
  func.func @transform_2(%arg0: i32) -> (i32, i32) {
    %c0_i32 = arith.constant 0 : i32
    %c0_i32_0 = arith.constant 0 : i32
    %c0_i32_1 = arith.constant 0 : i32
    return %c0_i32, %c0_i32_0 : i32, i32
  }
  func.func @transform_3(%arg0: i32) -> (i32, i32) {
    %c0_i32 = arith.constant 0 : i32
    %c0_i32_0 = arith.constant 0 : i32
    %c0_i32_1 = arith.constant 0 : i32
    return %c0_i32, %c0_i32_0 : i32, i32
  }
  func.func @transform_4(%arg0: i32) -> (i32, i32, i32) {
    %c0_i32 = arith.constant 0 : i32
    %c0_i32_0 = arith.constant 0 : i32
    %c0_i32_1 = arith.constant 0 : i32
    %c0_i32_2 = arith.constant 0 : i32
    return %c0_i32, %c0_i32_0, %c0_i32_1 : i32, i32, i32
  }
  func.func @transform_5(%arg0: i32) -> (i32, i32) {
    %c0_i32 = arith.constant 0 : i32
    %c0_i32_0 = arith.constant 0 : i32
    %c0_i32_1 = arith.constant 0 : i32
    return %c0_i32, %c0_i32_0 : i32, i32
  }
  func.func @transform_6(%arg0: i32) -> (i32, i32, i32) {
    %c0_i32 = arith.constant 0 : i32
    %c0_i32_0 = arith.constant 0 : i32
    %c0_i32_1 = arith.constant 0 : i32
    return %arg0, %c0_i32, %c0_i32_0 : i32, i32, i32
  }
  func.func @transform_7(%arg0: i32) -> (i32, i32, i32) {
    %c0_i32 = arith.constant 0 : i32
    %c0_i32_0 = arith.constant 0 : i32
    %c0_i32_1 = arith.constant 0 : i32
    return %arg0, %c0_i32, %c0_i32_0 : i32, i32, i32
  }
}

module attributes {stable_mosaic.version = 11 : i64} {
  func.func @_decoder_kernel(%arg0: i32, %arg1: i32, %arg2: memref<1x3x512xf32, #tpu.memory_space<vmem>>, %arg3: memref<1x8x512xf32, #tpu.memory_space<vmem>>, %arg4: memref<1x8x32x512xbf16, #tpu.memory_space<vmem>>, %arg5: memref<64x35xbf16, #tpu.memory_space<vmem>>, %arg6: memref<64x1xf32, #tpu.memory_space<vmem>>, %arg7: memref<64x64xbf16, #tpu.memory_space<vmem>>, %arg8: memref<64x1xf32, #tpu.memory_space<vmem>>, %arg9: memref<64x64xbf16, #tpu.memory_space<vmem>>, %arg10: memref<64x1xf32, #tpu.memory_space<vmem>>, %arg11: memref<64x1xf32, #tpu.memory_space<vmem>>, %arg12: memref<1x1xf32, #tpu.memory_space<vmem>>, %arg13: memref<1x1x512xf32, #tpu.memory_space<vmem>>) attributes {dimension_semantics = [#tpu.dimension_semantics<parallel>, #tpu.dimension_semantics<parallel>], iteration_bounds = array<i64: 2, 1>, scalar_prefetch = 0 : i64, scratch_operands = 0 : i64, tpu.core_type = #tpu.core_type<tc>, window_params = [{transform_indices = @transform_0, window_bounds = array<i64: 1, 3, 512>}, {transform_indices = @transform_1, window_bounds = array<i64: 1, 8, 512>}, {transform_indices = @transform_2, window_bounds = array<i64: 1, 8, 32, 512>}, {pipeline_mode = #tpu.pipeline_mode<synchronous>, transform_indices = @transform_3, window_bounds = array<i64: 64, 35>}, {pipeline_mode = #tpu.pipeline_mode<synchronous>, transform_indices = @transform_4, window_bounds = array<i64: 64, 1>}, {pipeline_mode = #tpu.pipeline_mode<synchronous>, transform_indices = @transform_5, window_bounds = array<i64: 64, 64>}, {pipeline_mode = #tpu.pipeline_mode<synchronous>, transform_indices = @transform_6, window_bounds = array<i64: 64, 1>}, {pipeline_mode = #tpu.pipeline_mode<synchronous>, transform_indices = @transform_7, window_bounds = array<i64: 64, 64>}, {pipeline_mode = #tpu.pipeline_mode<synchronous>, transform_indices = @transform_8, window_bounds = array<i64: 64, 1>}, {pipeline_mode = #tpu.pipeline_mode<synchronous>, transform_indices = @transform_9, window_bounds = array<i64: 64, 1>}, {pipeline_mode = #tpu.pipeline_mode<synchronous>, transform_indices = @transform_10, window_bounds = array<i64: 1, 1>}, {transform_indices = @transform_11, window_bounds = array<i64: 1, 1, 512>}]} {
    %c0 = arith.constant 0 : index
    %c0_0 = arith.constant 0 : index
    %c0_1 = arith.constant 0 : index
    %0 = vector.load %arg3[%c0, %c0_0, %c0_1] : memref<1x8x512xf32, #tpu.memory_space<vmem>>, vector<1x8x512xf32>
    %1 = vector.shape_cast %0 : vector<1x8x512xf32> to vector<8x512xf32>
    %2 = vector.extract_strided_slice %1 {offsets = [0, 0], sizes = [1, 512], strides = [1, 1]} : vector<8x512xf32> to vector<1x512xf32>
    %c0_2 = arith.constant 0 : index
    %c0_3 = arith.constant 0 : index
    %c0_4 = arith.constant 0 : index
    %c0_5 = arith.constant 0 : index
    %3 = vector.load %arg4[%c0_2, %c0_3, %c0_4, %c0_5] : memref<1x8x32x512xbf16, #tpu.memory_space<vmem>>, vector<1x1x32x512xbf16>
    %4 = vector.shape_cast %3 : vector<1x1x32x512xbf16> to vector<32x512xbf16>
    %5 = arith.extf %4 : vector<32x512xbf16> to vector<32x512xf32>
    %6 = vector.broadcast %2 : vector<1x512xf32> to vector<32x512xf32>
    %7 = arith.mulf %6, %5 : vector<32x512xf32>
    %8 = vector.extract_strided_slice %1 {offsets = [1, 0], sizes = [1, 512], strides = [1, 1]} : vector<8x512xf32> to vector<1x512xf32>
    %c0_6 = arith.constant 0 : index
    %c1 = arith.constant 1 : index
    %c0_7 = arith.constant 0 : index
    %c0_8 = arith.constant 0 : index
    %9 = vector.load %arg4[%c0_6, %c1, %c0_7, %c0_8] : memref<1x8x32x512xbf16, #tpu.memory_space<vmem>>, vector<1x1x32x512xbf16>
    %10 = vector.shape_cast %9 : vector<1x1x32x512xbf16> to vector<32x512xbf16>
    %11 = arith.extf %10 : vector<32x512xbf16> to vector<32x512xf32>
    %12 = vector.broadcast %8 : vector<1x512xf32> to vector<32x512xf32>
    %13 = arith.mulf %12, %11 : vector<32x512xf32>
    %14 = arith.addf %7, %13 : vector<32x512xf32>
    %15 = vector.extract_strided_slice %1 {offsets = [2, 0], sizes = [1, 512], strides = [1, 1]} : vector<8x512xf32> to vector<1x512xf32>
    %c0_9 = arith.constant 0 : index
    %c2 = arith.constant 2 : index
    %c0_10 = arith.constant 0 : index
    %c0_11 = arith.constant 0 : index
    %16 = vector.load %arg4[%c0_9, %c2, %c0_10, %c0_11] : memref<1x8x32x512xbf16, #tpu.memory_space<vmem>>, vector<1x1x32x512xbf16>
    %17 = vector.shape_cast %16 : vector<1x1x32x512xbf16> to vector<32x512xbf16>
    %18 = arith.extf %17 : vector<32x512xbf16> to vector<32x512xf32>
    %19 = vector.broadcast %15 : vector<1x512xf32> to vector<32x512xf32>
    %20 = arith.mulf %19, %18 : vector<32x512xf32>
    %21 = arith.addf %14, %20 : vector<32x512xf32>
    %22 = vector.extract_strided_slice %1 {offsets = [3, 0], sizes = [1, 512], strides = [1, 1]} : vector<8x512xf32> to vector<1x512xf32>
    %c0_12 = arith.constant 0 : index
    %c3 = arith.constant 3 : index
    %c0_13 = arith.constant 0 : index
    %c0_14 = arith.constant 0 : index
    %23 = vector.load %arg4[%c0_12, %c3, %c0_13, %c0_14] : memref<1x8x32x512xbf16, #tpu.memory_space<vmem>>, vector<1x1x32x512xbf16>
    %24 = vector.shape_cast %23 : vector<1x1x32x512xbf16> to vector<32x512xbf16>
    %25 = arith.extf %24 : vector<32x512xbf16> to vector<32x512xf32>
    %26 = vector.broadcast %22 : vector<1x512xf32> to vector<32x512xf32>
    %27 = arith.mulf %26, %25 : vector<32x512xf32>
    %28 = arith.addf %21, %27 : vector<32x512xf32>
    %29 = vector.extract_strided_slice %1 {offsets = [4, 0], sizes = [1, 512], strides = [1, 1]} : vector<8x512xf32> to vector<1x512xf32>
    %c0_15 = arith.constant 0 : index
    %c4 = arith.constant 4 : index
    %c0_16 = arith.constant 0 : index
    %c0_17 = arith.constant 0 : index
    %30 = vector.load %arg4[%c0_15, %c4, %c0_16, %c0_17] : memref<1x8x32x512xbf16, #tpu.memory_space<vmem>>, vector<1x1x32x512xbf16>
    %31 = vector.shape_cast %30 : vector<1x1x32x512xbf16> to vector<32x512xbf16>
    %32 = arith.extf %31 : vector<32x512xbf16> to vector<32x512xf32>
    %33 = vector.broadcast %29 : vector<1x512xf32> to vector<32x512xf32>
    %34 = arith.mulf %33, %32 : vector<32x512xf32>
    %35 = arith.addf %28, %34 : vector<32x512xf32>
    %36 = vector.extract_strided_slice %1 {offsets = [5, 0], sizes = [1, 512], strides = [1, 1]} : vector<8x512xf32> to vector<1x512xf32>
    %c0_18 = arith.constant 0 : index
    %c5 = arith.constant 5 : index
    %c0_19 = arith.constant 0 : index
    %c0_20 = arith.constant 0 : index
    %37 = vector.load %arg4[%c0_18, %c5, %c0_19, %c0_20] : memref<1x8x32x512xbf16, #tpu.memory_space<vmem>>, vector<1x1x32x512xbf16>
    %38 = vector.shape_cast %37 : vector<1x1x32x512xbf16> to vector<32x512xbf16>
    %39 = arith.extf %38 : vector<32x512xbf16> to vector<32x512xf32>
    %40 = vector.broadcast %36 : vector<1x512xf32> to vector<32x512xf32>
    %41 = arith.mulf %40, %39 : vector<32x512xf32>
    %42 = arith.addf %35, %41 : vector<32x512xf32>
    %43 = vector.extract_strided_slice %1 {offsets = [6, 0], sizes = [1, 512], strides = [1, 1]} : vector<8x512xf32> to vector<1x512xf32>
    %c0_21 = arith.constant 0 : index
    %c6 = arith.constant 6 : index
    %c0_22 = arith.constant 0 : index
    %c0_23 = arith.constant 0 : index
    %44 = vector.load %arg4[%c0_21, %c6, %c0_22, %c0_23] : memref<1x8x32x512xbf16, #tpu.memory_space<vmem>>, vector<1x1x32x512xbf16>
    %45 = vector.shape_cast %44 : vector<1x1x32x512xbf16> to vector<32x512xbf16>
    %46 = arith.extf %45 : vector<32x512xbf16> to vector<32x512xf32>
    %47 = vector.broadcast %43 : vector<1x512xf32> to vector<32x512xf32>
    %48 = arith.mulf %47, %46 : vector<32x512xf32>
    %49 = arith.addf %42, %48 : vector<32x512xf32>
    %50 = vector.extract_strided_slice %1 {offsets = [7, 0], sizes = [1, 512], strides = [1, 1]} : vector<8x512xf32> to vector<1x512xf32>
    %c0_24 = arith.constant 0 : index
    %c7 = arith.constant 7 : index
    %c0_25 = arith.constant 0 : index
    %c0_26 = arith.constant 0 : index
    %51 = vector.load %arg4[%c0_24, %c7, %c0_25, %c0_26] : memref<1x8x32x512xbf16, #tpu.memory_space<vmem>>, vector<1x1x32x512xbf16>
    %52 = vector.shape_cast %51 : vector<1x1x32x512xbf16> to vector<32x512xbf16>
    %53 = arith.extf %52 : vector<32x512xbf16> to vector<32x512xf32>
    %54 = vector.broadcast %50 : vector<1x512xf32> to vector<32x512xf32>
    %55 = arith.mulf %54, %53 : vector<32x512xf32>
    %56 = arith.addf %49, %55 : vector<32x512xf32>
    %c0_27 = arith.constant 0 : index
    %c0_28 = arith.constant 0 : index
    %c0_29 = arith.constant 0 : index
    %57 = vector.load %arg2[%c0_27, %c0_28, %c0_29] : memref<1x3x512xf32, #tpu.memory_space<vmem>>, vector<1x3x512xf32>
    %58 = vector.shape_cast %57 : vector<1x3x512xf32> to vector<3x512xf32>
    %59 = tpu.concatenate %56, %58 in 0 : vector<32x512xf32>, vector<3x512xf32> -> vector<35x512xf32>
    %60 = arith.truncf %59 : vector<35x512xf32> to vector<35x512xbf16>
    %c0_30 = arith.constant 0 : index
    %c0_31 = arith.constant 0 : index
    %61 = vector.load %arg5[%c0_30, %c0_31] : memref<64x35xbf16, #tpu.memory_space<vmem>>, vector<64x35xbf16>
    %cst = arith.constant dense<0.000000e+00> : vector<64x512xf32>
    %62 = tpu.matmul %61, %60, %cst {dimension_numbers = #tpu.dot_dimension_numbers<[1], [0], [0], [1], [0, 0, 1, 1], [], []>} : vector<64x35xbf16>, vector<35x512xbf16>, vector<64x512xf32> -> vector<64x512xf32>
    %c0_32 = arith.constant 0 : index
    %c0_33 = arith.constant 0 : index
    %63 = vector.load %arg6[%c0_32, %c0_33] : memref<64x1xf32, #tpu.memory_space<vmem>>, vector<64x1xf32>
    %64 = vector.broadcast %63 : vector<64x1xf32> to vector<64x512xf32>
    %65 = arith.addf %62, %64 : vector<64x512xf32>
    %cst_34 = arith.constant 0.000000e+00 : f32
    %66 = vector.broadcast %cst_34 : f32 to vector<64x512xf32>
    %67 = arith.maximumf %65, %66 : vector<64x512xf32>
    %c0_35 = arith.constant 0 : index
    %c0_36 = arith.constant 0 : index
    %68 = vector.load %arg7[%c0_35, %c0_36] : memref<64x64xbf16, #tpu.memory_space<vmem>>, vector<64x64xbf16>
    %69 = arith.truncf %67 : vector<64x512xf32> to vector<64x512xbf16>
    %cst_37 = arith.constant dense<0.000000e+00> : vector<64x512xf32>
    %70 = tpu.matmul %68, %69, %cst_37 {dimension_numbers = #tpu.dot_dimension_numbers<[1], [0], [0], [1], [0, 0, 1, 1], [], []>} : vector<64x64xbf16>, vector<64x512xbf16>, vector<64x512xf32> -> vector<64x512xf32>
    %c0_38 = arith.constant 0 : index
    %c0_39 = arith.constant 0 : index
    %71 = vector.load %arg8[%c0_38, %c0_39] : memref<64x1xf32, #tpu.memory_space<vmem>>, vector<64x1xf32>
    %72 = vector.broadcast %71 : vector<64x1xf32> to vector<64x512xf32>
    %73 = arith.addf %70, %72 : vector<64x512xf32>
    %cst_40 = arith.constant 0.000000e+00 : f32
    %74 = vector.broadcast %cst_40 : f32 to vector<64x512xf32>
    %75 = arith.maximumf %73, %74 : vector<64x512xf32>
    %c0_41 = arith.constant 0 : index
    %c0_42 = arith.constant 0 : index
    %76 = vector.load %arg9[%c0_41, %c0_42] : memref<64x64xbf16, #tpu.memory_space<vmem>>, vector<64x64xbf16>
    %77 = arith.truncf %75 : vector<64x512xf32> to vector<64x512xbf16>
    %cst_43 = arith.constant dense<0.000000e+00> : vector<64x512xf32>
    %78 = tpu.matmul %76, %77, %cst_43 {dimension_numbers = #tpu.dot_dimension_numbers<[1], [0], [0], [1], [0, 0, 1, 1], [], []>} : vector<64x64xbf16>, vector<64x512xbf16>, vector<64x512xf32> -> vector<64x512xf32>
    %c0_44 = arith.constant 0 : index
    %c0_45 = arith.constant 0 : index
    %79 = vector.load %arg10[%c0_44, %c0_45] : memref<64x1xf32, #tpu.memory_space<vmem>>, vector<64x1xf32>
    %80 = vector.broadcast %79 : vector<64x1xf32> to vector<64x512xf32>
    %81 = arith.addf %78, %80 : vector<64x512xf32>
    %cst_46 = arith.constant 0.000000e+00 : f32
    %82 = vector.broadcast %cst_46 : f32 to vector<64x512xf32>
    %83 = arith.maximumf %81, %82 : vector<64x512xf32>
    %c0_47 = arith.constant 0 : index
    %c0_48 = arith.constant 0 : index
    %84 = vector.load %arg11[%c0_47, %c0_48] : memref<64x1xf32, #tpu.memory_space<vmem>>, vector<64x1xf32>
    %85 = vector.broadcast %84 : vector<64x1xf32> to vector<64x512xf32>
    %86 = arith.mulf %83, %85 : vector<64x512xf32>
    %cst_49 = arith.constant dense<0.000000e+00> : vector<512xf32>
    %87 = vector.multi_reduction <add>, %86, %cst_49 [0] : vector<64x512xf32> to vector<512xf32>
    %88 = vector.shape_cast %87 : vector<512xf32> to vector<1x512xf32>
    %c0_50 = arith.constant 0 : index
    %c0_51 = arith.constant 0 : index
    %89 = vector.load %arg12[%c0_50, %c0_51] : memref<1x1xf32, #tpu.memory_space<vmem>>, vector<1x1xf32>
    %90 = vector.broadcast %89 : vector<1x1xf32> to vector<1x512xf32>
    %91 = arith.addf %88, %90 : vector<1x512xf32>
    %c0_52 = arith.constant 0 : index
    %c0_53 = arith.constant 0 : index
    %c0_54 = arith.constant 0 : index
    %92 = vector.load %arg13[%c0_52, %c0_53, %c0_54] : memref<1x1x512xf32, #tpu.memory_space<vmem>>, vector<1x1x512xf32>
    %93 = vector.shape_cast %92 : vector<1x1x512xf32> to vector<1x512xf32>
    %94 = vector.shape_cast %91 : vector<1x512xf32> to vector<1x1x512xf32>
    tpu.vector_store %arg13[%c0_52, %c0_53, %c0_54], %94 {strides = array<i32>} : memref<1x1x512xf32, #tpu.memory_space<vmem>>, vector<1x1x512xf32>,
    return
  }
  func.func @transform_0(%arg0: i32, %arg1: i32) -> (i32, i32, i32) {
    %c0_i32 = arith.constant 0 : i32
    %c0_i32_0 = arith.constant 0 : i32
    return %arg0, %c0_i32, %arg1 : i32, i32, i32
  }
  func.func @transform_1(%arg0: i32, %arg1: i32) -> (i32, i32, i32) {
    %c0_i32 = arith.constant 0 : i32
    %c0_i32_0 = arith.constant 0 : i32
    return %arg0, %c0_i32, %arg1 : i32, i32, i32
  }
  func.func @transform_2(%arg0: i32, %arg1: i32) -> (i32, i32, i32, i32) {
    %c0_i32 = arith.constant 0 : i32
    %c0_i32_0 = arith.constant 0 : i32
    %c0_i32_1 = arith.constant 0 : i32
    return %arg0, %c0_i32, %c0_i32_0, %arg1 : i32, i32, i32, i32
  }
  func.func @transform_3(%arg0: i32, %arg1: i32) -> (i32, i32) {
    %c0_i32 = arith.constant 0 : i32
    %c0_i32_0 = arith.constant 0 : i32
    %c0_i32_1 = arith.constant 0 : i32
    return %c0_i32, %c0_i32_0 : i32, i32
  }
  func.func @transform_4(%arg0: i32, %arg1: i32) -> (i32, i32) {
    %c0_i32 = arith.constant 0 : i32
    %c0_i32_0 = arith.constant 0 : i32
    %c0_i32_1 = arith.constant 0 : i32
    return %c0_i32, %c0_i32_0 : i32, i32
  }
  func.func @transform_5(%arg0: i32, %arg1: i32) -> (i32, i32) {
    %c0_i32 = arith.constant 0 : i32
    %c0_i32_0 = arith.constant 0 : i32
    %c0_i32_1 = arith.constant 0 : i32
    return %c0_i32, %c0_i32_0 : i32, i32
  }
  func.func @transform_6(%arg0: i32, %arg1: i32) -> (i32, i32) {
    %c0_i32 = arith.constant 0 : i32
    %c0_i32_0 = arith.constant 0 : i32
    %c0_i32_1 = arith.constant 0 : i32
    return %c0_i32, %c0_i32_0 : i32, i32
  }
  func.func @transform_7(%arg0: i32, %arg1: i32) -> (i32, i32) {
    %c0_i32 = arith.constant 0 : i32
    %c0_i32_0 = arith.constant 0 : i32
    %c0_i32_1 = arith.constant 0 : i32
    return %c0_i32, %c0_i32_0 : i32, i32
  }
  func.func @transform_8(%arg0: i32, %arg1: i32) -> (i32, i32) {
    %c0_i32 = arith.constant 0 : i32
    %c0_i32_0 = arith.constant 0 : i32
    %c0_i32_1 = arith.constant 0 : i32
    return %c0_i32, %c0_i32_0 : i32, i32
  }
  func.func @transform_9(%arg0: i32, %arg1: i32) -> (i32, i32) {
    %c0_i32 = arith.constant 0 : i32
    %c0_i32_0 = arith.constant 0 : i32
    %c0_i32_1 = arith.constant 0 : i32
    return %c0_i32, %c0_i32_0 : i32, i32
  }
  func.func @transform_10(%arg0: i32, %arg1: i32) -> (i32, i32) {
    %c0_i32 = arith.constant 0 : i32
    %c0_i32_0 = arith.constant 0 : i32
    %c0_i32_1 = arith.constant 0 : i32
    return %c0_i32, %c0_i32_0 : i32, i32
  }
  func.func @transform_11(%arg0: i32, %arg1: i32) -> (i32, i32, i32) {
    %c0_i32 = arith.constant 0 : i32
    %c0_i32_0 = arith.constant 0 : i32
    return %arg0, %c0_i32, %arg1 : i32, i32, i32
  }
}

</mosaic_0001>

<bundles_post_ra>
// kernel: arssr_forward.3
= control target key start
LH: loop header
LB: loop body
LE: loop exit
PB: predicated region body
PF: predicated region fallthrough
CT: control target
= control target key end

     0   :  { %s2477_s19 = smov 0   ;;  %s2479_s20 = smov 0   ;;  %s3387_s0 = inlined_call_operand.vmem [shape: f32[2,3,512], index: 0, kind: input, shape index: {}]   ;;  %s3388_s1 = inlined_call_operand.vmem [shape: f32[2,8,512], index: 1, kind: input, shape index: {}]   ;;  %s3389_s2 = inlined_call_operand.vmem [shape: bf16[2,8,32,512], index: 2, kind: input, shape index: {}]   ;;  %s3390_s3 = inlined_call_operand.vmem [shape: bf16[64,35], index: 3, kind: input, shape index: {}]   ;;  %s3391_s4 = inlined_call_operand.vmem [shape: f32[64,1], index: 4, kind: input, shape index: {}]   ;;  %s3392_s5 = inlined_call_operand.vmem [shape: bf16[64,64], index: 5, kind: input, shape index: {}]   ;;  %s3393_s6 = inlined_call_operand.vmem [shape: f32[64,1], index: 6, kind: input, shape index: {}]   ;;  %s3394_s7 = inlined_call_operand.vmem [shape: bf16[64,64], index: 7, kind: input, shape index: {}]   ;;  %s3395_s8 = inlined_call_operand.vmem [shape: f32[64,1], index: 8, kind: input, shape index: {}]   ;;  %s3396_s9 = inlined_call_operand.vmem [shape: f32[64,1], index: 9, kind: input, shape index: {}]   ;;  %s3397_s10 = inlined_call_operand.<no memory space> [shape: f32[1,1], index: 10, kind: input, shape index: {}]   ;;  %s3398_s11 = inlined_call_operand.vmem [shape: f32[2,1,512], index: 11, kind: output, shape index: {}]  }
   0x1   :  { %v16_v0 = vstv %s3397_s10  ;;  %s2481_s21 = smov 0  }
   0x2   :  { %17 = vst [vmem:[#allocation2] sm:$0x1] %v16_v0 }
   0x3 LB: > { %s35_s10 = sadd.s32 1, %s2405_s20  ;;  %p2239_p0 = scmp.ge.s32.totalorder %s2409_s21, 1  ;;  %s2409_s21 = sphi %s2481_s21, %s23_s21   ;;  %s2405_s20 = sphi %s2479_s20, %s3498_s20   ;;  %s2401_s19 = sphi %s2477_s19, %s3497_s19  }
   0x4   : > { %p37_p1 = scmp.ge.s32.totalorder %s35_s10, 2  ;;  %p394_p2 = scmp.lt.s32.totalorder %s2409_s21, 3 }
   0x6   : > { %s3500_s10 = smov (%p37_p1, %s35_s10), 0  ;;  %p395_p3 = pnand %p2239_p0, %p394_p2 }
   0x8   : > { %398 = sbr.rel (%p395_p3) target bundleno = 906 (0x38a), region = 64 }
   0xf   : > { %p460_p4 = scmp.lt.s32.totalorder %s2401_s19, 1  ;;  %v3399_v1 = vlaneseq  ;;  %vm1179_vm0 = vcmask 1040384   ;;  %vm1180_vm1 = vcmask 1041408   ;;  %v2411_v3 = vmov 65535  }
  0x10   : > { %v1181_v4 = vsel %vm1179_vm0, 4294967295, %v2411_v3  ;;  %v3400_v5 = vmov 0   ;;  %vm1166_vm2 = vcmask 285696   ;;  %vm1465_vm3 = vcmask 523264  }
  0x11   : > { %s3502_s19 = smov (!%p460_p4, %s2401_s19), 1  ;;  %v2498_v2 = vshrl.u32 %v3399_v1, 7  ;;  %1227 = vmatprep.mubr.bf16.mxu0 %v3400_v5  ;;  %1300 = vmatprep.mubr.bf16.mxu1 %v3400_v5  ;;  %v2532_v11 = vsel %vm1180_vm1, %v1181_v4, 0 }
  0x12   : > { %2371 = vset.pattern.permute.xlu0 %v3400_v5  ;;  %2372 = vset.pattern.permute.xlu1 %v3400_v5  ;;  %s2342_s22 = sshll.u32 %s3502_s19, 5  ;;  %s2343_s23 = sshll.u32 %s3502_s19, 9  ;;  %3447 = vst [vmem:[#allocation5_spill] sm:$0xff] %v2532_v11 }
  0x13   : > { %3445 = vst [vmem:[#allocation3_spill] sm:$0xff] %v2498_v2  ;;  %v2507_v6 = vsub.s32 0, %v2498_v2  ;;  %v2510_v7 = vsub.s32 1, %v2498_v2  ;;  %v2513_v8 = vsub.s32 2, %v2498_v2  ;;  %s2518_s26 = scalar_lea.vmem %s3388_s1, %s2342_s22  ;;  %s2523_s29 = scalar_lea.vmem %s3389_s2, %s2343_s23  ;;  %v2526_v9 = vsub.s32 3, %v2498_v2 }
  0x14   : > { %v2529_v10 = vsub.s32 4, %v2498_v2  ;;  %v2535_v12 = vld [vmem:[%s2518_s26 + $0x8] sm:$0xff]  ;;  %v2538_v13 = vld [vmem:[%s2523_s29] sm:$0xff]  ;;  %v2541_v14 = vld [vmem:[%s2523_s29 + $0x10] sm:$0xff]  ;;  %v2544_v15 = vsub.s32 5, %v2498_v2  ;;  %v2547_v16 = vsub.s32 6, %v2498_v2 }
  0x15   : > { %3446 = vst [vmem:[#allocation4_spill] sm:$0xff] %v2507_v6  ;;  %v2550_v17 = vsub.s32 7, %v2498_v2  ;;  %v512_v18 = vunpack.c.h.bf16 %v2538_v13  ;;  %v516_v19 = vunpack.c.h.bf16 %v2541_v14  ;;  %v2556_v20 = vrot.slane %v2535_v12, %v2507_v6  ;;  %v2559_v21 = vld [vmem:[%s2523_s29 + $0x40] sm:$0xff]  ;;  %v2562_v22 = vld [vmem:[%s2523_s29 + $0x50] sm:$0xff]  ;;  %v2641_v0 = vld [vmem:[%s2523_s29 + $0x8] sm:$0xff]  ;;  %s2341_s15 = sshll.u32 %s3502_s19, 4 }
  0x16   : > { %v2566_v23 = vrot.slane %v2535_v12, %v2510_v7  ;;  %v2569_v24 = vld [vmem:[%s2523_s29 + $0x80] sm:$0xff]  ;;  %v569_v25 = vunpack.c.h.bf16 %v2559_v21  ;;  %v573_v26 = vunpack.c.h.bf16 %v2562_v22  ;;  %v2574_v27 = vld [vmem:[%s2523_s29 + $0x90] sm:$0xff]  ;;  %v2579_v29 = vrot.slane %v2535_v12, %v2513_v8  ;;  %v2644_v3 = vld [vmem:[%s2523_s29 + $0x18] sm:$0xff]  ;;  %s467_s17 = scalar_lea.vmem %s3387_s0, %s2341_s15  ;;  %s2246_s30 = sshll.u32 %s3502_s19, 2 }
  0x17   : > { %v642_v28 = vunpack.c.h.bf16 %v2569_v24  ;;  %v2582_v30 = vld [vmem:[%s2523_s29 + $0xc0] sm:$0xff]  ;;  %v2585_v31 = vld [vmem:[%s2523_s29 + $0xd0] sm:$0xff]  ;;  %v544_v32 = vmul.f32 %v2556_v20, %v512_v18  ;;  %v548_v33 = vmul.f32 %v2556_v20, %v516_v19  ;;  %v646_v34 = vunpack.c.h.bf16 %v2574_v27  ;;  %v2714_v11 = vld [vmem:[%s2523_s29 + $0x108] sm:$0xff]  ;;  %s496_s14 = scalar_lea.vmem %s3398_s11, %s2246_s30 }
  0x18   : > { %3448 = vst [vmem:[#allocation6_spill] sm:$0xff] %v2579_v29  ;;  %v715_v35 = vunpack.c.h.bf16 %v2582_v30  ;;  %v2592_v36 = vld [vmem:[%s2523_s29 + $0x100] sm:$0xff]  ;;  %v2595_v37 = vld [vmem:[%s2523_s29 + $0x110] sm:$0xff]  ;;  %v601_v39 = vmul.f32 %v2566_v23, %v569_v25  ;;  %v605_v40 = vmul.f32 %v2566_v23, %v573_v26  ;;  %v719_v42 = vunpack.c.h.bf16 %v2585_v31 }
  0x19   : > { %v2598_v38 = vld [vmem:[%s2523_s29 + $0x140] sm:$0xff]  ;;  %v674_v41 = vmul.f32 %v2579_v29, %v642_v28  ;;  %v2605_v43 = vld [vmem:[%s2523_s29 + $0x150] sm:$0xff]  ;;  %v678_v44 = vmul.f32 %v2579_v29, %v646_v34  ;;  %v2610_v45 = vrot.slane %v2535_v12, %v2526_v9  ;;  %v788_v46 = vunpack.c.h.bf16 %v2592_v36  ;;  %v2656_v34 = vld [vmem:[%s2518_s26 + $0x18] sm:$0xff] }
  0x1a   : > { %v792_v47 = vunpack.c.h.bf16 %v2595_v37  ;;  %v617_v48 = vadd.f32 %v601_v39, %v544_v32  ;;  %v621_v49 = vadd.f32 %v605_v40, %v548_v33  ;;  %v2616_v50 = vrot.slane %v2535_v12, %v2529_v10  ;;  %v2620_v52 = vld [vmem:[%s2523_s29 + $0x180] sm:$0xff]  ;;  %v2623_v53 = vld [vmem:[%s2523_s29 + $0x190] sm:$0xff]  ;;  %v1099_v29 = vld [vmem:[%s3391_s4 + $0x8] sm:$0xff] }
  0x1b   : > { %3449 = vst [vmem:[#allocation7_spill] sm:$0xff] %v2610_v45  ;;  %v861_v51 = vunpack.c.h.bf16 %v2598_v38  ;;  %v747_v54 = vmul.f32 %v2610_v45, %v715_v35  ;;  %v751_v55 = vmul.f32 %v2610_v45, %v719_v42  ;;  %v865_v56 = vunpack.c.h.bf16 %v2605_v43  ;;  %v2633_v58 = vld [vmem:[%s2523_s29 + $0x1c0] sm:$0xff]  ;;  %v2638_v63 = vld [vmem:[%s2523_s29 + $0x1d0] sm:$0xff]  ;;  %v2659_v35 = vld [vmem:[%s2523_s29 + $0x48] sm:$0xff] }
  0x1c   : > { %3450 = vst [vmem:[#allocation8_spill] sm:$0xff] %v2616_v50  ;;  %v2630_v57 = vrot.slane %v2535_v12, %v2544_v15  ;;  %v690_v59 = vadd.f32 %v674_v41, %v617_v48  ;;  %v694_v60 = vadd.f32 %v678_v44, %v621_v49  ;;  %v820_v61 = vmul.f32 %v2616_v50, %v788_v46  ;;  %v2669_v44 = vld [vmem:[%s2523_s29 + $0x58] sm:$0xff] }
  0x1d   : > { %v824_v62 = vmul.f32 %v2616_v50, %v792_v47  ;;  %v934_v19 = vunpack.c.h.bf16 %v2620_v52  ;;  %v938_v25 = vunpack.c.h.bf16 %v2623_v53  ;;  %v2652_v32 = vrot.slane %v2535_v12, %v2547_v16  ;;  %v2730_v50 = vld [vmem:[%s2523_s29 + $0x188] sm:$0xff] }
  0x1e   : > { %3451 = vst [vmem:[#allocation9_spill] sm:$0xff] %v2630_v57  ;;  %v893_v4 = vmul.f32 %v2630_v57, %v861_v51  ;;  %v897_v18 = vmul.f32 %v2630_v57, %v865_v56  ;;  %v763_v26 = vadd.f32 %v747_v54, %v690_v59  ;;  %v767_v28 = vadd.f32 %v751_v55, %v694_v60  ;;  %v2674_v51 = vld [vmem:[%s2523_s29 + $0x88] sm:$0xff]  ;;  %v2677_v54 = vld [vmem:[%s2523_s29 + $0x98] sm:$0xff] }
  0x1f   : > { %3452 = vst [vmem:[#allocation10_spill] sm:$0xff] %v2652_v32  ;;  %v1007_v33 = vunpack.c.h.bf16 %v2633_v58  ;;  %v1011_v39 = vunpack.c.h.bf16 %v2638_v63  ;;  %v2664_v40 = vrot.slane %v2535_v12, %v2550_v17  ;;  %v514_v41 = vunpack.c.h.bf16 %v2641_v0 }
  0x20   : > { %v518_v42 = vunpack.c.h.bf16 %v2644_v3  ;;  %v836_v46 = vadd.f32 %v820_v61, %v763_v26  ;;  %v840_v47 = vadd.f32 %v824_v62, %v767_v28  ;;  %v966_v48 = vmul.f32 %v2652_v32, %v934_v19  ;;  %v2695_v26 = vld [vmem:[%s2523_s29 + $0xd8] sm:$0xff] }
  0x21   : > { %3453 = vst [vmem:[#allocation11_spill] sm:$0xff] %v2664_v40  ;;  %v970_v49 = vmul.f32 %v2652_v32, %v938_v25  ;;  %v1039_v12 = vmul.f32 %v2664_v40, %v1007_v33  ;;  %v1043_v55 = vmul.f32 %v2664_v40, %v1011_v39  ;;  %v2683_v56 = vrot.slane %v2656_v34, %v2507_v6  ;;  %v2692_v25 = vld [vmem:[%s2523_s29 + $0xc8] sm:$0xff] }
  0x22   : > { %v571_v59 = vunpack.c.h.bf16 %v2659_v35  ;;  %v909_v60 = vadd.f32 %v893_v4, %v836_v46  ;;  %v913_v61 = vadd.f32 %v897_v18, %v840_v47  ;;  %v575_v62 = vunpack.c.h.bf16 %v2669_v44 }
  0x23   : > { %3454 = vst [vmem:[#allocation12_spill] sm:$0xff] %v2683_v56  ;;  %v2689_v19 = vrot.slane %v2656_v34, %v2510_v7  ;;  %v546_v28 = vmul.f32 %v2683_v56, %v514_v41  ;;  %v550_v33 = vmul.f32 %v2683_v56, %v518_v42  ;;  %v644_v39 = vunpack.c.h.bf16 %v2674_v51 }
  0x24   : > { %v648_v4 = vunpack.c.h.bf16 %v2677_v54  ;;  %v982_v18 = vadd.f32 %v966_v48, %v909_v60  ;;  %v986_v46 = vadd.f32 %v970_v49, %v913_v61  ;;  %v2705_v5 = vrot.slane %v2656_v34, %v2513_v8  ;;  %v2717_v48 = vld [vmem:[%s2523_s29 + $0x118] sm:$0xff] }
  0x25   : > { %3455 = vst [vmem:[#allocation13_spill] sm:$0xff] %v2689_v19  ;;  %v603_v47 = vmul.f32 %v2689_v19, %v571_v59  ;;  %v607_v1 = vmul.f32 %v2689_v19, %v575_v62  ;;  %v717_v41 = vunpack.c.h.bf16 %v2692_v25  ;;  %v721_v42 = vunpack.c.h.bf16 %v2695_v26  ;;  %v2720_v62 = vld [vmem:[%s2523_s29 + $0x148] sm:$0xff]  ;;  %v2723_v19 = vld [vmem:[%s2523_s29 + $0x158] sm:$0xff] }
  0x26   : > { %3456 = vst [vmem:[#allocation14_spill] sm:$0xff] %v2705_v5  ;;  %v2711_v2 = vrot.slane %v2656_v34, %v2526_v9  ;;  %v1055_v49 = vadd.f32 %v1039_v12, %v982_v18  ;;  %v1059_v59 = vadd.f32 %v1043_v55, %v986_v46  ;;  %v676_v56 = vmul.f32 %v2705_v5, %v644_v39 }
  0x27   : > { %v619_v60 = vadd.f32 %v603_v47, %v546_v28  ;;  %v623_v61 = vadd.f32 %v607_v1, %v550_v33  ;;  %v680_v40 = vmul.f32 %v2705_v5, %v648_v4  ;;  %v790_v55 = vunpack.c.h.bf16 %v2714_v11  ;;  %v2739_v33 = vld [vmem:[%s2523_s29 + $0x198] sm:$0xff]  ;;  %v2744_v47 = vld [vmem:[%s2523_s29 + $0x1c8] sm:$0xff]  ;;  %v2762_v5 = vld [vmem:[%s2518_s26] sm:$0xff] }
  0x28   : > { %3457 = vst [vmem:[#allocation15_spill] sm:$0xff] %v2711_v2  ;;  %v749_v32 = vmul.f32 %v2711_v2, %v717_v41  ;;  %v753_v57 = vmul.f32 %v2711_v2, %v721_v42  ;;  %v1079_v12 = vpack.c.bf16 %v1059_v59, %v1055_v49  ;;  %v794_v1 = vunpack.c.h.bf16 %v2717_v48  ;;  %v2747_v41 = vld [vmem:[%s2523_s29 + $0x1d8] sm:$0xff] }
  0x29   : > { %v2736_v28 = vrot.slane %v2656_v34, %v2529_v10  ;;  %v692_v39 = vadd.f32 %v676_v56, %v619_v60  ;;  %v696_v4 = vadd.f32 %v680_v40, %v623_v61  ;;  %v863_v18 = vunpack.c.h.bf16 %v2720_v62 }
  0x2a   : > { %v867_v46 = vunpack.c.h.bf16 %v2723_v19  ;;  %1195 = vmatprep.subr.bf16.mxu0 %v1079_v12  ;;  %v2753_v59 = vrot.slane %v2656_v34, %v2544_v15  ;;  %v936_v56 = vunpack.c.h.bf16 %v2730_v50  ;;  %v940_v61 = vunpack.c.h.bf16 %v2739_v33  ;;  %v1098_v12 = vld [vmem:[%s3391_s4] sm:$0xff] }
  0x2b   : > { %3458 = vst [vmem:[#allocation16_spill] sm:$0xff] %v2736_v28  ;;  %v822_v42 = vmul.f32 %v2736_v28, %v790_v55  ;;  %v826_v49 = vmul.f32 %v2736_v28, %v794_v1  ;;  %v765_v40 = vadd.f32 %v749_v32, %v692_v39  ;;  %v769_v60 = vadd.f32 %v753_v57, %v696_v4 }
  0x2c   : > { %3459 = vst [vmem:[#allocation17_spill] sm:$0xff] %v2753_v59  ;;  %v2759_v2 = vrot.slane %v2656_v34, %v2547_v16  ;;  %v895_v55 = vmul.f32 %v2753_v59, %v863_v18  ;;  %v899_v1 = vmul.f32 %v2753_v59, %v867_v46  ;;  %v1009_v28 = vunpack.c.h.bf16 %v2744_v47  ;;  %1108 = vperm.xlu0 %2371, %v1098_v12   ;;  %v1100_v18 = vld [vmem:[%s3391_s4 + $0x10] sm:$0xff] }
  0x2d   : > { %v1013_v57 = vunpack.c.h.bf16 %v2747_v41  ;;  %v838_v32 = vadd.f32 %v822_v42, %v765_v40  ;;  %v842_v39 = vadd.f32 %v826_v49, %v769_v60  ;;  %v2781_v46 = vrot.slane %v2656_v34, %v2550_v17  ;;  %1118 = vperm.xlu1 %2372, %v1100_v18   ;;  %v1101_v34 = vld [vmem:[%s3391_s4 + $0x18] sm:$0xff] }
  0x2e   : > { %3460 = vst [vmem:[#allocation18_spill] sm:$0xff] %v2759_v2  ;;  %v968_v4 = vmul.f32 %v2759_v2, %v936_v56  ;;  %v972_v45 = vmul.f32 %v2759_v2, %v940_v61  ;;  %v511_v12 = vunpack.c.l.bf16 %v2538_v13  ;;  %v515_v42 = vunpack.c.l.bf16 %v2541_v14 }
  0x2f   : > { %v2787_v49 = vrot.slane %v2762_v5, %v2507_v6  ;;  %v911_v56 = vadd.f32 %v895_v55, %v838_v32  ;;  %v915_v40 = vadd.f32 %v899_v1, %v842_v39  ;;  %v568_v60 = vunpack.c.l.bf16 %v2559_v21  ;;  %v1102_v1 = vld [vmem:[%s3391_s4 + $0x20] sm:$0xff] }
  0x30   : > { %v572_v61 = vunpack.c.l.bf16 %v2562_v22  ;;  %v1041_v2 = vmul.f32 %v2781_v46, %v1009_v28  ;;  %v1045_v13 = vmul.f32 %v2781_v46, %v1013_v57  ;;  %1113 = vperm.xlu0 %2371, %v1099_v29   ;;  %v2800_v21 = vrot.slane %v2762_v5, %v2510_v7 }
  0x31   : > { %v543_v14 = vmul.f32 %v2787_v49, %v511_v12  ;;  %v547_v59 = vmul.f32 %v2787_v49, %v515_v42  ;;  %v984_v18 = vadd.f32 %v968_v4, %v911_v56  ;;  %v988_v55 = vadd.f32 %v972_v45, %v915_v40  ;;  %1123 = vperm.xlu1 %2372, %v1101_v34   ;;  %v1103_v12 = vld [vmem:[%s3391_s4 + $0x28] sm:$0xff] }
  0x32   : > { %v641_v22 = vunpack.c.l.bf16 %v2569_v24  ;;  %v645_v28 = vunpack.c.l.bf16 %v2574_v27  ;;  %v2809_v57 = vrot.slane %v2762_v5, %v2513_v8  ;;  %v714_v29 = vunpack.c.l.bf16 %v2582_v30 }
  0x33   : > { %v718_v45 = vunpack.c.l.bf16 %v2585_v31  ;;  %v1057_v32 = vadd.f32 %v1041_v2, %v984_v18  ;;  %v1061_v39 = vadd.f32 %v1045_v13, %v988_v55  ;;  %v600_v4 = vmul.f32 %v2800_v21, %v568_v60 }
  0x34   : > { %v604_v24 = vmul.f32 %v2800_v21, %v572_v61  ;;  %v673_v27 = vmul.f32 %v2809_v57, %v641_v22  ;;  %v677_v42 = vmul.f32 %v2809_v57, %v645_v28  ;;  %v2822_v30 = vrot.slane %v2762_v5, %v2526_v9  ;;  %1128 = vperm.xlu0 %2371, %v1102_v1   ;;  %v1104_v61 = vld [vmem:[%s3391_s4 + $0x30] sm:$0xff]  ;;  %v1397_v22 = vld [vmem:[%s3393_s6] sm:$0xff]  ;;  %v1105_v1 = vld [vmem:[%s3391_s4 + $0x38] sm:$0xff] }
  0x35   : > { %v787_v31 = vunpack.c.l.bf16 %v2592_v36  ;;  %v1081_v2 = vpack.c.bf16 %v1061_v39, %v1057_v32  ;;  %v616_v56 = vadd.f32 %v600_v4, %v543_v14  ;;  %v791_v60 = vunpack.c.l.bf16 %v2595_v37  ;;  %1133 = vperm.xlu1 %2372, %v1103_v12   ;;  %v1398_v12 = vld [vmem:[%s3393_s6 + $0x8] sm:$0xff] }
  0x36   : > { %v620_v40 = vadd.f32 %v604_v24, %v547_v59  ;;  %v746_v34 = vmul.f32 %v2822_v30, %v714_v29  ;;  %v750_v13 = vmul.f32 %v2822_v30, %v718_v45  ;;  %v2833_v18 = vrot.slane %v2762_v5, %v2529_v10  ;;  %v2852_v45 = vld [vmem:[%s2518_s26 + $0x10] sm:$0xff] }
  0x37   : > { %v860_v36 = vunpack.c.l.bf16 %v2598_v38  ;;  %1268 = vmatprep.subr.bf16.mxu1 %v1081_v2  ;;  %v689_v59 = vadd.f32 %v673_v27, %v616_v56  ;;  %v864_v37 = vunpack.c.l.bf16 %v2605_v43  ;;  %v2839_v55 = vrot.slane %v2762_v5, %v2544_v15 }
  0x38   : > { %v693_v14 = vadd.f32 %v677_v42, %v620_v40  ;;  %v819_v38 = vmul.f32 %v2833_v18, %v787_v31  ;;  %v823_v28 = vmul.f32 %v2833_v18, %v791_v60  ;;  %v933_v29 = vunpack.c.l.bf16 %v2620_v52  ;;  %1138 = vperm.xlu0 %2371, %v1104_v61  }
  0x39   : > { %v937_v43 = vunpack.c.l.bf16 %v2623_v53  ;;  %v762_v32 = vadd.f32 %v746_v34, %v689_v59  ;;  %v892_v4 = vmul.f32 %v2839_v55, %v860_v36  ;;  %v896_v24 = vmul.f32 %v2839_v55, %v864_v37  ;;  %1143 = vperm.xlu1 %2372, %v1105_v1  }
  0x3a   : > { %v766_v39 = vadd.f32 %v750_v13, %v693_v14  ;;  %v2861_v27 = vrot.slane %v2762_v5, %v2547_v16  ;;  %v1006_v52 = vunpack.c.l.bf16 %v2633_v58  ;;  %v1010_v53 = vunpack.c.l.bf16 %v2638_v63 }
  0x3b   : > { %v2867_v42 = vrot.slane %v2762_v5, %v2550_v17  ;;  %v835_v31 = vadd.f32 %v819_v38, %v762_v32  ;;  %v513_v56 = vunpack.c.l.bf16 %v2641_v0  ;;  %v517_v40 = vunpack.c.l.bf16 %v2644_v3  ;;  %v1399_v0 = vld [vmem:[%s3393_s6 + $0x10] sm:$0xff] }
  0x3c   : > { %v839_v2 = vadd.f32 %v823_v28, %v766_v39  ;;  %v965_v60 = vmul.f32 %v2861_v27, %v933_v29  ;;  %v969_v61 = vmul.f32 %v2861_v27, %v937_v43  ;;  %1407 = vperm.xlu0 %2371, %v1397_v22   ;;  %v2877_v5 = vrot.slane %v2852_v45, %v2507_v6  ;;  %v1400_v28 = vld [vmem:[%s3393_s6 + $0x18] sm:$0xff] }
  0x3d   : > { %v1038_v34 = vmul.f32 %v2867_v42, %v1006_v52  ;;  %v1042_v58 = vmul.f32 %v2867_v42, %v1010_v53  ;;  %v908_v63 = vadd.f32 %v892_v4, %v835_v31  ;;  %v570_v36 = vunpack.c.l.bf16 %v2659_v35  ;;  %1412 = vperm.xlu1 %2372, %v1398_v12   ;;  %v1401_v4 = vld [vmem:[%s3393_s6 + $0x20] sm:$0xff] }
  0x3e   : > { %v912_v13 = vadd.f32 %v896_v24, %v839_v2  ;;  %v574_v3 = vunpack.c.l.bf16 %v2669_v44  ;;  %v2886_v59 = vrot.slane %v2852_v45, %v2510_v7  ;;  %v643_v14 = vunpack.c.l.bf16 %v2674_v51 }
  0x3f   : > { %v647_v37 = vunpack.c.l.bf16 %v2677_v54  ;;  %v981_v22 = vadd.f32 %v965_v60, %v908_v63  ;;  %v545_v38 = vmul.f32 %v2877_v5, %v513_v56  ;;  %v549_v35 = vmul.f32 %v2877_v5, %v517_v40 }
  0x40   : > { %v985_v1 = vadd.f32 %v969_v61, %v912_v13  ;;  %v602_v44 = vmul.f32 %v2886_v59, %v570_v36  ;;  %v606_v7 = vmul.f32 %v2886_v59, %v574_v3  ;;  %v2899_v51 = vrot.slane %v2852_v45, %v2513_v8  ;;  %1417 = vperm.xlu0 %2371, %v1399_v0   ;;  %v2936_v36 = vld [vmem:[%s2523_s29 + $0x20] sm:$0xff]  ;;  %v2946_v3 = vld [vmem:[%s2523_s29 + $0x30] sm:$0xff] }
  0x41   : > { %v716_v54 = vunpack.c.l.bf16 %v2692_v25  ;;  %v1054_v29 = vadd.f32 %v1038_v34, %v981_v22  ;;  %v720_v32 = vunpack.c.l.bf16 %v2695_v26  ;;  %v2905_v39 = vrot.slane %v2852_v45, %v2526_v9  ;;  %1422 = vperm.xlu1 %2372, %v1400_v28   ;;  %v1402_v9 = vld [vmem:[%s3393_s6 + $0x28] sm:$0xff] }
  0x42   : > { %v1058_v43 = vadd.f32 %v1042_v58, %v985_v1  ;;  %v618_v24 = vadd.f32 %v602_v44, %v545_v38  ;;  %v622_v12 = vadd.f32 %v606_v7, %v549_v35  ;;  %v675_v8 = vmul.f32 %v2899_v51, %v643_v14  ;;  %v2949_v14 = vld [vmem:[%s2523_s29 + $0x60] sm:$0xff]  ;;  %v2957_v35 = vld [vmem:[%s2523_s29 + $0x70] sm:$0xff] }
  0x43   : > { %3461 = vst [vmem:[#allocation19_spill] sm:$0xff] %v2905_v39  ;;  %v679_v52 = vmul.f32 %v2899_v51, %v647_v37  ;;  %v748_v53 = vmul.f32 %v2905_v39, %v716_v54  ;;  %v752_v26 = vmul.f32 %v2905_v39, %v720_v32  ;;  %v789_v31 = vunpack.c.l.bf16 %v2714_v11  ;;  %v1404_v37 = vld [vmem:[%s3393_s6 + $0x38] sm:$0xff]  ;;  %v2972_v32 = vld [vmem:[%s2523_s29 + $0xa0] sm:$0xff] }
  0x44   : > { %v1078_v25 = vpack.c.bf16 %v1058_v43, %v1054_v29  ;;  %v691_v2 = vadd.f32 %v675_v8, %v618_v24  ;;  %v793_v40 = vunpack.c.l.bf16 %v2717_v48  ;;  %v2921_v60 = vrot.slane %v2852_v45, %v2529_v10  ;;  %1427 = vperm.xlu0 %2371, %v1401_v4   ;;  %v1403_v48 = vld [vmem:[%s3393_s6 + $0x30] sm:$0xff]  ;;  %v2978_v24 = vld [vmem:[%s2523_s29 + $0xe0] sm:$0xff] }
  0x45   : > { %v695_v56 = vadd.f32 %v679_v52, %v622_v12  ;;  %v862_v61 = vunpack.c.l.bf16 %v2720_v62  ;;  %v866_v11 = vunpack.c.l.bf16 %v2723_v19  ;;  %v2927_v34 = vrot.slane %v2852_v45, %v2544_v15  ;;  %1432 = vperm.xlu1 %2372, %v1402_v9   ;;  %v2975_v4 = vld [vmem:[%s2523_s29 + $0xb0] sm:$0xff] }
  0x46   : > { %3462 = vst [vmem:[#allocation20_spill] sm:$0xff] %v2921_v60  ;;  %1196 = vmatpush1.bf16.msra.mxu0 %v1078_v25  ;;  %v935_v58 = vunpack.c.l.bf16 %v2730_v50  ;;  %v764_v10 = vadd.f32 %v748_v53, %v691_v2  ;;  %v821_v13 = vmul.f32 %v2921_v60, %v789_v31  ;;  %v825_v62 = vmul.f32 %v2921_v60, %v793_v40  ;;  %v2985_v52 = vld [vmem:[%s2523_s29 + $0xf0] sm:$0xff]  ;;  %v1681_v25 = vld [vmem:[%s3395_s8 + $0x8] sm:$0xff] }
  0x47   : > { %3463 = vst [vmem:[#allocation21_spill] sm:$0xff] %v2927_v34  ;;  %v768_v63 = vadd.f32 %v752_v26, %v695_v56  ;;  %v894_v19 = vmul.f32 %v2927_v34, %v862_v61  ;;  %v898_v15 = vmul.f32 %v2927_v34, %v866_v11  ;;  %v939_v50 = vunpack.c.l.bf16 %v2739_v33  ;;  %v2997_v11 = vld [vmem:[%s2523_s29 + $0x120] sm:$0xff] }
  0x48   : > { %v2943_v0 = vrot.slane %v2852_v45, %v2547_v16  ;;  %v837_v22 = vadd.f32 %v821_v13, %v764_v10  ;;  %v1008_v38 = vunpack.c.l.bf16 %v2744_v47  ;;  %v1012_v33 = vunpack.c.l.bf16 %v2747_v41  ;;  %1437 = vperm.xlu0 %2371, %v1403_v48   ;;  %v1680_v47 = vld [vmem:[%s3395_s8] sm:$0xff] }
  0x49   : > { %v841_v1 = vadd.f32 %v825_v62, %v768_v63  ;;  %v2963_v44 = vrot.slane %v2852_v45, %v2550_v17  ;;  %v520_v7 = vunpack.c.h.bf16 %v2936_v36  ;;  %v524_v29 = vunpack.c.h.bf16 %v2946_v3  ;;  %1442 = vperm.xlu1 %2372, %v1404_v37   ;;  %v3007_v13 = vld [vmem:[%s2523_s29 + $0x160] sm:$0xff]  ;;  %v3010_v62 = vld [vmem:[%s2523_s29 + $0x170] sm:$0xff] }
  0x4a   : > { %3464 = vst [vmem:[#allocation22_spill] sm:$0xff] %v2943_v0  ;;  %v967_v16 = vmul.f32 %v2943_v0, %v935_v58  ;;  %v971_v28 = vmul.f32 %v2943_v0, %v939_v50  ;;  %v910_v54 = vadd.f32 %v894_v19, %v837_v22  ;;  %v577_v43 = vunpack.c.h.bf16 %v2949_v14  ;;  %v3000_v58 = vld [vmem:[%s2523_s29 + $0x130] sm:$0xff]  ;;  %v3467_v22 = vld [vmem:[#allocation7_spill] sm:$0xff] }
  0x4b   : > { %3465 = vst [vmem:[#allocation23_spill] sm:$0xff] %v2963_v44  ;;  %v914_v41 = vadd.f32 %v898_v15, %v841_v1  ;;  %v1040_v17 = vmul.f32 %v2963_v44, %v1008_v38  ;;  %v1044_v45 = vmul.f32 %v2963_v44, %v1012_v33  ;;  %v552_v12 = vmul.f32 %v2556_v20, %v520_v7  ;;  %v3466_v15 = vld [vmem:[#allocation6_spill] sm:$0xff]  ;;  %v3019_v33 = vld [vmem:[%s2523_s29 + $0x1b0] sm:$0xff]  ;;  %v3479_v60 = vld [vmem:[#allocation15_spill] sm:$0xff] }
  0x4c   : > { %v581_v8 = vunpack.c.h.bf16 %v2957_v35  ;;  %v983_v53 = vadd.f32 %v967_v16, %v910_v54  ;;  %v556_v31 = vmul.f32 %v2556_v20, %v524_v29  ;;  %v609_v9 = vmul.f32 %v2566_v23, %v577_v43  ;;  %1690 = vperm.xlu0 %2371, %v1680_v47   ;;  %v1682_v20 = vld [vmem:[%s3395_s8 + $0x10] sm:$0xff]  ;;  %v3016_v38 = vld [vmem:[%s2523_s29 + $0x1a0] sm:$0xff]  ;;  %v1683_v16 = vld [vmem:[%s3395_s8 + $0x18] sm:$0xff] }
  0x4d   : > { %v987_v26 = vadd.f32 %v971_v28, %v914_v41  ;;  %v650_v56 = vunpack.c.h.bf16 %v2972_v32  ;;  %v654_v40 = vunpack.c.h.bf16 %v2975_v4  ;;  %v723_v61 = vunpack.c.h.bf16 %v2978_v24  ;;  %1695 = vperm.xlu1 %2372, %v1681_v25   ;;  %v3468_v25 = vld [vmem:[#allocation8_spill] sm:$0xff] }
  0x4e   : > { %v613_v2 = vmul.f32 %v2566_v23, %v581_v8  ;;  %v1056_v48 = vadd.f32 %v1040_v17, %v983_v53  ;;  %v625_v63 = vadd.f32 %v609_v9, %v552_v12  ;;  %v727_v23 = vunpack.c.h.bf16 %v2985_v52  ;;  %v3033_v12 = vld [vmem:[%s2523_s29 + $0x1f0] sm:$0xff]  ;;  %v1938_v8 = vld [vmem:[%s3396_s9] sm:$0xff] }
  0x4f   : > { %v1060_v10 = vadd.f32 %v1044_v45, %v987_v26  ;;  %v682_v50 = vmul.f32 %v3466_v15, %v650_v56  ;;  %v686_v37 = vmul.f32 %v3466_v15, %v654_v40  ;;  %v755_v1 = vmul.f32 %v3467_v22, %v723_v61  ;;  %v3030_v45 = vld [vmem:[%s2523_s29 + $0x1e0] sm:$0xff]  ;;  %v3046_v56 = vld [vmem:[%s2523_s29 + $0x38] sm:$0xff] }
  0x50   : > { %v629_v19 = vadd.f32 %v613_v2, %v556_v31  ;;  %v759_v7 = vmul.f32 %v3467_v22, %v727_v23  ;;  %v796_v47 = vunpack.c.h.bf16 %v2997_v11  ;;  %v800_v54 = vunpack.c.h.bf16 %v3000_v58  ;;  %1700 = vperm.xlu0 %2371, %v1682_v20   ;;  %v3043_v2 = vld [vmem:[%s2523_s29 + $0x28] sm:$0xff]  ;;  %v3469_v20 = vld [vmem:[#allocation9_spill] sm:$0xff]  ;;  %v3470_v15 = vld [vmem:[#allocation10_spill] sm:$0xff] }
  0x51   : > { %v1080_v28 = vpack.c.bf16 %v1060_v10, %v1056_v48  ;;  %v698_v41 = vadd.f32 %v682_v50, %v625_v63  ;;  %v869_v43 = vunpack.c.h.bf16 %v3007_v13  ;;  %v873_v17 = vunpack.c.h.bf16 %v3010_v62  ;;  %1705 = vperm.xlu1 %2372, %v1683_v16   ;;  %v3051_v63 = vld [vmem:[%s2523_s29 + $0x68] sm:$0xff]  ;;  %v3054_v23 = vld [vmem:[%s2523_s29 + $0x78] sm:$0xff] }
  0x52   : > { %v702_v29 = vadd.f32 %v686_v37, %v629_v19  ;;  %v828_v53 = vmul.f32 %v3468_v25, %v796_v47  ;;  %v832_v26 = vmul.f32 %v3468_v25, %v800_v54  ;;  %v942_v31 = vunpack.c.h.bf16 %v3016_v38  ;;  %v1939_v19 = vld [vmem:[%s3396_s9 + $0x8] sm:$0xff] }
  0x53   : > { %1269 = vmatpush1.bf16.msra.mxu1 %v1080_v28  ;;  %v946_v9 = vunpack.c.h.bf16 %v3019_v33  ;;  %v771_v40 = vadd.f32 %v755_v1, %v698_v41  ;;  %v901_v48 = vmul.f32 %v3469_v20, %v869_v43  ;;  %v905_v10 = vmul.f32 %v3469_v20, %v873_v17  ;;  %v3066_v54 = vld [vmem:[%s2523_s29 + $0xa8] sm:$0xff]  ;;  %v3069_v41 = vld [vmem:[%s2523_s29 + $0xb8] sm:$0xff] }
  0x54   : > { %v775_v61 = vadd.f32 %v759_v7, %v702_v29  ;;  %v974_v50 = vmul.f32 %v3470_v15, %v942_v31  ;;  %v1015_v22 = vunpack.c.h.bf16 %v3030_v45  ;;  %v1019_v1 = vunpack.c.h.bf16 %v3033_v12  ;;  %1948 = vperm.xlu0 %2371, %v1938_v8   ;;  %v1684_v29 = vld [vmem:[%s3395_s8 + $0x20] sm:$0xff]  ;;  %v3082_v31 = vld [vmem:[%s2523_s29 + $0xf8] sm:$0xff] }
  0x55   : > { %v978_v37 = vmul.f32 %v3470_v15, %v946_v9  ;;  %v844_v16 = vadd.f32 %v828_v53, %v771_v40  ;;  %v522_v7 = vunpack.c.h.bf16 %v3043_v2  ;;  %v526_v47 = vunpack.c.h.bf16 %v3046_v56  ;;  %v3471_v43 = vld [vmem:[#allocation11_spill] sm:$0xff]  ;;  %1953 = vperm.xlu1 %2372, %v1939_v19  }
  0x56   : > { %v848_v28 = vadd.f32 %v832_v26, %v775_v61  ;;  %v1047_v17 = vmul.f32 %v3471_v43, %v1015_v22  ;;  %v1051_v25 = vmul.f32 %v3471_v43, %v1019_v1  ;;  %v579_v8 = vunpack.c.h.bf16 %v3051_v63  ;;  %v3079_v26 = vld [vmem:[%s2523_s29 + $0xe8] sm:$0xff]  ;;  %v1940_v22 = vld [vmem:[%s3396_s9 + $0x10] sm:$0xff] }
  0x57   : > { %v583_v53 = vunpack.c.h.bf16 %v3054_v23  ;;  %v917_v9 = vadd.f32 %v901_v48, %v844_v16  ;;  %v3472_v61 = vld [vmem:[#allocation12_spill] sm:$0xff]  ;;  %v3473_v1 = vld [vmem:[#allocation13_spill] sm:$0xff]  ;;  %v652_v44 = vunpack.c.h.bf16 %v3066_v54  ;;  %v656_v48 = vunpack.c.h.bf16 %v3069_v41 }
  0x58   : > { %v921_v40 = vadd.f32 %v905_v10, %v848_v28  ;;  %v554_v20 = vmul.f32 %v3472_v61, %v522_v7  ;;  %v558_v15 = vmul.f32 %v3472_v61, %v526_v47  ;;  %v611_v43 = vmul.f32 %v3473_v1, %v579_v8  ;;  %1710 = vperm.xlu0 %2371, %v1684_v29   ;;  %v3096_v7 = vld [vmem:[%s2523_s29 + $0x128] sm:$0xff]  ;;  %v3099_v47 = vld [vmem:[%s2523_s29 + $0x138] sm:$0xff] }
  0x59   : > { %v615_v6 = vmul.f32 %v3473_v1, %v583_v53  ;;  %v990_v10 = vadd.f32 %v974_v50, %v917_v9  ;;  %v725_v16 = vunpack.c.h.bf16 %v3079_v26  ;;  %v729_v28 = vunpack.c.h.bf16 %v3082_v31  ;;  %3474 = vst [vmem:[#allocation6_spill] sm:$0xff] %v3099_v47  ;;  %v1685_v8 = vld [vmem:[%s3395_s8 + $0x28] sm:$0xff]  ;;  %v3475_v1 = vld [vmem:[#allocation14_spill] sm:$0xff]  ;;  %1958 = vperm.xlu1 %2372, %v1940_v22  }
  0x5a   : > { %v994_v19 = vadd.f32 %v978_v37, %v921_v40  ;;  %v627_v53 = vadd.f32 %v611_v43, %v554_v20  ;;  %v684_v0 = vmul.f32 %v3475_v1, %v652_v44  ;;  %v688_v50 = vmul.f32 %v3475_v1, %v656_v48  ;;  %v3107_v37 = vld [vmem:[%s2523_s29 + $0x168] sm:$0xff]  ;;  %v3110_v29 = vld [vmem:[%s2523_s29 + $0x178] sm:$0xff] }
  0x5b   : > { %v631_v61 = vadd.f32 %v615_v6, %v558_v15  ;;  %3476 = vst [vmem:[#allocation7_spill] sm:$0xff] %v3107_v37  ;;  %3477 = vst [vmem:[#allocation8_spill] sm:$0xff] %v3110_v29  ;;  %v3113_v9 = vld [vmem:[%s2523_s29 + $0x1a8] sm:$0xff]  ;;  %v1063_v40 = vadd.f32 %v1047_v17, %v990_v10  ;;  %v757_v39 = vmul.f32 %v3479_v60, %v725_v16  ;;  %v1941_v44 = vld [vmem:[%s3396_s9 + $0x18] sm:$0xff]  ;;  %v798_v43 = vunpack.c.h.bf16 %v3096_v7 }
  0x5c   : > { %3478 = vst [vmem:[#allocation9_spill] sm:$0xff] %v3113_v9  ;;  %v1067_v34 = vadd.f32 %v1051_v25, %v994_v19  ;;  %v761_v6 = vmul.f32 %v3479_v60, %v729_v28  ;;  %v700_v20 = vadd.f32 %v684_v0, %v627_v53  ;;  %v802_v48 = vunpack.c.h.bf16 %v3099_v47  ;;  %v3123_v1 = vld [vmem:[%s2523_s29 + $0x1b8] sm:$0xff]  ;;  %1715 = vperm.xlu0 %2371, %v1685_v8   ;;  %v3129_v10 = vld [vmem:[%s2523_s29 + $0x1e8] sm:$0xff]  ;;  %v1686_v0 = vld [vmem:[%s3395_s8 + $0x30] sm:$0xff] }
  0x5d   : > { %v704_v15 = vadd.f32 %v688_v50, %v631_v61  ;;  %v871_v25 = vunpack.c.h.bf16 %v3107_v37  ;;  %v875_v22 = vunpack.c.h.bf16 %v3110_v29  ;;  %v944_v60 = vunpack.c.h.bf16 %v3113_v9  ;;  %v3132_v19 = vld [vmem:[%s2523_s29 + $0x1f8] sm:$0xff]  ;;  %v3480_v53 = vld [vmem:[#allocation16_spill] sm:$0xff]  ;;  %1963 = vperm.xlu1 %2372, %v1941_v44   ;;  %v1942_v47 = vld [vmem:[%s3396_s9 + $0x20] sm:$0xff] }
  0x5e   : > { %v1083_v17 = vpack.c.bf16 %v1067_v34, %v1063_v40  ;;  %v773_v16 = vadd.f32 %v757_v39, %v700_v20  ;;  %v830_v61 = vmul.f32 %v3480_v53, %v798_v43  ;;  %v834_v34 = vmul.f32 %v3480_v53, %v802_v48  ;;  %v3481_v8 = vld [vmem:[#allocation17_spill] sm:$0xff]  ;;  %v3482_v29 = vld [vmem:[#allocation18_spill] sm:$0xff] }
  0x5f   : > { %v777_v28 = vadd.f32 %v761_v6, %v704_v15  ;;  %v903_v50 = vmul.f32 %v3481_v8, %v871_v25  ;;  %v907_v40 = vmul.f32 %v3481_v8, %v875_v22  ;;  %v948_v9 = vunpack.c.h.bf16 %v3123_v1  ;;  %v1687_v25 = vld [vmem:[%s3395_s8 + $0x38] sm:$0xff]  ;;  %v1944_v8 = vld [vmem:[%s3396_s9 + $0x30] sm:$0xff] }
  0x60   : > { %1197 = vmatprep.subr.bf16.mxu0 %v1083_v17  ;;  %v976_v37 = vmul.f32 %v3482_v29, %v944_v60  ;;  %v846_v39 = vadd.f32 %v830_v61, %v773_v16  ;;  %v1017_v20 = vunpack.c.h.bf16 %v3129_v10  ;;  %v1021_v15 = vunpack.c.h.bf16 %v3132_v19  ;;  %1720 = vperm.xlu0 %2371, %v1686_v0  }
  0x61   : > { %v850_v6 = vadd.f32 %v834_v34, %v777_v28  ;;  %v980_v44 = vmul.f32 %v3482_v29, %v948_v9  ;;  %v519_v43 = vunpack.c.l.bf16 %v2936_v36  ;;  %v523_v48 = vunpack.c.l.bf16 %v2946_v3  ;;  %1968 = vperm.xlu1 %2372, %v1942_v47  }
  0x62   : > { %v576_v17 = vunpack.c.l.bf16 %v2949_v14  ;;  %v919_v22 = vadd.f32 %v903_v50, %v846_v39  ;;  %v1049_v16 = vmul.f32 %v2781_v46, %v1017_v20  ;;  %v1053_v28 = vmul.f32 %v2781_v46, %v1021_v15  ;;  %v1943_v14 = vld [vmem:[%s3396_s9 + $0x28] sm:$0xff] }
  0x63   : > { %v923_v60 = vadd.f32 %v907_v40, %v850_v6  ;;  %v551_v0 = vmul.f32 %v2787_v49, %v519_v43  ;;  %v555_v29 = vmul.f32 %v2787_v49, %v523_v48  ;;  %v580_v36 = vunpack.c.l.bf16 %v2957_v35 }
  0x64   : > { %v608_v3 = vmul.f32 %v2800_v21, %v576_v17  ;;  %v992_v9 = vadd.f32 %v976_v37, %v919_v22  ;;  %v649_v61 = vunpack.c.l.bf16 %v2972_v32  ;;  %v653_v34 = vunpack.c.l.bf16 %v2975_v4  ;;  %1725 = vperm.xlu0 %2371, %v1687_v25   ;;  %v2070_v17 = vld [vmem:[#allocation2] sm:$0x1] }
  0x65   : > { %v996_v53 = vadd.f32 %v980_v44, %v923_v60  ;;  %v612_v46 = vmul.f32 %v2800_v21, %v580_v36  ;;  %v722_v49 = vunpack.c.l.bf16 %v2978_v24  ;;  %v726_v35 = vunpack.c.l.bf16 %v2985_v52  ;;  %1973 = vperm.xlu1 %2372, %v1943_v14   ;;  %v1945_v52 = vld [vmem:[%s3396_s9 + $0x38] sm:$0xff] }
  0x66   : > { %v624_v47 = vadd.f32 %v608_v3, %v551_v0  ;;  %v1065_v50 = vadd.f32 %v1049_v16, %v992_v9  ;;  %v681_v37 = vmul.f32 %v2809_v57, %v649_v61  ;;  %v685_v32 = vmul.f32 %v2809_v57, %v653_v34 }
  0x67   : > { %v1069_v40 = vadd.f32 %v1053_v28, %v996_v53  ;;  %v628_v4 = vadd.f32 %v612_v46, %v555_v29  ;;  %v754_v39 = vmul.f32 %v2822_v30, %v722_v49  ;;  %v758_v21 = vmul.f32 %v2822_v30, %v726_v35 }
  0x68   : > { %v795_v24 = vunpack.c.l.bf16 %v2997_v11  ;;  %v697_v20 = vadd.f32 %v681_v37, %v624_v47  ;;  %v799_v15 = vunpack.c.l.bf16 %v3000_v58  ;;  %v868_v44 = vunpack.c.l.bf16 %v3007_v13  ;;  %1978 = vperm.xlu0 %2371, %v1944_v8   ;;  %v3483_v8 = vld [vmem:[#allocation19_spill] sm:$0xff]  ;;  %v3484_v37 = vld [vmem:[#allocation6_spill] sm:$0xff] }
  0x69   : > { %v1085_v6 = vpack.c.bf16 %v1069_v40, %v1065_v50  ;;  %v701_v57 = vadd.f32 %v685_v32, %v628_v4  ;;  %v872_v48 = vunpack.c.l.bf16 %v3010_v62  ;;  %v941_v30 = vunpack.c.l.bf16 %v3016_v38  ;;  %1983 = vperm.xlu1 %2372, %v1945_v52   ;;  %v3487_v52 = vld [vmem:[#allocation20_spill] sm:$0xff] }
  0x6a   : > { %v827_v43 = vmul.f32 %v2833_v18, %v795_v24  ;;  %v770_v11 = vadd.f32 %v754_v39, %v697_v20  ;;  %v831_v25 = vmul.f32 %v2833_v18, %v799_v15  ;;  %v900_v22 = vmul.f32 %v2839_v55, %v868_v44  ;;  %v3486_v39 = vld [vmem:[#allocation8_spill] sm:$0xff]  ;;  %v3488_v20 = vld [vmem:[#allocation9_spill] sm:$0xff]  ;;  %v1070_v44 = vld [vmem:[%s467_s17] sm:$0x77] }
  0x6b   : > { %1270 = vmatprep.subr.bf16.mxu1 %v1085_v6  ;;  %v945_v60 = vunpack.c.l.bf16 %v3019_v33  ;;  %v774_v58 = vadd.f32 %v758_v21, %v701_v57  ;;  %v904_v13 = vmul.f32 %v2839_v55, %v872_v48  ;;  %v973_v16 = vmul.f32 %v2861_v27, %v941_v30  ;;  %v1071_v57 = vld [vmem:[%s467_s17 + $0x8] sm:$0x77]  ;;  %v3489_v30 = vld [vmem:[#allocation21_spill] sm:$0xff] }
  0x6c   : > { %v1014_v28 = vunpack.c.l.bf16 %v3030_v45  ;;  %v843_v62 = vadd.f32 %v827_v43, %v770_v11  ;;  %v1018_v0 = vunpack.c.l.bf16 %v3033_v12  ;;  %v521_v18 = vunpack.c.l.bf16 %v3043_v2  ;;  %2073 = vperm.xlu0 %2371, %v2070_v17  }
  0x6d   : > { %v977_v38 = vmul.f32 %v2861_v27, %v945_v60  ;;  %v847_v29 = vadd.f32 %v831_v25, %v774_v58  ;;  %v525_v36 = vunpack.c.l.bf16 %v3046_v56  ;;  %v578_v55 = vunpack.c.l.bf16 %v3051_v63 }
  0x6e   : > { %v1046_v33 = vmul.f32 %v2867_v42, %v1014_v28  ;;  %v916_v3 = vadd.f32 %v900_v22, %v843_v62  ;;  %v1050_v14 = vmul.f32 %v2867_v42, %v1018_v0  ;;  %v553_v45 = vmul.f32 %v2877_v5, %v521_v18  ;;  %v3490_v22 = vld [vmem:[#allocation22_spill] sm:$0xff]  ;;  %v3491_v18 = vld [vmem:[#allocation23_spill] sm:$0xff] }
  0x6f   : > { %v582_v27 = vunpack.c.l.bf16 %v3054_v23  ;;  %v920_v9 = vadd.f32 %v904_v13, %v847_v29  ;;  %v557_v12 = vmul.f32 %v2877_v5, %v525_v36  ;;  %v610_v2 = vmul.f32 %v2886_v59, %v578_v55 }
  0x70   : > { %v651_v53 = vunpack.c.l.bf16 %v3066_v54  ;;  %v989_v61 = vadd.f32 %v973_v16, %v916_v3  ;;  %v655_v63 = vunpack.c.l.bf16 %v3069_v41  ;;  %v724_v34 = vunpack.c.l.bf16 %v3079_v26 }
  0x71   : > { %v614_v56 = vmul.f32 %v2886_v59, %v582_v27  ;;  %v993_v42 = vadd.f32 %v977_v38, %v920_v9  ;;  %v626_v46 = vadd.f32 %v610_v2, %v553_v45  ;;  %v728_v23 = vunpack.c.l.bf16 %v3082_v31  ;;  %v3485_v31 = vld [vmem:[#allocation7_spill] sm:$0xff]  ;;  %v3492_v45 = vld [vmem:[#allocation5_spill] sm:$0xff] }
  0x72   : > { %v683_v47 = vmul.f32 %v2899_v51, %v651_v53  ;;  %v1062_v49 = vadd.f32 %v1046_v33, %v989_v61  ;;  %v687_v35 = vmul.f32 %v2899_v51, %v655_v63  ;;  %v756_v54 = vmul.f32 %v3483_v8, %v724_v34  ;;  %v2375_v53 = vld [vmem:[%s3390_s3] sm:$0xff]  }
  0x73   : > { %v630_v5 = vadd.f32 %v614_v56, %v557_v12  ;;  %v1066_v59 = vadd.f32 %v1050_v14, %v993_v42  ;;  %v760_v26 = vmul.f32 %v3483_v8, %v728_v23  ;;  %v797_v50 = vunpack.c.l.bf16 %v3096_v7  ;;  %v2376_v42 = vld [vmem:[%s3390_s3 + $0x8] sm:$0xff]  }
  0x74   : > { %v699_v41 = vadd.f32 %v683_v47, %v626_v46  ;;  %v801_v32 = vunpack.c.l.bf16 %v3484_v37  ;;  %v870_v4 = vunpack.c.l.bf16 %v3485_v31  ;;  %v874_v21 = vunpack.c.l.bf16 %v3486_v39  ;;  %v2377_v46 = vld [vmem:[%s3390_s3 + $0x10] sm:$0xff]   ;;  %v2378_v47 = vld [vmem:[%s3390_s3 + $0x18] sm:$0xff]  }
  0x75   : > { %v703_v40 = vadd.f32 %v687_v35, %v630_v5  ;;  %v1082_v51 = vpack.c.bf16 %v1066_v59, %v1062_v49  ;;  %v829_v6 = vmul.f32 %v3487_v52, %v797_v50  ;;  %v943_v15 = vunpack.c.l.bf16 %v3488_v20 }
  0x76   : > { %v772_v24 = vadd.f32 %v756_v54, %v699_v41  ;;  %v833_v48 = vmul.f32 %v3487_v52, %v801_v32  ;;  %v902_v7 = vmul.f32 %v3489_v30, %v870_v4  ;;  %v906_v17 = vmul.f32 %v3489_v30, %v874_v21 }
  0x77   : > { %v776_v43 = vadd.f32 %v760_v26, %v703_v40  ;;  %1198 = vmatpush1.bf16.msra.mxu0 %v1082_v51  ;;  %v947_v25 = vunpack.c.l.bf16 %v3123_v1  ;;  %v975_v60 = vmul.f32 %v3490_v22, %v943_v15  ;;  %v1016_v58 = vunpack.c.l.bf16 %v3129_v10 }
  0x78   : > { %v845_v11 = vadd.f32 %v829_v6, %v772_v24  ;;  %v1020_v16 = vunpack.c.l.bf16 %v3132_v19  ;;  %v1074_v28 = vcombine.high %v1070_v44, %v1070_v44  ;;  %v1075_v62 = vcombine.high %v1071_v57, %v1071_v57 }
  0x79   : > { %v849_v13 = vadd.f32 %v833_v48, %v776_v43  ;;  %v979_v0 = vmul.f32 %v3490_v22, %v947_v25  ;;  %v1048_v29 = vmul.f32 %v3491_v18, %v1016_v58  ;;  %v1086_v33 = vpack.c.bf16 %v1070_v44, %v1070_v44 }
  0x7a   : > { %v918_v38 = vadd.f32 %v902_v7, %v845_v11  ;;  %v1052_v55 = vmul.f32 %v3491_v18, %v1020_v16  ;;  %v1087_v3 = vpack.c.bf16 %v1074_v28, %v1074_v28  ;;  %v1089_v14 = vpack.c.bf16 %v1075_v62, %v1075_v62 }
  0x7b   : > { %v922_v36 = vadd.f32 %v906_v17, %v849_v13  ;;  %v1184_v27 = vand.u32 %v3492_v45, %v1086_v33  ;;  %v1088_v2 = vpack.c.bf16 %v1071_v57, %v1071_v57  ;;  %v3493_v34 = vmov 0  }
  0x7c   : > { %v991_v1 = vadd.f32 %v975_v60, %v918_v38  ;;  %v1187_v9 = vand.u32 %v3492_v45, %v1087_v3  ;;  %v1193_v61 = vand.u32 %v3492_v45, %v1089_v14 }
  0x7d   : > { %v995_v10 = vadd.f32 %v979_v0, %v922_v36  ;;  %v1190_v63 = vand.u32 %v3492_v45, %v1088_v2 }
  0x7e   : > { %v1064_v19 = vadd.f32 %v1048_v29, %v991_v1  ;;  %1199 = vmatprep.subr.bf16.mxu0 %v1187_v9 }
  0x7f   : > { %v1068_v12 = vadd.f32 %v1052_v55, %v995_v10  ;;  %1200 = vmatpush1.bf16.msra.mxu0 %v1184_v27 }
  0x81   : > { %v1084_v56 = vpack.c.bf16 %v1068_v12, %v1064_v19 }
  0x82   : > { %2307 = vmatmul.mubr.msk.bf16.vlgmr.msra.gmra.mrb[0].mxu0 %vm1166_vm2, %v2375_v53 }
  0x83   : > { %1271 = vmatpush1.bf16.msra.mxu1 %v1084_v56  ;;  %1237 = vmatprep.mubr.bf16.mxu0 %v3493_v34 }
  0x84   : > { %1272 = vmatprep.subr.bf16.mxu1 %v1193_v61 }
  0x87   : > { %1273 = vmatpush1.bf16.msra.mxu1 %v1190_v63 }
  0x8a   : > { %2311 = vmatmul.mubr.msk.bf16.vlgmr.msra.gmra.mrb[0].mxu1 %vm1166_vm2, %v2375_v53  ;;  %2308 = vmatmul.mubr.msk.bf16.gmra.mrb[4].mxu0 %vm1166_vm2, %v2376_v42 }
  0x8b   : > { %1310 = vmatprep.mubr.bf16.mxu1 %v3493_v34  ;;  %1247 = vmatprep.mubr.bf16.mxu0 %v3493_v34 }
  0x92   : > { %2312 = vmatmul.mubr.msk.bf16.gmra.mrb[4].mxu1 %vm1166_vm2, %v2376_v42  ;;  %2309 = vmatmul.mubr.msk.bf16.gmra.mrb[8].mxu0 %vm1166_vm2, %v2377_v46 }
  0x93   : > { %1320 = vmatprep.mubr.bf16.mxu1 %v3493_v34  ;;  %1257 = vmatprep.mubr.bf16.mxu0 %v3493_v34 }
  0x9a   : > { %2313 = vmatmul.mubr.msk.bf16.gmra.mrb[8].mxu1 %vm1166_vm2, %v2377_v46  ;;  %2310 = vmatmul.mubr.msk.bf16.gmra.mrb[12].mxu0 %vm1166_vm2, %v2378_v47 }
  0x9b   : > { %1330 = vmatprep.mubr.bf16.mxu1 %v3493_v34  ;;  %1510 = vmatprep.mubr.bf16.mxu0 %v3493_v34 }
  0xa2   : > { %2314 = vmatmul.mubr.msk.bf16.gmra.mrb[12].mxu1 %vm1166_vm2, %v2378_v47 }
  0xa3   : > { %1583 = vmatprep.mubr.bf16.mxu1 %v3493_v34 }
  0xab   : > { %v1109_v23 = vpop.permute.xlu0 %1108 }
  0xac   : > { %v1119_v5 = vpop.permute.xlu1 %1118 }
  0xaf   : > { %v1114_v54 = vpop.permute.xlu0 %1113 }
  0xb0   : > { %v1124_v39 = vpop.permute.xlu1 %1123 }
  0xb3   : > { %v1129_v0 = vpop.permute.xlu0 %1128 }
  0xb4   : > { %v1134_v36 = vpop.permute.xlu1 %1133 }
 0x155   : > { %v1229_v49 = vpop.f32.mrb[0].mxu0 }
 0x156   : > { %v1230_v35 = vadd.f32 %v1229_v49, %v1109_v23  ;;  %v1231_v8 = vpop.f32.mrb[1].mxu0 }
 0x157   : > { %v1232_v59 = vadd.f32 %v1231_v8, %v1109_v23  ;;  %v1233_v41 = vpop.f32.mrb[2].mxu0 }
 0x158   : > { %v1234_v26 = vadd.f32 %v1233_v41, %v1114_v54  ;;  %v1235_v50 = vpop.f32.mrb[3].mxu0  ;;  %v1341_v37 = vmax.f32 %v1230_v35, 0.0  ;;  %v1139_v41 = vpop.permute.xlu0 %1138 }
 0x159   : > { %v1236_v40 = vadd.f32 %v1235_v50, %v1114_v54  ;;  %v1342_v31 = vmax.f32 %v1232_v59, 0.0 }
 0x15a   : > { %v1345_v32 = vmax.f32 %v1234_v26, 0.0 }
 0x15b   : > { %v1346_v4 = vmax.f32 %v1236_v40, 0.0 }
 0x15c   : > { %v1381_v51 = vpack.c.bf16 %v1345_v32, %v1341_v37  ;;  %v1144_v37 = vpop.permute.xlu1 %1143 }
 0x15d   : > { %v1302_v21 = vpop.f32.mrb[0].mxu1  ;;  %v1382_v6 = vpack.c.bf16 %v1346_v4, %v1342_v31  ;;  %v1239_v20 = vpop.f32.mrb[4].mxu0 }
 0x15e   : > { %v1303_v24 = vadd.f32 %v1302_v21, %v1109_v23  ;;  %v1304_v52 = vpop.f32.mrb[1].mxu1  ;;  %v1240_v57 = vadd.f32 %v1239_v20, %v1119_v5  ;;  %v1241_v43 = vpop.f32.mrb[5].mxu0 }
 0x15f   : > { %v1305_v15 = vadd.f32 %v1304_v52, %v1109_v23  ;;  %v1306_v44 = vpop.f32.mrb[2].mxu1  ;;  %v1242_v7 = vadd.f32 %v1241_v43, %v1119_v5  ;;  %v1243_v17 = vpop.f32.mrb[6].mxu0  ;;  %1478 = vmatprep.subr.bf16.mxu0 %v1382_v6 }
 0x160   : > { %v1307_v48 = vadd.f32 %v1306_v44, %v1114_v54  ;;  %v1308_v30 = vpop.f32.mrb[3].mxu1  ;;  %v1244_v25 = vadd.f32 %v1243_v17, %v1124_v39  ;;  %v1245_v22 = vpop.f32.mrb[7].mxu0  ;;  %1479 = vmatpush1.bf16.msra.mxu0 %v1381_v51  ;;  %v1343_v60 = vmax.f32 %v1303_v24, 0.0  ;;  %v1349_v62 = vmax.f32 %v1240_v57, 0.0 }
 0x161   : > { %v1309_v11 = vadd.f32 %v1308_v30, %v1114_v54  ;;  %v1246_v13 = vadd.f32 %v1245_v22, %v1124_v39  ;;  %v1344_v16 = vmax.f32 %v1305_v15, 0.0  ;;  %v1350_v29 = vmax.f32 %v1242_v7, 0.0 }
 0x162   : > { %v1347_v58 = vmax.f32 %v1307_v48, 0.0  ;;  %v1353_v38 = vmax.f32 %v1244_v25, 0.0 }
 0x163   : > { %v1348_v28 = vmax.f32 %v1309_v11, 0.0  ;;  %v1354_v33 = vmax.f32 %v1246_v13, 0.0 }
 0x164   : > { %v1383_v18 = vpack.c.bf16 %v1347_v58, %v1343_v60  ;;  %v1385_v1 = vpack.c.bf16 %v1353_v38, %v1349_v62 }
 0x165   : > { %v1384_v55 = vpack.c.bf16 %v1348_v28, %v1344_v16  ;;  %v1312_v3 = vpop.f32.mrb[4].mxu1  ;;  %v1386_v27 = vpack.c.bf16 %v1354_v33, %v1350_v29  ;;  %v1249_v10 = vpop.f32.mrb[8].mxu0 }
 0x166   : > { %v1313_v14 = vadd.f32 %v1312_v3, %v1119_v5  ;;  %v1314_v45 = vpop.f32.mrb[5].mxu1  ;;  %v1250_v12 = vadd.f32 %v1249_v10, %v1129_v0  ;;  %v1251_v2 = vpop.f32.mrb[9].mxu0 }
 0x167   : > { %v1315_v9 = vadd.f32 %v1314_v45, %v1119_v5  ;;  %v1316_v19 = vpop.f32.mrb[6].mxu1  ;;  %1551 = vmatprep.subr.bf16.mxu1 %v1384_v55  ;;  %v1252_v56 = vadd.f32 %v1251_v2, %v1129_v0  ;;  %v1253_v63 = vpop.f32.mrb[10].mxu0  ;;  %1480 = vmatprep.subr.bf16.mxu0 %v1386_v27  ;;  %v2379_v27 = vld [vmem:[%s3392_s5] sm:$0xff]  }
 0x168   : > { %v1317_v53 = vadd.f32 %v1316_v19, %v1124_v39  ;;  %v1318_v61 = vpop.f32.mrb[7].mxu1  ;;  %1552 = vmatpush1.bf16.msra.mxu1 %v1383_v18  ;;  %v1254_v46 = vadd.f32 %v1253_v63, %v1134_v36  ;;  %v1255_v47 = vpop.f32.mrb[11].mxu0  ;;  %1481 = vmatpush1.bf16.msra.mxu0 %v1385_v1  ;;  %v1351_v23 = vmax.f32 %v1313_v14, 0.0  ;;  %v1357_v5 = vmax.f32 %v1250_v12, 0.0  ;;  %v2381_v63 = vld [vmem:[%s3392_s5 + $0x10] sm:$0xff]  }
 0x169   : > { %v1319_v42 = vadd.f32 %v1318_v61, %v1124_v39  ;;  %v1256_v35 = vadd.f32 %v1255_v47, %v1134_v36  ;;  %v1352_v8 = vmax.f32 %v1315_v9, 0.0  ;;  %v1358_v50 = vmax.f32 %v1252_v56, 0.0  ;;  %v2380_v56 = vld [vmem:[%s3392_s5 + $0x8] sm:$0xff]  }
 0x16a   : > { %v1355_v49 = vmax.f32 %v1317_v53, 0.0  ;;  %v1361_v59 = vmax.f32 %v1254_v46, 0.0  ;;  %v1408_v46 = vpop.permute.xlu0 %1407 }
 0x16b   : > { %v1356_v54 = vmax.f32 %v1319_v42, 0.0  ;;  %v1362_v40 = vmax.f32 %v1256_v35, 0.0  ;;  %v2382_v42 = vld [vmem:[%s3392_s5 + $0x18] sm:$0xff]  }
 0x16c   : > { %v1387_v26 = vpack.c.bf16 %v1355_v49, %v1351_v23  ;;  %v1389_v4 = vpack.c.bf16 %v1361_v59, %v1357_v5  ;;  %v1413_v23 = vpop.permute.xlu1 %1412 }
 0x16d   : > { %v1388_v32 = vpack.c.bf16 %v1356_v54, %v1352_v8  ;;  %v1322_v31 = vpop.f32.mrb[8].mxu1  ;;  %v1390_v51 = vpack.c.bf16 %v1362_v40, %v1358_v50  ;;  %v1259_v24 = vpop.f32.mrb[12].mxu0 }
 0x16e   : > { %v1323_v21 = vadd.f32 %v1322_v31, %v1129_v0  ;;  %v1324_v39 = vpop.f32.mrb[9].mxu1  ;;  %v1260_v20 = vadd.f32 %v1259_v24, %v1139_v41  ;;  %v1261_v15 = vpop.f32.mrb[13].mxu0 }
 0x16f   : > { %v1325_v52 = vadd.f32 %v1324_v39, %v1129_v0  ;;  %v1326_v6 = vpop.f32.mrb[10].mxu1  ;;  %1553 = vmatprep.subr.bf16.mxu1 %v1388_v32  ;;  %v1262_v43 = vadd.f32 %v1261_v15, %v1139_v41  ;;  %v1263_v48 = vpop.f32.mrb[14].mxu0  ;;  %1482 = vmatprep.subr.bf16.mxu0 %v1390_v51 }
 0x170   : > { %v1327_v44 = vadd.f32 %v1326_v6, %v1134_v36  ;;  %v1328_v57 = vpop.f32.mrb[11].mxu1  ;;  %1554 = vmatpush1.bf16.msra.mxu1 %v1387_v26  ;;  %v1264_v7 = vadd.f32 %v1263_v48, %v1144_v37  ;;  %v1265_v17 = vpop.f32.mrb[15].mxu0  ;;  %1483 = vmatpush1.bf16.msra.mxu0 %v1389_v4  ;;  %v1359_v11 = vmax.f32 %v1323_v21, 0.0  ;;  %v1365_v13 = vmax.f32 %v1260_v20, 0.0 }
 0x171   : > { %v1329_v30 = vadd.f32 %v1328_v57, %v1134_v36  ;;  %v1266_v22 = vadd.f32 %v1265_v17, %v1144_v37  ;;  %v1360_v60 = vmax.f32 %v1325_v52, 0.0  ;;  %v1366_v62 = vmax.f32 %v1262_v43, 0.0  ;;  %v1418_v40 = vpop.permute.xlu0 %1417  ;;  %v1423_v31 = vpop.permute.xlu1 %1422 }
 0x172   : > { %v1363_v25 = vmax.f32 %v1327_v44, 0.0  ;;  %v1369_v16 = vmax.f32 %v1264_v7, 0.0 }
 0x173   : > { %v1364_v58 = vmax.f32 %v1329_v30, 0.0  ;;  %v1370_v38 = vmax.f32 %v1266_v22, 0.0 }
 0x174   : > { %v1391_v28 = vpack.c.bf16 %v1363_v25, %v1359_v11  ;;  %v1393_v29 = vpack.c.bf16 %v1369_v16, %v1365_v13 }
 0x175   : > { %v1392_v0 = vpack.c.bf16 %v1364_v58, %v1360_v60  ;;  %v1332_v18 = vpop.f32.mrb[12].mxu1  ;;  %v1394_v3 = vpack.c.bf16 %v1370_v38, %v1366_v62  ;;  %v1428_v62 = vpop.permute.xlu0 %1427 }
 0x176   : > { %v1333_v33 = vadd.f32 %v1332_v18, %v1139_v41  ;;  %v1334_v55 = vpop.f32.mrb[13].mxu1 }
 0x177   : > { %v1335_v36 = vadd.f32 %v1334_v55, %v1139_v41  ;;  %v1336_v1 = vpop.f32.mrb[14].mxu1  ;;  %1555 = vmatprep.subr.bf16.mxu1 %v1392_v0  ;;  %1484 = vmatprep.subr.bf16.mxu0 %v1394_v3 }
 0x178   : > { %v1337_v14 = vadd.f32 %v1336_v1, %v1144_v37  ;;  %v1338_v45 = vpop.f32.mrb[15].mxu1  ;;  %1556 = vmatpush1.bf16.msra.mxu1 %v1391_v28  ;;  %1485 = vmatpush1.bf16.msra.mxu0 %v1393_v29  ;;  %v1367_v9 = vmax.f32 %v1333_v33, 0.0  ;;  %v1433_v29 = vpop.permute.xlu1 %1432 }
 0x179   : > { %v1339_v10 = vadd.f32 %v1338_v45, %v1144_v37  ;;  %v1368_v12 = vmax.f32 %v1335_v36, 0.0 }
 0x17a   : > { %v1371_v19 = vmax.f32 %v1337_v14, 0.0 }
 0x17b   : > { %v1372_v2 = vmax.f32 %v1339_v10, 0.0  ;;  %2319 = vmatmul.mubr.msk.bf16.vlgmr.msra.gmra.mrb[16].mxu0 %vm1465_vm3, %v2379_v27 }
 0x17c   : > { %v1395_v53 = vpack.c.bf16 %v1371_v19, %v1367_v9  ;;  %1520 = vmatprep.mubr.bf16.mxu0 %v3493_v34 }
 0x17d   : > { %v1396_v61 = vpack.c.bf16 %v1372_v2, %v1368_v12 }
 0x17f   : > { %1557 = vmatprep.subr.bf16.mxu1 %v1396_v61 }
 0x180   : > { %1558 = vmatpush1.bf16.msra.mxu1 %v1395_v53 }
 0x183   : > { %2323 = vmatmul.mubr.msk.bf16.vlgmr.msra.gmra.mrb[16].mxu1 %vm1465_vm3, %v2379_v27  ;;  %2320 = vmatmul.mubr.msk.bf16.gmra.mrb[20].mxu0 %vm1465_vm3, %v2380_v56 }
 0x184   : > { %1593 = vmatprep.mubr.bf16.mxu1 %v3493_v34  ;;  %1530 = vmatprep.mubr.bf16.mxu0 %v3493_v34 }
 0x18b   : > { %2324 = vmatmul.mubr.msk.bf16.gmra.mrb[20].mxu1 %vm1465_vm3, %v2380_v56  ;;  %2321 = vmatmul.mubr.msk.bf16.gmra.mrb[24].mxu0 %vm1465_vm3, %v2381_v63 }
 0x18c   : > { %1603 = vmatprep.mubr.bf16.mxu1 %v3493_v34  ;;  %1540 = vmatprep.mubr.bf16.mxu0 %v3493_v34 }
 0x193   : > { %2325 = vmatmul.mubr.msk.bf16.gmra.mrb[24].mxu1 %vm1465_vm3, %v2381_v63  ;;  %2322 = vmatmul.mubr.msk.bf16.gmra.mrb[28].mxu0 %vm1465_vm3, %v2382_v42 }
 0x194   : > { %1613 = vmatprep.mubr.bf16.mxu1 %v3493_v34  ;;  %1792 = vmatprep.mubr.bf16.mxu0 %v3493_v34 }
 0x19b   : > { %2326 = vmatmul.mubr.msk.bf16.gmra.mrb[28].mxu1 %vm1465_vm3, %v2382_v42 }
 0x19c   : > { %1865 = vmatprep.mubr.bf16.mxu1 %v3493_v34 }
 0x24e   : > { %v1512_v47 = vpop.f32.mrb[16].mxu0 }
 0x24f   : > { %v1513_v49 = vadd.f32 %v1512_v47, %v1408_v46  ;;  %v1514_v35 = vpop.f32.mrb[17].mxu0 }
 0x250   : > { %v1515_v8 = vadd.f32 %v1514_v35, %v1408_v46  ;;  %v1516_v54 = vpop.f32.mrb[18].mxu0 }
 0x251   : > { %v1517_v5 = vadd.f32 %v1516_v54, %v1413_v23  ;;  %v1518_v59 = vpop.f32.mrb[19].mxu0  ;;  %v1624_v26 = vmax.f32 %v1513_v49, 0.0 }
 0x252   : > { %v1519_v41 = vadd.f32 %v1518_v59, %v1413_v23  ;;  %v1625_v37 = vmax.f32 %v1515_v8, 0.0 }
 0x253   : > { %v1628_v50 = vmax.f32 %v1517_v5, 0.0  ;;  %v1438_v5 = vpop.permute.xlu0 %1437 }
 0x254   : > { %v1629_v32 = vmax.f32 %v1519_v41, 0.0 }
 0x255   : > { %v1664_v21 = vpack.c.bf16 %v1628_v50, %v1624_v26  ;;  %v1443_v50 = vpop.permute.xlu1 %1442 }
 0x256   : > { %v1585_v4 = vpop.f32.mrb[16].mxu1  ;;  %v1665_v24 = vpack.c.bf16 %v1629_v32, %v1625_v37  ;;  %v1522_v52 = vpop.f32.mrb[20].mxu0 }
 0x257   : > { %v1586_v39 = vadd.f32 %v1585_v4, %v1408_v46  ;;  %v1587_v51 = vpop.f32.mrb[17].mxu1  ;;  %v1523_v15 = vadd.f32 %v1522_v52, %v1418_v40  ;;  %v1524_v44 = vpop.f32.mrb[21].mxu0 }
 0x258   : > { %v1588_v6 = vadd.f32 %v1587_v51, %v1408_v46  ;;  %v1589_v20 = vpop.f32.mrb[18].mxu1  ;;  %v1525_v48 = vadd.f32 %v1524_v44, %v1418_v40  ;;  %v1526_v30 = vpop.f32.mrb[22].mxu0  ;;  %1760 = vmatprep.subr.bf16.mxu0 %v1665_v24 }
 0x259   : > { %v1590_v57 = vadd.f32 %v1589_v20, %v1413_v23  ;;  %v1591_v43 = vpop.f32.mrb[19].mxu1  ;;  %v1527_v17 = vadd.f32 %v1526_v30, %v1423_v31  ;;  %v1528_v11 = vpop.f32.mrb[23].mxu0  ;;  %1761 = vmatpush1.bf16.msra.mxu0 %v1664_v21  ;;  %v1626_v25 = vmax.f32 %v1586_v39, 0.0  ;;  %v1632_v16 = vmax.f32 %v1523_v15, 0.0 }
 0x25a   : > { %v1592_v7 = vadd.f32 %v1591_v43, %v1413_v23  ;;  %v1529_v60 = vadd.f32 %v1528_v11, %v1423_v31  ;;  %v1627_v58 = vmax.f32 %v1588_v6, 0.0  ;;  %v1633_v0 = vmax.f32 %v1525_v48, 0.0 }
 0x25b   : > { %v1630_v22 = vmax.f32 %v1590_v57, 0.0  ;;  %v1636_v28 = vmax.f32 %v1527_v17, 0.0 }
 0x25c   : > { %v1631_v13 = vmax.f32 %v1592_v7, 0.0  ;;  %v1637_v18 = vmax.f32 %v1529_v60, 0.0 }
 0x25d   : > { %v1666_v38 = vpack.c.bf16 %v1630_v22, %v1626_v25  ;;  %v1668_v3 = vpack.c.bf16 %v1636_v28, %v1632_v16 }
 0x25e   : > { %v1667_v33 = vpack.c.bf16 %v1631_v13, %v1627_v58  ;;  %v1595_v55 = vpop.f32.mrb[20].mxu1  ;;  %v1669_v14 = vpack.c.bf16 %v1637_v18, %v1633_v0  ;;  %v1532_v45 = vpop.f32.mrb[24].mxu0 }
 0x25f   : > { %v1596_v36 = vadd.f32 %v1595_v55, %v1418_v40  ;;  %v1597_v1 = vpop.f32.mrb[21].mxu1  ;;  %v1533_v9 = vadd.f32 %v1532_v45, %v1428_v62  ;;  %v1534_v19 = vpop.f32.mrb[25].mxu0 }
 0x260   : > { %v1598_v27 = vadd.f32 %v1597_v1, %v1418_v40  ;;  %v1599_v10 = vpop.f32.mrb[22].mxu1  ;;  %1833 = vmatprep.subr.bf16.mxu1 %v1667_v33  ;;  %v1535_v53 = vadd.f32 %v1534_v19, %v1428_v62  ;;  %v1536_v61 = vpop.f32.mrb[26].mxu0  ;;  %1762 = vmatprep.subr.bf16.mxu0 %v1669_v14  ;;  %v2383_v14 = vld [vmem:[%s3394_s7] sm:$0xff]  }
 0x261   : > { %v1600_v12 = vadd.f32 %v1599_v10, %v1423_v31  ;;  %v1601_v2 = vpop.f32.mrb[23].mxu1  ;;  %1834 = vmatpush1.bf16.msra.mxu1 %v1666_v38  ;;  %v1537_v63 = vadd.f32 %v1536_v61, %v1433_v29  ;;  %v1538_v42 = vpop.f32.mrb[27].mxu0  ;;  %1763 = vmatpush1.bf16.msra.mxu0 %v1668_v3  ;;  %v1634_v46 = vmax.f32 %v1596_v36, 0.0  ;;  %v1640_v8 = vmax.f32 %v1533_v9, 0.0  ;;  %v2385_v61 = vld [vmem:[%s3394_s7 + $0x10] sm:$0xff]  }
 0x262   : > { %v1602_v56 = vadd.f32 %v1601_v2, %v1423_v31  ;;  %v1539_v23 = vadd.f32 %v1538_v42, %v1433_v29  ;;  %v1635_v49 = vmax.f32 %v1598_v27, 0.0  ;;  %v1641_v41 = vmax.f32 %v1535_v53, 0.0  ;;  %v2384_v53 = vld [vmem:[%s3394_s7 + $0x8] sm:$0xff]   ;;  %v1696_v42 = vpop.permute.xlu1 %1695 }
 0x263   : > { %v1638_v47 = vmax.f32 %v1600_v12, 0.0  ;;  %v1644_v54 = vmax.f32 %v1537_v63, 0.0  ;;  %v1691_v63 = vpop.permute.xlu0 %1690 }
 0x264   : > { %v1639_v35 = vmax.f32 %v1602_v56, 0.0  ;;  %v1645_v26 = vmax.f32 %v1539_v23, 0.0  ;;  %v2386_v56 = vld [vmem:[%s3394_s7 + $0x18] sm:$0xff]  }
 0x265   : > { %v1670_v59 = vpack.c.bf16 %v1638_v47, %v1634_v46  ;;  %v1672_v32 = vpack.c.bf16 %v1644_v54, %v1640_v8 }
 0x266   : > { %v1671_v40 = vpack.c.bf16 %v1639_v35, %v1635_v49  ;;  %v1605_v37 = vpop.f32.mrb[24].mxu1  ;;  %v1673_v21 = vpack.c.bf16 %v1645_v26, %v1641_v41  ;;  %v1542_v39 = vpop.f32.mrb[28].mxu0 }
 0x267   : > { %v1606_v4 = vadd.f32 %v1605_v37, %v1428_v62  ;;  %v1607_v31 = vpop.f32.mrb[25].mxu1  ;;  %v1543_v52 = vadd.f32 %v1542_v39, %v1438_v5  ;;  %v1544_v6 = vpop.f32.mrb[29].mxu0 }
 0x268   : > { %v1608_v51 = vadd.f32 %v1607_v31, %v1428_v62  ;;  %v1609_v24 = vpop.f32.mrb[26].mxu1  ;;  %1835 = vmatprep.subr.bf16.mxu1 %v1671_v40  ;;  %v1545_v44 = vadd.f32 %v1544_v6, %v1438_v5  ;;  %v1546_v57 = vpop.f32.mrb[30].mxu0  ;;  %1764 = vmatprep.subr.bf16.mxu0 %v1673_v21 }
 0x269   : > { %v1610_v20 = vadd.f32 %v1609_v24, %v1433_v29  ;;  %v1611_v15 = vpop.f32.mrb[27].mxu1  ;;  %1836 = vmatpush1.bf16.msra.mxu1 %v1670_v59  ;;  %v1547_v48 = vadd.f32 %v1546_v57, %v1443_v50  ;;  %v1548_v30 = vpop.f32.mrb[31].mxu0  ;;  %1765 = vmatpush1.bf16.msra.mxu0 %v1672_v32  ;;  %v1642_v7 = vmax.f32 %v1606_v4, 0.0  ;;  %v1648_v60 = vmax.f32 %v1543_v52, 0.0 }
 0x26a   : > { %v1612_v43 = vadd.f32 %v1611_v15, %v1433_v29  ;;  %v1549_v11 = vadd.f32 %v1548_v30, %v1443_v50  ;;  %v1643_v25 = vmax.f32 %v1608_v51, 0.0  ;;  %v1649_v16 = vmax.f32 %v1545_v44, 0.0  ;;  %v3317_v46 = vpop.permute.xlu0 %1700  ;;  %v3319_v47 = vpop.permute.xlu1 %1705 }
 0x26b   : > { %v1646_v17 = vmax.f32 %v1610_v20, 0.0  ;;  %v1652_v58 = vmax.f32 %v1547_v48, 0.0 }
 0x26c   : > { %v1647_v22 = vmax.f32 %v1612_v43, 0.0  ;;  %v1653_v28 = vmax.f32 %v1549_v11, 0.0 }
 0x26d   : > { %v1674_v13 = vpack.c.bf16 %v1646_v17, %v1642_v7  ;;  %v1676_v0 = vpack.c.bf16 %v1652_v58, %v1648_v60 }
 0x26e   : > { %v1675_v62 = vpack.c.bf16 %v1647_v22, %v1643_v25  ;;  %v1615_v38 = vpop.f32.mrb[28].mxu1  ;;  %v1677_v55 = vpack.c.bf16 %v1653_v28, %v1649_v16  ;;  %v1949_v23 = vpop.permute.xlu0 %1948 }
 0x26f   : > { %v1616_v18 = vadd.f32 %v1615_v38, %v1438_v5  ;;  %v1617_v33 = vpop.f32.mrb[29].mxu1  ;;  %v1954_v49 = vpop.permute.xlu1 %1953 }
 0x270   : > { %v1618_v29 = vadd.f32 %v1617_v33, %v1438_v5  ;;  %v1619_v3 = vpop.f32.mrb[30].mxu1  ;;  %1837 = vmatprep.subr.bf16.mxu1 %v1675_v62  ;;  %1766 = vmatprep.subr.bf16.mxu0 %v1677_v55 }
 0x271   : > { %v1620_v36 = vadd.f32 %v1619_v3, %v1443_v50  ;;  %v1621_v1 = vpop.f32.mrb[31].mxu1  ;;  %1838 = vmatpush1.bf16.msra.mxu1 %v1674_v13  ;;  %1767 = vmatpush1.bf16.msra.mxu0 %v1676_v0  ;;  %v1650_v27 = vmax.f32 %v1616_v18, 0.0 }
 0x272   : > { %v1622_v45 = vadd.f32 %v1621_v1, %v1443_v50  ;;  %v1651_v9 = vmax.f32 %v1618_v29, 0.0  ;;  %v3321_v35 = vpop.permute.xlu0 %1710 }
 0x273   : > { %v1654_v10 = vmax.f32 %v1620_v36, 0.0  ;;  %v3323_v54 = vpop.permute.xlu1 %1958 }
 0x274   : > { %v1655_v19 = vmax.f32 %v1622_v45, 0.0  ;;  %2331 = vmatmul.mubr.msk.bf16.vlgmr.msra.gmra.mrb[32].mxu0 %vm1465_vm3, %v2383_v14 }
 0x275   : > { %v1678_v12 = vpack.c.bf16 %v1654_v10, %v1650_v27  ;;  %1802 = vmatprep.mubr.bf16.mxu0 %v3493_v34 }
 0x276   : > { %v1679_v2 = vpack.c.bf16 %v1655_v19, %v1651_v9  ;;  %v3325_v31 = vpop.permute.xlu0 %1715 }
 0x277   : > { %v3327_v39 = vpop.permute.xlu1 %1963 }
 0x278   : > { %1839 = vmatprep.subr.bf16.mxu1 %v1679_v2 }
 0x279   : > { %1840 = vmatpush1.bf16.msra.mxu1 %v1678_v12 }
 0x27a   : > { %v3334_v1 = vpop.permute.xlu0 %1720 }
 0x27b   : > { %v3337_v9 = vpop.permute.xlu1 %1968 }
 0x27c   : > { %2335 = vmatmul.mubr.msk.bf16.vlgmr.msra.gmra.mrb[32].mxu1 %vm1465_vm3, %v2383_v14  ;;  %2332 = vmatmul.mubr.msk.bf16.gmra.mrb[36].mxu0 %vm1465_vm3, %v2384_v53 }
 0x27d   : > { %1875 = vmatprep.mubr.bf16.mxu1 %v3493_v34  ;;  %1812 = vmatprep.mubr.bf16.mxu0 %v3493_v34 }
 0x284   : > { %2336 = vmatmul.mubr.msk.bf16.gmra.mrb[36].mxu1 %vm1465_vm3, %v2384_v53  ;;  %2333 = vmatmul.mubr.msk.bf16.gmra.mrb[40].mxu0 %vm1465_vm3, %v2385_v61 }
 0x285   : > { %1885 = vmatprep.mubr.bf16.mxu1 %v3493_v34  ;;  %1822 = vmatprep.mubr.bf16.mxu0 %v3493_v34 }
 0x28c   : > { %2337 = vmatmul.mubr.msk.bf16.gmra.mrb[40].mxu1 %vm1465_vm3, %v2385_v61  ;;  %2334 = vmatmul.mubr.msk.bf16.gmra.mrb[44].mxu0 %vm1465_vm3, %v2386_v56 }
 0x28d   : > { %1895 = vmatprep.mubr.bf16.mxu1 %v3493_v34 }
 0x294   : > { %2338 = vmatmul.mubr.msk.bf16.gmra.mrb[44].mxu1 %vm1465_vm3, %v2386_v56 }
 0x347   : > { %v1794_v8 = vpop.f32.mrb[32].mxu0 }
 0x348   : > { %v1795_v5 = vadd.f32 %v1794_v8, %v1691_v63  ;;  %v1796_v59 = vpop.f32.mrb[33].mxu0 }
 0x349   : > { %v1797_v34 = vadd.f32 %v1796_v59, %v1691_v63  ;;  %v1798_v41 = vpop.f32.mrb[34].mxu0 }
 0x34a   : > { %v1906_v26 = vmax.f32 %v1795_v5, 0.0  ;;  %v1799_v50 = vadd.f32 %v1798_v41, %v1696_v42  ;;  %v1800_v40 = vpop.f32.mrb[35].mxu0 }
 0x34b   : > { %v1907_v37 = vmax.f32 %v1797_v34, 0.0  ;;  %v1801_v32 = vadd.f32 %v1800_v40, %v1696_v42 }
 0x34c   : > { %v1910_v4 = vmax.f32 %v1799_v50, 0.0  ;;  %v1986_v51 = vmul.f32 %v1949_v23, %v1906_v26 }
 0x34d   : > { %v1911_v21 = vmax.f32 %v1801_v32, 0.0  ;;  %v1987_v20 = vmul.f32 %v1949_v23, %v1907_v37 }
 0x34e   : > { %v1990_v52 = vmul.f32 %v1954_v49, %v1910_v4 }
 0x34f   : > { %v1867_v24 = vpop.f32.mrb[32].mxu1  ;;  %v1991_v44 = vmul.f32 %v1954_v49, %v1911_v21  ;;  %v1804_v57 = vpop.f32.mrb[36].mxu0 }
 0x350   : > { %v1868_v6 = vadd.f32 %v1867_v24, %v1691_v63  ;;  %v1869_v15 = vpop.f32.mrb[33].mxu1  ;;  %v2018_v48 = vadd.f32 %v1990_v52, %v1986_v51  ;;  %v1805_v7 = vadd.f32 %v1804_v57, %v3317_v46  ;;  %v1806_v17 = vpop.f32.mrb[37].mxu0 }
 0x351   : > { %v1870_v43 = vadd.f32 %v1869_v15, %v1691_v63  ;;  %v1871_v30 = vpop.f32.mrb[34].mxu1  ;;  %v2031_v22 = vadd.f32 %v1991_v44, %v1987_v20  ;;  %v1807_v58 = vadd.f32 %v1806_v17, %v3317_v46  ;;  %v1808_v13 = vpop.f32.mrb[38].mxu0 }
 0x352   : > { %v1908_v11 = vmax.f32 %v1868_v6, 0.0  ;;  %v1872_v25 = vadd.f32 %v1871_v30, %v1696_v42  ;;  %v1873_v60 = vpop.f32.mrb[35].mxu1  ;;  %v1914_v62 = vmax.f32 %v1805_v7, 0.0  ;;  %v1809_v38 = vadd.f32 %v1808_v13, %v3319_v47  ;;  %v1810_v0 = vpop.f32.mrb[39].mxu0 }
 0x353   : > { %v1909_v16 = vmax.f32 %v1870_v43, 0.0  ;;  %v1874_v28 = vadd.f32 %v1873_v60, %v1696_v42  ;;  %v1915_v33 = vmax.f32 %v1807_v58, 0.0  ;;  %v1811_v55 = vadd.f32 %v1810_v0, %v3319_v47 }
 0x354   : > { %v1912_v18 = vmax.f32 %v1872_v25, 0.0  ;;  %v1994_v3 = vmul.f32 %v3323_v54, %v1914_v62  ;;  %v1918_v36 = vmax.f32 %v1809_v38, 0.0  ;;  %v1988_v14 = vmul.f32 %v1949_v23, %v1908_v11  ;;  %v3352_v11 = vpop.permute.xlu0 %1725  ;;  %v1974_v25 = vpop.permute.xlu1 %1973 }
 0x355   : > { %v1913_v29 = vmax.f32 %v1874_v28, 0.0  ;;  %v1995_v27 = vmul.f32 %v3323_v54, %v1915_v33  ;;  %v1919_v10 = vmax.f32 %v1811_v55, 0.0  ;;  %v1989_v19 = vmul.f32 %v1949_v23, %v1909_v16 }
 0x356   : > { %v1992_v45 = vmul.f32 %v1954_v49, %v1912_v18  ;;  %v2019_v2 = vadd.f32 %v2018_v48, %v1994_v3  ;;  %v1998_v61 = vmul.f32 %v3327_v39, %v1918_v36 }
 0x357   : > { %v1993_v12 = vmul.f32 %v1954_v49, %v1913_v29  ;;  %v1877_v53 = vpop.f32.mrb[36].mxu1  ;;  %v2032_v42 = vadd.f32 %v2031_v22, %v1995_v27  ;;  %v1999_v5 = vmul.f32 %v3327_v39, %v1919_v10  ;;  %v1814_v59 = vpop.f32.mrb[40].mxu0 }
 0x358   : > { %v2044_v56 = vadd.f32 %v1992_v45, %v1988_v14  ;;  %v1878_v63 = vadd.f32 %v1877_v53, %v3317_v46  ;;  %v1879_v8 = vpop.f32.mrb[37].mxu1  ;;  %v2020_v26 = vadd.f32 %v2019_v2, %v1998_v61  ;;  %v1815_v23 = vadd.f32 %v1814_v59, %v3321_v35  ;;  %v1816_v49 = vpop.f32.mrb[41].mxu0 }
 0x359   : > { %v2057_v34 = vadd.f32 %v1993_v12, %v1989_v19  ;;  %v1880_v41 = vadd.f32 %v1879_v8, %v3317_v46  ;;  %v1881_v50 = vpop.f32.mrb[38].mxu1  ;;  %v2033_v32 = vadd.f32 %v2032_v42, %v1999_v5  ;;  %v1817_v21 = vadd.f32 %v1816_v49, %v3321_v35  ;;  %v1818_v51 = vpop.f32.mrb[42].mxu0 }
 0x35a   : > { %v1916_v40 = vmax.f32 %v1878_v63, 0.0  ;;  %v1882_v37 = vadd.f32 %v1881_v50, %v3319_v47  ;;  %v1883_v4 = vpop.f32.mrb[39].mxu1  ;;  %v1922_v6 = vmax.f32 %v1815_v23, 0.0  ;;  %v1819_v20 = vadd.f32 %v1818_v51, %v3325_v31  ;;  %v1820_v46 = vpop.f32.mrb[43].mxu0 }
 0x35b   : > { %v1917_v24 = vmax.f32 %v1880_v41, 0.0  ;;  %v1884_v52 = vadd.f32 %v1883_v4, %v3319_v47  ;;  %v1923_v57 = vmax.f32 %v1817_v21, 0.0  ;;  %v1821_v43 = vadd.f32 %v1820_v46, %v3325_v31  ;;  %v1979_v5 = vpop.permute.xlu0 %1978 }
 0x35c   : > { %v1996_v15 = vmul.f32 %v3323_v54, %v1916_v40  ;;  %v1920_v44 = vmax.f32 %v1882_v37, 0.0  ;;  %v2002_v7 = vmul.f32 %v3337_v9, %v1922_v6  ;;  %v1926_v17 = vmax.f32 %v1819_v20, 0.0  ;;  %v1984_v37 = vpop.permute.xlu1 %1983 }
 0x35d   : > { %v1997_v48 = vmul.f32 %v3323_v54, %v1917_v24  ;;  %v1921_v30 = vmax.f32 %v1884_v52, 0.0  ;;  %v2003_v60 = vmul.f32 %v3337_v9, %v1923_v57  ;;  %v1927_v58 = vmax.f32 %v1821_v43, 0.0 }
 0x35e   : > { %v2045_v47 = vadd.f32 %v2044_v56, %v1996_v15  ;;  %v2000_v22 = vmul.f32 %v3327_v39, %v1920_v44  ;;  %v2021_v28 = vadd.f32 %v2020_v26, %v2002_v7  ;;  %v2006_v38 = vmul.f32 %v1974_v25, %v1926_v17 }
 0x35f   : > { %v2058_v13 = vadd.f32 %v2057_v34, %v1997_v48  ;;  %v2001_v16 = vmul.f32 %v3327_v39, %v1921_v30  ;;  %v1887_v62 = vpop.f32.mrb[40].mxu1  ;;  %v2034_v18 = vadd.f32 %v2033_v32, %v2003_v60  ;;  %v2007_v55 = vmul.f32 %v1974_v25, %v1927_v58  ;;  %v1824_v29 = vpop.f32.mrb[44].mxu0 }
 0x360   : > { %v2046_v54 = vadd.f32 %v2045_v47, %v2000_v22  ;;  %v1888_v0 = vadd.f32 %v1887_v62, %v3321_v35  ;;  %v1889_v33 = vpop.f32.mrb[41].mxu1  ;;  %v2022_v14 = vadd.f32 %v2021_v28, %v2006_v38  ;;  %v1825_v27 = vadd.f32 %v1824_v29, %v3334_v1  ;;  %v1826_v10 = vpop.f32.mrb[45].mxu0 }
 0x361   : > { %v2059_v3 = vadd.f32 %v2058_v13, %v2001_v16  ;;  %v1890_v36 = vadd.f32 %v1889_v33, %v3321_v35  ;;  %v1891_v45 = vpop.f32.mrb[42].mxu1  ;;  %v2035_v12 = vadd.f32 %v2034_v18, %v2007_v55  ;;  %v1827_v53 = vadd.f32 %v1826_v10, %v3334_v1  ;;  %v1828_v61 = vpop.f32.mrb[46].mxu0 }
 0x362   : > { %v1924_v19 = vmax.f32 %v1888_v0, 0.0  ;;  %v1892_v39 = vadd.f32 %v1891_v45, %v3325_v31  ;;  %v1893_v2 = vpop.f32.mrb[43].mxu1  ;;  %v1930_v42 = vmax.f32 %v1825_v27, 0.0  ;;  %v1829_v8 = vadd.f32 %v1828_v61, %v3352_v11  ;;  %v1830_v35 = vpop.f32.mrb[47].mxu0  ;;  %v3494_v61 = vld [vmem:[#allocation4_spill] sm:$0xff] }
 0x363   : > { %v1925_v56 = vmax.f32 %v1890_v36, 0.0  ;;  %v1894_v63 = vadd.f32 %v1893_v2, %v3325_v31  ;;  %v1931_v41 = vmax.f32 %v1827_v53, 0.0  ;;  %v1831_v26 = vadd.f32 %v1830_v35, %v3352_v11  ;;  %v2074_v10 = vpop.permute.xlu0 %2073 }
 0x364   : > { %v2004_v59 = vmul.f32 %v3337_v9, %v1924_v19  ;;  %v1928_v34 = vmax.f32 %v1892_v39, 0.0  ;;  %v2010_v49 = vmul.f32 %v1979_v5, %v1930_v42  ;;  %v1934_v40 = vmax.f32 %v1829_v8, 0.0 }
 0x365   : > { %v2005_v50 = vmul.f32 %v3337_v9, %v1925_v56  ;;  %v1929_v23 = vmax.f32 %v1894_v63, 0.0  ;;  %v2011_v31 = vmul.f32 %v1979_v5, %v1931_v41  ;;  %v1935_v21 = vmax.f32 %v1831_v26, 0.0 }
 0x366   : > { %v2047_v32 = vadd.f32 %v2046_v54, %v2004_v59  ;;  %v2008_v4 = vmul.f32 %v1974_v25, %v1928_v34  ;;  %v2023_v52 = vadd.f32 %v2022_v14, %v2010_v49  ;;  %v2014_v20 = vmul.f32 %v1984_v37, %v1934_v40 }
 0x367   : > { %v2060_v51 = vadd.f32 %v2059_v3, %v2005_v50  ;;  %v2009_v24 = vmul.f32 %v1974_v25, %v1929_v23  ;;  %v1897_v6 = vpop.f32.mrb[44].mxu1  ;;  %v2036_v44 = vadd.f32 %v2035_v12, %v2011_v31  ;;  %v2015_v43 = vmul.f32 %v1984_v37, %v1935_v21  ;;  %v3495_v31 = vld [vmem:[#allocation3_spill] sm:$0xff] }
 0x368   : > { %v2048_v46 = vadd.f32 %v2047_v32, %v2008_v4  ;;  %v1898_v15 = vadd.f32 %v1897_v6, %v3334_v1  ;;  %v1899_v57 = vpop.f32.mrb[45].mxu1  ;;  %v2024_v30 = vadd.f32 %v2023_v52, %v2014_v20  ;;  %v2079_v56 = vrot.slane %v2074_v10, %v3494_v61 }
 0x369   : > { %v2061_v9 = vadd.f32 %v2060_v51, %v2009_v24  ;;  %v1900_v48 = vadd.f32 %v1899_v57, %v3334_v1  ;;  %v1901_v7 = vpop.f32.mrb[46].mxu1  ;;  %v2037_v22 = vadd.f32 %v2036_v44, %v2015_v43  ;;  %v2413_v42 = vmov 1966171168  }
 0x36a   : > { %v1932_v17 = vmax.f32 %v1898_v15, 0.0  ;;  %v1902_v47 = vadd.f32 %v1901_v7, %v3352_v11  ;;  %v1903_v60 = vpop.f32.mrb[47].mxu1  ;;  %v2025_v58 = vrot.slane %v2024_v30, 4  ;;  %v2091_v8 = vunpack.c.l.s4 %v2413_v42 }
 0x36b   : > { %v1933_v25 = vmax.f32 %v1900_v48, 0.0  ;;  %v1904_v13 = vadd.f32 %v1903_v60, %v3352_v11  ;;  %v2038_v62 = vrot.slane %v2037_v22, 4  ;;  %v3496_v44 = vlaneseq }
 0x36c   : > { %v2012_v16 = vmul.f32 %v1979_v5, %v1932_v17  ;;  %v1936_v28 = vmax.f32 %v1902_v47, 0.0  ;;  %v2026_v54 = vadd.f32 %v2025_v58, %v2024_v30  ;;  %v2092_v23 = vunpack.c.0.s8 %v2091_v8 }
 0x36d   : > { %v2013_v38 = vmul.f32 %v1979_v5, %v1933_v25  ;;  %v1937_v0 = vmax.f32 %v1904_v13, 0.0  ;;  %v2039_v1 = vadd.f32 %v2038_v62, %v2037_v22  ;;  %vm2115_vm4 = vcmp.lt.s32.totalorder %v3496_v44, 512 }
 0x36e   : > { %v2049_v18 = vadd.f32 %v2048_v46, %v2012_v16  ;;  %v2016_v33 = vmul.f32 %v1984_v37, %v1936_v28  ;;  %v2027_v29 = vrot.slane %v2026_v54, 2  ;;  %v2095_v21 = vsub.s32 %v2092_v23, %v3495_v31 }
 0x36f   : > { %v2062_v55 = vadd.f32 %v2061_v9, %v2013_v38  ;;  %v2017_v3 = vmul.f32 %v1984_v37, %v1937_v0  ;;  %v2040_v14 = vrot.slane %v2039_v1, 2 }
 0x370   : > { %v2050_v36 = vadd.f32 %v2049_v18, %v2016_v33  ;;  %v2028_v45 = vadd.f32 %v2027_v29, %v2026_v54 }
 0x371   : > { %v2063_v27 = vadd.f32 %v2062_v55, %v2017_v3  ;;  %v2041_v39 = vadd.f32 %v2040_v14, %v2039_v1 }
 0x372   : > { %v2051_v19 = vrot.slane %v2050_v36, 4  ;;  %v2029_v11 = vrot.slane %v2028_v45, 1 }
 0x373   : > { %v2064_v12 = vrot.slane %v2063_v27, 4  ;;  %v2042_v53 = vrot.slane %v2041_v39, 1 }
 0x374   : > { %v2052_v2 = vadd.f32 %v2051_v19, %v2050_v36  ;;  %v2030_v63 = vadd.f32 %v2029_v11, %v2028_v45 }
 0x375   : > { %v2065_v35 = vadd.f32 %v2064_v12, %v2063_v27  ;;  %v2043_v59 = vadd.f32 %v2042_v53, %v2041_v39 }
 0x376   : > { %v2053_v5 = vrot.slane %v2052_v2, 2  ;;  %v2080_v34 = vadd.f32 %v2079_v56, %v2030_v63 }
 0x377   : > { %v2066_v41 = vrot.slane %v2065_v35, 2  ;;  %v2081_v50 = vadd.f32 %v2079_v56, %v2043_v59 }
 0x378   : > { %v2054_v26 = vadd.f32 %v2053_v5, %v2052_v2 }
 0x379   : > { %v2067_v49 = vadd.f32 %v2066_v41, %v2065_v35  ;;  %v2088_v37 = vcombine.low %v2080_v34, %v2081_v50 }
 0x37a   : > { %v2055_v40 = vrot.slane %v2054_v26, 1 }
 0x37b   : > { %v2068_v32 = vrot.slane %v2067_v49, 1  ;;  %v2096_v6 = vrot.slane %v2088_v37, %v2095_v21 }
 0x37c   : > { %v2056_v4 = vadd.f32 %v2055_v40, %v2054_v26 }
 0x37d   : > { %v2069_v51 = vadd.f32 %v2068_v32, %v2067_v49 }
 0x37e   : > { %v2082_v24 = vadd.f32 %v2079_v56, %v2056_v4 }
 0x37f   : > { %v2083_v52 = vadd.f32 %v2079_v56, %v2069_v51 }
 0x381   : > { %v2089_v20 = vcombine.low %v2082_v24, %v2083_v52 }
 0x383   : > { %v2103_v46 = vrot.slane %v2089_v20, %v2095_v21 }
 0x385   : > { %v2104_v15 = vcombine.low %v2096_v6, %v2103_v46 }
 0x387   : > { %v2111_v57 = vrot.slane %v2104_v15, %v2095_v21 }
 0x389   : > { %2117 = vst.msk [vmem:[%s496_s14] sm:$0xf] %vm2115_vm4, %v2111_v57 }
 0x38a PF: > { %s23_s21 = sadd.s32 1, %s2409_s21   ;;  %s3497_s19 = smov %s2405_s20 }
 0x38b   : > { %p20_p5 = scmp.ge.s32.totalorder %s23_s21, 4   ;;  %s3498_s20 = smov %s3500_s10 }
 0x38d   :  { %22 = sbr.rel (!%p20_p5) target bundleno = 3 (0x3), region = 107 }

// kernel: arssr_forward.2
= control target key start
LH: loop header
LB: loop body
LE: loop exit
PB: predicated region body
PF: predicated region fallthrough
CT: control target
= control target key end

     0   :  { %s9110_s24 = smov 0   ;;  %s12875_s0 = inlined_call_operand.vmem [shape: f32[2,1,768], index: 0, kind: input, shape index: {}]   ;;  %s12876_s1 = inlined_call_operand.vmem [shape: s32[2,512], index: 1, kind: input, shape index: {}]   ;;  %s12877_s2 = inlined_call_operand.vmem [shape: bf16[32,27], index: 2, kind: input, shape index: {}]   ;;  %s12878_s3 = inlined_call_operand.vmem [shape: f32[32,1], index: 3, kind: input, shape index: {}]   ;;  %s12879_s4 = inlined_call_operand.vmem [shape: bf16[27,32,32], index: 4, kind: input, shape index: {}]   ;;  %s12880_s5 = inlined_call_operand.vmem [shape: f32[32,1], index: 5, kind: input, shape index: {}]   ;;  %s12881_s6 = inlined_call_operand.vmem [shape: f32[2,32,512], index: 6, kind: output, shape index: {0}]   ;;  %s12882_s7 = inlined_call_operand.vmem [shape: bf16[2,32,512], index: 7, kind: output, shape index: {1}]  }
   0x1 LB: > { %s8048_s25 = sadd.s32 4294967295, %s9042_s24   ;;  %p8052_p0 = scmp.ge.s32.totalorder %s9042_s24, 1  ;;  %s9042_s24 = sphi %s9110_s24, %s18_s24  }
   0x2   : > { %p239_p1 = scmp.lt.s32.totalorder %s9042_s24, 3 }
   0x4   : > { %p240_p2 = pnand %p8052_p0, %p239_p1 }
   0x6   : > { %243 = sbr.rel (%p240_p2) target bundleno = 1675 (0x68b), region = 44 }
   0xd   : > { %v291_v0 = vld [vmem:[%s12876_s1] ss:$2 sm:$0xf]  ;;  %v8057_v1 = vld [vmem:[%s12876_s1 + $0x1] ss:$2 sm:$0xf]  ;;  %v533_v23 = vlaneseq }
   0xe   : > { %v294_v2 = vadd.s32 4294967295, %v291_v0  ;;  %vm317_vm0 = vcmp.ge.s32.totalorder %v8057_v1, 0  ;;  %vm318_vm1 = vcmp.lt.s32.totalorder %v8057_v1, 8  ;;  %v311_v3 = vadd.s32 4294967295, %v8057_v1  ;;  %p275_p3 = scmp.lt.s32.totalorder %s8048_s25, 1  ;;  %s9045_s30 = smov 56  }
   0xf   : > { %vm319_vm2 = vmand %vm317_vm0, %vm318_vm1  ;;  %v305_v4 = vadd.s32 1, %v291_v0  ;;  %v322_v5 = vadd.s32 1, %v8057_v1  ;;  %v9044_v6 = vmov 0.0   ;;  %vm300_vm5 = vcmp.ge.s32.totalorder %v291_v0, 0  ;;  %s9046_s8 = smov 119   ;;  %s9047_s10 = smov 73  }
  0x10   : > { %vm295_vm3 = vcmp.ge.s32.totalorder %v294_v2, 0  ;;  %vm296_vm4 = vcmp.lt.s32.totalorder %v294_v2, 8  ;;  %v8062_v7 = vsel %vm319_vm2, 1.0, %v9044_v6  ;;  %vm312_vm7 = vcmp.ge.s32.totalorder %v311_v3, 0  ;;  %s13349_s25 = smov (!%p275_p3, %s8048_s25), 1  ;;  %s9048_s11 = smov 57  }
  0x11   : > { %vm297_vm6 = vmand %vm295_vm3, %vm296_vm4  ;;  %vm313_vm8 = vcmp.lt.s32.totalorder %v311_v3, 8  ;;  %vm306_vm9 = vcmp.ge.s32.totalorder %v305_v4, 0  ;;  %vm307_vm10 = vcmp.lt.s32.totalorder %v305_v4, 8  ;;  %vm323_vm12 = vcmp.ge.s32.totalorder %v322_v5, 0  ;;  %s8772_s9 = smul.u32 6, %s13349_s25  ;;  %s9049_s15 = smov 120  }
  0x12   : > { %v8058_v8 = vsel %vm297_vm6, 1.0, %v9044_v6  ;;  %vm314_vm11 = vmand %vm312_vm7, %vm313_vm8  ;;  %vm324_vm13 = vcmp.lt.s32.totalorder %v322_v5, 8  ;;  %vm301_vm14 = vcmp.lt.s32.totalorder %v291_v0, 8  ;;  %s9050_s16 = smov 63   ;;  %s9051_s17 = smov 121   ;;  %v534_v24 = vshrl.u32 %v533_v23, 7 }
  0x13   : > { %v9126_v9 = vmul.f32 %v8062_v7, %v8058_v8  ;;  %v8061_v10 = vsel %vm314_vm11, 1.0, %v9044_v6  ;;  %vm308_vm15 = vmand %vm306_vm9, %vm307_vm10  ;;  %s9153_s14 = scalar_lea.vmem %s12875_s0, %s8772_s9  ;;  %s9052_s18 = smov 64   ;;  %vm342_vm2 = vcmask 457728   ;;  %vm369_vm3 = vcmask 523264  }
  0x14   : > { %v9132_v11 = vmul.f32 %v8061_v10, %v8058_v8  ;;  %v8060_v12 = vsel %vm308_vm15, 1.0, %v9044_v6  ;;  %vm325_vm0 = vmand %vm323_vm12, %vm324_vm13  ;;  %v9160_v18 = vld [vmem:[%s9153_s14] sm:$0x3f]  ;;  %s9053_s19 = smov 127   ;;  %s9054_s20 = smov 65   ;;  %v9199_v26 = vsub.s32 2, %v534_v24 }
  0x15   : > { %339 = vrot.lane.b32.xlu0 %v9126_v9, %s9045_s30  ;;  %v8063_v13 = vsel %vm325_vm0, 1.0, %v9044_v6  ;;  %vm302_vm1 = vmand %vm300_vm5, %vm301_vm14  ;;  %v9180_v21 = vmul.f32 %v8061_v10, %v8060_v12  ;;  %s9055_s21 = smov 72   ;;  %s9056_s22 = smov 71   ;;  %v9188_v22 = vmul.f32 %v8062_v7, %v8060_v12  ;;  %v438_v25 = vrot.slane %v9160_v18, 1 }
  0x16   : > { %409 = vrot.lane.b32.xlu1 %v9132_v11, %s9046_s8  ;;  %v9139_v14 = vmul.f32 %v8063_v13, %v8060_v12  ;;  %v9141_v15 = vmul.f32 %v8063_v13, %v8058_v8  ;;  %v8059_v16 = vsel %vm302_vm1, 1.0, %v9044_v6  ;;  %v9201_v27 = vsub.s32 3, %v534_v24  ;;  %s9057_s23 = smov 55   ;;  %s9058_s26 = smov 110  }
  0x17   : > { %v9148_v17 = vmul.f32 %v8061_v10, %v8059_v16  ;;  %v9166_v19 = vmul.f32 %v8062_v7, %v8059_v16  ;;  %v9174_v20 = vmul.f32 %v8063_v13, %v8059_v16  ;;  %13032 = vst [vmem:[#allocation3_spill] sm:$0xff] %v9180_v21  ;;  %13033 = vst [vmem:[#allocation4_spill] sm:$0xff] %v9188_v22  ;;  %v9208_v29 = vsub.s32 0, %v534_v24  ;;  %s9059_s27 = smov 126   ;;  %s9060_s28 = smov 62  }
  0x18   : > { %13031 = vst [vmem:[#allocation2_spill] sm:$0xff] %v9139_v14  ;;  %v9210_v30 = vsub.s32 1, %v534_v24  ;;  %vm12888_vm4 = vcmask 596992   ;;  %vm412_vm5 = vcmask 973824   ;;  %v9237_v56 = vsub.s32 4, %v534_v24  ;;  %s9061_s29 = smov 118  }
  0x19   : > { %402 = vrot.lane.b32.xlu0 %v9139_v14, %s9047_s10  ;;  %v440_v28 = vmul.f32 %v438_v25, %v9166_v19  ;;  %vm12887_vm6 = vcmask 465920   ;;  %vm419_vm7 = vcmask 982016   ;;  %vm360_vm8 = vcmask 515072   ;;  %s9062_s9 = smov 112   ;;  %s9063_s12 = smov 111  }
  0x1a   : > { %348 = vrot.lane.b32.xlu1 %v9141_v15, %s9048_s11  ;;  %vm12883_vm9 = vcmask 990208   ;;  %vm12896_vm10 = vcmask 1039360   ;;  %vm12886_vm11 = vcmask 531456   ;;  %vm12884_vm12 = vcmask 588800  }
  0x1b   : > { %v1056_v31 = vrot.slane %v440_v28, %v9199_v26  ;;  %v1060_v32 = vrot.slane %v440_v28, %v9201_v27  ;;  %v1048_v33 = vrot.slane %v440_v28, %v9208_v29  ;;  %v1052_v34 = vrot.slane %v440_v28, %v9210_v30 }
  0x1c   : > { %vm12885_vm13 = vcmask 580608   ;;  %vm333_vm14 = vcmask 449536   ;;  %vm1143_vm15 = vcmask 1040384   ;;  %vm1149_vm0 = vcmask 1041408  }
  0x1d   : > { %416 = vrot.lane.b32.xlu0 %v9126_v9, %s9049_s15  ;;  %v8812_v35 = vpack.i.bf16 %v1060_v32, %v1056_v31  ;;  %v8807_v36 = vpack.i.bf16 %v1052_v34, %v1048_v33  ;;  %vm1155_vm1 = vcmask 1042432  }
  0x1e   : > { %357 = vrot.lane.b32.xlu1 %v9148_v17, %s9050_s16 }
  0x21   : > { %423 = vrot.lane.b32.xlu0 %v9141_v15, %s9051_s17 }
  0x22   : > { %455 = vrot.lane.b32.xlu1 %v9160_v18, %s9049_s15 }
  0x25   : > { %462 = vrot.lane.b32.xlu0 %v9160_v18, %s9046_s8 }
  0x26   : > { %366 = vrot.lane.b32.xlu1 %v9166_v19, %s9052_s18 }
  0x29   : > { %430 = vrot.lane.b32.xlu0 %v9148_v17, %s9053_s19 }
  0x2a   : > { %469 = vrot.lane.b32.xlu1 %v9160_v18, %s9047_s10 }
  0x2d   : > { %375 = vrot.lane.b32.xlu0 %v9174_v20, %s9054_s20 }
  0x2e   : > { %476 = vrot.lane.b32.xlu1 %v9160_v18, %s9055_s21 }
  0x31   : > { %384 = vrot.lane.b32.xlu0 %v9180_v21, %s9056_s22 }
  0x32   : > { %441 = vrot.lane.b32.xlu1 %v9160_v18, %s9053_s19 }
  0x35   : > { %483 = vrot.lane.b32.xlu0 %v9160_v18, %s9056_s22 }
  0x36   : > { %393 = vrot.lane.b32.xlu1 %v9188_v22, %s9055_s21 }
  0x39   : > { %448 = vrot.lane.b32.xlu0 %v9160_v18, %s9051_s17 }
  0x3a   : > { %490 = vrot.lane.b32.xlu1 %v9160_v18, %s9054_s20 }
  0x3d   : > { %497 = vrot.lane.b32.xlu0 %v9160_v18, %s9052_s18 }
  0x3e   : > { %511 = vrot.lane.b32.xlu1 %v9160_v18, %s9048_s11 }
  0x41   : > { %518 = vrot.lane.b32.xlu0 %v9160_v18, %s9045_s30 }
  0x42   : > { %504 = vrot.lane.b32.xlu1 %v9160_v18, %s9050_s16 }
  0x45   : > { %525 = vrot.lane.b32.xlu0 %v9160_v18, %s9057_s23 }
  0x46   : > { %330 = vrot.lane.b32.xlu1 %v9132_v11, %s9057_s23 }
  0x49   : > { %8813 = vrot.lane.b32.xlu0 %v8812_v35, %s9057_s23 }
  0x4a   : > { %8808 = vrot.lane.b32.xlu1 %v8807_v36, %s9057_s23 }
  0x87   : > { %v340_v40 = vpop.permute.xlu0 %339 }
  0x88   : > { %v410_v37 = vpop.permute.xlu1 %409  ;;  %v341_v42 = vrot.slane %v340_v40, 7 }
  0x89   : > { %v411_v52 = vrot.slane %v410_v37, 7 }
  0x8a   : > { %v343_v45 = vsel %vm342_vm2, %v341_v42, %v340_v40 }
  0x8b   : > { %v403_v43 = vpop.permute.xlu0 %402  ;;  %v345_v49 = vmul.f32 %v343_v45, %v9160_v18  ;;  %v413_v63 = vsel %vm412_vm5, %v411_v52, %v410_v37 }
  0x8c   : > { %v349_v38 = vpop.permute.xlu1 %348  ;;  %v404_v47 = vrot.slane %v403_v43, 7  ;;  %v9251_v2 = vmul.f32 %v413_v63, %v9160_v18 }
  0x8d   : > { %v566_v58 = vrot.slane %v345_v49, %v9210_v30  ;;  %v570_v62 = vrot.slane %v345_v49, %v9199_v26  ;;  %v350_v6 = vrot.slane %v349_v38, 7  ;;  %v574_v8 = vrot.slane %v345_v49, %v9201_v27 }
  0x8e   : > { %v406_v53 = vsel %vm12888_vm4, %v404_v47, %v403_v43  ;;  %v578_v10 = vrot.slane %v345_v49, %v9237_v56  ;;  %v891_v16 = vrot.slane %v9251_v2, %v9210_v30  ;;  %v895_v23 = vrot.slane %v9251_v2, %v9199_v26 }
  0x8f   : > { %v417_v51 = vpop.permute.xlu0 %416  ;;  %v9242_v59 = vmul.f32 %v406_v53, %v9160_v18  ;;  %v8827_v3 = vpack.i.bf16 %v570_v62, %v566_v58  ;;  %v352_v24 = vsel %vm12887_vm6, %v350_v6, %v349_v38  ;;  %v899_v37 = vrot.slane %v9251_v2, %v9201_v27 }
  0x90   : > { %v9226_v39 = vpop.permute.xlu1 %357  ;;  %v8832_v25 = vpack.i.bf16 %v578_v10, %v574_v8  ;;  %v9276_v32 = vmul.f32 %v352_v24, %v9160_v18  ;;  %v8847_v33 = vpack.i.bf16 %v895_v23, %v891_v16  ;;  %v418_v34 = vrot.slane %v417_v51, 7 }
  0x91   : > { %v850_v4 = vrot.slane %v9242_v59, %v9210_v30  ;;  %v854_v5 = vrot.slane %v9242_v59, %v9199_v26  ;;  %v858_v28 = vrot.slane %v9242_v59, %v9201_v27  ;;  %v862_v31 = vrot.slane %v9242_v59, %v9237_v56 }
  0x92   : > { %v903_v38 = vrot.slane %v9251_v2, %v9237_v56  ;;  %v562_v42 = vrot.slane %v345_v49, %v9208_v29  ;;  %v614_v43 = vrot.slane %v9276_v32, %v9201_v27  ;;  %v420_v45 = vsel %vm419_vm7, %v418_v34, %v417_v51 }
  0x93   : > { %v9247_v0 = vpop.permute.xlu0 %423  ;;  %v8837_v13 = vpack.i.bf16 %v854_v5, %v850_v4  ;;  %v8842_v36 = vpack.i.bf16 %v862_v31, %v858_v28  ;;  %v610_v49 = vrot.slane %v9276_v32, %v9199_v26  ;;  %v887_v58 = vrot.slane %v9251_v2, %v9208_v29 }
  0x94   : > { %v9228_v41 = vpop.permute.xlu1 %455  ;;  %v8852_v47 = vpack.i.bf16 %v903_v38, %v899_v37  ;;  %v602_v37 = vrot.slane %v9276_v32, %v9208_v29 }
  0x95   : > { %v457_v62 = vrot.slane %v9228_v41, 1  ;;  %v458_v63 = vrot.slane %v9228_v41, 2 }
  0x97   : > { %v9262_v12 = vpop.permute.xlu0 %462 }
  0x98   : > { %v367_v44 = vpop.permute.xlu1 %366  ;;  %v464_v8 = vrot.slane %v9262_v12, 1  ;;  %v465_v10 = vrot.slane %v9262_v12, 2 }
  0x99   : > { %v368_v46 = vrot.slane %v367_v44, 7 }
  0x9a   : > { %v466_v12 = vsel %vm412_vm5, %v464_v8, %v465_v10 }
  0x9b   : > { %v370_v48 = vsel %vm369_vm3, %v368_v46, %v367_v44  ;;  %v9279_v35 = vpop.permute.xlu0 %430  ;;  %v618_v44 = vrot.slane %v9276_v32, %v9237_v56  ;;  %v359_v46 = vrot.slane %v9226_v39, 7 }
  0x9c   : > { %v372_v50 = vmul.f32 %v370_v48, %v9160_v18  ;;  %v470_v40 = vpop.permute.xlu1 %469  ;;  %v606_v48 = vrot.slane %v9276_v32, %v9210_v30 }
  0x9d   : > { %v8862_v51 = vpack.i.bf16 %v618_v44, %v614_v43  ;;  %v361_v53 = vsel %vm360_vm8, %v359_v46, %v9226_v39  ;;  %v471_v16 = vrot.slane %v470_v40, 1  ;;  %v472_v23 = vrot.slane %v470_v40, 2 }
  0x9e   : > { %v687_v54 = vrot.slane %v372_v50, %v9210_v30  ;;  %v691_v55 = vrot.slane %v372_v50, %v9199_v26  ;;  %v695_v57 = vrot.slane %v372_v50, %v9201_v27  ;;  %v699_v61 = vrot.slane %v372_v50, %v9237_v56 }
  0x9f   : > { %v683_v7 = vrot.slane %v372_v50, %v9208_v29  ;;  %v9300_v50 = vmul.f32 %v420_v45, %v9160_v18  ;;  %v9302_v52 = vpop.permute.xlu0 %375  ;;  %v473_v34 = vsel %vm12888_vm4, %v471_v16, %v472_v23  ;;  %v9368_v43 = vmul.f32 %v466_v12, %v9139_v14 }
  0xa0   : > { %v8817_v60 = vpack.i.bf16 %v691_v55, %v687_v54  ;;  %v8822_v1 = vpack.i.bf16 %v699_v61, %v695_v57  ;;  %v9307_v54 = vpop.permute.xlu1 %476  ;;  %v8857_v55 = vpack.i.bf16 %v610_v49, %v606_v48  ;;  %v9311_v57 = vmul.f32 %v361_v53, %v9160_v18 }
  0xa1   : > { %v943_v39 = vrot.slane %v9300_v50, %v9237_v56  ;;  %v425_v61 = vrot.slane %v9247_v0, 7  ;;  %v931_v2 = vrot.slane %v9300_v50, %v9210_v30  ;;  %v935_v4 = vrot.slane %v9300_v50, %v9199_v26 }
  0xa2   : > { %8818 = vrot.lane.b32.xlu0 %v8817_v60, %s9046_s8  ;;  %8823 = vrot.lane.b32.xlu1 %v8822_v1, %s9046_s8  ;;  %v939_v60 = vrot.slane %v9300_v50, %v9201_v27  ;;  %v647_v41 = vrot.slane %v9311_v57, %v9210_v30  ;;  %v655_v38 = vrot.slane %v9311_v57, %v9201_v27  ;;  %v478_v49 = vrot.slane %v9307_v54, 1 }
  0xa3   : > { %v9323_v1 = vpop.permute.xlu0 %384  ;;  %v8867_v24 = vpack.i.bf16 %v935_v4, %v931_v2  ;;  %v659_v40 = vrot.slane %v9311_v57, %v9237_v56  ;;  %v927_v32 = vrot.slane %v9300_v50, %v9208_v29  ;;  %v9382_v48 = vmul.f32 %v473_v34, %v9132_v11 }
  0xa4   : > { %v9332_v5 = vpop.permute.xlu1 %441  ;;  %v8872_v6 = vpack.i.bf16 %v943_v39, %v939_v60  ;;  %v1249_v4 = vrot.slane %v9368_v43, %v9210_v30  ;;  %vm629_vm4 = vcmask 1031168  }
  0xa5   : > { %v8882_v53 = vpack.i.bf16 %v659_v40, %v655_v38  ;;  %v443_v8 = vrot.slane %v9332_v5, 1  ;;  %v444_v16 = vrot.slane %v9332_v5, 2  ;;  %v1274_v5 = vrot.slane %v9382_v48, %v9199_v26 }
  0xa6   : > { %8828 = vrot.lane.b32.xlu0 %v8827_v3, %s9053_s19  ;;  %700 = vrot.lane.b32.xlu1 %v683_v7, %s9046_s8  ;;  %v846_v3 = vrot.slane %v9242_v59, %v9208_v29  ;;  %v651_v7 = vrot.slane %v9311_v57, %v9199_v26  ;;  %v427_v59 = vsel %vm12883_vm9, %v425_v61, %v9247_v0 }
  0xa7   : > { %v9348_v28 = vpop.permute.xlu0 %483  ;;  %v1278_v40 = vrot.slane %v9382_v48, %v9201_v27 }
  0xa8   : > { %v8877_v31 = vpack.i.bf16 %v651_v7, %v647_v41  ;;  %v1266_v41 = vrot.slane %v9382_v48, %v9208_v29  ;;  %v485_v23 = vrot.slane %v9348_v28, 1 }
  0xaa   : > { %8838 = vrot.lane.b32.xlu0 %v8837_v13, %s9058_s26  ;;  %8833 = vrot.lane.b32.xlu1 %v8832_v25, %s9053_s19  ;;  %v459_v13 = vsel %vm419_vm7, %v457_v62, %v458_v63  ;;  %v9346_v25 = vmul.f32 %v427_v59, %v9160_v18  ;;  %v1245_v62 = vrot.slane %v9368_v43, %v9208_v29 }
  0xab   : > { %v9352_v0 = vmul.f32 %v459_v13, %v9188_v22  ;;  %v449_v50 = vpop.permute.xlu0 %448 }
  0xac   : > { %v979_v44 = vrot.slane %v9346_v25, %v9201_v27  ;;  %v983_v45 = vrot.slane %v9346_v25, %v9237_v56  ;;  %v451_v38 = vrot.slane %v449_v50, 2 }
  0xad   : > { %v1224_v46 = vrot.slane %v9352_v0, %v9208_v29  ;;  %v1232_v60 = vrot.slane %v9352_v0, %v9199_v26  ;;  %v1236_v61 = vrot.slane %v9352_v0, %v9201_v27 }
  0xae   : > { %8848 = vrot.lane.b32.xlu0 %v8847_v33, %s9052_s18  ;;  %8843 = vrot.lane.b32.xlu1 %v8842_v36, %s9058_s26  ;;  %v432_v33 = vrot.slane %v9279_v35, 7  ;;  %v9357_v36 = vpop.permute.xlu1 %393  ;;  %v8892_v2 = vpack.i.bf16 %v983_v45, %v979_v44 }
  0xaf   : > { %v498_v12 = vpop.permute.xlu0 %497 }
  0xb2   : > { %579 = vrot.lane.b32.xlu0 %v562_v42, %s9053_s19  ;;  %8853 = vrot.lane.b32.xlu1 %v8852_v47, %s9052_s18  ;;  %v377_v42 = vrot.slane %v9302_v52, 7  ;;  %v434_v47 = vsel %vm12896_vm10, %v432_v33, %v9279_v35  ;;  %v1228_v35 = vrot.slane %v9352_v0, %v9210_v30  ;;  %v967_v33 = vrot.slane %v9346_v25, %v9208_v29 }
  0xb3   : > { %v9403_v63 = vmul.f32 %v434_v47, %v9160_v18 }
  0xb4   : > { %v379_v39 = vsel %vm12886_vm11, %v377_v42, %v9302_v52  ;;  %v1253_v52 = vrot.slane %v9368_v43, %v9199_v26 }
  0xb5   : > { %v9417_v7 = vmul.f32 %v379_v39, %v9160_v18  ;;  %v1020_v34 = vrot.slane %v9403_v63, %v9201_v27  ;;  %v1016_v44 = vrot.slane %v9403_v63, %v9199_v26 }
  0xb6   : > { %8863 = vrot.lane.b32.xlu0 %v8862_v51, %s9059_s27  ;;  %8858 = vrot.lane.b32.xlu1 %v8857_v55, %s9059_s27  ;;  %v479_v51 = vrot.slane %v9307_v54, 2  ;;  %v971_v55 = vrot.slane %v9346_v25, %v9210_v30  ;;  %v386_v54 = vrot.slane %v9323_v1, 7 }
  0xb8   : > { %v480_v59 = vsel %vm12884_vm12, %v478_v49, %v479_v51  ;;  %v388_v13 = vsel %vm12885_vm13, %v386_v54, %v9323_v1  ;;  %v1270_v1 = vrot.slane %v9382_v48, %v9210_v30  ;;  %v445_v49 = vsel %vm12896_vm10, %v443_v8, %v444_v16 }
  0xb9   : > { %v9446_v45 = vmul.f32 %v480_v59, %v9126_v9  ;;  %v9449_v47 = vmul.f32 %v388_v13, %v9160_v18  ;;  %v735_v59 = vrot.slane %v9417_v7, %v9201_v27  ;;  %v500_v8 = vrot.slane %v498_v12, 2 }
  0xba   : > { %904 = vrot.lane.b32.xlu0 %v887_v58, %s9052_s18  ;;  %863 = vrot.lane.b32.xlu1 %v846_v3, %s9058_s26  ;;  %v975_v58 = vrot.slane %v9346_v25, %v9199_v26  ;;  %v9405_v3 = vpop.permute.xlu1 %490  ;;  %v643_v25 = vrot.slane %v9311_v57, %v9208_v29  ;;  %v739_v13 = vrot.slane %v9417_v7, %v9237_v56  ;;  %s9068_s26 = smov 1  }
  0xbb   : > { %v492_v54 = vrot.slane %v9405_v3, 1  ;;  %v1287_v16 = vrot.slane %v9446_v45, %v9208_v29 }
  0xbc   : > { %v8887_v10 = vpack.i.bf16 %v975_v58, %v971_v55  ;;  %v731_v55 = vrot.slane %v9417_v7, %v9199_v26  ;;  %v519_v58 = vpop.permute.xlu0 %518 }
  0xbe   : > { %8873 = vrot.lane.b32.xlu0 %v8872_v6, %s9050_s16  ;;  %8868 = vrot.lane.b32.xlu1 %v8867_v24, %s9050_s16  ;;  %v1257_v6 = vrot.slane %v9368_v43, %v9201_v27  ;;  %v486_v24 = vrot.slane %v9348_v28, 2  ;;  %v450_v28 = vrot.slane %v449_v50, 1  ;;  %v512_v42 = vpop.permute.xlu1 %511 }
  0xc0   : > { %v487_v51 = vsel %vm12885_vm13, %v485_v23, %v486_v24  ;;  %v452_v39 = vsel %vm12883_vm9, %v450_v28, %v451_v38  ;;  %v1291_v23 = vrot.slane %v9446_v45, %v9210_v30  ;;  %v1299_v24 = vrot.slane %v9446_v45, %v9201_v27 }
  0xc1   : > { %v9485_v28 = vmul.f32 %v452_v39, %v9180_v21  ;;  %v521_v39 = vrot.slane %v519_v58, 2  ;;  %vm1161_vm9 = vcmask 1043456   ;;  %vm1173_vm13 = vcmask 1045504  }
  0xc2   : > { %8878 = vrot.lane.b32.xlu0 %v8877_v31, %s9049_s15  ;;  %619 = vrot.lane.b32.xlu1 %v602_v37, %s9059_s27  ;;  %v395_v31 = vrot.slane %v9357_v36, 7  ;;  %v1024_v37 = vrot.slane %v9403_v63, %v9237_v56 }
  0xc4   : > { %v397_v57 = vsel %vm12884_vm12, %v395_v31, %v9357_v36  ;;  %v8902_v50 = vpack.i.bf16 %v1024_v37, %v1020_v34  ;;  %v499_v36 = vrot.slane %v498_v12, 1  ;;  %v447_v31 = vmul.f32 %v445_v49, %v9174_v20  ;;  %v505_v34 = vpop.permute.xlu1 %504 }
  0xc5   : > { %v9478_v12 = vmul.f32 %v487_v51, %v9141_v15  ;;  %v8912_v49 = vpack.i.bf16 %v739_v13, %v735_v59  ;;  %v772_v51 = vrot.slane %v9449_v47, %v9199_v26  ;;  %v776_v59 = vrot.slane %v9449_v47, %v9201_v27 }
  0xc6   : > { %944 = vrot.lane.b32.xlu0 %v927_v32, %s9050_s16  ;;  %8883 = vrot.lane.b32.xlu1 %v8882_v53, %s9049_s15  ;;  %v1012_v32 = vrot.slane %v9403_v63, %v9210_v30  ;;  %v727_v53 = vrot.slane %v9417_v7, %v9210_v30  ;;  %vm1167_vm12 = vcmask 1044480  }
  0xc8   : > { %v8907_v37 = vpack.i.bf16 %v731_v55, %v727_v53  ;;  %v507_v53 = vrot.slane %v505_v34, 2  ;;  %v520_v55 = vrot.slane %v519_v58, 1 }
  0xca   : > { %8893 = vrot.lane.b32.xlu0 %v8892_v2, %s9060_s28  ;;  %8888 = vrot.lane.b32.xlu1 %v8887_v10, %s9060_s28  ;;  %v493_v2 = vrot.slane %v9405_v3, 2  ;;  %v8897_v10 = vpack.i.bf16 %v1016_v44, %v1012_v32  ;;  %v1295_v3 = vrot.slane %v9446_v45, %v9199_v26  ;;  %v514_v32 = vrot.slane %v512_v42, 2 }
  0xcb   : > { %v501_v44 = vsel %vm369_vm3, %v499_v36, %v500_v8 }
  0xcc   : > { %v494_v38 = vsel %vm12886_vm11, %v492_v54, %v493_v2  ;;  %v1008_v2 = vrot.slane %v9403_v63, %v9208_v29  ;;  %v9505_v36 = vmul.f32 %v501_v44, %v9166_v19  ;;  %v1081_v63 = vrot.slane %v447_v31, %v9208_v29 }
  0xcd   : > { %v9495_v54 = vmul.f32 %v494_v38, %v9148_v17  ;;  %v522_v38 = vsel %vm342_vm2, %v520_v55, %v521_v39  ;;  %vm1179_vm11 = vcmask 1046528  }
  0xce   : > { %984 = vrot.lane.b32.xlu0 %v967_v33, %s9060_s28  ;;  %660 = vrot.lane.b32.xlu1 %v643_v25, %s9049_s15  ;;  %v9481_v33 = vmul.f32 %v397_v57, %v9160_v18  ;;  %v513_v25 = vrot.slane %v512_v42, 1  ;;  %v768_v18 = vrot.slane %v9449_v47, %v9210_v30  ;;  %v526_v57 = vpop.permute.xlu0 %525  ;;  %v723_v42 = vrot.slane %v9417_v7, %v9208_v29  ;;  %s9066_s28 = smov 9  }
  0xcf   : > { %v527_v8 = vrot.slane %v526_v57, 1  ;;  %v780_v7 = vrot.slane %v9449_v47, %v9237_v56 }
  0xd0   : > { %v515_v58 = vsel %vm12887_vm6, %v513_v25, %v514_v32  ;;  %v8917_v13 = vpack.i.bf16 %v772_v51, %v768_v18  ;;  %v1089_v25 = vrot.slane %v447_v31, %v9199_v26  ;;  %v1093_v32 = vrot.slane %v447_v31, %v9201_v27 }
  0xd1   : > { %v809_v44 = vrot.slane %v9481_v33, %v9210_v30  ;;  %v1114_v18 = vrot.slane %v9485_v28, %v9208_v29  ;;  %v1118_v51 = vrot.slane %v9485_v28, %v9210_v30  ;;  %v8922_v55 = vpack.i.bf16 %v780_v7, %v776_v59 }
  0xd2   : > { %8903 = vrot.lane.b32.xlu0 %v8902_v50, %s9045_s30  ;;  %8898 = vrot.lane.b32.xlu1 %v8897_v10, %s9045_s30  ;;  %v506_v50 = vrot.slane %v505_v34, 1  ;;  %v528_v10 = vrot.slane %v526_v57, 2  ;;  %v1085_v34 = vrot.slane %v447_v31, %v9210_v30  ;;  %v9527_v57 = vmul.f32 %v515_v58, %v9180_v21 }
  0xd3   : > { %v764_v59 = vrot.slane %v9449_v47, %v9208_v29  ;;  %v1337_v47 = vrot.slane %v9495_v54, %v9199_v26  ;;  %vm873_vm6 = vcmask 900096  }
  0xd4   : > { %v529_v31 = vsel %vm333_vm14, %v527_v8, %v528_v10  ;;  %v8927_v39 = vpack.i.bf16 %v1085_v34, %v1081_v63  ;;  %v9543_v8 = vmul.f32 %v522_v38, %v9188_v22  ;;  %v8932_v10 = vpack.i.bf16 %v1093_v32, %v1089_v25 }
  0xd5   : > { %v9549_v7 = vmul.f32 %v529_v31, %v9139_v14  ;;  %v8947_v63 = vpack.i.bf16 %v1118_v51, %v1114_v18  ;;  %v1320_v38 = vrot.slane %v9478_v12, %v9201_v27  ;;  %v1341_v32 = vrot.slane %v9495_v54, %v9201_v27 }
  0xd6   : > { %8908 = vrot.lane.b32.xlu0 %v8907_v37, %s9061_s29  ;;  %8913 = vrot.lane.b32.xlu1 %v8912_v49, %s9061_s29  ;;  %v508_v37 = vsel %vm360_vm8, %v506_v50, %v507_v53  ;;  %v813_v49 = vrot.slane %v9481_v33, %v9199_v26  ;;  %v817_v50 = vrot.slane %v9481_v33, %v9201_v27 }
  0xd7   : > { %v821_v53 = vrot.slane %v9481_v33, %v9237_v56  ;;  %v9540_v58 = vmul.f32 %v508_v37, %v9174_v20  ;;  %v1316_v37 = vrot.slane %v9478_v12, %v9199_v26  ;;  %v1453_v31 = vsel %vm1143_vm15, %v1232_v60, %v1253_v52 }
  0xd8   : > { %v1308_v52 = vrot.slane %v9478_v12, %v9208_v29  ;;  %v1413_v45 = vrot.slane %v9543_v8, %v9208_v29 }
  0xd9   : > { %v8942_v34 = vpack.i.bf16 %v821_v53, %v817_v50  ;;  %v1379_v18 = vrot.slane %v9540_v58, %v9199_v26  ;;  %v1383_v51 = vrot.slane %v9540_v58, %v9201_v27  ;;  %v1454_v50 = vsel %vm1143_vm15, %v1236_v61, %v1257_v6 }
  0xda   : > { %1025 = vrot.lane.b32.xlu0 %v1008_v2, %s9045_s30  ;;  %740 = vrot.lane.b32.xlu1 %v723_v42, %s9061_s29  ;;  %v1122_v42 = vrot.slane %v9485_v28, %v9199_v26  ;;  %v1126_v2 = vrot.slane %v9485_v28, %v9201_v27  ;;  %v805_v28 = vrot.slane %v9481_v33, %v9208_v29  ;;  %s9067_s29 = smov 8  }
  0xdb   : > { %v1457_v53 = vsel %vm1149_vm0, %v1453_v31, %v1274_v5  ;;  %v1458_v60 = vsel %vm1149_vm0, %v1454_v50, %v1278_v40  ;;  %v1329_v5 = vrot.slane %v9495_v54, %v9208_v29  ;;  %v1333_v40 = vrot.slane %v9495_v54, %v9210_v30 }
  0xdc   : > { %v8952_v25 = vpack.i.bf16 %v1126_v2, %v1122_v42  ;;  %v1461_v61 = vsel %vm1155_vm1, %v1457_v53, %v1295_v3  ;;  %v1462_v6 = vsel %vm1155_vm1, %v1458_v60, %v1299_v24  ;;  %v1451_v3 = vsel %vm1143_vm15, %v1224_v46, %v1245_v62 }
  0xdd   : > { %v1452_v24 = vsel %vm1143_vm15, %v1228_v35, %v1249_v4  ;;  %v1466_v54 = vsel %vm1161_vm9, %v1462_v6, %v1320_v38  ;;  %v1354_v42 = vrot.slane %v9505_v36, %v9210_v30  ;;  %v1455_v2 = vsel %vm1149_vm0, %v1451_v3, %v1266_v41  ;;  %v9712_v3 = vpop.permute.xlu0 %8813 }
  0xde   : > { %8918 = vrot.lane.b32.xlu0 %v8917_v13, %s9062_s9  ;;  %8923 = vrot.lane.b32.xlu1 %v8922_v55, %s9062_s9  ;;  %v8937_v13 = vpack.i.bf16 %v813_v49, %v809_v44  ;;  %v1358_v44 = vrot.slane %v9505_v36, %v9199_v26  ;;  %v1362_v49 = vrot.slane %v9505_v36, %v9201_v27 }
  0xdf   : > { %v1312_v55 = vrot.slane %v9478_v12, %v9210_v30  ;;  %v1465_v12 = vsel %vm1161_vm9, %v1461_v61, %v1316_v37  ;;  %v1456_v43 = vsel %vm1149_vm0, %v1452_v24, %v1270_v1  ;;  %v1371_v46 = vrot.slane %v9540_v58, %v9208_v29 }
  0xe0   : > { %v1469_v0 = vsel %vm1167_vm12, %v1465_v12, %v1337_v47  ;;  %v1459_v35 = vsel %vm1155_vm1, %v1455_v2, %v1287_v16  ;;  %v1460_v48 = vsel %vm1155_vm1, %v1456_v43, %v1291_v23  ;;  %v1470_v62 = vsel %vm1167_vm12, %v1466_v54, %v1341_v32 }
  0xe1   : > { %v1375_v4 = vrot.slane %v9540_v58, %v9210_v30  ;;  %v1463_v41 = vsel %vm1161_vm9, %v1459_v35, %v1308_v52  ;;  %v1464_v1 = vsel %vm1161_vm9, %v1460_v48, %v1312_v55  ;;  %v1396_v16 = vrot.slane %v9527_v57, %v9210_v30 }
  0xe2   : > { %8928 = vrot.lane.b32.xlu0 %v8927_v39, %s9057_s23  ;;  %8933 = vrot.lane.b32.xlu1 %v8932_v10, %s9057_s23  ;;  %v1350_v39 = vrot.slane %v9505_v36, %v9208_v29  ;;  %v1392_v36 = vrot.slane %v9527_v57, %v9208_v29  ;;  %v1417_v23 = vrot.slane %v9543_v8, %v9210_v30  ;;  %v12889_v12 = vmov 0  }
  0xe3   : > { %v1467_v58 = vsel %vm1167_vm12, %v1463_v41, %v1329_v5  ;;  %v1468_v10 = vsel %vm1167_vm12, %v1464_v1, %v1333_v40  ;;  %v1421_v38 = vrot.slane %v9543_v8, %v9199_v26  ;;  %v1425_v47 = vrot.slane %v9543_v8, %v9201_v27  ;;  %8978 = vset.pattern.permute.xlu1 %v12889_v12 }
  0xe4   : > { %v1472_v37 = vsel %vm1173_vm13, %v1468_v10, %v1354_v42  ;;  %v1434_v50 = vrot.slane %v9549_v7, %v9208_v29  ;;  %v1474_v53 = vsel %vm1173_vm13, %v1470_v62, %v1362_v49  ;;  %v1479_v60 = vsel %vm1143_vm15, %v1392_v36, %v1413_v45  ;;  %8977 = vset.pattern.permute.xlu0 %v12889_v12 }
  0xe5   : > { %v1476_v31 = vsel %vm1179_vm11, %v1472_v37, %v1375_v4  ;;  %v1480_v8 = vsel %vm1143_vm15, %v1396_v16, %v1417_v23  ;;  %v1478_v55 = vsel %vm1179_vm11, %v1474_v53, %v1383_v51  ;;  %v1442_v61 = vrot.slane %v9549_v7, %v9199_v26  ;;  %1724 = vmatprep.mubr.bf16.mxu1 %v12889_v12 }
  0xe6   : > { %781 = vrot.lane.b32.xlu0 %v764_v59, %s9062_s9  ;;  %8938 = vrot.lane.b32.xlu1 %v8937_v13, %s9063_s12  ;;  %v1400_v59 = vrot.slane %v9527_v57, %v9199_v26  ;;  %v1404_v13 = vrot.slane %v9527_v57, %v9201_v27  ;;  %v1438_v57 = vrot.slane %v9549_v7, %v9210_v30  ;;  %s9069_s9 = smov 7  }
  0xe7   : > { %v1446_v6 = vrot.slane %v9549_v7, %v9201_v27  ;;  %1671 = vmatprep.mubr.bf16.mxu0 %v12889_v12 }
  0xe8   : > { %v1482_v49 = vsel %vm1143_vm15, %v1404_v13, %v1425_v47  ;;  %v1484_v51 = vsel %vm1149_vm0, %v1480_v8, %v1438_v57  ;;  %v8815_v13 = vunpack.i.l.bf16 %v9712_v3  ;;  %v9035_v47 = vld [vmem:[%s9153_s14] sm:$0x3f] }
  0xe9   : > { %v1486_v7 = vsel %vm1149_vm0, %v1482_v49, %v1446_v6 }
  0xea   : > { %8943 = vrot.lane.b32.xlu0 %v8942_v34, %s9063_s12  ;;  %8948 = vrot.lane.b32.xlu1 %v8947_v63, %s9057_s23  ;;  %v1471_v34 = vsel %vm1173_vm13, %v1467_v58, %v1350_v39  ;;  %v1473_v63 = vsel %vm1173_vm13, %v1469_v0, %v1358_v44  ;;  %v1481_v44 = vsel %vm1143_vm15, %v1400_v59, %v1421_v38  ;;  %v331_v39 = vpop.permute.xlu1 %330  ;;  %v12892_v59 = vunpack.i.h.bf16 %v9712_v3 }
  0xeb   : > { %v1475_v32 = vsel %vm1179_vm11, %v1471_v34, %v1371_v46  ;;  %v1477_v52 = vsel %vm1179_vm11, %v1473_v63, %v1379_v18  ;;  %v1483_v18 = vsel %vm1149_vm0, %v1479_v60, %v1434_v50  ;;  %v1485_v40 = vsel %vm1149_vm0, %v1481_v44, %v1442_v61 }
  0xec   : > { %v8967_v5 = vpack.i.bf16 %v1478_v55, %v1477_v52  ;;  %v8962_v33 = vpack.i.bf16 %v1484_v51, %v1483_v18  ;;  %v332_v45 = vrot.slane %v331_v39, 7  ;;  %v9755_v50 = vsel %vm333_vm14, %v8815_v13, %v12892_v59 }
  0xee   : > { %8953 = vrot.lane.b32.xlu0 %v8952_v25, %s9057_s23  ;;  %822 = vrot.lane.b32.xlu1 %v805_v28, %s9063_s12  ;;  %v8957_v25 = vpack.i.bf16 %v1476_v31, %v1475_v32  ;;  %v8972_v28 = vpack.i.bf16 %v1486_v7, %v1485_v40  ;;  %v9714_v24 = vpop.permute.xlu1 %8808  ;;  %v334_v10 = vsel %vm333_vm14, %v332_v45, %v331_v39 }
  0xef   : > { %v8811_v34 = vunpack.i.h.bf16 %v9714_v24  ;;  %v12891_v37 = vunpack.i.l.bf16 %v9714_v24  ;;  %v336_v32 = vmul.f32 %v9035_v47, %v334_v10 }
  0xf1   : > { %v9758_v57 = vsel %vm333_vm14, %v8811_v34, %v8815_v13  ;;  %v9763_v63 = vsel %vm333_vm14, %v12891_v37, %v8811_v34  ;;  %v540_v44 = vrot.slane %v336_v32, %v9210_v30  ;;  %v544_v51 = vrot.slane %v336_v32, %v9199_v26 }
  0xf2   : > { %8958 = vrot.lane.b32.xlu0 %v8957_v25, %s9057_s23  ;;  %8968 = vrot.lane.b32.xlu1 %v8967_v5, %s9057_s23  ;;  %v548_v5 = vrot.slane %v336_v32, %v9201_v27 }
  0xf6   : > { %8963 = vrot.lane.b32.xlu0 %v8962_v33, %s9057_s23  ;;  %8973 = vrot.lane.b32.xlu1 %v8972_v28, %s9057_s23  ;;  %v552_v28 = vrot.slane %v336_v32, %v9237_v56 }
 0x114   : > { %v8819_v54 = vpop.permute.xlu0 %8818  ;;  %v9716_v42 = vpop.permute.xlu1 %8823 }
 0x115   : > { %v8821_v52 = vunpack.i.h.bf16 %v8819_v54  ;;  %v8820_v55 = vunpack.i.l.bf16 %v8819_v54  ;;  %v8825_v61 = vunpack.i.l.bf16 %v9716_v42  ;;  %v12893_v25 = vunpack.i.h.bf16 %v9716_v42 }
 0x117   : > { %v9788_v45 = vsel %vm412_vm5, %v8821_v52, %v8825_v61  ;;  %v9795_v56 = vsel %vm412_vm5, %v8825_v61, %v12893_v25 }
 0x118   : > { %v9718_v2 = vpop.permute.xlu0 %8828  ;;  %v701_v43 = vpop.permute.xlu1 %700 }
 0x119   : > { %v8831_v53 = vunpack.i.h.bf16 %v9718_v2  ;;  %v8830_v60 = vunpack.i.l.bf16 %v9718_v2 }
 0x11b   : > { %v590_v33 = vsel %vm12896_vm10, %v8830_v60, %v8831_v53 }
 0x11c   : > { %v9720_v0 = vpop.permute.xlu0 %8838  ;;  %v8834_v46 = vpop.permute.xlu1 %8833 }
 0x11d   : > { %v8835_v6 = vunpack.i.l.bf16 %v8834_v46  ;;  %v8836_v49 = vunpack.i.h.bf16 %v8834_v46  ;;  %v8841_v40 = vunpack.i.h.bf16 %v9720_v0  ;;  %v8840_v7 = vunpack.i.l.bf16 %v9720_v0 }
 0x11e   : > { %v9785_v46 = vsel %vm412_vm5, %v8820_v55, %v8821_v52  ;;  %v536_v0 = vrot.slane %v336_v32, %v9208_v29  ;;  %v9803_v52 = vsel %vm412_vm5, %v701_v43, %v8820_v55 }
 0x11f   : > { %v591_v10 = vsel %vm12896_vm10, %v8831_v53, %v8835_v6  ;;  %v592_v13 = vsel %vm12896_vm10, %v8835_v6, %v8836_v49  ;;  %v1145_v53 = vsel %vm1143_vm15, %v540_v44, %v590_v33  ;;  %v875_v12 = vsel %vm873_vm6, %v8840_v7, %v8841_v40 }
 0x120   : > { %v9722_v35 = vpop.permute.xlu0 %8848  ;;  %v9724_v48 = vpop.permute.xlu1 %8843  ;;  %v1148_v61 = vsel %vm1143_vm15, %v552_v28, %v8836_v49  ;;  %v1146_v37 = vsel %vm1143_vm15, %v544_v51, %v591_v10  ;;  %v1147_v25 = vsel %vm1143_vm15, %v548_v5, %v592_v13 }
 0x121   : > { %v8851_v39 = vunpack.i.h.bf16 %v9722_v35  ;;  %v8850_v54 = vunpack.i.l.bf16 %v9722_v35  ;;  %v8846_v35 = vunpack.i.h.bf16 %v9724_v48  ;;  %v8845_v34 = vunpack.i.l.bf16 %v9724_v48 }
 0x123   : > { %v915_v6 = vsel %vm369_vm3, %v8850_v54, %v8851_v39  ;;  %v876_v51 = vsel %vm873_vm6, %v8841_v40, %v8845_v34  ;;  %v877_v28 = vsel %vm873_vm6, %v8845_v34, %v8846_v35 }
 0x124   : > { %v9726_v62 = vpop.permute.xlu0 %579  ;;  %v9728_v4 = vpop.permute.xlu1 %8853  ;;  %v1186_v5 = vsel %vm1143_vm15, %v875_v12, %v915_v6 }
 0x125   : > { %v8855_v32 = vunpack.i.l.bf16 %v9728_v4  ;;  %v8856_v59 = vunpack.i.h.bf16 %v9728_v4  ;;  %v589_v43 = vsel %vm12896_vm10, %v9726_v62, %v8830_v60  ;;  %vm994_vm10 = vcmask 506880  }
 0x127   : > { %v916_v10 = vsel %vm369_vm3, %v8851_v39, %v8855_v32  ;;  %v917_v60 = vsel %vm369_vm3, %v8855_v32, %v8856_v59  ;;  %v1189_v34 = vsel %vm1143_vm15, %v8846_v35, %v8856_v59 }
 0x128   : > { %v9730_v41 = vpop.permute.xlu0 %8863  ;;  %v9732_v1 = vpop.permute.xlu1 %8858 }
 0x129   : > { %v8866_v55 = vunpack.i.h.bf16 %v9730_v41  ;;  %v8865_v44 = vunpack.i.l.bf16 %v9730_v41  ;;  %v8861_v33 = vunpack.i.h.bf16 %v9732_v1  ;;  %v8860_v49 = vunpack.i.l.bf16 %v9732_v1 }
 0x12a   : > { %v1144_v41 = vsel %vm1143_vm15, %v536_v0, %v589_v43 }
 0x12b   : > { %v633_v6 = vsel %vm629_vm4, %v8865_v44, %v8866_v55  ;;  %v631_v32 = vsel %vm629_vm4, %v8860_v49, %v8861_v33 }
 0x12c   : > { %v9734_v36 = vpop.permute.xlu0 %904  ;;  %v9736_v16 = vpop.permute.xlu1 %863  ;;  %v1151_v21 = vsel %vm1149_vm0, %v1145_v53, %v631_v32 }
 0x12d   : > { %v914_v0 = vsel %vm369_vm3, %v9734_v36, %v8850_v54  ;;  %v874_v59 = vsel %vm873_vm6, %v9736_v16, %v8840_v7  ;;  %v1153_v36 = vsel %vm1149_vm0, %v1147_v25, %v633_v6  ;;  %vm791_vm6 = vcmask 916480  }
 0x130   : > { %v9738_v23 = vpop.permute.xlu0 %8873  ;;  %v9740_v58 = vpop.permute.xlu1 %8868 }
 0x131   : > { %v8876_v13 = vunpack.i.h.bf16 %v9738_v23  ;;  %v8875_v62 = vunpack.i.l.bf16 %v9738_v23  ;;  %v8871_v39 = vunpack.i.h.bf16 %v9740_v58  ;;  %v8870_v12 = vunpack.i.l.bf16 %v9740_v58 }
 0x132   : > { %v1187_v23 = vsel %vm1143_vm15, %v876_v51, %v916_v10  ;;  %v1154_v51 = vsel %vm1149_vm0, %v1148_v61, %v8866_v55  ;;  %v1188_v10 = vsel %vm1143_vm15, %v877_v28, %v917_v60 }
 0x133   : > { %v957_v35 = vsel %vm360_vm8, %v8875_v62, %v8876_v13  ;;  %v956_v16 = vsel %vm360_vm8, %v8871_v39, %v8875_v62  ;;  %v1194_v61 = vsel %vm1149_vm0, %v1189_v34, %v8876_v13 }
 0x134   : > { %v9747_v38 = vpop.permute.xlu0 %8878  ;;  %v9750_v31 = vpop.permute.xlu1 %619  ;;  %v1193_v55 = vsel %vm1149_vm0, %v1188_v10, %v957_v35 }
 0x135   : > { %v8881_v14 = vunpack.i.h.bf16 %v9747_v38  ;;  %v8880_v1 = vunpack.i.l.bf16 %v9747_v38  ;;  %v632_v38 = vsel %vm629_vm4, %v8861_v33, %v8865_v44  ;;  %v955_v33 = vsel %vm360_vm8, %v8870_v12, %v8871_v39 }
 0x136   : > { %v630_v7 = vsel %vm629_vm4, %v9750_v31, %v8860_v49  ;;  %v1152_v25 = vsel %vm1149_vm0, %v1146_v37, %v632_v38  ;;  %v1191_v53 = vsel %vm1149_vm0, %v1186_v5, %v955_v33  ;;  %v1192_v49 = vsel %vm1149_vm0, %v1187_v23, %v956_v16 }
 0x137   : > { %v671_v54 = vsel %vm419_vm7, %v8880_v1, %v8881_v14  ;;  %v1150_v13 = vsel %vm1149_vm0, %v1144_v41, %v630_v7  ;;  %vm750_vm4 = vcmask 965632  }
 0x138   : > { %v9767_v8 = vpop.permute.xlu0 %944  ;;  %v9772_v18 = vpop.permute.xlu1 %8883  ;;  %v1157_v60 = vsel %vm1155_vm1, %v1151_v21, %v671_v54 }
 0x139   : > { %v8886_v58 = vunpack.i.h.bf16 %v9772_v18  ;;  %v8885_v22 = vunpack.i.l.bf16 %v9772_v18  ;;  %v1185_v18 = vsel %vm1143_vm15, %v874_v59, %v914_v0  ;;  %v954_v34 = vsel %vm360_vm8, %v9767_v8, %v8870_v12 }
 0x13a   : > { %v1163_v8 = vsel %vm1161_vm9, %v1157_v60, %v9785_v46  ;;  %v1190_v59 = vsel %vm1149_vm0, %v1185_v18, %v954_v34 }
 0x13b   : > { %v673_v6 = vsel %vm419_vm7, %v8885_v22, %v8886_v58  ;;  %v672_v39 = vsel %vm419_vm7, %v8881_v14, %v8885_v22  ;;  %v1160_v21 = vsel %vm1155_vm1, %v1154_v51, %v8886_v58 }
 0x13c   : > { %v9782_v2 = vpop.permute.xlu0 %8893  ;;  %v9800_v47 = vpop.permute.xlu1 %8888 }
 0x13d   : > { %v8896_v62 = vunpack.i.h.bf16 %v9782_v2  ;;  %v8895_v31 = vunpack.i.l.bf16 %v9782_v2  ;;  %v8891_v0 = vunpack.i.h.bf16 %v9800_v47  ;;  %v8890_v32 = vunpack.i.l.bf16 %v9800_v47 }
 0x13e   : > { %v1159_v2 = vsel %vm1155_vm1, %v1153_v36, %v673_v6  ;;  %v1158_v47 = vsel %vm1155_vm1, %v1152_v25, %v672_v39 }
 0x13f   : > { %v998_v14 = vsel %vm994_vm10, %v8895_v31, %v8896_v62  ;;  %v1199_v35 = vsel %vm1155_vm1, %v1194_v61, %v8896_v62  ;;  %v996_v46 = vsel %vm994_vm10, %v8890_v32, %v8891_v0 }
 0x140   : > { %v9812_v48 = vpop.permute.xlu0 %984  ;;  %v661_v4 = vpop.permute.xlu1 %660  ;;  %v1198_v36 = vsel %vm1155_vm1, %v1193_v55, %v998_v14  ;;  %v1196_v6 = vsel %vm1155_vm1, %v1191_v53, %v996_v46 }
 0x141   : > { %v670_v12 = vsel %vm419_vm7, %v661_v4, %v8880_v1  ;;  %v995_v4 = vsel %vm994_vm10, %v9812_v48, %v8890_v32  ;;  %v997_v1 = vsel %vm994_vm10, %v8891_v0, %v8895_v31  ;;  %vm832_vm10 = vcmask 908288  }
 0x142   : > { %v1156_v10 = vsel %vm1155_vm1, %v1150_v13, %v670_v12  ;;  %v1195_v62 = vsel %vm1155_vm1, %v1190_v59, %v995_v4  ;;  %v1197_v13 = vsel %vm1155_vm1, %v1192_v49, %v997_v1 }
 0x143   : > { %v9927_v34 = vsel %vm1161_vm9, %v1156_v10, %v9803_v52 }
 0x144   : > { %v9831_v40 = vpop.permute.xlu0 %8903  ;;  %v9842_v43 = vpop.permute.xlu1 %8898 }
 0x145   : > { %v8906_v5 = vunpack.i.h.bf16 %v9831_v40  ;;  %v8905_v41 = vunpack.i.l.bf16 %v9831_v40  ;;  %v8901_v22 = vunpack.i.h.bf16 %v9842_v43  ;;  %v8900_v38 = vunpack.i.l.bf16 %v9842_v43 }
 0x146   : > { %v13034_v40 = vunpack.i.h.bf16 %v9716_v42  ;;  %v1165_v43 = vsel %vm1161_vm9, %v1159_v2, %v9795_v56 }
 0x147   : > { %v1038_v42 = vsel %vm342_vm2, %v8905_v41, %v8906_v5  ;;  %v1204_v54 = vsel %vm1161_vm9, %v1199_v35, %v8906_v5  ;;  %v1036_v16 = vsel %vm342_vm2, %v8900_v38, %v8901_v22  ;;  %v1037_v7 = vsel %vm342_vm2, %v8901_v22, %v8905_v41 }
 0x148   : > { %v9853_v44 = vpop.permute.xlu0 %8908  ;;  %v9864_v28 = vpop.permute.xlu1 %8913  ;;  %v1166_v58 = vsel %vm1161_vm9, %v1160_v21, %v13034_v40  ;;  %v1203_v31 = vsel %vm1161_vm9, %v1198_v36, %v1038_v42  ;;  %v13035_v21 = vunpack.i.h.bf16 %v9712_v3  ;;  %v1202_v0 = vsel %vm1161_vm9, %v1197_v13, %v1037_v7 }
 0x149   : > { %v8911_v48 = vunpack.i.h.bf16 %v9853_v44  ;;  %v8910_v18 = vunpack.i.l.bf16 %v9853_v44  ;;  %v8916_v61 = vunpack.i.h.bf16 %v9864_v28  ;;  %v8915_v56 = vunpack.i.l.bf16 %v9864_v28 }
 0x14a   : > { %v9921_v44 = vsel %vm1161_vm9, %v1158_v47, %v9788_v45  ;;  %v1201_v28 = vsel %vm1161_vm9, %v1196_v6, %v1036_v16  ;;  %v1209_v53 = vsel %vm1167_vm12, %v1204_v54, %v13035_v21  ;;  %v1208_v52 = vsel %vm1167_vm12, %v1203_v31, %v9755_v50 }
 0x14b   : > { %v752_v32 = vsel %vm750_vm4, %v8910_v18, %v8911_v48  ;;  %v754_v5 = vsel %vm750_vm4, %v8915_v56, %v8916_v61  ;;  %v1172_v59 = vsel %vm1167_vm12, %v1166_v58, %v8916_v61 }
 0x14c   : > { %v1026_v37 = vpop.permute.xlu0 %1025  ;;  %v741_v23 = vpop.permute.xlu1 %740  ;;  %v1169_v40 = vsel %vm1167_vm12, %v1163_v8, %v752_v32  ;;  %v1171_v8 = vsel %vm1167_vm12, %v1165_v43, %v754_v5 }
 0x14d   : > { %v1035_v49 = vsel %vm342_vm2, %v1026_v37, %v8900_v38  ;;  %v1206_v37 = vsel %vm1167_vm12, %v1201_v28, %v9763_v63  ;;  %v1207_v38 = vsel %vm1167_vm12, %v1202_v0, %v9758_v57  ;;  %v751_v1 = vsel %vm750_vm4, %v741_v23, %v8910_v18 }
 0x14e   : > { %v1200_v10 = vsel %vm1161_vm9, %v1195_v62, %v1035_v49  ;;  %vm13048_vm9 = vcmask 596992  }
 0x14f   : > { %vm13050_vm15 = vmmov %vm13048_vm9 }
 0x150   : > { %v9894_v51 = vpop.permute.xlu0 %8918  ;;  %v8924_v33 = vpop.permute.xlu1 %8923  ;;  %vm13051_vm0 = vmmov %vm13048_vm9 }
 0x151   : > { %v8921_v25 = vunpack.i.h.bf16 %v9894_v51  ;;  %v8920_v55 = vunpack.i.l.bf16 %v9894_v51  ;;  %v8926_v2 = vunpack.i.h.bf16 %v8924_v33  ;;  %v8925_v45 = vunpack.i.l.bf16 %v8924_v33  ;;  %vm13052_vm1 = vmmov %vm13051_vm0 }
 0x152   : > { %v753_v51 = vsel %vm750_vm4, %v8911_v48, %v8915_v56  ;;  %vm13053_vm4 = vmmov %vm13051_vm0 }
 0x153   : > { %v793_v12 = vsel %vm791_vm6, %v8920_v55, %v8921_v25  ;;  %v795_v4 = vsel %vm791_vm6, %v8925_v45, %v8926_v2  ;;  %v1178_v23 = vsel %vm1173_vm13, %v1172_v59, %v8926_v2  ;;  %v794_v48 = vsel %vm791_vm6, %v8921_v25, %v8925_v45 }
 0x154   : > { %v9914_v60 = vpop.permute.xlu0 %8928  ;;  %v8934_v39 = vpop.permute.xlu1 %8933  ;;  %v1175_v36 = vsel %vm1173_vm13, %v1169_v40, %v793_v12  ;;  %v1177_v7 = vsel %vm1173_vm13, %v1171_v8, %v795_v4 }
 0x155   : > { %v8936_v14 = vunpack.i.h.bf16 %v8934_v39  ;;  %v8935_v3 = vunpack.i.l.bf16 %v8934_v39  ;;  %v8931_v22 = vunpack.i.h.bf16 %v9914_v60  ;;  %v8930_v47 = vunpack.i.l.bf16 %v9914_v60 }
 0x157   : > { %v1104_v63 = vsel %vm333_vm14, %v8935_v3, %v8936_v14  ;;  %v1102_v57 = vsel %vm333_vm14, %v8930_v47, %v8931_v22  ;;  %v1103_v33 = vsel %vm333_vm14, %v8931_v22, %v8935_v3  ;;  %v1214_v13 = vsel %vm1173_vm13, %v1209_v53, %v8936_v14 }
 0x158   : > { %v782_v41 = vpop.permute.xlu0 %781  ;;  %v8939_v35 = vpop.permute.xlu1 %8938  ;;  %v1211_v31 = vsel %vm1173_vm13, %v1206_v37, %v1102_v57  ;;  %v1213_v28 = vsel %vm1173_vm13, %v1208_v52, %v1104_v63  ;;  %v1212_v25 = vsel %vm1173_vm13, %v1207_v38, %v1103_v33  ;;  %v1170_v37 = vsel %vm1167_vm12, %v9921_v44, %v753_v51 }
 0x159   : > { %v8941_v50 = vunpack.i.h.bf16 %v8939_v35  ;;  %v8940_v46 = vunpack.i.l.bf16 %v8939_v35  ;;  %v792_v6 = vsel %vm791_vm6, %v782_v41, %v8920_v55  ;;  %v1168_v35 = vsel %vm1167_vm12, %v9927_v34, %v751_v1  ;;  %vm13054_vm6 = vmmov %vm13051_vm0 }
 0x15a   : > { %v1174_v4 = vsel %vm1173_vm13, %v1168_v35, %v792_v6  ;;  %v10127_v35 = vrot.slane %v9166_v19, %v9199_v26 }
 0x15b   : > { %v834_v43 = vsel %vm832_vm10, %v8940_v46, %v8941_v50 }
 0x15c   : > { %v8944_v58 = vpop.permute.xlu0 %8943  ;;  %v8949_v16 = vpop.permute.xlu1 %8948  ;;  %v1181_v2 = vsel %vm1179_vm11, %v1175_v36, %v834_v43  ;;  %v1176_v36 = vsel %vm1173_vm13, %v1170_v37, %v794_v48  ;;  %13047 = vst [vmem:[#allocation15_spill] sm:$0xff] %v10127_v35 }
 0x15d   : > { %v8946_v42 = vunpack.i.h.bf16 %v8944_v58  ;;  %v8945_v54 = vunpack.i.l.bf16 %v8944_v58  ;;  %v8951_v18 = vunpack.i.h.bf16 %v8949_v16  ;;  %v8950_v61 = vunpack.i.l.bf16 %v8949_v16 }
 0x15f   : > { %v836_v56 = vsel %vm832_vm10, %v8945_v54, %v8946_v42  ;;  %v1135_v0 = vsel %vm333_vm14, %v8950_v61, %v8951_v18  ;;  %v1184_v55 = vsel %vm1179_vm11, %v1178_v23, %v8946_v42  ;;  %v835_v12 = vsel %vm832_vm10, %v8941_v50, %v8945_v54 }
 0x160   : > { %v8954_v62 = vpop.permute.xlu0 %8953  ;;  %v823_v32 = vpop.permute.xlu1 %822  ;;  %v1216_v45 = vsel %vm1179_vm11, %v1211_v31, %v1135_v0  ;;  %v1183_v5 = vsel %vm1179_vm11, %v1177_v7, %v836_v56  ;;  %v13036_v50 = vunpack.i.l.bf16 %v9714_v24  ;;  %v1182_v63 = vsel %vm1179_vm11, %v1176_v36, %v835_v12  ;;  %v1544_v0 = vld [vmem:[%s12878_s3 + $0x18] sm:$0xff] }
 0x161   : > { %v8956_v39 = vunpack.i.h.bf16 %v8954_v62  ;;  %v8955_v21 = vunpack.i.l.bf16 %v8954_v62  ;;  %v1532_v49 = vpack.c.bf16 %v1216_v45, %v1181_v2  ;;  %v833_v52 = vsel %vm832_vm10, %v823_v32, %v8940_v46 }
 0x162   : > { %v1205_v46 = vsel %vm1167_vm12, %v1200_v10, %v13036_v50  ;;  %v1180_v34 = vsel %vm1179_vm11, %v1174_v4, %v833_v52  ;;  %v10025_v32 = vrot.slane %v9126_v9, %v9210_v30  ;;  %v10029_v2 = vrot.slane %v9126_v9, %v9208_v29 }
 0x163   : > { %v1219_v53 = vsel %vm1179_vm11, %v1214_v13, %v8956_v39  ;;  %v1137_v41 = vsel %vm333_vm14, %v8955_v21, %v8956_v39  ;;  %v1136_v59 = vsel %vm333_vm14, %v8951_v18, %v8955_v21  ;;  %1587 = vrot.lane.b32.xlu0 %v1532_v49, %s9047_s10  ;;  %v1210_v24 = vsel %vm1173_vm13, %v1205_v46, %v8930_v47  ;;  %v1541_v39 = vld [vmem:[%s12878_s3] sm:$0xff]  ;;  %v1542_v21 = vld [vmem:[%s12878_s3 + $0x8] sm:$0xff] }
 0x164   : > { %v8959_v14 = vpop.permute.xlu0 %8958  ;;  %v1535_v3 = vpack.c.bf16 %v1219_v53, %v1184_v55  ;;  %v1218_v22 = vsel %vm1179_vm11, %v1213_v28, %v1137_v41  ;;  %v1217_v38 = vsel %vm1179_vm11, %v1212_v25, %v1136_v59  ;;  %v8969_v58 = vpop.permute.xlu1 %8968  ;;  %v1215_v54 = vsel %vm1179_vm11, %v1210_v24, %v8950_v61  ;;  %v1543_v25 = vld [vmem:[%s12878_s3 + $0x10] sm:$0xff]  ;;  %vm13049_vm11 = vmmov %vm13048_vm9 }
 0x165   : > { %v1534_v40 = vpack.c.bf16 %v1218_v22, %v1183_v5  ;;  %v8961_v1 = vunpack.i.h.bf16 %v8959_v14  ;;  %v8960_v8 = vunpack.i.l.bf16 %v8959_v14  ;;  %v1533_v51 = vpack.c.bf16 %v1217_v38, %v1182_v63 }
 0x166   : > { %1593 = vrot.lane.b32.xlu1 %v1535_v3, %s9047_s10  ;;  %v8970_v10 = vunpack.i.l.bf16 %v8969_v58  ;;  %v8971_v33 = vunpack.i.h.bf16 %v8969_v58  ;;  %v1531_v23 = vpack.c.bf16 %v1215_v54, %v1180_v34  ;;  %v10035_v45 = vrot.slane %v9126_v9, %v9201_v27 }
 0x167   : > { %1591 = vrot.lane.b32.xlu0 %v1534_v40, %s9047_s10  ;;  %v1511_v18 = vsel %vm333_vm14, %v8960_v8, %v8961_v1  ;;  %v10041_v55 = vrot.slane %v9126_v9, %v9199_v26  ;;  %v10047_v5 = vrot.slane %v9132_v11, %v9210_v30  ;;  %v10053_v49 = vrot.slane %v9132_v11, %v9208_v29 }
 0x168   : > { %v8964_v44 = vpop.permute.xlu0 %8963  ;;  %v8974_v16 = vpop.permute.xlu1 %8973  ;;  %v1512_v47 = vsel %vm333_vm14, %v8961_v1, %v8970_v10  ;;  %v1513_v62 = vsel %vm333_vm14, %v8970_v10, %v8971_v33  ;;  %13037 = vst [vmem:[#allocation5_spill] sm:$0xff] %v10035_v45  ;;  %v10059_v9 = vrot.slane %v9132_v11, %v9201_v27  ;;  %v10065_v53 = vrot.slane %v9132_v11, %v9199_v26 }
 0x169   : > { %v8966_v57 = vunpack.i.h.bf16 %v8964_v44  ;;  %v8965_v42 = vunpack.i.l.bf16 %v8964_v44  ;;  %v8976_v7 = vunpack.i.h.bf16 %v8974_v16  ;;  %v8975_v48 = vunpack.i.l.bf16 %v8974_v16 }
 0x16a   : > { %1589 = vrot.lane.b32.xlu1 %v1533_v51, %s9047_s10  ;;  %v10071_v41 = vrot.slane %v9141_v15, %v9210_v30  ;;  %v10077_v12 = vrot.slane %v9141_v15, %v9208_v29  ;;  %v10083_v11 = vrot.slane %v9141_v15, %v9201_v27  ;;  %v10089_v52 = vrot.slane %v9141_v15, %v9199_v26 }
 0x16b   : > { %v1514_v60 = vsel %vm333_vm14, %v8965_v42, %v8966_v57  ;;  %1585 = vrot.lane.b32.xlu0 %v1531_v23, %s9047_s10  ;;  %v1515_v56 = vsel %vm333_vm14, %v8966_v57, %v8975_v48  ;;  %v1516_v61 = vsel %vm333_vm14, %v8975_v48, %v8976_v7  ;;  %v1540_v13 = vpack.c.bf16 %v8976_v7, %v8971_v33 }
 0x16c   : > { %v1537_v43 = vpack.c.bf16 %v1514_v60, %v1511_v18  ;;  %v1538_v6 = vpack.c.bf16 %v1515_v56, %v1512_v47  ;;  %v1539_v31 = vpack.c.bf16 %v1516_v61, %v1513_v62  ;;  %v1536_v28 = vpack.c.bf16 %v8965_v42, %v8960_v8  ;;  %13038 = vst [vmem:[#allocation6_spill] sm:$0xff] %v10071_v41  ;;  %v8979_v18 = vld [vmem:[%s12877_s2] sm:$0xff]  }
 0x16d   : > { %13039 = vst [vmem:[#allocation7_spill] sm:$0xff] %v10077_v12  ;;  %13040 = vst [vmem:[#allocation8_spill] sm:$0xff] %v10083_v11  ;;  %v10095_v14 = vrot.slane %v9148_v17, %v9210_v30  ;;  %v10101_v3 = vrot.slane %v9148_v17, %v9208_v29  ;;  %v10107_v15 = vrot.slane %v9148_v17, %v9201_v27  ;;  %v9065_v36 = vmov 65535  }
 0x16e   : > { %1597 = vrot.lane.b32.xlu1 %v1537_v43, %s9047_s10  ;;  %13041 = vst [vmem:[#allocation9_spill] sm:$0xff] %v10089_v52  ;;  %v10113_v22 = vrot.slane %v9148_v17, %v9199_v26  ;;  %v10119_v59 = vrot.slane %v9166_v19, %v9208_v29  ;;  %v1625_v34 = vsel %vm1167_vm12, 4294967295, %v9065_v36  ;;  %vm13055_vm12 = vmmov %vm13051_vm0  ;;  %v13056_v60 = vmov 0   ;;  %v8980_v43 = vld [vmem:[%s12877_s2 + $0x8] sm:$0xff]  }
 0x16f   : > { %1599 = vrot.lane.b32.xlu0 %v1538_v6, %s9047_s10  ;;  %13042 = vst [vmem:[#allocation10_spill] sm:$0xff] %v10095_v14  ;;  %13043 = vst [vmem:[#allocation11_spill] sm:$0xff] %v10101_v3  ;;  %v1626_v63 = vsel %vm1173_vm13, %v1625_v34, 0  ;;  %vm1618_vm13 = vcmask 220160   ;;  %v10209_v34 = vrot.slane %v9174_v20, %v9201_v27  ;;  %vm13097_vm10 = vcmask 465920  }
 0x170   : > { %13044 = vst [vmem:[#allocation12_spill] sm:$0xff] %v10107_v15  ;;  %13045 = vst [vmem:[#allocation13_spill] sm:$0xff] %v10113_v22 }
 0x171   : > { %13046 = vst [vmem:[#allocation14_spill] sm:$0xff] %v10119_v59  ;;  %13066 = vst [vmem:[#allocation25_spill] sm:$0xff] %v10209_v34 }
 0x172   : > { %1601 = vrot.lane.b32.xlu1 %v1539_v31, %s9047_s10 }
 0x173   : > { %1603 = vrot.lane.b32.xlu0 %v1540_v13, %s9047_s10 }
 0x176   : > { %1595 = vrot.lane.b32.xlu1 %v1536_v28, %s9047_s10 }
 0x177   : > { %1547 = vperm.xlu0 %8977, %v1541_v39  }
 0x17a   : > { %1552 = vperm.xlu1 %8978, %v1542_v21  }
 0x17b   : > { %1562 = vperm.xlu0 %8977, %v1544_v0   ;;  %v10171_v0 = vrot.slane %v9166_v19, %v9210_v30 }
 0x17d   : > { %13059 = vst [vmem:[#allocation18_spill] sm:$0xff] %v10171_v0 }
 0x17e   : > { %1557 = vperm.xlu1 %8978, %v1543_v25  }
 0x17f   : > { %1841 = vrot.lane.b32.xlu0 %v10025_v32, %s9045_s30 }
 0x182   : > { %1839 = vrot.lane.b32.xlu1 %v10029_v2, %s9045_s30 }
 0x183   : > { %1845 = vrot.lane.b32.xlu0 %v10035_v45, %s9045_s30 }
 0x186   : > { %1843 = vrot.lane.b32.xlu1 %v10041_v55, %s9045_s30 }
 0x187   : > { %1779 = vrot.lane.b32.xlu0 %v10047_v5, %s9057_s23 }
 0x18a   : > { %1777 = vrot.lane.b32.xlu1 %v10053_v49, %s9057_s23 }
 0x18b   : > { %1783 = vrot.lane.b32.xlu0 %v10059_v9, %s9057_s23 }
 0x18e   : > { %1781 = vrot.lane.b32.xlu1 %v10065_v53, %s9057_s23 }
 0x18f   : > { %2236 = vrot.lane.b32.xlu0 %v10071_v41, %s9048_s11 }
 0x192   : > { %2234 = vrot.lane.b32.xlu1 %v10077_v12, %s9048_s11 }
 0x193   : > { %2240 = vrot.lane.b32.xlu0 %v10083_v11, %s9048_s11 }
 0x196   : > { %2238 = vrot.lane.b32.xlu1 %v10089_v52, %s9048_s11 }
 0x197   : > { %2481 = vrot.lane.b32.xlu0 %v10095_v14, %s9050_s16 }
 0x19a   : > { %2479 = vrot.lane.b32.xlu1 %v10101_v3, %s9050_s16 }
 0x19b   : > { %2485 = vrot.lane.b32.xlu0 %v10107_v15, %s9050_s16 }
 0x19e   : > { %2483 = vrot.lane.b32.xlu1 %v10113_v22, %s9050_s16 }
 0x19f   : > { %2728 = vrot.lane.b32.xlu0 %v10119_v59, %s9052_s18 }
 0x1a3   : > { %2732 = vrot.lane.b32.xlu0 %v10127_v35, %s9052_s18 }
 0x1d5   : > { %v1588_v17 = vpop.permute.xlu0 %1587 }
 0x1d8   : > { %v1594_v40 = vpop.permute.xlu1 %1593 }
 0x1d9   : > { %v1592_v37 = vpop.permute.xlu0 %1591 }
 0x1da   : > { %v1609_v38 = vsel %vm13048_vm9, %v1592_v37, %v1594_v40  ;;  %v10181_v40 = vrot.slane %v9166_v19, %v9201_v27  ;;  %v10197_v19 = vrot.slane %v9174_v20, %v9210_v30  ;;  %vm13100_vm9 = vmmov %vm13097_vm10 }
 0x1db   : > { %1692 = vmatprep.subr.bf16.mxu1 %v1609_v38 }
 0x1dc   : > { %v1590_v50 = vpop.permute.xlu1 %1589  ;;  %13061 = vst [vmem:[#allocation20_spill] sm:$0xff] %v10181_v40  ;;  %13064 = vst [vmem:[#allocation23_spill] sm:$0xff] %v10197_v19 }
 0x1dd   : > { %v1607_v46 = vsel %vm13049_vm11, %v1588_v17, %v1590_v50  ;;  %v1608_v4 = vsel %vm13050_vm15, %v1590_v50, %v1592_v37  ;;  %v1586_v58 = vpop.permute.xlu0 %1585  ;;  %vm13105_vm11 = vcmask 531456  }
 0x1de   : > { %1639 = vmatprep.subr.bf16.mxu0 %v1607_v46  ;;  %1693 = vmatpush1.bf16.msra.mxu1 %v1608_v4  ;;  %v1606_v1 = vsel %vm13051_vm0, %v1586_v58, %v1588_v17  ;;  %v10193_v4 = vrot.slane %v9174_v20, %v9208_v29  ;;  %vm13108_vm15 = vmmov %vm13105_vm11  ;;  %vm13111_vm0 = vcmask 580608  }
 0x1df   : > { %1640 = vmatpush1.bf16.msra.mxu0 %v1606_v1  ;;  %v10213_v1 = vrot.slane %v9174_v20, %v9199_v26 }
 0x1e0   : > { %v1598_v8 = vpop.permute.xlu1 %1597  ;;  %13063 = vst [vmem:[#allocation22_spill] sm:$0xff] %v10193_v4 }
 0x1e1   : > { %v1600_v44 = vpop.permute.xlu0 %1599  ;;  %13067 = vst [vmem:[#allocation26_spill] sm:$0xff] %v10213_v1 }
 0x1e2   : > { %v1611_v51 = vsel %vm13052_vm1, %v1598_v8, %v1600_v44  ;;  %vm13114_vm1 = vmmov %vm13111_vm0 }
 0x1e3   : > { %v1631_v10 = vand.u32 %v1626_v63, %v1611_v51  ;;  %v13069_v51 = vld [vmem:[#allocation3_spill] sm:$0xff] }
 0x1e4   : > { %v1602_v24 = vpop.permute.xlu1 %1601 }
 0x1e5   : > { %v1612_v57 = vsel %vm13053_vm4, %v1600_v44, %v1602_v24  ;;  %v1604_v42 = vpop.permute.xlu0 %1603  ;;  %1641 = vmatprep.subr.bf16.mxu0 %v1631_v10  ;;  %vm13117_vm4 = vmmov %vm13100_vm9 }
 0x1e6   : > { %v1613_v54 = vsel %vm13054_vm6, %v1602_v24, %v1604_v42  ;;  %v1634_v48 = vand.u32 %v1626_v63, %v1612_v57  ;;  %v10224_v24 = vrot.slane %v13069_v51, %v9208_v29  ;;  %v10237_v42 = vrot.slane %v13069_v51, %v9210_v30  ;;  %vm13121_vm6 = vmmov %vm13105_vm11 }
 0x1e7   : > { %v1637_v16 = vand.u32 %v1626_v63, %v1613_v54  ;;  %v10241_v54 = vrot.slane %v13069_v51, %v9199_v26 }
 0x1e8   : > { %v1596_v33 = vpop.permute.xlu1 %1595  ;;  %13070 = vst [vmem:[#allocation3_spill] sm:$0xff] %v10224_v24  ;;  %13072 = vst [vmem:[#allocation29_spill] sm:$0xff] %v10237_v42 }
 0x1e9   : > { %v1610_v23 = vsel %vm13055_vm12, %v1596_v33, %v1598_v8  ;;  %1694 = vmatprep.subr.bf16.mxu1 %v1637_v16  ;;  %13073 = vst [vmem:[#allocation30_spill] sm:$0xff] %v10241_v54  ;;  %vm13123_vm12 = vmmov %vm13111_vm0 }
 0x1ea   : > { %v1628_v7 = vand.u32 %v1626_v63, %v1610_v23  ;;  %1695 = vmatpush1.bf16.msra.mxu1 %v1634_v48  ;;  %v10252_v23 = vrot.slane %v13069_v51, %v9201_v27  ;;  %v13076_v48 = vld [vmem:[#allocation4_spill] sm:$0xff]  ;;  %v13082_v51 = vld [vmem:[#allocation2_spill] sm:$0xff] }
 0x1ec   : > { %1642 = vmatpush1.bf16.msra.mxu0 %v1628_v7  ;;  %13075 = vst [vmem:[#allocation32_spill] sm:$0xff] %v10252_v23 }
 0x1ed   : > { %8068 = vmatmul.mubr.msk.bf16.vlgmr.msra.gmra.mrb[0].mxu1 %vm1618_vm13, %v8979_v18 }
 0x1ee   : > { %1734 = vmatprep.mubr.bf16.mxu1 %v13056_v60 }
 0x1ef   : > { %8066 = vmatmul.mubr.msk.bf16.vlgmr.msra.gmra.mrb[0].mxu0 %vm1618_vm13, %v8979_v18  ;;  %v10258_v18 = vrot.slane %v13076_v48, %v9208_v29 }
 0x1f0   : > { %1681 = vmatprep.mubr.bf16.mxu0 %v13056_v60 }
 0x1f1   : > { %13077 = vst [vmem:[#allocation4_spill] sm:$0xff] %v10258_v18 }
 0x1f5   : > { %8069 = vmatmul.mubr.msk.bf16.gmra.mrb[4].mxu1 %vm1618_vm13, %v8980_v43 }
 0x1f6   : > { %v10149_v47 = vpop.permute.xlu0 %1547  ;;  %2032 = vmatprep.mubr.bf16.mxu1 %v13056_v60 }
 0x1f7   : > { %8067 = vmatmul.mubr.msk.bf16.gmra.mrb[4].mxu0 %vm1618_vm13, %v8980_v43  ;;  %v10263_v43 = vrot.slane %v13076_v48, %v9210_v30  ;;  %vm13128_vm13 = vcmask 588800  }
 0x1f8   : > { %1979 = vmatprep.mubr.bf16.mxu0 %v13056_v60 }
 0x1f9   : > { %v10153_v56 = vpop.permute.xlu1 %1552  ;;  %13078 = vst [vmem:[#allocation33_spill] sm:$0xff] %v10263_v43 }
 0x1fa   : > { %v10155_v61 = vpop.permute.xlu0 %1562 }
 0x1fd   : > { %v10157_v6 = vpop.permute.xlu1 %1557 }
 0x1fe   : > { %v10159_v62 = vpop.permute.xlu0 %1841 }
 0x201   : > { %v10161_v31 = vpop.permute.xlu1 %1839 }
 0x202   : > { %13057 = vst [vmem:[#allocation16_spill] sm:$0xff] %v10161_v31  ;;  %v1855_v13 = vmul.f32 0.0, %v10161_v31  ;;  %v10164_v39 = vpop.permute.xlu0 %1845 }
 0x203   : > { %13058 = vst [vmem:[#allocation17_spill] sm:$0xff] %v10164_v39 }
 0x204   : > { %v1877_v28 = vpack.c.bf16 %v1855_v13, %v1855_v13 }
 0x205   : > { %v10166_v21 = vpop.permute.xlu1 %1843 }
 0x206   : > { %1905 = vrot.lane.b32.xlu1 %v1877_v28, %s9055_s21  ;;  %v10173_v25 = vpop.permute.xlu0 %1779  ;;  %v10271_v28 = vrot.slane %v13076_v48, %v9199_v26 }
 0x208   : > { %13080 = vst [vmem:[#allocation35_spill] sm:$0xff] %v10271_v28 }
 0x209   : > { %v10175_v17 = vpop.permute.xlu1 %1777 }
 0x20a   : > { %13060 = vst [vmem:[#allocation19_spill] sm:$0xff] %v10175_v17  ;;  %2730 = vrot.lane.b32.xlu1 %v10171_v0, %s9052_s18  ;;  %v1793_v37 = vmul.f32 0.0, %v10175_v17  ;;  %v10184_v50 = vpop.permute.xlu0 %1783 }
 0x20b   : > { %13062 = vst [vmem:[#allocation21_spill] sm:$0xff] %v10184_v50 }
 0x20c   : > { %v1814_v38 = vpack.c.bf16 %v1793_v37, %v1793_v37 }
 0x20d   : > { %v10186_v46 = vpop.permute.xlu1 %1781 }
 0x20e   : > { %2734 = vrot.lane.b32.xlu1 %v10181_v40, %s9052_s18  ;;  %2072 = vrot.lane.b32.xlu0 %v1814_v38, %s9047_s10  ;;  %v10199_v58 = vpop.permute.xlu0 %2236  ;;  %v10278_v38 = vrot.slane %v13076_v48, %v9201_v27 }
 0x210   : > { %13081 = vst [vmem:[#allocation36_spill] sm:$0xff] %v10278_v38 }
 0x211   : > { %v10201_v36 = vpop.permute.xlu1 %2234 }
 0x212   : > { %13065 = vst [vmem:[#allocation24_spill] sm:$0xff] %v10201_v36  ;;  %2973 = vrot.lane.b32.xlu1 %v10193_v4, %s9054_s20  ;;  %2975 = vrot.lane.b32.xlu0 %v10197_v19, %s9054_s20  ;;  %v2250_v8 = vmul.f32 0.0, %v10201_v36  ;;  %v10216_v63 = vpop.permute.xlu0 %2240 }
 0x213   : > { %13068 = vst [vmem:[#allocation27_spill] sm:$0xff] %v10216_v63 }
 0x214   : > { %v2272_v10 = vpack.c.bf16 %v2250_v8, %v2250_v8 }
 0x215   : > { %v10218_v44 = vpop.permute.xlu1 %2238 }
 0x216   : > { %2979 = vrot.lane.b32.xlu0 %v10209_v34, %s9054_s20  ;;  %2977 = vrot.lane.b32.xlu1 %v10213_v1, %s9054_s20  ;;  %v10228_v57 = vpop.permute.xlu0 %2481 }
 0x219   : > { %v10230_v20 = vpop.permute.xlu1 %2479 }
 0x21a   : > { %13071 = vst [vmem:[#allocation28_spill] sm:$0xff] %v10230_v20  ;;  %3218 = vrot.lane.b32.xlu0 %v10224_v24, %s9056_s22  ;;  %2300 = vrot.lane.b32.xlu1 %v2272_v10, %s9056_s22  ;;  %v2495_v33 = vmul.f32 0.0, %v10230_v20  ;;  %v10244_v16 = vpop.permute.xlu0 %2485  ;;  %v10286_v10 = vrot.slane %v13082_v51, %v9208_v29  ;;  %v10303_v29 = vrot.slane %v13082_v51, %v9201_v27 }
 0x21b   : > { %13074 = vst [vmem:[#allocation31_spill] sm:$0xff] %v10244_v16 }
 0x21c   : > { %v2517_v7 = vpack.c.bf16 %v2495_v33, %v2495_v33  ;;  %13083 = vst [vmem:[#allocation2_spill] sm:$0xff] %v10286_v10  ;;  %v10291_v33 = vrot.slane %v13082_v51, %v9210_v30  ;;  %13086 = vst [vmem:[#allocation39_spill] sm:$0xff] %v10303_v29 }
 0x21e   : > { %3220 = vrot.lane.b32.xlu1 %v10237_v42, %s9056_s22  ;;  %3222 = vrot.lane.b32.xlu0 %v10241_v54, %s9056_s22  ;;  %v10265_v13 = vpop.permute.xlu0 %2728  ;;  %13084 = vst [vmem:[#allocation37_spill] sm:$0xff] %v10291_v33 }
 0x21f   : > { %13079 = vst [vmem:[#allocation34_spill] sm:$0xff] %v10265_v13  ;;  %v2744_v37 = vmul.f32 0.0, %v10265_v13 }
 0x221   : > { %v2766_v8 = vpack.c.bf16 %v2744_v37, %v2744_v37 }
 0x222   : > { %3224 = vrot.lane.b32.xlu1 %v10252_v23, %s9056_s22  ;;  %2545 = vrot.lane.b32.xlu0 %v2517_v7, %s9054_s20  ;;  %v10297_v7 = vrot.slane %v13082_v51, %v9199_v26  ;;  %v10313_v26 = vpop.permute.xlu1 %2483  ;;  %v10317_v48 = vpop.permute.xlu0 %2732 }
 0x224   : > { %13085 = vst [vmem:[#allocation38_spill] sm:$0xff] %v10297_v7 }
 0x226   : > { %3463 = vrot.lane.b32.xlu1 %v10258_v18, %s9055_s21  ;;  %3465 = vrot.lane.b32.xlu0 %v10263_v43, %s9055_s21 }
 0x22a   : > { %3467 = vrot.lane.b32.xlu1 %v10271_v28, %s9055_s21  ;;  %3469 = vrot.lane.b32.xlu0 %v10278_v38, %s9055_s21 }
 0x22e   : > { %2794 = vrot.lane.b32.xlu1 %v2766_v8, %s9052_s18  ;;  %3708 = vrot.lane.b32.xlu0 %v10286_v10, %s9047_s10 }
 0x232   : > { %3710 = vrot.lane.b32.xlu1 %v10291_v33, %s9047_s10  ;;  %3712 = vrot.lane.b32.xlu0 %v10297_v7, %s9047_s10 }
 0x236   : > { %3714 = vrot.lane.b32.xlu1 %v10303_v29, %s9047_s10 }
 0x23a   : > { %3937 = vrot.lane.b32.xlu1 %v10053_v49, %s9046_s8 }
 0x23e   : > { %3941 = vrot.lane.b32.xlu1 %v10065_v53, %s9046_s8 }
 0x278   : > { %v10315_v30 = vpop.permute.xlu1 %1905 }
 0x279   : > { %13087 = vst [vmem:[#allocation40_spill] sm:$0xff] %v10315_v30 }
 0x27c   : > { %v10319_v27 = vpop.permute.xlu1 %2730 }
 0x280   : > { %v10321_v37 = vpop.permute.xlu0 %2072  ;;  %v10323_v8 = vpop.permute.xlu1 %2734 }
 0x281   : > { %13088 = vst [vmem:[#allocation41_spill] sm:$0xff] %v10321_v37  ;;  %13089 = vst [vmem:[#allocation42_spill] sm:$0xff] %v10323_v8 }
 0x284   : > { %v10325_v51 = vpop.permute.xlu0 %2975  ;;  %v10327_v35 = vpop.permute.xlu1 %2973 }
 0x285   : > { %13090 = vst [vmem:[#allocation43_spill] sm:$0xff] %v10327_v35  ;;  %v2989_v49 = vmul.f32 0.0, %v10327_v35 }
 0x287   : > { %v3011_v40 = vpack.c.bf16 %v2989_v49, %v2989_v49 }
 0x288   : > { %v10330_v53 = vpop.permute.xlu0 %2979  ;;  %v10429_v15 = vpop.permute.xlu1 %2977 }
 0x289   : > { %13091 = vst [vmem:[#allocation44_spill] sm:$0xff] %v10330_v53  ;;  %3039 = vrot.lane.b32.xlu0 %v3011_v40, %s9050_s16 }
 0x28c   : > { %v10333_v59 = vpop.permute.xlu0 %3218  ;;  %v10455_v22 = vpop.permute.xlu1 %2300 }
 0x28d   : > { %13092 = vst [vmem:[#allocation45_spill] sm:$0xff] %v10333_v59  ;;  %3939 = vrot.lane.b32.xlu0 %v10047_v5, %s9046_s8  ;;  %v3234_v0 = vmul.f32 0.0, %v10333_v59  ;;  %13103 = vst [vmem:[#allocation54_spill] sm:$0xff] %v10455_v22 }
 0x28f   : > { %v3256_v7 = vpack.c.bf16 %v3234_v0, %v3234_v0 }
 0x291   : > { %3284 = vrot.lane.b32.xlu1 %v3256_v7, %s9048_s11  ;;  %3943 = vrot.lane.b32.xlu0 %v10059_v9, %s9046_s8 }
 0x295   : > { %4168 = vrot.lane.b32.xlu1 %v10025_v32, %s9049_s15  ;;  %4166 = vrot.lane.b32.xlu0 %v10029_v2, %s9049_s15 }
 0x299   : > { %4170 = vrot.lane.b32.xlu0 %v10041_v55, %s9049_s15 }
 0x2c0   : > { %v1726_v40 = vpop.f32.mrb[0].mxu1 }
 0x2c1   : > { %v10347_v5 = vpop.f32.mrb[1].mxu1  ;;  %v1727_v7 = vadd.f32 %v1726_v40, %v10149_v47  ;;  %v10371_v40 = vsel %vm333_vm14, %v10175_v17, %v10173_v25 }
 0x2c2   : > { %v1673_v49 = vpop.f32.mrb[0].mxu0  ;;  %v1730_v9 = vpop.f32.mrb[2].mxu1  ;;  %13094 = vst [vmem:[#allocation47_spill] sm:$0xff] %v10371_v40  ;;  %v1729_v12 = vadd.f32 %v10347_v5, %v10149_v47 }
 0x2c3   : > { %v1674_v0 = vadd.f32 %v1673_v49, %v10149_v47  ;;  %v10350_v29 = vpop.f32.mrb[1].mxu0  ;;  %v1731_v32 = vadd.f32 %v1730_v9, %v10153_v56  ;;  %v10356_v2 = vpop.f32.mrb[3].mxu1  ;;  %v10366_v49 = vsel %vm342_vm2, %v10161_v31, %v10159_v62  ;;  %v10386_v31 = vsel %vm342_vm2, %v10166_v21, %v10164_v39 }
 0x2c4   : > { %v1677_v10 = vpop.f32.mrb[2].mxu0  ;;  %13093 = vst [vmem:[#allocation46_spill] sm:$0xff] %v10366_v49  ;;  %13095 = vst [vmem:[#allocation48_spill] sm:$0xff] %v10386_v31  ;;  %v1676_v41 = vadd.f32 %v10350_v29, %v10149_v47  ;;  %v1733_v29 = vadd.f32 %v10356_v2, %v10153_v56 }
 0x2c5   : > { %v10353_v33 = vmax.f32 %v1674_v0, 0.0  ;;  %v1678_v55 = vadd.f32 %v1677_v10, %v10153_v56  ;;  %v1679_v38 = vpop.f32.mrb[3].mxu0  ;;  %v10359_v43 = vmax.f32 %v1731_v32, 0.0  ;;  %v10373_v0 = vmax.f32 %v1727_v7, 0.0 }
 0x2c6   : > { %v10391_v7 = vsel %vm333_vm14, %v10186_v46, %v10184_v50  ;;  %v10508_v45 = vmax.f32 %v1676_v41, 0.0  ;;  %v10526_v47 = vmax.f32 %v1733_v29, 0.0 }
 0x2c7   : > { %v10361_v28 = vmax.f32 %v1678_v55, 0.0  ;;  %v1856_v10 = vmul.f32 %v10366_v49, %v10353_v33  ;;  %v1794_v32 = vmul.f32 %v10371_v40, %v10353_v33  ;;  %13096 = vst [vmem:[#allocation49_spill] sm:$0xff] %v10391_v7  ;;  %v1862_v34 = vmul.f32 %v10386_v31, %v10359_v43 }
 0x2c8   : > { %v10393_v17 = vpop.f32.mrb[4].mxu1  ;;  %v1800_v19 = vmul.f32 %v10391_v7, %v10359_v43 }
 0x2c9   : > { %v1860_v9 = vmul.f32 %v10366_v49, %v10361_v28  ;;  %v1798_v55 = vmul.f32 %v10371_v40, %v10361_v28  ;;  %v10397_v54 = vpop.f32.mrb[5].mxu1 }
 0x2ca   : > { %v10395_v18 = vpop.f32.mrb[4].mxu0  ;;  %v10405_v1 = vpop.f32.mrb[6].mxu1 }
 0x2cb   : > { %v10399_v23 = vpop.f32.mrb[5].mxu0  ;;  %v1878_v42 = vpack.c.bf16 %v1860_v9, %v1856_v10  ;;  %v1815_v24 = vpack.c.bf16 %v1798_v55, %v1794_v32  ;;  %v10409_v60 = vpop.f32.mrb[7].mxu1  ;;  %v1858_v10 = vmul.f32 %v10386_v31, %v10373_v0  ;;  %v1796_v9 = vmul.f32 %v10391_v7, %v10373_v0 }
 0x2cc   : > { %v10407_v4 = vpop.f32.mrb[6].mxu0  ;;  %v10422_v32 = vsel %vm13097_vm10, %v10201_v36, %v10199_v58  ;;  %v10427_v55 = vsel %vm360_vm8, %v10230_v20, %v10228_v57  ;;  %vm13130_vm10 = vmmov %vm13128_vm13 }
 0x2cd   : > { %v10411_v37 = vpop.f32.mrb[7].mxu0  ;;  %1907 = vrot.lane.b32.xlu1 %v1878_v42, %s9055_s21  ;;  %2074 = vrot.lane.b32.xlu0 %v1815_v24, %s9047_s10  ;;  %13098 = vst [vmem:[#allocation50_spill] sm:$0xff] %v10422_v32  ;;  %13099 = vst [vmem:[#allocation51_spill] sm:$0xff] %v10427_v55  ;;  %v1880_v42 = vpack.c.bf16 %v1862_v34, %v1858_v10  ;;  %v1817_v24 = vpack.c.bf16 %v1800_v19, %v1796_v9 }
 0x2ce   : > { %v2255_v30 = vmul.f32 %v10422_v32, %v10361_v28  ;;  %v2500_v14 = vmul.f32 %v10427_v55, %v10361_v28  ;;  %v2251_v36 = vmul.f32 %v10422_v32, %v10353_v33  ;;  %v2496_v20 = vmul.f32 %v10427_v55, %v10353_v33 }
 0x2cf   : > { %v10444_v19 = vsel %vm13100_vm9, %v10218_v44, %v10216_v63  ;;  %v10449_v34 = vsel %vm360_vm8, %v10313_v26, %v10244_v16  ;;  %vm13134_vm9 = vmmov %vm13130_vm10 }
 0x2d0   : > { %13101 = vst [vmem:[#allocation52_spill] sm:$0xff] %v10444_v19  ;;  %13102 = vst [vmem:[#allocation53_spill] sm:$0xff] %v10449_v34  ;;  %v2273_v10 = vpack.c.bf16 %v2255_v30, %v2251_v36  ;;  %v2518_v9 = vpack.c.bf16 %v2500_v14, %v2496_v20  ;;  %v2253_v3 = vmul.f32 %v10444_v19, %v10373_v0 }
 0x2d1   : > { %1911 = vrot.lane.b32.xlu1 %v1880_v42, %s9055_s21  ;;  %2078 = vrot.lane.b32.xlu0 %v1817_v24, %s9047_s10  ;;  %v2257_v42 = vmul.f32 %v10444_v19, %v10359_v43  ;;  %v2502_v24 = vmul.f32 %v10449_v34, %v10359_v43  ;;  %v2498_v11 = vmul.f32 %v10449_v34, %v10373_v0 }
 0x2d2   : > { %v10466_v14 = vsel %vm369_vm3, %v10265_v13, %v10319_v27  ;;  %v10471_v36 = vsel %vm13105_vm11, %v10327_v35, %v10325_v51  ;;  %v1680_v20 = vadd.f32 %v1679_v38, %v10153_v56  ;;  %v10494_v38 = vsel %vm13108_vm15, %v10429_v15, %v10330_v53 }
 0x2d3   : > { %13104 = vst [vmem:[#allocation55_spill] sm:$0xff] %v10466_v14  ;;  %13106 = vst [vmem:[#allocation56_spill] sm:$0xff] %v10471_v36  ;;  %v2275_v30 = vpack.c.bf16 %v2257_v42, %v2253_v3  ;;  %v2994_v22 = vmul.f32 %v10471_v36, %v10361_v28  ;;  %v2745_v35 = vmul.f32 %v10466_v14, %v10353_v33  ;;  %vm13140_vm11 = vcmask 596992  }
 0x2d4   : > { %v2990_v3 = vmul.f32 %v10471_v36, %v10353_v33  ;;  %13109 = vst [vmem:[#allocation58_spill] sm:$0xff] %v10494_v38  ;;  %v10498_v42 = vmax.f32 %v1680_v20, 0.0  ;;  %v2996_v52 = vmul.f32 %v10494_v38, %v10359_v43  ;;  %vm13142_vm15 = vmmov %vm13140_vm11 }
 0x2d5   : > { %2302 = vrot.lane.b32.xlu1 %v2273_v10, %s9056_s22  ;;  %2547 = vrot.lane.b32.xlu0 %v2518_v9, %s9054_s20  ;;  %v2520_v10 = vpack.c.bf16 %v2502_v24, %v2498_v11  ;;  %v2749_v9 = vmul.f32 %v10466_v14, %v10361_v28  ;;  %v10489_v11 = vsel %vm369_vm3, %v10317_v48, %v10323_v8  ;;  %v10500_v24 = vpop.permute.xlu1 %3220 }
 0x2d6   : > { %13107 = vst [vmem:[#allocation57_spill] sm:$0xff] %v10489_v11  ;;  %v2751_v13 = vmul.f32 %v10489_v11, %v10359_v43  ;;  %v2747_v56 = vmul.f32 %v10489_v11, %v10373_v0  ;;  %v10524_v41 = vsel %vm13111_vm0, %v10333_v59, %v10500_v24  ;;  %vm13144_vm0 = vmmov %vm13140_vm11 }
 0x2d7   : > { %13112 = vst [vmem:[#allocation60_spill] sm:$0xff] %v10524_v41 }
 0x2d8   : > { %v2769_v5 = vpack.c.bf16 %v2751_v13, %v2747_v56 }
 0x2d9   : > { %2306 = vrot.lane.b32.xlu1 %v2275_v30, %s9056_s22  ;;  %2551 = vrot.lane.b32.xlu0 %v2520_v10, %s9054_s20  ;;  %v2767_v30 = vpack.c.bf16 %v2749_v9, %v2745_v35  ;;  %v3012_v10 = vpack.c.bf16 %v2994_v22, %v2990_v3  ;;  %v2992_v22 = vmul.f32 %v10494_v38, %v10373_v0  ;;  %v3223_v3 = vpop.permute.xlu0 %3222 }
 0x2da   : > { %v10519_v35 = vsel %vm342_vm2, %v10159_v62, %v10166_v21  ;;  %v3239_v9 = vmul.f32 %v10524_v41, %v10361_v28  ;;  %v10534_v62 = vmax.f32 %v1729_v12, 0.0  ;;  %v1863_v12 = vmul.f32 %v10164_v39, %v10526_v47 }
 0x2db   : > { %13110 = vst [vmem:[#allocation59_spill] sm:$0xff] %v10519_v35  ;;  %v3014_v2 = vpack.c.bf16 %v2996_v52, %v2992_v22  ;;  %v1861_v20 = vmul.f32 %v10519_v35, %v10498_v42  ;;  %v1857_v21 = vmul.f32 %v10519_v35, %v10508_v45  ;;  %v3235_v52 = vmul.f32 %v10524_v41, %v10353_v33 }
 0x2dc   : > { %v1859_v22 = vmul.f32 %v10164_v39, %v10534_v62 }
 0x2dd   : > { %2796 = vrot.lane.b32.xlu1 %v2767_v30, %s9052_s18  ;;  %3041 = vrot.lane.b32.xlu0 %v3012_v10, %s9050_s16  ;;  %v10532_v30 = vpop.permute.xlu1 %3224  ;;  %v1879_v29 = vpack.c.bf16 %v1861_v20, %v1857_v21  ;;  %v3257_v10 = vpack.c.bf16 %v3239_v9, %v3235_v52  ;;  %v10564_v20 = vsel %vm13117_vm4, %v10199_v58, %v10218_v44 }
 0x2de   : > { %13113 = vst [vmem:[#allocation61_spill] sm:$0xff] %v10532_v30  ;;  %v10544_v13 = vsel %vm13114_vm1, %v3223_v3, %v10532_v30  ;;  %13118 = vst [vmem:[#allocation64_spill] sm:$0xff] %v10564_v20  ;;  %v1881_v9 = vpack.c.bf16 %v1863_v12, %v1859_v22  ;;  %v2256_v52 = vmul.f32 %v10564_v20, %v10498_v42 }
 0x2df   : > { %13115 = vst [vmem:[#allocation62_spill] sm:$0xff] %v10544_v13  ;;  %v3241_v56 = vmul.f32 %v10544_v13, %v10359_v43  ;;  %v1801_v12 = vmul.f32 %v10184_v50, %v10526_v47  ;;  %v1797_v22 = vmul.f32 %v10184_v50, %v10534_v62  ;;  %vm13152_vm1 = vmmov %vm13134_vm9 }
 0x2e0   : > { %vm13154_vm4 = vmmov %vm13152_vm1 }
 0x2e1   : > { %2800 = vrot.lane.b32.xlu1 %v2769_v5, %s9052_s18  ;;  %3045 = vrot.lane.b32.xlu0 %v3014_v2, %s9050_s16  ;;  %v3237_v5 = vmul.f32 %v10544_v13, %v10373_v0  ;;  %v10559_v2 = vsel %vm333_vm14, %v10173_v25, %v10186_v46  ;;  %v2252_v25 = vmul.f32 %v10564_v20, %v10508_v45 }
 0x2e2   : > { %13116 = vst [vmem:[#allocation63_spill] sm:$0xff] %v10559_v2  ;;  %v1795_v46 = vmul.f32 %v10559_v2, %v10508_v45 }
 0x2e3   : > { %v3259_v21 = vpack.c.bf16 %v3241_v56, %v3237_v5  ;;  %v2274_v58 = vpack.c.bf16 %v2256_v52, %v2252_v25  ;;  %v2254_v56 = vmul.f32 %v10216_v63, %v10534_v62  ;;  %v10589_v5 = vsel %vm360_vm8, %v10228_v57, %v10313_v26 }
 0x2e4   : > { %13119 = vst [vmem:[#allocation65_spill] sm:$0xff] %v10589_v5  ;;  %v1818_v52 = vpack.c.bf16 %v1801_v12, %v1797_v22  ;;  %v2501_v25 = vmul.f32 %v10589_v5, %v10498_v42  ;;  %v2497_v26 = vmul.f32 %v10589_v5, %v10508_v45  ;;  %v10619_v12 = vsel %vm13121_vm6, %v10325_v51, %v10429_v15  ;;  %vm13157_vm6 = vmmov %vm13152_vm1 }
 0x2e5   : > { %1909 = vrot.lane.b32.xlu0 %v1879_v29, %s9055_s21  ;;  %3286 = vrot.lane.b32.xlu1 %v3257_v10, %s9048_s11  ;;  %v1799_v29 = vmul.f32 %v10559_v2, %v10498_v42  ;;  %v2258_v10 = vmul.f32 %v10216_v63, %v10526_v47  ;;  %13122 = vst [vmem:[#allocation67_spill] sm:$0xff] %v10619_v12 }
 0x2e6   : > { %v1688_v22 = vadd.f32 %v10407_v4, %v10155_v61  ;;  %v2991_v4 = vmul.f32 %v10619_v12, %v10508_v45  ;;  %v1741_v51 = vadd.f32 %v10405_v1, %v10155_v61  ;;  %v3238_v1 = vmul.f32 %v10532_v30, %v10534_v62 }
 0x2e7   : > { %v1816_v44 = vpack.c.bf16 %v1799_v29, %v1795_v46  ;;  %v2752_v46 = vmul.f32 %v10323_v8, %v10526_v47 }
 0x2e9   : > { %1913 = vrot.lane.b32.xlu0 %v1881_v9, %s9055_s21  ;;  %3290 = vrot.lane.b32.xlu1 %v3259_v21, %s9048_s11  ;;  %v10594_v9 = vsel %vm369_vm3, %v10319_v27, %v10317_v48  ;;  %v2276_v21 = vpack.c.bf16 %v2258_v10, %v2254_v56  ;;  %v2519_v27 = vpack.c.bf16 %v2501_v25, %v2497_v26 }
 0x2ea   : > { %13120 = vst [vmem:[#allocation66_spill] sm:$0xff] %v10594_v9  ;;  %v2750_v29 = vmul.f32 %v10594_v9, %v10498_v42  ;;  %v2746_v57 = vmul.f32 %v10594_v9, %v10508_v45  ;;  %v2499_v10 = vmul.f32 %v10244_v16, %v10534_v62  ;;  %v10623_v56 = vsel %vm13123_vm12, %v10500_v24, %v3223_v3  ;;  %vm13158_vm12 = vmmov %vm13152_vm1 }
 0x2eb   : > { %13124 = vst [vmem:[#allocation68_spill] sm:$0xff] %v10623_v56  ;;  %v2995_v25 = vmul.f32 %v10619_v12, %v10498_v42  ;;  %v3236_v15 = vmul.f32 %v10623_v56, %v10508_v45  ;;  %v10641_v24 = vmax.f32 %v1688_v22, 0.0 }
 0x2ec   : > { %v2768_v48 = vpack.c.bf16 %v2750_v29, %v2746_v57  ;;  %v3240_v29 = vmul.f32 %v10623_v56, %v10498_v42  ;;  %v1684_v57 = vadd.f32 %v10395_v18, %v10157_v6  ;;  %v3242_v18 = vmul.f32 %v10532_v30, %v10526_v47 }
 0x2ed   : > { %2304 = vrot.lane.b32.xlu0 %v2274_v58, %s9056_s22  ;;  %2076 = vrot.lane.b32.xlu1 %v1816_v44, %s9047_s10  ;;  %v2503_v58 = vmul.f32 %v10244_v16, %v10526_v47  ;;  %v2748_v44 = vmul.f32 %v10323_v8, %v10534_v62  ;;  %v3013_v26 = vpack.c.bf16 %v2995_v25, %v2991_v4 }
 0x2ee   : > { %v3258_v3 = vpack.c.bf16 %v3240_v29, %v3236_v15  ;;  %v1868_v22 = vmul.f32 %v10366_v49, %v10641_v24 }
 0x2f1   : > { %2308 = vrot.lane.b32.xlu0 %v2276_v21, %s9056_s22  ;;  %2080 = vrot.lane.b32.xlu1 %v1818_v52, %s9047_s10  ;;  %v2770_v21 = vpack.c.bf16 %v2752_v46, %v2748_v44  ;;  %v2521_v52 = vpack.c.bf16 %v2503_v58, %v2499_v10  ;;  %v10649_v46 = vmax.f32 %v1684_v57, 0.0  ;;  %v2993_v58 = vmul.f32 %v10330_v53, %v10534_v62 }
 0x2f2   : > { %v10657_v44 = vmax.f32 %v1741_v51, 0.0  ;;  %v3260_v10 = vpack.c.bf16 %v3242_v18, %v3238_v1  ;;  %v10681_v18 = vpop.permute.xlu0 %2545 }
 0x2f3   : > { %v1864_v29 = vmul.f32 %v10366_v49, %v10649_v46  ;;  %v1802_v25 = vmul.f32 %v10371_v40, %v10649_v46 }
 0x2f4   : > { %v1870_v15 = vmul.f32 %v10386_v31, %v10657_v44  ;;  %v1808_v51 = vmul.f32 %v10391_v7, %v10657_v44 }
 0x2f5   : > { %2798 = vrot.lane.b32.xlu0 %v2768_v48, %s9052_s18  ;;  %2549 = vrot.lane.b32.xlu1 %v2519_v27, %s9054_s20  ;;  %v2997_v48 = vmul.f32 %v10330_v53, %v10526_v47  ;;  %v1737_v27 = vadd.f32 %v10393_v17, %v10157_v6  ;;  %v1806_v17 = vmul.f32 %v10371_v40, %v10641_v24 }
 0x2f6   : > { %v1882_v57 = vpack.c.bf16 %v1868_v22, %v1864_v29  ;;  %v2504_v22 = vmul.f32 %v10427_v55, %v10649_v46 }
 0x2f7   : > { %v1819_v4 = vpack.c.bf16 %v1806_v17, %v1802_v25  ;;  %v2265_v17 = vmul.f32 %v10444_v19, %v10657_v44  ;;  %v2510_v25 = vmul.f32 %v10449_v34, %v10657_v44 }
 0x2f9   : > { %2802 = vrot.lane.b32.xlu0 %v2770_v21, %s9052_s18  ;;  %2553 = vrot.lane.b32.xlu1 %v2521_v52, %s9054_s20  ;;  %v3015_v21 = vpack.c.bf16 %v2997_v48, %v2993_v58  ;;  %v10663_v52 = vmax.f32 %v1737_v27, 0.0  ;;  %v2263_v27 = vmul.f32 %v10422_v32, %v10641_v24  ;;  %v2508_v58 = vmul.f32 %v10427_v55, %v10641_v24 }
 0x2fb   : > { %v2522_v29 = vpack.c.bf16 %v2508_v58, %v2504_v22  ;;  %v2753_v58 = vmul.f32 %v10466_v14, %v10649_v46  ;;  %v2998_v22 = vmul.f32 %v10471_v36, %v10649_v46 }
 0x2fd   : > { %3288 = vrot.lane.b32.xlu0 %v3258_v3, %s9048_s11  ;;  %3043 = vrot.lane.b32.xlu1 %v3013_v26, %s9050_s16  ;;  %v1866_v3 = vmul.f32 %v10386_v31, %v10663_v52  ;;  %v1804_v26 = vmul.f32 %v10391_v7, %v10663_v52 }
 0x2ff   : > { %v1884_v48 = vpack.c.bf16 %v1870_v15, %v1866_v3  ;;  %v1821_v1 = vpack.c.bf16 %v1808_v51, %v1804_v26  ;;  %v3466_v15 = vpop.permute.xlu0 %3465  ;;  %v2506_v51 = vmul.f32 %v10449_v34, %v10663_v52  ;;  %v2757_v26 = vmul.f32 %v10466_v14, %v10641_v24 }
 0x301   : > { %3292 = vrot.lane.b32.xlu0 %v3260_v10, %s9048_s11  ;;  %3047 = vrot.lane.b32.xlu1 %v3015_v21, %s9050_s16  ;;  %v2259_v10 = vmul.f32 %v10422_v32, %v10649_v46 }
 0x303   : > { %v2277_v21 = vpack.c.bf16 %v2263_v27, %v2259_v10  ;;  %v2524_v27 = vpack.c.bf16 %v2510_v25, %v2506_v51  ;;  %v1686_v10 = vadd.f32 %v10399_v23, %v10157_v6  ;;  %v1743_v25 = vadd.f32 %v10409_v60, %v10155_v61 }
 0x304   : > { %v3004_v23 = vmul.f32 %v10494_v38, %v10657_v44  ;;  %v3000_v60 = vmul.f32 %v10494_v38, %v10663_v52 }
 0x305   : > { %1915 = vrot.lane.b32.xlu0 %v1882_v57, %s9055_s21  ;;  %2082 = vrot.lane.b32.xlu1 %v1819_v4, %s9047_s10  ;;  %v10697_v57 = vpop.permute.xlu1 %3463  ;;  %v2261_v4 = vmul.f32 %v10444_v19, %v10663_v52 }
 0x306   : > { %13125 = vst [vmem:[#allocation69_spill] sm:$0xff] %v10697_v57  ;;  %v3479_v14 = vmul.f32 0.0, %v10697_v57 }
 0x307   : > { %v2279_v3 = vpack.c.bf16 %v2265_v17, %v2261_v4  ;;  %v10719_v17 = vpop.permute.xlu0 %3469 }
 0x308   : > { %13126 = vst [vmem:[#allocation70_spill] sm:$0xff] %v10719_v17 }
 0x309   : > { %1919 = vrot.lane.b32.xlu0 %v1884_v48, %s9055_s21  ;;  %2086 = vrot.lane.b32.xlu1 %v1821_v1, %s9047_s10  ;;  %v1690_v48 = vadd.f32 %v10411_v37, %v10155_v61  ;;  %v3002_v1 = vmul.f32 %v10471_v36, %v10641_v24  ;;  %v2771_v37 = vpack.c.bf16 %v2757_v26, %v2753_v58 }
 0x30a   : > { %v1739_v26 = vadd.f32 %v10397_v54, %v10157_v6  ;;  %v3018_v58 = vpack.c.bf16 %v3004_v23, %v3000_v60  ;;  %v3243_v54 = vmul.f32 %v10524_v41, %v10649_v46  ;;  %v3245_v60 = vmul.f32 %v10544_v13, %v10663_v52 }
 0x30b   : > { %v10725_v4 = vmax.f32 %v1690_v48, 0.0  ;;  %v3016_v51 = vpack.c.bf16 %v3002_v1, %v2998_v22  ;;  %v3247_v48 = vmul.f32 %v10524_v41, %v10641_v24  ;;  %v10741_v1 = vmax.f32 %v1743_v25, 0.0  ;;  %v10747_v6 = vpop.permute.xlu0 %3708 }
 0x30c   : > { %13127 = vst [vmem:[#allocation71_spill] sm:$0xff] %v10747_v6  ;;  %v3487_v41 = vmul.f32 %v10719_v17, %v10526_v47 }
 0x30d   : > { %2310 = vrot.lane.b32.xlu0 %v2277_v21, %s9056_s22  ;;  %2555 = vrot.lane.b32.xlu1 %v2522_v29, %s9054_s20  ;;  %v3468_v21 = vpop.permute.xlu1 %3467  ;;  %v2759_v29 = vmul.f32 %v10489_v11, %v10657_v44  ;;  %v1869_v22 = vmul.f32 %v10519_v35, %v10725_v4  ;;  %v3261_v25 = vpack.c.bf16 %v3247_v48, %v3243_v54 }
 0x30e   : > { %v10812_v36 = vsel %vm13134_vm9, %v3468_v21, %v10719_v17  ;;  %vm13170_vm9 = vmmov %vm13144_vm0 }
 0x311   : > { %2314 = vrot.lane.b32.xlu0 %v2279_v3, %s9056_s22  ;;  %2559 = vrot.lane.b32.xlu1 %v2524_v27, %s9054_s20  ;;  %v2755_v3 = vmul.f32 %v10489_v11, %v10663_v52  ;;  %v10734_v27 = vmax.f32 %v1686_v10, 0.0  ;;  %v10752_v10 = vmax.f32 %v1739_v26, 0.0  ;;  %v10766_v26 = vsel %vm13128_vm13, %v10697_v57, %v3466_v15  ;;  %vm13167_vm13 = vmmov %vm13152_vm1 }
 0x312   : > { %13129 = vst [vmem:[#allocation72_spill] sm:$0xff] %v10766_v26  ;;  %v3484_v54 = vmul.f32 %v10766_v26, %v10361_v28 }
 0x313   : > { %v2773_v61 = vpack.c.bf16 %v2759_v29, %v2755_v3  ;;  %v1865_v29 = vmul.f32 %v10519_v35, %v10734_v27  ;;  %v1871_v3 = vmul.f32 %v10164_v39, %v10741_v1  ;;  %v2262_v34 = vmul.f32 %v10216_v63, %v10752_v10 }
 0x315   : > { %2804 = vrot.lane.b32.xlu0 %v2771_v37, %s9052_s18  ;;  %3049 = vrot.lane.b32.xlu1 %v3016_v51, %s9050_s16  ;;  %v10745_v37 = vpop.permute.xlu1 %2794  ;;  %v3249_v51 = vmul.f32 %v10544_v13, %v10657_v44  ;;  %v1883_v23 = vpack.c.bf16 %v1869_v22, %v1865_v29 }
 0x317   : > { %v3263_v22 = vpack.c.bf16 %v3249_v51, %v3245_v60  ;;  %v1807_v51 = vmul.f32 %v10559_v2, %v10725_v4 }
 0x319   : > { %2808 = vrot.lane.b32.xlu0 %v2773_v61, %s9052_s18  ;;  %3053 = vrot.lane.b32.xlu1 %v3018_v58, %s9050_s16  ;;  %v1867_v61 = vmul.f32 %v10164_v39, %v10752_v10  ;;  %v10771_v48 = vpop.permute.xlu1 %3710  ;;  %v10773_v58 = vpop.permute.xlu0 %3712 }
 0x31b   : > { %v1885_v29 = vpack.c.bf16 %v1871_v3, %v1867_v61  ;;  %v1803_v61 = vmul.f32 %v10559_v2, %v10734_v27 }
 0x31d   : > { %3294 = vrot.lane.b32.xlu0 %v3261_v25, %s9048_s11  ;;  %1917 = vrot.lane.b32.xlu1 %v1883_v23, %s9055_s21  ;;  %v3480_v25 = vmul.f32 %v10766_v26, %v10353_v33  ;;  %v10782_v23 = vsel %vm13130_vm10, %v3466_v15, %v3468_v21  ;;  %v10784_v59 = vpop.permute.xlu0 %3039  ;;  %v10790_v3 = vpop.permute.xlu1 %3714  ;;  %vm13168_vm10 = vmmov %vm13152_vm1 }
 0x31e   : > { %13131 = vst [vmem:[#allocation73_spill] sm:$0xff] %v10782_v23  ;;  %13132 = vst [vmem:[#allocation74_spill] sm:$0xff] %v10784_v59  ;;  %v3485_v60 = vmul.f32 %v10782_v23, %v10498_v42  ;;  %v3481_v15 = vmul.f32 %v10782_v23, %v10508_v45 }
 0x31f   : > { %v3502_v13 = vpack.c.bf16 %v3484_v54, %v3480_v25  ;;  %v1820_v54 = vpack.c.bf16 %v1807_v51, %v1803_v61  ;;  %v3483_v51 = vmul.f32 %v10719_v17, %v10534_v62  ;;  %v3486_v61 = vmul.f32 %v10812_v36, %v10359_v43 }
 0x320   : > { %v3503_v25 = vpack.c.bf16 %v3485_v60, %v3481_v15 }
 0x321   : > { %3298 = vrot.lane.b32.xlu0 %v3263_v22, %s9048_s11  ;;  %1921 = vrot.lane.b32.xlu1 %v1885_v29, %s9055_s21  ;;  %v13133_v22 = vld [vmem:[#allocation5_spill] sm:$0xff]  ;;  %v1809_v29 = vmul.f32 %v10184_v50, %v10741_v1  ;;  %v10803_v38 = vpop.permute.xlu1 %3937  ;;  %v3505_v15 = vpack.c.bf16 %v3487_v41, %v3483_v51  ;;  %v3501_v41 = vpack.c.bf16 %v3479_v14, %v3479_v14  ;;  %v13139_v14 = vld [vmem:[#allocation6_spill] sm:$0xff] }
 0x322   : > { %13135 = vst [vmem:[#allocation5_spill] sm:$0xff] %v10812_v36 }
 0x325   : > { %3531 = vrot.lane.b32.xlu0 %v3502_v13, %s9045_s30  ;;  %4172 = vrot.lane.b32.xlu1 %v13133_v22, %s9049_s15  ;;  %v10805_v13 = vpop.permute.xlu0 %3939  ;;  %v1805_v22 = vmul.f32 %v10184_v50, %v10752_v10  ;;  %v10823_v11 = vpop.permute.xlu1 %3941  ;;  %v2754_v50 = vmul.f32 %v10594_v9, %v10734_v27 }
 0x327   : > { %v1822_v60 = vpack.c.bf16 %v1809_v29, %v1805_v22  ;;  %v13136_v29 = vld [vmem:[#allocation7_spill] sm:$0xff]  ;;  %v3492_v22 = vmul.f32 %v10766_v26, %v10641_v24 }
 0x329   : > { %2084 = vrot.lane.b32.xlu0 %v1820_v54, %s9047_s10  ;;  %3533 = vrot.lane.b32.xlu1 %v3503_v25, %s9045_s30  ;;  %v3482_v54 = vmul.f32 %v10812_v36, %v10373_v0  ;;  %v10825_v21 = vpop.permute.xlu0 %3943  ;;  %v10833_v51 = vpop.permute.xlu1 %3284 }
 0x32a   : > { %13137 = vst [vmem:[#allocation7_spill] sm:$0xff] %v10833_v51 }
 0x32b   : > { %v3504_v25 = vpack.c.bf16 %v3486_v61, %v3482_v54  ;;  %v3488_v61 = vmul.f32 %v10766_v26, %v10649_v46  ;;  %v13141_v26 = vld [vmem:[#allocation8_spill] sm:$0xff] }
 0x32d   : > { %2088 = vrot.lane.b32.xlu0 %v1822_v60, %s9047_s10  ;;  %3537 = vrot.lane.b32.xlu1 %v3505_v15, %s9045_s30  ;;  %v10835_v60 = vpop.permute.xlu0 %4166  ;;  %v13138_v15 = vld [vmem:[#allocation9_spill] sm:$0xff]  ;;  %v3506_v54 = vpack.c.bf16 %v3492_v22, %v3488_v61 }
 0x331   : > { %3535 = vrot.lane.b32.xlu0 %v3504_v25, %s9045_s30  ;;  %4395 = vrot.lane.b32.xlu1 %v13136_v29, %s9051_s17  ;;  %v2264_v25 = vmul.f32 %v10564_v20, %v10725_v4  ;;  %v10849_v29 = vsel %vm13140_vm11, %v10771_v48, %v10773_v58  ;;  %v10856_v57 = vpop.permute.xlu0 %4170  ;;  %vm1940_vm11 = vcmask 261120  }
 0x332   : > { %v3730_v22 = vmul.f32 %v10849_v29, %v10498_v42 }
 0x335   : > { %3529 = vrot.lane.b32.xlu0 %v3501_v41, %s9045_s30  ;;  %4399 = vrot.lane.b32.xlu1 %v13138_v15, %s9051_s17  ;;  %v2260_v41 = vmul.f32 %v10564_v20, %v10734_v27  ;;  %v10854_v15 = vpop.permute.xlu1 %4168  ;;  %v3494_v20 = vmul.f32 %v10812_v36, %v10657_v44 }
 0x337   : > { %v2278_v61 = vpack.c.bf16 %v2264_v25, %v2260_v41  ;;  %v3732_v25 = vmul.f32 %v10790_v3, %v10526_v47 }
 0x339   : > { %4397 = vrot.lane.b32.xlu0 %v13139_v14, %s9051_s17  ;;  %3539 = vrot.lane.b32.xlu1 %v3506_v54, %s9045_s30  ;;  %v2266_v14 = vmul.f32 %v10216_v63, %v10741_v1  ;;  %v3726_v54 = vmul.f32 %v10849_v29, %v10508_v45 }
 0x33b   : > { %v3748_v32 = vpack.c.bf16 %v3730_v22, %v3726_v54  ;;  %v2280_v41 = vpack.c.bf16 %v2266_v14, %v2262_v34  ;;  %v10884_v22 = vsel %vm13142_vm15, %v10747_v6, %v10771_v48  ;;  %vm13171_vm15 = vmmov %vm13152_vm1 }
 0x33c   : > { %13143 = vst [vmem:[#allocation9_spill] sm:$0xff] %v10884_v22  ;;  %v3725_v48 = vmul.f32 %v10884_v22, %v10353_v33 }
 0x33d   : > { %4401 = vrot.lane.b32.xlu0 %v13141_v26, %s9051_s17  ;;  %2312 = vrot.lane.b32.xlu1 %v2278_v61, %s9056_s22  ;;  %v3728_v26 = vmul.f32 %v10790_v3, %v10534_v62  ;;  %v3490_v61 = vmul.f32 %v10812_v36, %v10663_v52  ;;  %v2505_v36 = vmul.f32 %v10589_v5, %v10734_v27 }
 0x33f   : > { %v10869_v55 = vpop.permute.xlu0 %2074  ;;  %v1908_v19 = vpop.permute.xlu1 %1907  ;;  %v3750_v14 = vpack.c.bf16 %v3732_v25, %v3728_v26  ;;  %v3508_v63 = vpack.c.bf16 %v3494_v20, %v3490_v61  ;;  %v10903_v25 = vsel %vm13144_vm0, %v10773_v58, %v10790_v3  ;;  %vm13172_vm0 = vmmov %vm13152_vm1 }
 0x340   : > { %13145 = vst [vmem:[#allocation6_spill] sm:$0xff] %v10903_v25  ;;  %v3727_v58 = vmul.f32 %v10903_v25, %v10373_v0 }
 0x341   : > { %3778 = vrot.lane.b32.xlu0 %v3748_v32, %s9057_s23  ;;  %2316 = vrot.lane.b32.xlu1 %v2280_v41, %s9056_s22  ;;  %v2509_v32 = vmul.f32 %v10589_v5, %v10725_v4  ;;  %v3729_v41 = vmul.f32 %v10884_v22, %v10361_v28  ;;  %v2507_v5 = vmul.f32 %v10244_v16, %v10752_v10 }
 0x343   : > { %v10886_v54 = vpop.permute.xlu0 %2078  ;;  %v10888_v34 = vpop.permute.xlu1 %1911  ;;  %v2523_v61 = vpack.c.bf16 %v2509_v32, %v2505_v36  ;;  %v3747_v31 = vpack.c.bf16 %v3729_v41, %v3725_v48  ;;  %v3724_v41 = vmul.f32 0.0, %v10747_v6  ;;  %v3945_v6 = vsel %vm412_vm5, %v10803_v38, %v10805_v13 }
 0x344   : > { %v3954_v40 = vmul.f32 %v3945_v6, %v10353_v33  ;;  %v3958_v2 = vmul.f32 %v3945_v6, %v10361_v28 }
 0x345   : > { %3782 = vrot.lane.b32.xlu0 %v3750_v14, %s9057_s23  ;;  %3543 = vrot.lane.b32.xlu1 %v3508_v63, %s9045_s30  ;;  %v2511_v14 = vmul.f32 %v10244_v16, %v10741_v1  ;;  %v3731_v63 = vmul.f32 %v10903_v25, %v10359_v43  ;;  %v13147_v16 = vld [vmem:[#allocation11_spill] sm:$0xff] }
 0x347   : > { %v10905_v26 = vpop.permute.xlu0 %2547  ;;  %v10907_v20 = vpop.permute.xlu1 %2302  ;;  %v2525_v32 = vpack.c.bf16 %v2511_v14, %v2507_v5  ;;  %v3749_v39 = vpack.c.bf16 %v3731_v63, %v3727_v58  ;;  %v3737_v14 = vmul.f32 %v10884_v22, %v10641_v24  ;;  %v13149_v63 = vld [vmem:[#allocation13_spill] sm:$0xff]  ;;  %v13150_v58 = vld [vmem:[#allocation10_spill] sm:$0xff] }
 0x349   : > { %2557 = vrot.lane.b32.xlu0 %v2523_v61, %s9054_s20  ;;  %3776 = vrot.lane.b32.xlu1 %v3747_v31, %s9057_s23  ;;  %v3746_v31 = vpack.c.bf16 %v3724_v41, %v3724_v41 }
 0x34b   : > { %v10919_v35 = vpop.permute.xlu0 %2551  ;;  %v10921_v36 = vpop.permute.xlu1 %2306 }
 0x34d   : > { %2561 = vrot.lane.b32.xlu0 %v2525_v32, %s9054_s20  ;;  %3780 = vrot.lane.b32.xlu1 %v3749_v39, %s9057_s23  ;;  %v3733_v39 = vmul.f32 %v10884_v22, %v10649_v46 }
 0x34f   : > { %v10926_v48 = vpop.permute.xlu0 %3041  ;;  %v10928_v61 = vpop.permute.xlu1 %2796  ;;  %v3751_v41 = vpack.c.bf16 %v3737_v14, %v3733_v39  ;;  %v3735_v14 = vmul.f32 %v10903_v25, %v10663_v52  ;;  %v13155_v39 = vld [vmem:[#allocation12_spill] sm:$0xff] }
 0x350   : > { %13146 = vst [vmem:[#allocation8_spill] sm:$0xff] %v10926_v48  ;;  %v8981_v48 = vld [vmem:[%s12879_s4 + $0x10] sm:$0xff]  }
 0x351   : > { %4624 = vrot.lane.b32.xlu0 %v13147_v16, %s9053_s19  ;;  %3774 = vrot.lane.b32.xlu1 %v3746_v31, %s9057_s23  ;;  %v3739_v31 = vmul.f32 %v10903_v25, %v10657_v44 }
 0x353   : > { %v10933_v49 = vpop.permute.xlu0 %3045  ;;  %v10935_v5 = vpop.permute.xlu1 %2800 }
 0x354   : > { %13148 = vst [vmem:[#allocation11_spill] sm:$0xff] %v10933_v49 }
 0x355   : > { %4628 = vrot.lane.b32.xlu0 %v13149_v63, %s9053_s19  ;;  %4626 = vrot.lane.b32.xlu1 %v13150_v58, %s9053_s19  ;;  %v2758_v63 = vmul.f32 %v10594_v9, %v10725_v4  ;;  %v13153_v58 = vld [vmem:[#allocation40_spill] sm:$0xff]  ;;  %v10978_v9 = vsel %vm412_vm5, %v10805_v13, %v10823_v11 }
 0x356   : > { %v1924_v22 = vsel %vm13154_vm4, %v13153_v58, %v1908_v19 }
 0x357   : > { %v1910_v32 = vpop.permute.xlu0 %1909  ;;  %v10945_v16 = vpop.permute.xlu1 %3286  ;;  %v2772_v25 = vpack.c.bf16 %v2758_v63, %v2754_v50  ;;  %v2756_v50 = vmul.f32 %v10323_v8, %v10752_v10 }
 0x358   : > { %13151 = vst [vmem:[#allocation13_spill] sm:$0xff] %v10945_v16  ;;  %v1925_v7 = vsel %vm13152_vm1, %v1908_v19, %v1910_v32  ;;  %v3947_v19 = vsel %vm412_vm5, %v10823_v11, %v10825_v21  ;;  %v11032_v16 = vsel %vm419_vm7, %v10854_v15, %v10856_v57  ;;  %vm13174_vm1 = vmmov %vm13170_vm9 }
 0x359   : > { %3784 = vrot.lane.b32.xlu0 %v3751_v41, %s9057_s23  ;;  %1947 = vmatprep.subr.bf16.mxu0 %v1925_v7  ;;  %v3753_v7 = vpack.c.bf16 %v3739_v31, %v3735_v14  ;;  %v1926_v31 = vsel %vm13158_vm12, %v1910_v32, %v10888_v34  ;;  %v3976_v14 = vpack.c.bf16 %v3958_v2, %v3954_v40  ;;  %vm13176_vm4 = vmmov %vm13174_vm1 }
 0x35a   : > { %4630 = vrot.lane.b32.xlu1 %v13155_v39, %s9053_s19  ;;  %1948 = vmatpush1.bf16.msra.mxu0 %v1924_v22  ;;  %v2760_v22 = vmul.f32 %v10323_v8, %v10741_v1  ;;  %v3956_v11 = vmul.f32 %v3947_v19, %v10373_v0  ;;  %v3960_v13 = vmul.f32 %v3947_v19, %v10359_v43  ;;  %vm13179_vm12 = vmmov %vm13174_vm1 }
 0x35b   : > { %v1914_v51 = vpop.permute.xlu0 %1913  ;;  %v10966_v41 = vpop.permute.xlu1 %3290  ;;  %v3003_v2 = vmul.f32 %v10619_v12, %v10725_v4  ;;  %v3957_v8 = vmul.f32 %v10825_v21, %v10534_v62  ;;  %13159 = vst [vmem:[#allocation40_spill] sm:$0xff] %v11032_v16 }
 0x35c   : > { %13156 = vst [vmem:[#allocation10_spill] sm:$0xff] %v10966_v41  ;;  %v1927_v39 = vsel %vm13157_vm6, %v10888_v34, %v1914_v51  ;;  %v3959_v34 = vmul.f32 %v10978_v9, %v10498_v42  ;;  %v3978_v40 = vpack.c.bf16 %v3960_v13, %v3956_v11  ;;  %vm13178_vm6 = vmmov %vm13174_vm1 }
 0x35d   : > { %3788 = vrot.lane.b32.xlu0 %v3753_v7, %s9057_s23  ;;  %2000 = vmatprep.subr.bf16.mxu1 %v1927_v39  ;;  %v3955_v7 = vmul.f32 %v10978_v9, %v10508_v45 }
 0x35e   : > { %2806 = vrot.lane.b32.xlu1 %v2772_v25, %s9052_s18  ;;  %2001 = vmatpush1.bf16.msra.mxu1 %v1926_v31  ;;  %v2774_v25 = vpack.c.bf16 %v2760_v22, %v2756_v50  ;;  %v3961_v22 = vmul.f32 %v10825_v21, %v10526_v47  ;;  %v2999_v50 = vmul.f32 %v10619_v12, %v10734_v27 }
 0x35f   : > { %v10986_v51 = vpop.permute.xlu0 %2304  ;;  %v10988_v63 = vpop.permute.xlu1 %2076  ;;  %v3977_v31 = vpack.c.bf16 %v3959_v34, %v3955_v7  ;;  %v3005_v7 = vmul.f32 %v10330_v53, %v10741_v1  ;;  %v3962_v34 = vmul.f32 %v3945_v6, %v10649_v46 }
 0x360   : > { %v3017_v13 = vpack.c.bf16 %v3003_v2, %v2999_v50  ;;  %v3979_v41 = vpack.c.bf16 %v3961_v22, %v3957_v8  ;;  %v3968_v22 = vmul.f32 %v3947_v19, %v10657_v44 }
 0x361   : > { %4005 = vrot.lane.b32.xlu0 %v3976_v14, %s9066_s28 }
 0x362   : > { %2810 = vrot.lane.b32.xlu1 %v2774_v25, %s9052_s18  ;;  %v3966_v25 = vmul.f32 %v3945_v6, %v10641_v24  ;;  %v3964_v6 = vmul.f32 %v3947_v19, %v10663_v52 }
 0x363   : > { %v10998_v32 = vpop.permute.xlu0 %2308  ;;  %v11000_v39 = vpop.permute.xlu1 %2080 }
 0x364   : > { %v3980_v8 = vpack.c.bf16 %v3966_v25, %v3962_v34 }
 0x365   : > { %4009 = vrot.lane.b32.xlu0 %v3978_v40, %s9066_s28  ;;  %v3001_v40 = vmul.f32 %v10330_v53, %v10752_v10 }
 0x366   : > { %4007 = vrot.lane.b32.xlu1 %v3977_v31, %s9066_s28  ;;  %v3953_v31 = vmul.f32 0.0, %v10803_v38 }
 0x367   : > { %v11012_v14 = vpop.permute.xlu0 %2798  ;;  %v11014_v11 = vpop.permute.xlu1 %2549  ;;  %v3019_v50 = vpack.c.bf16 %v3005_v7, %v3001_v40  ;;  %v4188_v7 = vmul.f32 %v11032_v16, %v10498_v42  ;;  %v3982_v40 = vpack.c.bf16 %v3968_v22, %v3964_v6 }
 0x368   : > { %v3975_v38 = vpack.c.bf16 %v3953_v31, %v3953_v31 }
 0x369   : > { %3051 = vrot.lane.b32.xlu0 %v3017_v13, %s9050_s16  ;;  %v4184_v13 = vmul.f32 %v11032_v16, %v10508_v45 }
 0x36a   : > { %4011 = vrot.lane.b32.xlu1 %v3979_v41, %s9066_s28  ;;  %v11039_v41 = vsel %vm419_vm7, %v10835_v60, %v10854_v15 }
 0x36b   : > { %v11025_v12 = vpop.permute.xlu0 %2802  ;;  %v11027_v2 = vpop.permute.xlu1 %2553  ;;  %v4183_v19 = vmul.f32 %v11039_v41, %v10353_v33  ;;  %v4187_v15 = vmul.f32 %v11039_v41, %v10361_v28 }
 0x36d   : > { %3055 = vrot.lane.b32.xlu0 %v3019_v50, %s9050_s16  ;;  %v4206_v50 = vpack.c.bf16 %v4188_v7, %v4184_v13  ;;  %v4205_v53 = vpack.c.bf16 %v4187_v15, %v4183_v19 }
 0x36e   : > { %4013 = vrot.lane.b32.xlu1 %v3980_v8, %s9066_s28 }
 0x36f   : > { %v11047_v34 = vpop.permute.xlu0 %3288  ;;  %v11049_v25 = vpop.permute.xlu1 %3043 }
 0x370   : > { %13160 = vst [vmem:[#allocation12_spill] sm:$0xff] %v11047_v34  ;;  %13161 = vst [vmem:[#allocation75_spill] sm:$0xff] %v11049_v25 }
 0x371   : > { %4003 = vrot.lane.b32.xlu0 %v3975_v38, %s9066_s28 }
 0x372   : > { %4017 = vrot.lane.b32.xlu1 %v3982_v40, %s9066_s28 }
 0x373   : > { %v11057_v31 = vpop.permute.xlu0 %3292  ;;  %v11059_v8 = vpop.permute.xlu1 %3047 }
 0x374   : > { %13162 = vst [vmem:[#allocation76_spill] sm:$0xff] %v11057_v31  ;;  %13163 = vst [vmem:[#allocation77_spill] sm:$0xff] %v11059_v8 }
 0x375   : > { %4236 = vrot.lane.b32.xlu0 %v4206_v50, %s9067_s29 }
 0x376   : > { %4234 = vrot.lane.b32.xlu1 %v4205_v53, %s9067_s29 }
 0x377   : > { %v1916_v34 = vpop.permute.xlu0 %1915  ;;  %v2083_v16 = vpop.permute.xlu1 %2082 }
 0x378   : > { %v1928_v8 = vsel %vm13168_vm10, %v13153_v58, %v1916_v34  ;;  %vm13181_vm10 = vcmask 580608  }
 0x37b   : > { %v1920_v49 = vpop.permute.xlu0 %1919  ;;  %v11063_v59 = vpop.permute.xlu1 %2086 }
 0x37f   : > { %v11065_v6 = vpop.permute.xlu0 %2310  ;;  %v11067_v22 = vpop.permute.xlu1 %2555 }
 0x383   : > { %v11069_v38 = vpop.permute.xlu0 %2314  ;;  %v11071_v13 = vpop.permute.xlu1 %2559 }
 0x387   : > { %v11073_v7 = vpop.permute.xlu0 %2804  ;;  %v11075_v19 = vpop.permute.xlu1 %3049 }
 0x388   : > { %13164 = vst [vmem:[#allocation78_spill] sm:$0xff] %v11075_v19 }
 0x38b   : > { %v11077_v15 = vpop.permute.xlu0 %2808  ;;  %v11079_v53 = vpop.permute.xlu1 %3053 }
 0x38c   : > { %13165 = vst [vmem:[#allocation79_spill] sm:$0xff] %v11079_v53  ;;  %v2091_v53 = vsel %vm13170_vm9, %v10869_v55, %v10988_v63  ;;  %vm13182_vm9 = vmmov %vm13174_vm1 }
 0x38f   : > { %v11081_v40 = vpop.permute.xlu0 %3294  ;;  %v1918_v50 = vpop.permute.xlu1 %1917 }
 0x390   : > { %13166 = vst [vmem:[#allocation80_spill] sm:$0xff] %v11081_v40  ;;  %v1929_v31 = vsel %vm13167_vm13, %v1916_v34, %v1918_v50  ;;  %v1930_v58 = vsel %vm13172_vm0, %v1918_v50, %v1920_v49  ;;  %v13173_v34 = vld [vmem:[#allocation41_spill] sm:$0xff]  ;;  %vm13180_vm13 = vmmov %vm13174_vm1 }
 0x391   : > { %1949 = vmatprep.subr.bf16.mxu0 %v1929_v31  ;;  %v2090_v31 = vsel %vm13174_vm1, %v13173_v34, %v10869_v55  ;;  %v8982_v50 = vld [vmem:[%s12879_s4 + $0x18] sm:$0xff]   ;;  %vm13185_vm0 = vmmov %vm13181_vm10 }
 0x392   : > { %1950 = vmatpush1.bf16.msra.mxu0 %v1928_v8 }
 0x393   : > { %v11089_v25 = vpop.permute.xlu0 %3298  ;;  %2112 = vmatprep.subr.bf16.mxu0 %v2091_v53  ;;  %v1922_v40 = vpop.permute.xlu1 %1921  ;;  %v2093_v53 = vsel %vm13176_vm4, %v10886_v54, %v11000_v39  ;;  %v2092_v39 = vsel %vm13178_vm6, %v10988_v63, %v10886_v54  ;;  %v3248_v63 = vmul.f32 %v10623_v56, %v10725_v4  ;;  %vm13189_vm4 = vmmov %vm13185_vm0  ;;  %vm13190_vm6 = vcmask 990208  }
 0x394   : > { %13169 = vst [vmem:[#allocation81_spill] sm:$0xff] %v11089_v25  ;;  %v1931_v19 = vsel %vm13171_vm15, %v1920_v49, %v1922_v40  ;;  %v13177_v40 = vmov 0   ;;  %vm13184_vm15 = vmmov %vm13174_vm1 }
 0x395   : > { %8076 = vmatmul.mubr.msk.bf16.vlgmr.msra.gmra.mrb[8].mxu0 %vm1940_vm11, %v8981_v48  ;;  %2002 = vmatprep.subr.bf16.mxu1 %v1931_v19  ;;  %vm13188_vm1 = vmmov %vm13185_vm0 }
 0x396   : > { %2003 = vmatpush1.bf16.msra.mxu1 %v1930_v58  ;;  %2113 = vmatpush1.bf16.msra.mxu0 %v2090_v31 }
 0x397   : > { %v11100_v8 = vpop.permute.xlu0 %3531  ;;  %2165 = vmatprep.subr.bf16.mxu1 %v2093_v53  ;;  %v11105_v25 = vpop.permute.xlu1 %4172  ;;  %1989 = vmatprep.mubr.bf16.mxu0 %v13177_v40 }
 0x398   : > { %13175 = vst [vmem:[#allocation41_spill] sm:$0xff] %v11100_v8  ;;  %v11111_v49 = vsel %vm419_vm7, %v10856_v57, %v11105_v25  ;;  %v4186_v55 = vmul.f32 %v11105_v25, %v10534_v62  ;;  %v4190_v19 = vmul.f32 %v11105_v25, %v10526_v47 }
 0x399   : > { %8078 = vmatmul.mubr.msk.bf16.vlgmr.msra.gmra.mrb[8].mxu1 %vm1940_vm11, %v8981_v48  ;;  %v4185_v57 = vmul.f32 %v11111_v49, %v10373_v0  ;;  %v4189_v58 = vmul.f32 %v11111_v49, %v10359_v43 }
 0x39a   : > { %2166 = vmatpush1.bf16.msra.mxu1 %v2092_v39  ;;  %v4208_v53 = vpack.c.bf16 %v4190_v19, %v4186_v55  ;;  %2042 = vmatprep.mubr.bf16.mxu1 %v13177_v40  ;;  %v2094_v55 = vsel %vm13180_vm13, %v13173_v34, %v2083_v16  ;;  %v3244_v19 = vmul.f32 %v10623_v56, %v10734_v27  ;;  %v13183_v34 = vld [vmem:[#allocation22_spill] sm:$0xff]  ;;  %vm13193_vm13 = vmmov %vm13185_vm0 }
 0x39b   : > { %v2085_v31 = vpop.permute.xlu0 %2084  ;;  %v11129_v48 = vpop.permute.xlu1 %3533  ;;  %v4207_v54 = vpack.c.bf16 %v4189_v58, %v4185_v57  ;;  %v2320_v57 = vsel %vm13181_vm10, %v10907_v20, %v10986_v51  ;;  %vm13194_vm10 = vmmov %vm13185_vm0 }
 0x39c   : > { %v2095_v8 = vsel %vm13179_vm12, %v2083_v16, %v2085_v31  ;;  %4240 = vrot.lane.b32.xlu0 %v4208_v53, %s9067_s29  ;;  %v3262_v53 = vpack.c.bf16 %v3248_v63, %v3244_v19  ;;  %v3250_v16 = vmul.f32 %v10532_v30, %v10741_v1  ;;  %v3246_v63 = vmul.f32 %v10532_v30, %v10752_v10  ;;  %vm13192_vm12 = vmmov %vm13190_vm6 }
 0x39d   : > { %2114 = vmatprep.subr.bf16.mxu0 %v2095_v8  ;;  %8077 = vmatmul.mubr.msk.bf16.gmra.mrb[12].mxu0 %vm1940_vm11, %v8982_v50  ;;  %v4191_v19 = vmul.f32 %v11039_v41, %v10649_v46 }
 0x39e   : > { %4238 = vrot.lane.b32.xlu1 %v4207_v54, %s9067_s29  ;;  %2115 = vmatpush1.bf16.msra.mxu0 %v2094_v55  ;;  %v2096_v54 = vsel %vm13184_vm15, %v2085_v31, %v11063_v59  ;;  %v8983_v55 = vld [vmem:[%s12879_s4] sm:$0xff]   ;;  %v4182_v31 = vmul.f32 0.0, %v10835_v60  ;;  %v3493_v60 = vmul.f32 %v10782_v23, %v10725_v4  ;;  %vm13197_vm15 = vmmov %vm13190_vm6 }
 0x39f   : > { %v2089_v39 = vpop.permute.xlu0 %2088  ;;  %2144 = vmatprep.mubr.bf16.mxu0 %v13177_v40  ;;  %2341 = vmatprep.subr.bf16.mxu0 %v2320_v57  ;;  %v11145_v8 = vpop.permute.xlu1 %3537 }
 0x3a0   : > { %v2097_v58 = vsel %vm13182_vm9, %v11063_v59, %v2089_v39  ;;  %5020 = vrot.lane.b32.xlu0 %v13183_v34, %s9068_s26  ;;  %v4195_v39 = vmul.f32 %v11039_v41, %v10641_v24  ;;  %v2322_v59 = vsel %vm13185_vm0, %v10921_v36, %v10998_v32  ;;  %v13187_v41 = vld [vmem:[#allocation54_spill] sm:$0xff]  ;;  %vm13195_vm9 = vcmask 531456  }
 0x3a1   : > { %2167 = vmatprep.subr.bf16.mxu1 %v2097_v58  ;;  %8079 = vmatmul.mubr.msk.bf16.gmra.mrb[12].mxu1 %vm1940_vm11, %v8982_v50  ;;  %v3264_v58 = vpack.c.bf16 %v3250_v16, %v3246_v63  ;;  %v2319_v34 = vsel %vm13188_vm1, %v13187_v41, %v10907_v20  ;;  %v4204_v16 = vpack.c.bf16 %v4182_v31, %v4182_v31  ;;  %vm13198_vm1 = vmmov %vm13185_vm0 }
 0x3a2   : > { %3296 = vrot.lane.b32.xlu1 %v3262_v53, %s9048_s11  ;;  %2168 = vmatpush1.bf16.msra.mxu1 %v2096_v54  ;;  %v13186_v53 = vld [vmem:[#allocation26_spill] sm:$0xff]  ;;  %v4209_v54 = vpack.c.bf16 %v4195_v39, %v4191_v19  ;;  %v2321_v20 = vsel %vm13189_vm4, %v10986_v51, %v10921_v36  ;;  %v8984_v19 = vld [vmem:[%s12879_s4 + $0x8] sm:$0xff]   ;;  %v3491_v36 = vmul.f32 %v10719_v17, %v10752_v10  ;;  %vm13199_vm4 = vmmov %vm13195_vm9 }
 0x3a3   : > { %v11166_v50 = vpop.permute.xlu0 %3535  ;;  %2197 = vmatprep.mubr.bf16.mxu1 %v13177_v40  ;;  %2394 = vmatprep.subr.bf16.mxu1 %v2322_v59  ;;  %v11173_v57 = vpop.permute.xlu1 %4395  ;;  %v3489_v59 = vmul.f32 %v10782_v23, %v10734_v27 }
 0x3a4   : > { %5024 = vrot.lane.b32.xlu0 %v13186_v53, %s9068_s26 }
 0x3a5   : > { %8082 = vmatmul.mubr.msk.bf16.vlgmr.msra.gmra.mrb[8].mxu0 %vm1940_vm11, %v8983_v55  ;;  %v3507_v31 = vpack.c.bf16 %v3493_v60, %v3489_v59  ;;  %v4193_v60 = vmul.f32 %v11111_v49, %v10663_v52 }
 0x3a6   : > { %3300 = vrot.lane.b32.xlu1 %v3264_v58, %s9048_s11  ;;  %2342 = vmatpush1.bf16.msra.mxu0 %v2319_v34  ;;  %v3495_v58 = vmul.f32 %v10719_v17, %v10741_v1 }
 0x3a7   : > { %v11182_v32 = vpop.permute.xlu0 %3529  ;;  %2154 = vmatprep.mubr.bf16.mxu0 %v13177_v40  ;;  %v4400_v63 = vpop.permute.xlu1 %4399 }
 0x3a8   : > { %4242 = vrot.lane.b32.xlu0 %v4209_v54, %s9067_s29  ;;  %v3509_v54 = vpack.c.bf16 %v3495_v58, %v3491_v36  ;;  %v8985_v36 = vld [vmem:[%s12879_s4 + $0x20] sm:$0xff]  }
 0x3a9   : > { %8084 = vmatmul.mubr.msk.bf16.vlgmr.msra.gmra.mrb[8].mxu1 %vm1940_vm11, %v8983_v55  ;;  %v13191_v55 = vld [vmem:[#allocation23_spill] sm:$0xff] }
 0x3aa   : > { %4232 = vrot.lane.b32.xlu1 %v4204_v16, %s9067_s29  ;;  %2395 = vmatpush1.bf16.msra.mxu1 %v2321_v20  ;;  %v4197_v16 = vmul.f32 %v11111_v49, %v10657_v44  ;;  %v2323_v49 = vsel %vm13194_vm10, %v13187_v41, %v11065_v6  ;;  %vm13203_vm10 = vmmov %vm13199_vm4 }
 0x3ab   : > { %v4398_v39 = vpop.permute.xlu0 %4397  ;;  %2207 = vmatprep.mubr.bf16.mxu1 %v13177_v40  ;;  %v11201_v53 = vpop.permute.xlu1 %3539 }
 0x3ac   : > { %3541 = vrot.lane.b32.xlu0 %v3507_v31, %s9045_s30  ;;  %v11207_v51 = vsel %vm13190_vm6, %v4398_v39, %v4400_v63  ;;  %v11221_v59 = vsel %vm13192_vm12, %v11173_v57, %v4398_v39  ;;  %v2565_v39 = vsel %vm13195_vm9, %v10905_v26, %v11014_v11  ;;  %vm13200_vm6 = vmmov %vm13199_vm4 }
 0x3ad   : > { %8083 = vmatmul.mubr.msk.bf16.gmra.mrb[12].mxu0 %vm1940_vm11, %v8984_v19  ;;  %v4413_v31 = vmul.f32 %v11207_v51, %v10508_v45  ;;  %v4416_v17 = vmul.f32 %v11221_v59, %v10361_v28  ;;  %vm13201_vm12 = vmmov %vm13199_vm4 }
 0x3ae   : > { %5022 = vrot.lane.b32.xlu1 %v13191_v55, %s9068_s26  ;;  %2373 = vmatprep.mubr.bf16.mxu0 %v13177_v40  ;;  %v4417_v55 = vmul.f32 %v11207_v51, %v10498_v42  ;;  %vm13205_vm9 = vmmov %vm13199_vm4 }
 0x3af   : > { %v11212_v34 = vpop.permute.xlu0 %4401  ;;  %v2313_v20 = vpop.permute.xlu1 %2312 }
 0x3b0   : > { %3545 = vrot.lane.b32.xlu0 %v3509_v54, %s9045_s30  ;;  %v2324_v58 = vsel %vm13193_vm13, %v11065_v6, %v2313_v20  ;;  %v4412_v54 = vmul.f32 %v11221_v59, %v10353_v33  ;;  %v4211_v6 = vpack.c.bf16 %v4197_v16, %v4193_v60  ;;  %v11250_v41 = vsel %vm13197_vm15, %v4400_v63, %v11212_v34  ;;  %vm13202_vm13 = vmmov %vm13199_vm4 }
 0x3b1   : > { %8085 = vmatmul.mubr.msk.bf16.gmra.mrb[12].mxu1 %vm1940_vm11, %v8984_v19  ;;  %2343 = vmatprep.subr.bf16.mxu0 %v2324_v58  ;;  %v13196_v19 = vld [vmem:[#allocation25_spill] sm:$0xff]  ;;  %v4435_v30 = vpack.c.bf16 %v4417_v55, %v4413_v31  ;;  %v4419_v60 = vmul.f32 %v11212_v34, %v10526_v47  ;;  %v2325_v63 = vsel %vm13198_vm1, %v2313_v20, %v11069_v38  ;;  %v4411_v20 = vmul.f32 0.0, %v11173_v57  ;;  %vm13206_vm15 = vmmov %vm13199_vm4 }
 0x3b2   : > { %5026 = vrot.lane.b32.xlu1 %v13196_v19, %s9068_s26  ;;  %2344 = vmatpush1.bf16.msra.mxu0 %v2323_v49  ;;  %v4415_v49 = vmul.f32 %v11212_v34, %v10534_v62  ;;  %v2564_v16 = vsel %vm13199_vm4, %v10681_v18, %v10905_v26  ;;  %v4434_v55 = vpack.c.bf16 %v4416_v17, %v4412_v54  ;;  %v8986_v17 = vld [vmem:[%s12879_s4 + $0x28] sm:$0xff]  }
 0x3b3   : > { %v11246_v58 = vpop.permute.xlu0 %3778  ;;  %2586 = vmatprep.subr.bf16.mxu0 %v2565_v39  ;;  %v2317_v23 = vpop.permute.xlu1 %2316  ;;  %2426 = vmatprep.mubr.bf16.mxu1 %v13177_v40  ;;  %v4433_v57 = vpack.c.bf16 %v4411_v20, %v4411_v20 }
 0x3b4   : > { %4246 = vrot.lane.b32.xlu0 %v4211_v6, %s9067_s29  ;;  %v2326_v56 = vsel %vm13185_vm0, %v11069_v38, %v2317_v23  ;;  %v2567_v23 = vsel %vm13200_vm6, %v10919_v35, %v11027_v2  ;;  %v4418_v38 = vmul.f32 %v11250_v41, %v10359_v43  ;;  %v4437_v2 = vpack.c.bf16 %v4419_v60, %v4415_v49  ;;  %v13204_v6 = vld [vmem:[#allocation3_spill] sm:$0xff] }
 0x3b5   : > { %8092 = vmatmul.mubr.msk.bf16.vlgmr.msra.gmra.mrb[8].mxu0 %vm1940_vm11, %v8985_v36  ;;  %2396 = vmatprep.subr.bf16.mxu1 %v2326_v56  ;;  %v4414_v56 = vmul.f32 %v11250_v41, %v10373_v0  ;;  %v2814_v60 = vsel %vm369_vm3, %v10928_v61, %v11012_v14  ;;  %vm13210_vm0 = vcmask 1039360   ;;  %vm13223_vm6 = vcmask 465920  }
 0x3b6   : > { %4465 = vrot.lane.b32.xlu1 %v4435_v30, %s9069_s9  ;;  %2397 = vmatpush1.bf16.msra.mxu1 %v2325_v63  ;;  %v2566_v30 = vsel %vm13201_vm12, %v11014_v11, %v10919_v35  ;;  %v3738_v35 = vmul.f32 %v10849_v29, %v10725_v4  ;;  %v2568_v11 = vsel %vm13203_vm10, %v10681_v18, %v11067_v22  ;;  %vm13211_vm1 = vmmov %vm13210_vm0 }
 0x3b7   : > { %v11270_v31 = vpop.permute.xlu0 %3782  ;;  %2587 = vmatpush1.bf16.msra.mxu0 %v2564_v16  ;;  %2639 = vmatprep.subr.bf16.mxu1 %v2567_v23  ;;  %v11276_v26 = vpop.permute.xlu1 %3543  ;;  %v4436_v54 = vpack.c.bf16 %v4418_v38, %v4414_v56  ;;  %v3734_v63 = vmul.f32 %v10849_v29, %v10734_v27  ;;  %v8987_v56 = vld [vmem:[%s12879_s4 + $0x30] sm:$0xff]   ;;  %vm13212_vm4 = vmmov %vm13210_vm0 }
 0x3b8   : > { %4463 = vrot.lane.b32.xlu0 %v4434_v55, %s9069_s9  ;;  %2383 = vmatprep.mubr.bf16.mxu0 %v13177_v40  ;;  %vm13228_vm12 = vmmov %vm13223_vm6 }
 0x3b9   : > { %8094 = vmatmul.mubr.msk.bf16.vlgmr.msra.gmra.mrb[8].mxu1 %vm1940_vm11, %v8985_v36  ;;  %v3752_v18 = vpack.c.bf16 %v3738_v35, %v3734_v63  ;;  %vm13231_vm10 = vmmov %vm13223_vm6 }
 0x3ba   : > { %4469 = vrot.lane.b32.xlu1 %v4437_v2, %s9069_s9  ;;  %2640 = vmatpush1.bf16.msra.mxu1 %v2566_v30  ;;  %v2816_v2 = vsel %vm369_vm3, %v10935_v5, %v11025_v12  ;;  %v3736_v30 = vmul.f32 %v10790_v3, %v10752_v10  ;;  %v3963_v12 = vmul.f32 %v10978_v9, %v10734_v27 }
 0x3bb   : > { %v2558_v39 = vpop.permute.xlu0 %2557  ;;  %v11289_v19 = vpop.permute.xlu1 %3776  ;;  %2436 = vmatprep.mubr.bf16.mxu1 %v13177_v40 }
 0x3bc   : > { %v2569_v36 = vsel %vm13202_vm13, %v11067_v22, %v2558_v39  ;;  %4467 = vrot.lane.b32.xlu0 %v4436_v54, %s9069_s9  ;;  %v3740_v22 = vmul.f32 %v10790_v3, %v10741_v1  ;;  %v2570_v55 = vsel %vm13206_vm15, %v2558_v39, %v11071_v13  ;;  %v2813_v39 = vsel %vm369_vm3, %v10745_v37, %v10928_v61  ;;  %v13208_v61 = vld [vmem:[#allocation32_spill] sm:$0xff]  ;;  %vm13230_vm13 = vmmov %vm13223_vm6 }
 0x3bd   : > { %2588 = vmatprep.subr.bf16.mxu0 %v2569_v36  ;;  %8093 = vmatmul.mubr.msk.bf16.gmra.mrb[12].mxu0 %vm1940_vm11, %v8986_v17  ;;  %v3967_v54 = vmul.f32 %v10978_v9, %v10725_v4  ;;  %v8988_v9 = vld [vmem:[%s12879_s4 + $0x38] sm:$0xff]   ;;  %vm13240_vm15 = vmmov %vm13223_vm6 }
 0x3be   : > { %5250 = vrot.lane.b32.xlu1 %v13204_v6, %s9069_s9  ;;  %2589 = vmatpush1.bf16.msra.mxu0 %v2568_v11  ;;  %v3754_v20 = vpack.c.bf16 %v3740_v22, %v3736_v30  ;;  %v4420_v11 = vmul.f32 %v11221_v59, %v10649_v46  ;;  %v13209_v6 = vld [vmem:[#allocation30_spill] sm:$0xff] }
 0x3bf   : > { %v2562_v49 = vpop.permute.xlu0 %2561  ;;  %2835 = vmatprep.subr.bf16.mxu0 %v2814_v60  ;;  %v11308_v16 = vpop.permute.xlu1 %3780  ;;  %2618 = vmatprep.mubr.bf16.mxu0 %v13177_v40  ;;  %v3981_v63 = vpack.c.bf16 %v3967_v54, %v3963_v12 }
 0x3c0   : > { %v2571_v23 = vsel %vm13205_vm9, %v11071_v13, %v2562_v49  ;;  %4461 = vrot.lane.b32.xlu0 %v4433_v57, %s9069_s9  ;;  %v13207_v13 = vld [vmem:[#allocation29_spill] sm:$0xff]  ;;  %v4424_v57 = vmul.f32 %v11221_v59, %v10641_v24  ;;  %v2815_v49 = vsel %vm369_vm3, %v11012_v14, %v10935_v5  ;;  %v3965_v59 = vmul.f32 %v10825_v21, %v10752_v10  ;;  %vm13239_vm9 = vmmov %vm13223_vm6 }
 0x3c1   : > { %2641 = vmatprep.subr.bf16.mxu1 %v2571_v23  ;;  %8095 = vmatmul.mubr.msk.bf16.gmra.mrb[12].mxu1 %vm1940_vm11, %v8986_v17  ;;  %v3969_v23 = vmul.f32 %v10825_v21, %v10741_v1  ;;  %v4422_v14 = vmul.f32 %v11250_v41, %v10663_v52 }
 0x3c2   : > { %3786 = vrot.lane.b32.xlu1 %v3752_v18, %s9057_s23  ;;  %2642 = vmatpush1.bf16.msra.mxu1 %v2570_v55  ;;  %v4438_v5 = vpack.c.bf16 %v4424_v57, %v4420_v11  ;;  %v4426_v55 = vmul.f32 %v11250_v41, %v10657_v44  ;;  %v2817_v11 = vsel %vm369_vm3, %v10745_v37, %v11073_v7  ;;  %v13213_v57 = vld [vmem:[#allocation75_spill] sm:$0xff] }
 0x3c3   : > { %v11323_v38 = vpop.permute.xlu0 %4624  ;;  %2888 = vmatprep.subr.bf16.mxu1 %v2816_v2  ;;  %v11330_v17 = vpop.permute.xlu1 %3774  ;;  %2671 = vmatprep.mubr.bf16.mxu1 %v13177_v40 }
 0x3c4   : > { %5252 = vrot.lane.b32.xlu0 %v13207_v13, %s9069_s9  ;;  %v3983_v13 = vpack.c.bf16 %v3969_v23, %v3965_v59  ;;  %v4440_v12 = vpack.c.bf16 %v4426_v55, %v4422_v14 }
 0x3c5   : > { %8102 = vmatmul.mubr.msk.bf16.vlgmr.msra.gmra.mrb[8].mxu0 %vm1940_vm11, %v8987_v56 }
 0x3c6   : > { %3790 = vrot.lane.b32.xlu1 %v3754_v20, %s9057_s23  ;;  %2836 = vmatpush1.bf16.msra.mxu0 %v2813_v39 }
 0x3c7   : > { %v4629_v36 = vpop.permute.xlu0 %4628  ;;  %v4627_v35 = vpop.permute.xlu1 %4626  ;;  %2628 = vmatprep.mubr.bf16.mxu0 %v13177_v40 }
 0x3c8   : > { %5256 = vrot.lane.b32.xlu0 %v13208_v61, %s9069_s9  ;;  %v11367_v18 = vsel %vm13210_vm0, %v4627_v35, %v4629_v36  ;;  %v11379_v21 = vsel %vm13211_vm1, %v11323_v38, %v4627_v35  ;;  %v13214_v61 = vld [vmem:[#allocation8_spill] sm:$0xff]  ;;  %vm13243_vm0 = vmmov %vm13223_vm6 }
 0x3c9   : > { %8104 = vmatmul.mubr.msk.bf16.vlgmr.msra.gmra.mrb[8].mxu1 %vm1940_vm11, %v8987_v56  ;;  %v4642_v56 = vmul.f32 %v11367_v18, %v10508_v45  ;;  %v4646_v2 = vmul.f32 %v11367_v18, %v10498_v42  ;;  %v4641_v20 = vmul.f32 %v11379_v21, %v10353_v33  ;;  %v4645_v39 = vmul.f32 %v11379_v21, %v10361_v28  ;;  %vm13244_vm1 = vmmov %vm13243_vm0 }
 0x3ca   : > { %5254 = vrot.lane.b32.xlu1 %v13209_v6, %s9069_s9  ;;  %2889 = vmatpush1.bf16.msra.mxu1 %v2815_v49  ;;  %v3059_v6 = vsel %vm360_vm8, %v13214_v61, %v13213_v57  ;;  %v8989_v49 = vld [vmem:[%s12879_s4 + $0x40] sm:$0xff]  }
 0x3cb   : > { %v11360_v60 = vpop.permute.xlu0 %3784  ;;  %2681 = vmatprep.mubr.bf16.mxu1 %v13177_v40  ;;  %v4663_v59 = vpack.c.bf16 %v4645_v39, %v4641_v20  ;;  %v13216_v20 = vld [vmem:[#allocation77_spill] sm:$0xff]  ;;  %v13217_v39 = vld [vmem:[#allocation11_spill] sm:$0xff] }
 0x3cc   : > { %v11369_v22 = vpop.permute.xlu1 %4630  ;;  %4015 = vrot.lane.b32.xlu0 %v3981_v63, %s9066_s28  ;;  %v4664_v63 = vpack.c.bf16 %v4646_v2, %v4642_v56  ;;  %v13215_v56 = vld [vmem:[#allocation74_spill] sm:$0xff] }
 0x3cd   : > { %8103 = vmatmul.mubr.msk.bf16.gmra.mrb[12].mxu0 %vm1940_vm11, %v8988_v9  ;;  %v11399_v35 = vsel %vm13212_vm4, %v4629_v36, %v11369_v22  ;;  %v4648_v37 = vmul.f32 %v11369_v22, %v10526_v47  ;;  %v3058_v2 = vsel %vm360_vm8, %v13215_v56, %v13214_v61  ;;  %v8990_v61 = vld [vmem:[%s12879_s4 + $0x48] sm:$0xff]   ;;  %vm4708_vm4 = vcmask 7168  }
 0x3ce   : > { %4471 = vrot.lane.b32.xlu1 %v4438_v5, %s9069_s9  ;;  %2867 = vmatprep.mubr.bf16.mxu0 %v13177_v40  ;;  %v4643_v5 = vmul.f32 %v11399_v35, %v10373_v0  ;;  %v4647_v14 = vmul.f32 %v11399_v35, %v10359_v43 }
 0x3cf   : > { %v11387_v30 = vpop.permute.xlu0 %3788 }
 0x3d0   : > { %v2807_v41 = vpop.permute.xlu1 %2806  ;;  %4019 = vrot.lane.b32.xlu0 %v3983_v13, %s9066_s28 }
 0x3d1   : > { %v2818_v54 = vsel %vm369_vm3, %v11073_v7, %v2807_v41  ;;  %8105 = vmatmul.mubr.msk.bf16.gmra.mrb[12].mxu1 %vm1940_vm11, %v8988_v9  ;;  %v4644_v9 = vmul.f32 %v11369_v22, %v10534_v62  ;;  %v2819_v55 = vsel %vm369_vm3, %v2807_v41, %v11077_v15  ;;  %v3060_v41 = vsel %vm360_vm8, %v13213_v57, %v13217_v39 }
 0x3d2   : > { %2837 = vmatprep.subr.bf16.mxu0 %v2818_v54  ;;  %4475 = vrot.lane.b32.xlu1 %v4440_v12, %s9069_s9  ;;  %v3061_v12 = vsel %vm360_vm8, %v13217_v39, %v13216_v20  ;;  %v13224_v39 = vld [vmem:[#allocation79_spill] sm:$0xff] }
 0x3d3   : > { %2838 = vmatpush1.bf16.msra.mxu0 %v2817_v11  ;;  %v11412_v36 = vpop.permute.xlu0 %4005  ;;  %2920 = vmatprep.mubr.bf16.mxu1 %v13177_v40  ;;  %v4666_v54 = vpack.c.bf16 %v4648_v37, %v4644_v9  ;;  %v4640_v11 = vmul.f32 0.0, %v11323_v38  ;;  %v13218_v38 = vld [vmem:[#allocation78_spill] sm:$0xff]  ;;  %v13219_v9 = vld [vmem:[#allocation40_spill] sm:$0xff] }
 0x3d4   : > { %3080 = vmatprep.subr.bf16.mxu0 %v3059_v6  ;;  %v2811_v7 = vpop.permute.xlu1 %2810  ;;  %4694 = vrot.lane.b32.xlu0 %v4664_v63, %s9068_s26  ;;  %v4196_v37 = vmul.f32 %v13219_v9, %v10725_v4 }
 0x3d5   : > { %v2820_v23 = vsel %vm369_vm3, %v11077_v15, %v2811_v7  ;;  %v4665_v15 = vpack.c.bf16 %v4647_v14, %v4643_v5  ;;  %v4662_v57 = vpack.c.bf16 %v4640_v11, %v4640_v11  ;;  %v13220_v7 = vld [vmem:[#allocation4_spill] sm:$0xff]  ;;  %v4653_v5 = vmul.f32 %v11379_v21, %v10641_v24 }
 0x3d6   : > { %8112 = vmatmul.mubr.msk.bf16.vlgmr.msra.gmra.mrb[8].mxu0 %vm1940_vm11, %v8989_v49  ;;  %2890 = vmatprep.subr.bf16.mxu1 %v2820_v23  ;;  %v4649_v23 = vmul.f32 %v11379_v21, %v10649_v46  ;;  %v4194_v21 = vmul.f32 %v11105_v25, %v10752_v10  ;;  %v4198_v11 = vmul.f32 %v11105_v25, %v10741_v1 }
 0x3d7   : > { %4692 = vrot.lane.b32.xlu1 %v4663_v59, %s9068_s26  ;;  %2891 = vmatpush1.bf16.msra.mxu1 %v2819_v55  ;;  %v11433_v13 = vpop.permute.xlu0 %4009  ;;  %v3062_v59 = vsel %vm360_vm8, %v13215_v56, %v13218_v38  ;;  %v13221_v55 = vld [vmem:[#allocation12_spill] sm:$0xff]  ;;  %v13225_v56 = vld [vmem:[#allocation35_spill] sm:$0xff]  ;;  %v4651_v25 = vmul.f32 %v11399_v35, %v10663_v52 }
 0x3d8   : > { %3081 = vmatpush1.bf16.msra.mxu0 %v3058_v2  ;;  %3133 = vmatprep.subr.bf16.mxu1 %v3061_v12  ;;  %v13222_v2 = vld [vmem:[#allocation13_spill] sm:$0xff] }
 0x3d9   : > { %4698 = vrot.lane.b32.xlu0 %v4666_v54, %s9068_s26  ;;  %2877 = vmatprep.mubr.bf16.mxu0 %v13177_v40  ;;  %v3304_v20 = vsel %vm13223_vm6, %v13222_v2, %v13221_v55  ;;  %vm4021_vm6 = vcmask 72704  }
 0x3da   : > { %8114 = vmatmul.mubr.msk.bf16.vlgmr.msra.gmra.mrb[8].mxu1 %vm1940_vm11, %v8989_v49  ;;  %v4192_v49 = vmul.f32 %v13219_v9, %v10734_v27  ;;  %v8991_v9 = vld [vmem:[%s12879_s4 + $0x50] sm:$0xff]  }
 0x3db   : > { %4696 = vrot.lane.b32.xlu1 %v4665_v15, %s9068_s26  ;;  %3134 = vmatpush1.bf16.msra.mxu1 %v3060_v41  ;;  %v3052_v6 = vpop.permute.xlu0 %3051  ;;  %v13226_v41 = vld [vmem:[#allocation76_spill] sm:$0xff] }
 0x3dc   : > { %v3063_v63 = vsel %vm360_vm8, %v13218_v38, %v3052_v6  ;;  %2930 = vmatprep.mubr.bf16.mxu1 %v13177_v40  ;;  %v4210_v54 = vpack.c.bf16 %v4196_v37, %v4192_v49  ;;  %v3064_v15 = vsel %vm360_vm8, %v3052_v6, %v13224_v39  ;;  %v13227_v38 = vld [vmem:[#allocation10_spill] sm:$0xff]  ;;  %v4667_v49 = vpack.c.bf16 %v4653_v5, %v4649_v23  ;;  %v13229_v37 = vld [vmem:[#allocation7_spill] sm:$0xff]  ;;  %v8992_v5 = vld [vmem:[%s12879_s4 + $0x58] sm:$0xff]  }
 0x3dd   : > { %5480 = vrot.lane.b32.xlu0 %v13220_v7, %s9067_s29  ;;  %3082 = vmatprep.subr.bf16.mxu0 %v3063_v63  ;;  %v3306_v63 = vsel %vm13228_vm12, %v13227_v38, %v13226_v41  ;;  %v4212_v6 = vpack.c.bf16 %v4198_v11, %v4194_v21  ;;  %v4421_v7 = vmul.f32 %v11207_v51, %v10734_v27  ;;  %v13237_v21 = vld [vmem:[#allocation38_spill] sm:$0xff]  ;;  %vm4479_vm12 = vcmask 56320  }
 0x3de   : > { %8113 = vmatmul.mubr.msk.bf16.gmra.mrb[12].mxu0 %vm1940_vm11, %v8990_v61  ;;  %v3305_v23 = vsel %vm13231_vm10, %v13221_v55, %v13227_v38  ;;  %v13233_v55 = vld [vmem:[#allocation36_spill] sm:$0xff]  ;;  %vm13259_vm10 = vcmask 1039360  }
 0x3df   : > { %4690 = vrot.lane.b32.xlu1 %v4662_v57, %s9068_s26  ;;  %3083 = vmatpush1.bf16.msra.mxu0 %v3062_v59  ;;  %v3056_v14 = vpop.permute.xlu0 %3055  ;;  %v3303_v57 = vsel %vm13230_vm13, %v13229_v37, %v13222_v2  ;;  %v4425_v59 = vmul.f32 %v11207_v51, %v10725_v4  ;;  %v13232_v51 = vld [vmem:[#allocation33_spill] sm:$0xff]  ;;  %v4423_v2 = vmul.f32 %v11212_v34, %v10752_v10  ;;  %vm4250_vm13 = vcmask 64512  }
 0x3e0   : > { %3325 = vmatprep.subr.bf16.mxu0 %v3304_v20  ;;  %v3065_v12 = vsel %vm360_vm8, %v13224_v39, %v3056_v14  ;;  %3112 = vmatprep.mubr.bf16.mxu0 %v13177_v40  ;;  %v4427_v20 = vmul.f32 %v11212_v34, %v10741_v1  ;;  %v11530_v34 = vpop.permute.xlu1 %4007 }
 0x3e1   : > { %5484 = vrot.lane.b32.xlu0 %v13225_v56, %s9067_s29  ;;  %3135 = vmatprep.subr.bf16.mxu1 %v3065_v12  ;;  %v4439_v14 = vpack.c.bf16 %v4425_v59, %v4421_v7  ;;  %v13234_v12 = vld [vmem:[#allocation37_spill] sm:$0xff]  ;;  %v13235_v56 = vld [vmem:[#allocation2_spill] sm:$0xff] }
 0x3e2   : > { %8115 = vmatmul.mubr.msk.bf16.gmra.mrb[12].mxu1 %vm1940_vm11, %v8990_v61  ;;  %v4655_v61 = vmul.f32 %v11399_v35, %v10657_v44  ;;  %v4441_v39 = vpack.c.bf16 %v4427_v20, %v4423_v2  ;;  %v13242_v2 = vld [vmem:[#allocation81_spill] sm:$0xff] }
 0x3e3   : > { %4244 = vrot.lane.b32.xlu1 %v4210_v54, %s9067_s29  ;;  %3136 = vmatpush1.bf16.msra.mxu1 %v3064_v15  ;;  %v13236_v54 = vld [vmem:[#allocation39_spill] sm:$0xff]  ;;  %v11542_v41 = vpop.permute.xlu0 %4003 }
 0x3e4   : > { %3378 = vmatprep.subr.bf16.mxu1 %v3306_v63  ;;  %3165 = vmatprep.mubr.bf16.mxu1 %v13177_v40  ;;  %v4669_v35 = vpack.c.bf16 %v4655_v61, %v4651_v25  ;;  %v11538_v11 = vpop.permute.xlu1 %4011 }
 0x3e5   : > { %4700 = vrot.lane.b32.xlu0 %v4667_v49, %s9068_s26 }
 0x3e6   : > { %8122 = vmatmul.mubr.msk.bf16.vlgmr.msra.gmra.mrb[8].mxu0 %vm1940_vm11, %v8991_v9 }
 0x3e7   : > { %4248 = vrot.lane.b32.xlu1 %v4212_v6, %s9067_s29  ;;  %3326 = vmatpush1.bf16.msra.mxu0 %v3303_v57  ;;  %v11546_v63 = vpop.permute.xlu0 %4236  ;;  %v13238_v57 = vld [vmem:[#allocation80_spill] sm:$0xff] }
 0x3e8   : > { %3122 = vmatprep.mubr.bf16.mxu0 %v13177_v40  ;;  %v11540_v15 = vpop.permute.xlu1 %4013  ;;  %v3307_v59 = vsel %vm13240_vm15, %v13229_v37, %v13238_v57 }
 0x3e9   : > { %4704 = vrot.lane.b32.xlu0 %v4669_v35, %s9068_s26  ;;  %v8993_v35 = vld [vmem:[%s12879_s4 + $0x60] sm:$0xff]  }
 0x3ea   : > { %8124 = vmatmul.mubr.msk.bf16.vlgmr.msra.gmra.mrb[8].mxu1 %vm1940_vm11, %v8991_v9 }
 0x3eb   : > { %5482 = vrot.lane.b32.xlu1 %v13232_v51, %s9067_s29  ;;  %3379 = vmatpush1.bf16.msra.mxu1 %v3305_v23 }
 0x3ec   : > { %3175 = vmatprep.mubr.bf16.mxu1 %v13177_v40  ;;  %v11544_v38 = vpop.permute.xlu1 %4017 }
 0x3ed   : > { %4473 = vrot.lane.b32.xlu0 %v4439_v14, %s9069_s9 }
 0x3ee   : > { %8123 = vmatmul.mubr.msk.bf16.gmra.mrb[12].mxu0 %vm1940_vm11, %v8992_v5 }
 0x3ef   : > { %5486 = vrot.lane.b32.xlu1 %v13233_v55, %s9067_s29  ;;  %3357 = vmatprep.mubr.bf16.mxu0 %v13177_v40 }
 0x3f0   : > { %v11548_v9 = vpop.permute.xlu1 %4234 }
 0x3f1   : > { %4477 = vrot.lane.b32.xlu0 %v4441_v39, %s9069_s9 }
 0x3f2   : > { %8125 = vmatmul.mubr.msk.bf16.gmra.mrb[12].mxu1 %vm1940_vm11, %v8992_v5  ;;  %v13241_v5 = vld [vmem:[#allocation41_spill] sm:$0xff] }
 0x3f3   : > { %5712 = vrot.lane.b32.xlu1 %v13234_v12, %s9066_s28  ;;  %3410 = vmatprep.mubr.bf16.mxu1 %v13177_v40  ;;  %v3549_v51 = vsel %vm342_vm2, %v13241_v5, %v11129_v48  ;;  %v3548_v55 = vsel %vm342_vm2, %v11182_v32, %v13241_v5  ;;  %v3551_v12 = vsel %vm342_vm2, %v11166_v50, %v11145_v8 }
 0x3f5   : > { %5710 = vrot.lane.b32.xlu0 %v13235_v56, %s9066_s28 }
 0x3f7   : > { %5716 = vrot.lane.b32.xlu1 %v13236_v54, %s9066_s28  ;;  %v3550_v54 = vsel %vm342_vm2, %v11129_v48, %v11166_v50  ;;  %v3552_v50 = vsel %vm342_vm2, %v11182_v32, %v11201_v53 }
 0x3f9   : > { %5714 = vrot.lane.b32.xlu0 %v13237_v21, %s9066_s28  ;;  %v8994_v21 = vld [vmem:[%s12879_s4 + $0x68] sm:$0xff]  }
 0x40e   : > { %v11550_v49 = vpop.permute.xlu0 %4240 }
 0x410   : > { %v11552_v25 = vpop.permute.xlu1 %4238 }
 0x412   : > { %v11554_v61 = vpop.permute.xlu0 %5020 }
 0x414   : > { %v3297_v6 = vpop.permute.xlu1 %3296 }
 0x415   : > { %v3308_v7 = vsel %vm13239_vm9, %v13238_v57, %v3297_v6  ;;  %v3309_v37 = vsel %vm13244_vm1, %v3297_v6, %v13242_v2  ;;  %vm13262_vm9 = vmmov %vm13259_vm10 }
 0x416   : > { %3327 = vmatprep.subr.bf16.mxu0 %v3308_v7  ;;  %v5025_v23 = vpop.permute.xlu0 %5024  ;;  %vm13266_vm15 = vmmov %vm13262_vm9 }
 0x417   : > { %3328 = vmatpush1.bf16.msra.mxu0 %v3307_v59  ;;  %v3794_v59 = vsel %vm333_vm14, %v11289_v19, %v11246_v58 }
 0x418   : > { %3570 = vmatprep.subr.bf16.mxu0 %v3549_v51  ;;  %v3301_v14 = vpop.permute.xlu1 %3300 }
 0x419   : > { %v3310_v20 = vsel %vm13243_vm0, %v13242_v2, %v3301_v14  ;;  %vm13267_vm0 = vmmov %vm13262_vm9 }
 0x41a   : > { %8132 = vmatmul.mubr.msk.bf16.vlgmr.msra.gmra.mrb[8].mxu0 %vm1940_vm11, %v8993_v35  ;;  %3380 = vmatprep.subr.bf16.mxu1 %v3310_v20  ;;  %v11575_v39 = vpop.permute.xlu0 %4242  ;;  %vm13277_vm1 = vmmov %vm13267_vm0 }
 0x41b   : > { %3381 = vmatpush1.bf16.msra.mxu1 %v3309_v37  ;;  %3571 = vmatpush1.bf16.msra.mxu0 %v3548_v55 }
 0x41c   : > { %3623 = vmatprep.subr.bf16.mxu1 %v3551_v12  ;;  %v11580_v56 = vpop.permute.xlu1 %4232  ;;  %3367 = vmatprep.mubr.bf16.mxu0 %v13177_v40 }
 0x41e   : > { %8134 = vmatmul.mubr.msk.bf16.vlgmr.msra.gmra.mrb[8].mxu1 %vm1940_vm11, %v8993_v35  ;;  %v3542_v6 = vpop.permute.xlu0 %3541 }
 0x41f   : > { %3624 = vmatpush1.bf16.msra.mxu1 %v3550_v54  ;;  %3420 = vmatprep.mubr.bf16.mxu1 %v13177_v40  ;;  %v3553_v8 = vsel %vm342_vm2, %v11201_v53, %v3542_v6  ;;  %v3554_v54 = vsel %vm342_vm2, %v3542_v6, %v11276_v26  ;;  %v4654_v6 = vmul.f32 %v11367_v18, %v10725_v4 }
 0x420   : > { %v5023_v57 = vpop.permute.xlu1 %5022  ;;  %3572 = vmatprep.subr.bf16.mxu0 %v3553_v8  ;;  %v8995_v8 = vld [vmem:[%s12879_s4 + $0x70] sm:$0xff]  }
 0x421   : > { %v11595_v7 = vsel %vm4708_vm4, %v11554_v61, %v5023_v57  ;;  %v5030_v48 = vsel %vm4708_vm4, %v5023_v57, %v5025_v23  ;;  %3573 = vmatpush1.bf16.msra.mxu0 %v3552_v50 }
 0x422   : > { %8133 = vmatmul.mubr.msk.bf16.gmra.mrb[12].mxu0 %vm1940_vm11, %v8994_v21  ;;  %v5038_v35 = vmul.f32 %v11595_v7, %v10508_v45  ;;  %v5039_v5 = vmul.f32 %v5030_v48, %v10373_v0  ;;  %v5043_v51 = vmul.f32 %v11595_v7, %v10498_v42  ;;  %v5044_v14 = vmul.f32 %v5030_v48, %v10359_v43  ;;  %v3546_v2 = vpop.permute.xlu0 %3545 }
 0x423   : > { %3815 = vmatprep.subr.bf16.mxu0 %v3794_v59  ;;  %v3555_v32 = vsel %vm342_vm2, %v11276_v26, %v3546_v2  ;;  %3602 = vmatprep.mubr.bf16.mxu0 %v13177_v40  ;;  %v3796_v26 = vsel %vm333_vm14, %v11308_v16, %v11270_v31  ;;  %v5037_v31 = vmul.f32 %v11554_v61, %v10353_v33 }
 0x424   : > { %v5027_v20 = vpop.permute.xlu1 %5026  ;;  %v5061_v53 = vpack.c.bf16 %v5044_v14, %v5039_v5  ;;  %v5060_v37 = vpack.c.bf16 %v5043_v51, %v5038_v35  ;;  %3625 = vmatprep.subr.bf16.mxu1 %v3555_v32  ;;  %v3793_v51 = vsel %vm333_vm14, %v11330_v17, %v11289_v19  ;;  %v5042_v14 = vmul.f32 %v11554_v61, %v10361_v28 }
 0x425   : > { %v11615_v55 = vsel %vm4708_vm4, %v5025_v23, %v5027_v20  ;;  %v5041_v12 = vmul.f32 0.0, %v5027_v20  ;;  %3626 = vmatpush1.bf16.msra.mxu1 %v3554_v54  ;;  %v3795_v19 = vsel %vm333_vm14, %v11246_v58, %v11308_v16  ;;  %v4652_v32 = vmul.f32 %v11369_v22, %v10752_v10  ;;  %v8996_v54 = vld [vmem:[%s12879_s4 + $0x78] sm:$0xff]  }
 0x426   : > { %8135 = vmatmul.mubr.msk.bf16.gmra.mrb[12].mxu1 %vm1940_vm11, %v8994_v21  ;;  %v5040_v57 = vmul.f32 %v11615_v55, %v10534_v62  ;;  %v5045_v50 = vmul.f32 %v11615_v55, %v10526_v47  ;;  %v11627_v23 = vpop.permute.xlu0 %4246  ;;  %5091 = vrot.lane.b32.xlu1 %v5061_v53, %s9053_s19  ;;  %v4650_v21 = vmul.f32 %v11367_v18, %v10734_v27 }
 0x427   : > { %v5063_v59 = vpack.c.bf16 %v5041_v12, %v5041_v12  ;;  %5089 = vrot.lane.b32.xlu0 %v5060_v37, %s9053_s19  ;;  %3868 = vmatprep.subr.bf16.mxu1 %v3796_v26  ;;  %v5048_v53 = vmul.f32 %v5030_v48, %v10663_v52  ;;  %v5052_v37 = vmul.f32 %v5030_v48, %v10657_v44 }
 0x428   : > { %v11638_v35 = vpop.permute.xlu1 %4465  ;;  %v5062_v5 = vpack.c.bf16 %v5045_v50, %v5040_v57  ;;  %3655 = vmatprep.mubr.bf16.mxu1 %v13177_v40  ;;  %v4668_v20 = vpack.c.bf16 %v4654_v6, %v4650_v21  ;;  %v5059_v12 = vpack.c.bf16 %v5042_v14, %v5037_v31  ;;  %v4656_v57 = vmul.f32 %v11369_v22, %v10741_v1 }
 0x429   : > { %v5046_v50 = vmul.f32 %v11554_v61, %v10649_v46  ;;  %v5050_v22 = vmul.f32 %v11554_v61, %v10641_v24  ;;  %v3797_v61 = vsel %vm333_vm14, %v11330_v17, %v11360_v60  ;;  %v4023_v14 = vsel %vm4021_vm6, %v11412_v36, %v11530_v34 }
 0x42a   : > { %8142 = vmatmul.mubr.msk.bf16.vlgmr.msra.gmra.mrb[8].mxu0 %vm1940_vm11, %v8995_v8  ;;  %v11649_v18 = vpop.permute.xlu0 %4463  ;;  %5095 = vrot.lane.b32.xlu1 %v5063_v59, %s9053_s19  ;;  %v4670_v48 = vpack.c.bf16 %v4656_v57, %v4652_v32 }
 0x42b   : > { %3816 = vmatpush1.bf16.msra.mxu0 %v3793_v51  ;;  %3612 = vmatprep.mubr.bf16.mxu0 %v13177_v40  ;;  %v5064_v21 = vpack.c.bf16 %v5050_v22, %v5046_v50  ;;  %v8997_v51 = vld [vmem:[%s12879_s4 + $0x80] sm:$0xff]  }
 0x42c   : > { %5093 = vrot.lane.b32.xlu0 %v5062_v5, %s9053_s19  ;;  %v11654_v2 = vpop.permute.xlu1 %4469 }
 0x42e   : > { %8144 = vmatmul.mubr.msk.bf16.vlgmr.msra.gmra.mrb[8].mxu1 %vm1940_vm11, %v8995_v8  ;;  %v11669_v58 = vpop.permute.xlu0 %4467  ;;  %4702 = vrot.lane.b32.xlu1 %v4668_v20, %s9068_s26  ;;  %v5066_v8 = vpack.c.bf16 %v5052_v37, %v5048_v53  ;;  %v4022_v37 = vsel %vm4021_vm6, %v11542_v41, %v11412_v36 }
 0x42f   : > { %3869 = vmatpush1.bf16.msra.mxu1 %v3795_v19  ;;  %3665 = vmatprep.mubr.bf16.mxu1 %v13177_v40 }
 0x430   : > { %5087 = vrot.lane.b32.xlu0 %v5059_v12, %s9053_s19  ;;  %v11674_v16 = vpop.permute.xlu1 %5250 }
 0x432   : > { %8143 = vmatmul.mubr.msk.bf16.gmra.mrb[12].mxu0 %vm1940_vm11, %v8996_v54  ;;  %v11681_v59 = vpop.permute.xlu0 %4461  ;;  %4706 = vrot.lane.b32.xlu1 %v4670_v48, %s9068_s26  ;;  %s8347_s26 = sshll.u32 %s13349_s25, 6 }
 0x433   : > { %3847 = vmatprep.mubr.bf16.mxu0 %v13177_v40  ;;  %s12847_s27 = scalar_lea.vmem %s12882_s7, %s8347_s26 }
 0x434   : > { %5101 = vrot.lane.b32.xlu0 %v5066_v8, %s9053_s19  ;;  %v3787_v26 = vpop.permute.xlu1 %3786 }
 0x435   : > { %v3798_v6 = vsel %vm333_vm14, %v11360_v60, %v3787_v26  ;;  %v3799_v53 = vsel %vm333_vm14, %v3787_v26, %v11387_v30 }
 0x436   : > { %8145 = vmatmul.mubr.msk.bf16.gmra.mrb[12].mxu1 %vm1940_vm11, %v8996_v54  ;;  %3817 = vmatprep.subr.bf16.mxu0 %v3798_v6  ;;  %v5253_v5 = vpop.permute.xlu0 %5252  ;;  %v4025_v54 = vsel %vm4021_vm6, %v11433_v13, %v11538_v11  ;;  %v5272_v6 = vmul.f32 %v11674_v16, %v10361_v28 }
 0x437   : > { %3900 = vmatprep.mubr.bf16.mxu1 %v13177_v40  ;;  %v11699_v31 = vsel %vm4479_vm12, %v11674_v16, %v5253_v5  ;;  %3818 = vmatpush1.bf16.msra.mxu0 %v3797_v61 }
 0x438   : > { %5097 = vrot.lane.b32.xlu0 %v5064_v21, %s9053_s19  ;;  %v5268_v17 = vmul.f32 %v11699_v31, %v10508_v45  ;;  %v5273_v60 = vmul.f32 %v11699_v31, %v10498_v42  ;;  %4044 = vmatprep.subr.bf16.mxu0 %v4023_v14  ;;  %v3791_v19 = vpop.permute.xlu1 %3790  ;;  %v8998_v21 = vld [vmem:[%s12879_s4 + $0x88] sm:$0xff]  }
 0x439   : > { %v3800_v20 = vsel %vm333_vm14, %v11387_v30, %v3791_v19  ;;  %v4024_v30 = vsel %vm4021_vm6, %v11530_v34, %v11433_v13  ;;  %v5267_v34 = vmul.f32 %v11674_v16, %v10353_v33  ;;  %v4252_v19 = vsel %vm4250_vm13, %v11548_v9, %v11546_v63 }
 0x43a   : > { %8152 = vmatmul.mubr.msk.bf16.vlgmr.msra.gmra.mrb[8].mxu0 %vm1940_vm11, %v8997_v51  ;;  %3870 = vmatprep.subr.bf16.mxu1 %v3800_v20  ;;  %v5257_v32 = vpop.permute.xlu0 %5256  ;;  %v5290_v12 = vpack.c.bf16 %v5273_v60, %v5268_v17  ;;  %v4026_v17 = vsel %vm4021_vm6, %v11542_v41, %v11540_v15 }
 0x43b   : > { %3871 = vmatpush1.bf16.msra.mxu1 %v3799_v53  ;;  %4045 = vmatpush1.bf16.msra.mxu0 %v4022_v37  ;;  %v5271_v13 = vmul.f32 0.0, %v5257_v32  ;;  %v5289_v53 = vpack.c.bf16 %v5272_v6, %v5267_v34 }
 0x43c   : > { %4097 = vmatprep.subr.bf16.mxu1 %v4025_v54  ;;  %v5255_v57 = vpop.permute.xlu1 %5254  ;;  %5319 = vrot.lane.b32.xlu1 %v5290_v12, %s9051_s17 }
 0x43d   : > { %v5260_v48 = vsel %vm4479_vm12, %v5253_v5, %v5255_v57  ;;  %v11722_v8 = vsel %vm4479_vm12, %v5255_v57, %v5257_v32  ;;  %3857 = vmatprep.mubr.bf16.mxu0 %v13177_v40  ;;  %v5293_v20 = vpack.c.bf16 %v5271_v13, %v5271_v13  ;;  %v4254_v57 = vsel %vm4250_vm13, %v11552_v25, %v11550_v49 }
 0x43e   : > { %v5269_v36 = vmul.f32 %v5260_v48, %v10373_v0  ;;  %v5270_v11 = vmul.f32 %v11722_v8, %v10534_v62  ;;  %v5274_v50 = vmul.f32 %v5260_v48, %v10359_v43  ;;  %v5275_v22 = vmul.f32 %v11722_v8, %v10526_v47  ;;  %8154 = vmatmul.mubr.msk.bf16.vlgmr.msra.gmra.mrb[8].mxu1 %vm1940_vm11, %v8997_v51  ;;  %v4016_v26 = vpop.permute.xlu0 %4015 }
 0x43f   : > { %4098 = vmatpush1.bf16.msra.mxu1 %v4024_v30  ;;  %v4027_v61 = vsel %vm4021_vm6, %v11540_v15, %v4016_v26  ;;  %3910 = vmatprep.mubr.bf16.mxu1 %v13177_v40  ;;  %v5278_v37 = vmul.f32 %v5260_v48, %v10663_v52  ;;  %v5282_v12 = vmul.f32 %v5260_v48, %v10657_v44  ;;  %v8999_v48 = vld [vmem:[%s12879_s4 + $0x90] sm:$0xff]  }
 0x440   : > { %v11742_v5 = vpop.permute.xlu1 %4471  ;;  %v5292_v51 = vpack.c.bf16 %v5275_v22, %v5270_v11  ;;  %v5291_v14 = vpack.c.bf16 %v5274_v50, %v5269_v36  ;;  %4046 = vmatprep.subr.bf16.mxu0 %v4027_v61  ;;  %v4028_v41 = vsel %vm4021_vm6, %v4016_v26, %v11544_v38  ;;  %v5276_v36 = vmul.f32 %v11674_v16, %v10649_v46 }
 0x441   : > { %4047 = vmatpush1.bf16.msra.mxu0 %v4026_v17  ;;  %v5296_v30 = vpack.c.bf16 %v5282_v12, %v5278_v37  ;;  %v5280_v11 = vmul.f32 %v11674_v16, %v10641_v24  ;;  %v4251_v49 = vsel %vm4250_vm13, %v11580_v56, %v11548_v9  ;;  %v4253_v16 = vsel %vm4250_vm13, %v11546_v63, %v11552_v25  ;;  %v9000_v9 = vld [vmem:[%s12879_s4 + $0x98] sm:$0xff]  }
 0x442   : > { %8153 = vmatmul.mubr.msk.bf16.gmra.mrb[12].mxu0 %vm1940_vm11, %v8998_v21  ;;  %5323 = vrot.lane.b32.xlu1 %v5292_v51, %s9051_s17  ;;  %v4020_v60 = vpop.permute.xlu0 %4019  ;;  %v4255_v61 = vsel %vm4250_vm13, %v11580_v56, %v11575_v39  ;;  %v9001_v51 = vld [vmem:[%s12879_s4 + $0xa0] sm:$0xff]  }
 0x443   : > { %5321 = vrot.lane.b32.xlu0 %v5291_v14, %s9051_s17  ;;  %v4029_v32 = vsel %vm4021_vm6, %v11544_v38, %v4020_v60  ;;  %4273 = vmatprep.subr.bf16.mxu0 %v4252_v19  ;;  %v5294_v26 = vpack.c.bf16 %v5280_v11, %v5276_v36  ;;  %v4481_v14 = vsel %vm4479_vm12, %v11649_v18, %v11638_v35 }
 0x444   : > { %v11760_v15 = vpop.permute.xlu1 %4475  ;;  %4099 = vmatprep.subr.bf16.mxu1 %v4029_v32  ;;  %4076 = vmatprep.mubr.bf16.mxu0 %v13177_v40  ;;  %v4480_v19 = vsel %vm4479_vm12, %v11681_v59, %v11649_v18  ;;  %v4482_v18 = vsel %vm4479_vm12, %v11638_v35, %v11669_v58  ;;  %v5047_v11 = vmul.f32 %v11595_v7, %v10734_v27 }
 0x445   : > { %4100 = vmatpush1.bf16.msra.mxu1 %v4028_v41 }
 0x446   : > { %8155 = vmatmul.mubr.msk.bf16.gmra.mrb[12].mxu1 %vm1940_vm11, %v8998_v21  ;;  %5317 = vrot.lane.b32.xlu1 %v5289_v53, %s9051_s17  ;;  %v11767_v54 = vpop.permute.xlu0 %4694 }
 0x447   : > { %5325 = vrot.lane.b32.xlu0 %v5293_v20, %s9051_s17  ;;  %4326 = vmatprep.subr.bf16.mxu1 %v4254_v57  ;;  %v4483_v20 = vsel %vm4479_vm12, %v11669_v58, %v11654_v2 }
 0x448   : > { %4129 = vmatprep.mubr.bf16.mxu1 %v13177_v40 }
 0x449   : > { %v11776_v38 = vpop.permute.xlu1 %4692 }
 0x44a   : > { %8162 = vmatmul.mubr.msk.bf16.vlgmr.msra.gmra.mrb[8].mxu0 %vm1940_vm11, %v8999_v48  ;;  %5331 = vrot.lane.b32.xlu1 %v5296_v30, %s9051_s17 }
 0x44b   : > { %v11788_v50 = vpop.permute.xlu0 %4698  ;;  %4274 = vmatpush1.bf16.msra.mxu0 %v4251_v49  ;;  %4086 = vmatprep.mubr.bf16.mxu0 %v13177_v40  ;;  %v5051_v49 = vmul.f32 %v11595_v7, %v10725_v4  ;;  %v4710_v7 = vsel %vm4708_vm4, %v11776_v38, %v11767_v54 }
 0x44d   : > { %v11791_v22 = vpop.permute.xlu1 %4696 }
 0x44e   : > { %8164 = vmatmul.mubr.msk.bf16.vlgmr.msra.gmra.mrb[8].mxu1 %vm1940_vm11, %v8999_v48  ;;  %5327 = vrot.lane.b32.xlu1 %v5294_v26, %s9051_s17  ;;  %v9002_v48 = vld [vmem:[%s12879_s4 + $0xa8] sm:$0xff]  }
 0x44f   : > { %v11798_v21 = vpop.permute.xlu0 %5480  ;;  %4327 = vmatpush1.bf16.msra.mxu1 %v4253_v16  ;;  %4139 = vmatprep.mubr.bf16.mxu1 %v13177_v40 }
 0x451   : > { %v11804_v13 = vpop.permute.xlu1 %4690 }
 0x452   : > { %8163 = vmatmul.mubr.msk.bf16.gmra.mrb[12].mxu0 %vm1940_vm11, %v9000_v9 }
 0x453   : > { %v5485_v34 = vpop.permute.xlu0 %5484  ;;  %4305 = vmatprep.mubr.bf16.mxu0 %v13177_v40 }
 0x455   : > { %v4245_v6 = vpop.permute.xlu1 %4244 }
 0x456   : > { %v4256_v63 = vsel %vm4250_vm13, %v11575_v39, %v4245_v6  ;;  %8165 = vmatmul.mubr.msk.bf16.gmra.mrb[12].mxu1 %vm1940_vm11, %v9000_v9  ;;  %v4257_v56 = vsel %vm4250_vm13, %v4245_v6, %v11627_v23  ;;  %v4484_v6 = vsel %vm4479_vm12, %v11681_v59, %v11742_v5  ;;  %v5053_v59 = vmul.f32 %v11615_v55, %v10741_v1 }
 0x457   : > { %4275 = vmatprep.subr.bf16.mxu0 %v4256_v63  ;;  %v11811_v25 = vpop.permute.xlu0 %4700  ;;  %4358 = vmatprep.mubr.bf16.mxu1 %v13177_v40 }
 0x458   : > { %4276 = vmatpush1.bf16.msra.mxu0 %v4255_v61 }
 0x459   : > { %4502 = vmatprep.subr.bf16.mxu0 %v4481_v14  ;;  %v4249_v17 = vpop.permute.xlu1 %4248 }
 0x45a   : > { %v4258_v60 = vsel %vm4250_vm13, %v11627_v23, %v4249_v17 }
 0x45b   : > { %8172 = vmatmul.mubr.msk.bf16.vlgmr.msra.gmra.mrb[8].mxu0 %vm1940_vm11, %v9001_v51  ;;  %4328 = vmatprep.subr.bf16.mxu1 %v4258_v60  ;;  %v11826_v39 = vpop.permute.xlu0 %4704 }
 0x45c   : > { %4329 = vmatpush1.bf16.msra.mxu1 %v4257_v56  ;;  %4503 = vmatpush1.bf16.msra.mxu0 %v4480_v19  ;;  %v9003_v56 = vld [vmem:[%s12879_s4 + $0xb0] sm:$0xff]   ;;  %v5497_v19 = vmul.f32 %v11798_v21, %v10353_v33 }
 0x45d   : > { %4555 = vmatprep.subr.bf16.mxu1 %v4483_v20  ;;  %v5483_v32 = vpop.permute.xlu1 %5482  ;;  %4315 = vmatprep.mubr.bf16.mxu0 %v13177_v40  ;;  %v4712_v20 = vsel %vm4708_vm4, %v11791_v22, %v11788_v50 }
 0x45e   : > { %v11839_v53 = vsel %vm4250_vm13, %v11798_v21, %v5483_v32  ;;  %v5490_v23 = vsel %vm4250_vm13, %v5483_v32, %v5485_v34  ;;  %v4709_v32 = vsel %vm4708_vm4, %v11804_v13, %v11776_v38 }
 0x45f   : > { %v5498_v37 = vmul.f32 %v11839_v53, %v10508_v45  ;;  %v5499_v12 = vmul.f32 %v5490_v23, %v10373_v0  ;;  %v5503_v2 = vmul.f32 %v11839_v53, %v10498_v42  ;;  %v5504_v41 = vmul.f32 %v5490_v23, %v10359_v43  ;;  %8174 = vmatmul.mubr.msk.bf16.vlgmr.msra.gmra.mrb[8].mxu1 %vm1940_vm11, %v9001_v51  ;;  %v4474_v57 = vpop.permute.xlu0 %4473 }
 0x460   : > { %4556 = vmatpush1.bf16.msra.mxu1 %v4482_v18  ;;  %v4485_v35 = vsel %vm4479_vm12, %v11742_v5, %v4474_v57  ;;  %4368 = vmatprep.mubr.bf16.mxu1 %v13177_v40  ;;  %v5049_v51 = vmul.f32 %v11615_v55, %v10752_v10  ;;  %v5065_v5 = vpack.c.bf16 %v5051_v49, %v5047_v11  ;;  %v9004_v49 = vld [vmem:[%s12879_s4 + $0xb8] sm:$0xff]  }
 0x461   : > { %v5487_v30 = vpop.permute.xlu1 %5486  ;;  %v5521_v58 = vpack.c.bf16 %v5504_v41, %v5499_v12  ;;  %v5520_v36 = vpack.c.bf16 %v5503_v2, %v5498_v37  ;;  %4504 = vmatprep.subr.bf16.mxu0 %v4485_v35  ;;  %v4486_v17 = vsel %vm4479_vm12, %v4474_v57, %v11760_v15  ;;  %v5502_v55 = vmul.f32 %v11798_v21, %v10361_v28 }
 0x462   : > { %v11863_v26 = vsel %vm4250_vm13, %v5485_v34, %v5487_v30  ;;  %4505 = vmatpush1.bf16.msra.mxu0 %v4484_v6  ;;  %v5067_v18 = vpack.c.bf16 %v5053_v59, %v5049_v51  ;;  %v5508_v37 = vmul.f32 %v5490_v23, %v10663_v52  ;;  %v5512_v12 = vmul.f32 %v5490_v23, %v10657_v44  ;;  %vm13282_vm13 = vmmov %vm13267_vm0 }
 0x463   : > { %v5500_v16 = vmul.f32 %v11863_v26, %v10534_v62  ;;  %v5505_v9 = vmul.f32 %v11863_v26, %v10526_v47  ;;  %8173 = vmatmul.mubr.msk.bf16.gmra.mrb[12].mxu0 %vm1940_vm11, %v9002_v48  ;;  %v4478_v63 = vpop.permute.xlu0 %4477  ;;  %5551 = vrot.lane.b32.xlu1 %v5521_v58, %s9049_s15  ;;  %v5519_v50 = vpack.c.bf16 %v5502_v55, %v5497_v19 }
 0x464   : > { %v4487_v34 = vsel %vm4479_vm12, %v11760_v15, %v4478_v63  ;;  %5549 = vrot.lane.b32.xlu0 %v5520_v36, %s9049_s15  ;;  %4731 = vmatprep.subr.bf16.mxu0 %v4710_v7  ;;  %v5501_v15 = vmul.f32 0.0, %v5487_v30  ;;  %v4711_v30 = vsel %vm4708_vm4, %v11767_v54, %v11791_v22  ;;  %v5526_v58 = vpack.c.bf16 %v5512_v12, %v5508_v37  ;;  %vm13281_vm12 = vmmov %vm13267_vm0 }
 0x465   : > { %v5522_v61 = vpack.c.bf16 %v5505_v9, %v5500_v16  ;;  %4557 = vmatprep.subr.bf16.mxu1 %v4487_v34  ;;  %v5713_v14 = vpop.permute.xlu1 %5712  ;;  %4534 = vmatprep.mubr.bf16.mxu0 %v13177_v40  ;;  %v5506_v36 = vmul.f32 %v11798_v21, %v10649_v46  ;;  %v5510_v11 = vmul.f32 %v11798_v21, %v10641_v24 }
 0x466   : > { %4558 = vmatpush1.bf16.msra.mxu1 %v4486_v17  ;;  %v5523_v38 = vpack.c.bf16 %v5501_v15, %v5501_v15  ;;  %v5277_v9 = vmul.f32 %v11699_v31, %v10734_v27  ;;  %v5281_v21 = vmul.f32 %v11699_v31, %v10725_v4  ;;  %v5283_v31 = vmul.f32 %v11722_v8, %v10741_v1 }
 0x467   : > { %8175 = vmatmul.mubr.msk.bf16.gmra.mrb[12].mxu1 %vm1940_vm11, %v9002_v48  ;;  %v11888_v60 = vpop.permute.xlu0 %5710  ;;  %5099 = vrot.lane.b32.xlu1 %v5065_v5, %s9053_s19  ;;  %v5524_v6 = vpack.c.bf16 %v5510_v11, %v5506_v36  ;;  %v5509_v37 = vmul.f32 %v11863_v26, %v10752_v10  ;;  %v5513_v12 = vmul.f32 %v11863_v26, %v10741_v1  ;;  %v13245_v36 = vld [vmem:[#allocation63_spill] sm:$0xff] }
 0x468   : > { %5553 = vrot.lane.b32.xlu0 %v5522_v61, %s9049_s15  ;;  %4784 = vmatprep.subr.bf16.mxu1 %v4712_v20  ;;  %v11910_v2 = vsel %vm4021_vm6, %v11888_v60, %v5713_v14  ;;  %v5727_v7 = vmul.f32 %v11888_v60, %v10353_v33  ;;  %v5732_v34 = vmul.f32 %v11888_v60, %v10361_v28 }
 0x469   : > { %4587 = vmatprep.mubr.bf16.mxu1 %v13177_v40  ;;  %v5717_v57 = vpop.permute.xlu1 %5716  ;;  %v5728_v48 = vmul.f32 %v11910_v2, %v10508_v45  ;;  %v5733_v23 = vmul.f32 %v11910_v2, %v10498_v42  ;;  %v5279_v61 = vmul.f32 %v11722_v8, %v10752_v10  ;;  %v5295_v59 = vpack.c.bf16 %v5281_v21, %v5277_v9  ;;  %v13247_v9 = vld [vmem:[#allocation21_spill] sm:$0xff] }
 0x46a   : > { %v5511_v20 = vmul.f32 %v11839_v53, %v10725_v4  ;;  %v5947_v11 = vmul.f32 %v13245_v36, %v10359_v43  ;;  %v5944_v21 = vmul.f32 0.0, %v13247_v9 }
 0x46b   : > { %8182 = vmatmul.mubr.msk.bf16.vlgmr.msra.gmra.mrb[8].mxu0 %vm1940_vm11, %v9003_v56  ;;  %5103 = vrot.lane.b32.xlu1 %v5067_v18, %s9053_s19  ;;  %v5715_v41 = vpop.permute.xlu0 %5714  ;;  %v5750_v16 = vpack.c.bf16 %v5733_v23, %v5728_v48  ;;  %v5297_v55 = vpack.c.bf16 %v5283_v31, %v5279_v61  ;;  %v5736_v48 = vmul.f32 %v11888_v60, %v10649_v46 }
 0x46c   : > { %4732 = vmatpush1.bf16.msra.mxu0 %v4709_v32  ;;  %5547 = vrot.lane.b32.xlu0 %v5519_v50, %s9049_s15  ;;  %v5721_v35 = vsel %vm4021_vm6, %v5715_v41, %v5717_v57  ;;  %v5720_v51 = vsel %vm4021_vm6, %v5713_v14, %v5715_v41  ;;  %v5507_v14 = vmul.f32 %v11839_v53, %v10734_v27  ;;  %v5731_v32 = vmul.f32 0.0, %v5717_v57 }
 0x46d   : > { %4544 = vmatprep.mubr.bf16.mxu0 %v13177_v40  ;;  %v5730_v54 = vmul.f32 %v5721_v35, %v10534_v62  ;;  %v5735_v22 = vmul.f32 %v5721_v35, %v10526_v47  ;;  %v5738_v5 = vmul.f32 %v5720_v51, %v10663_v52  ;;  %v5742_v17 = vmul.f32 %v5720_v51, %v10657_v44 }
 0x46e   : > { %v5729_v19 = vmul.f32 %v5720_v51, %v10373_v0  ;;  %v5734_v8 = vmul.f32 %v5720_v51, %v10359_v43  ;;  %v5525_v50 = vpack.c.bf16 %v5511_v20, %v5507_v14  ;;  %v5737_v41 = vmul.f32 %v11910_v2, %v10734_v27 }
 0x46f   : > { %8184 = vmatmul.mubr.msk.bf16.vlgmr.msra.gmra.mrb[8].mxu1 %vm1940_vm11, %v9003_v56  ;;  %5555 = vrot.lane.b32.xlu1 %v5523_v38, %s9049_s15  ;;  %v5752_v63 = vpack.c.bf16 %v5735_v22, %v5730_v54  ;;  %v5749_v56 = vpack.c.bf16 %v5732_v34, %v5727_v7  ;;  %v5756_v15 = vpack.c.bf16 %v5742_v17, %v5738_v5  ;;  %v13246_v54 = vld [vmem:[#allocation47_spill] sm:$0xff]  ;;  %vm13280_vm6 = vcmask 990208  }
 0x470   : > { %4785 = vmatpush1.bf16.msra.mxu1 %v4711_v30  ;;  %5561 = vrot.lane.b32.xlu0 %v5526_v58, %s9049_s15  ;;  %v5751_v18 = vpack.c.bf16 %v5734_v8, %v5729_v19  ;;  %v5741_v53 = vmul.f32 %v11910_v2, %v10725_v4  ;;  %v5753_v38 = vpack.c.bf16 %v5731_v32, %v5731_v32 }
 0x471   : > { %4597 = vmatprep.mubr.bf16.mxu1 %v13177_v40  ;;  %v5527_v57 = vpack.c.bf16 %v5513_v12, %v5509_v37  ;;  %v5740_v23 = vmul.f32 %v11888_v60, %v10641_v24  ;;  %v5739_v26 = vmul.f32 %v5721_v35, %v10752_v10  ;;  %v5743_v30 = vmul.f32 %v5721_v35, %v10741_v1  ;;  %v13250_v37 = vld [vmem:[#allocation46_spill] sm:$0xff] }
 0x472   : > { %v5755_v58 = vpack.c.bf16 %v5741_v53, %v5737_v41  ;;  %v5946_v22 = vmul.f32 %v13246_v54, %v10498_v42  ;;  %v5942_v60 = vmul.f32 %v13245_v36, %v10373_v0  ;;  %v5941_v35 = vmul.f32 %v13246_v54, %v10508_v45 }
 0x473   : > { %8183 = vmatmul.mubr.msk.bf16.gmra.mrb[12].mxu0 %vm1940_vm11, %v9004_v49  ;;  %5779 = vrot.lane.b32.xlu1 %v5750_v16, %s9046_s8  ;;  %v5754_v2 = vpack.c.bf16 %v5740_v23, %v5736_v48  ;;  %v5966_v61 = vpack.c.bf16 %v5944_v21, %v5944_v21  ;;  %v5954_v31 = vmul.f32 %v13246_v54, %v10725_v4 }
 0x474   : > { %4763 = vmatprep.mubr.bf16.mxu0 %v13177_v40  ;;  %5557 = vrot.lane.b32.xlu0 %v5524_v6, %s9049_s15  ;;  %v5964_v16 = vpack.c.bf16 %v5947_v11, %v5942_v60  ;;  %v5963_v6 = vpack.c.bf16 %v5946_v22, %v5941_v35  ;;  %v5950_v17 = vmul.f32 %v13246_v54, %v10734_v27  ;;  %v13254_v22 = vld [vmem:[#allocation18_spill] sm:$0xff] }
 0x475   : > { %v5955_v14 = vmul.f32 %v13245_v36, %v10657_v44  ;;  %v6158_v12 = vmul.f32 %v13250_v37, %v10498_v42  ;;  %v6153_v53 = vmul.f32 %v13250_v37, %v10508_v45  ;;  %v4858_v60 = vmul.f32 %v13254_v22, %v10498_v42 }
 0x476   : > { %v5968_v19 = vpack.c.bf16 %v5954_v31, %v5950_v17  ;;  %v4713_v17 = vsel %vm4708_vm4, %v11804_v13, %v11811_v25 }
 0x477   : > { %8185 = vmatmul.mubr.msk.bf16.gmra.mrb[12].mxu1 %vm1940_vm11, %v9004_v49  ;;  %5783 = vrot.lane.b32.xlu1 %v5752_v63, %s9046_s8  ;;  %v5757_v49 = vpack.c.bf16 %v5743_v30, %v5739_v26  ;;  %v13248_v63 = vld [vmem:[#allocation49_spill] sm:$0xff]  ;;  %v6175_v26 = vpack.c.bf16 %v6158_v12, %v6153_v53  ;;  %v13252_v30 = vld [vmem:[#allocation59_spill] sm:$0xff]  ;;  %v6166_v12 = vmul.f32 %v13250_v37, %v10725_v4 }
 0x478   : > { %4816 = vmatprep.mubr.bf16.mxu1 %v13177_v40  ;;  %5329 = vrot.lane.b32.xlu0 %v5295_v59, %s9051_s17  ;;  %v5948_v7 = vmul.f32 %v13248_v63, %v10526_v47  ;;  %v5943_v34 = vmul.f32 %v13248_v63, %v10534_v62  ;;  %v13249_v59 = vld [vmem:[#allocation19_spill] sm:$0xff]  ;;  %v5956_v8 = vmul.f32 %v13248_v63, %v10741_v1 }
 0x479   : > { %v5945_v5 = vmul.f32 %v13249_v59, %v10361_v28  ;;  %v5952_v20 = vmul.f32 %v13248_v63, %v10752_v10  ;;  %v5953_v41 = vmul.f32 %v13249_v59, %v10641_v24 }
 0x47a   : > { %v5965_v51 = vpack.c.bf16 %v5948_v7, %v5943_v34  ;;  %v4854_v7 = vmul.f32 %v13254_v22, %v10508_v45  ;;  %v13256_v34 = vld [vmem:[#allocation14_spill] sm:$0xff] }
 0x47b   : > { %5777 = vrot.lane.b32.xlu1 %v5749_v56, %s9046_s8  ;;  %v5940_v56 = vmul.f32 %v13249_v59, %v10353_v33 }
 0x47c   : > { %5333 = vrot.lane.b32.xlu0 %v5297_v55, %s9051_s17 }
 0x47d   : > { %v5962_v55 = vpack.c.bf16 %v5945_v5, %v5940_v56  ;;  %v4866_v5 = vmul.f32 %v13254_v22, %v10725_v4  ;;  %v4875_v56 = vpack.c.bf16 %v4858_v60, %v4854_v7 }
 0x47f   : > { %5791 = vrot.lane.b32.xlu1 %v5756_v15, %s9046_s8  ;;  %v5951_v15 = vmul.f32 %v13245_v36, %v10663_v52 }
 0x480   : > { %5781 = vrot.lane.b32.xlu0 %v5751_v18, %s9046_s8  ;;  %v5970_v18 = vpack.c.bf16 %v5956_v8, %v5952_v20  ;;  %v13257_v8 = vld [vmem:[#allocation20_spill] sm:$0xff]  ;;  %v4862_v20 = vmul.f32 %v13254_v22, %v10734_v27 }
 0x482   : > { %v4879_v53 = vpack.c.bf16 %v4866_v5, %v4862_v20 }
 0x483   : > { %5559 = vrot.lane.b32.xlu1 %v5525_v50, %s9049_s15  ;;  %v5969_v50 = vpack.c.bf16 %v5955_v14, %v5951_v15  ;;  %v4856_v15 = vmul.f32 %v13257_v8, %v10534_v62 }
 0x484   : > { %5785 = vrot.lane.b32.xlu0 %v5753_v38, %s9046_s8  ;;  %v5949_v38 = vmul.f32 %v13249_v59, %v10649_v46  ;;  %v4853_v59 = vmul.f32 %v13256_v34, %v10353_v33 }
 0x486   : > { %v5967_v11 = vpack.c.bf16 %v5953_v41, %v5949_v38  ;;  %v6163_v38 = vmul.f32 %v13252_v30, %v10663_v52 }
 0x487   : > { %5563 = vrot.lane.b32.xlu1 %v5527_v57, %s9049_s15  ;;  %v13251_v57 = vld [vmem:[#allocation17_spill] sm:$0xff] }
 0x488   : > { %5789 = vrot.lane.b32.xlu0 %v5755_v58, %s9046_s8  ;;  %v6156_v48 = vmul.f32 0.0, %v13251_v57  ;;  %v6159_v58 = vmul.f32 %v13252_v30, %v10359_v43  ;;  %v4865_v57 = vmul.f32 %v13256_v34, %v10641_v24 }
 0x48a   : > { %v6178_v35 = vpack.c.bf16 %v6156_v48, %v6156_v48 }
 0x48b   : > { %5787 = vrot.lane.b32.xlu1 %v5754_v2, %s9046_s8  ;;  %v13253_v2 = vld [vmem:[#allocation48_spill] sm:$0xff] }
 0x48c   : > { %5793 = vrot.lane.b32.xlu0 %v5757_v49, %s9046_s8  ;;  %v6160_v36 = vmul.f32 %v13253_v2, %v10526_v47  ;;  %v6154_v49 = vmul.f32 %v13252_v30, %v10373_v0  ;;  %v6155_v54 = vmul.f32 %v13253_v2, %v10534_v62 }
 0x48e   : > { %v6177_v63 = vpack.c.bf16 %v6160_v36, %v6155_v54 }
 0x48f   : > { %5994 = vrot.lane.b32.xlu1 %v5964_v16, %s9047_s10  ;;  %v13255_v16 = vld [vmem:[#allocation16_spill] sm:$0xff] }
 0x490   : > { %5992 = vrot.lane.b32.xlu0 %v5963_v6, %s9047_s10  ;;  %v6157_v9 = vmul.f32 %v13255_v16, %v10361_v28  ;;  %v6176_v6 = vpack.c.bf16 %v6159_v58, %v6154_v49  ;;  %v4868_v49 = vmul.f32 %v13257_v8, %v10741_v1  ;;  %v6165_v60 = vmul.f32 %v13255_v16, %v10641_v24 }
 0x493   : > { %5998 = vrot.lane.b32.xlu1 %v5966_v61, %s9047_s10  ;;  %v4857_v61 = vmul.f32 %v13256_v34, %v10361_v28 }
 0x494   : > { %5996 = vrot.lane.b32.xlu0 %v5965_v51, %s9047_s10  ;;  %v6152_v51 = vmul.f32 %v13255_v16, %v10353_v33 }
 0x496   : > { %v6174_v14 = vpack.c.bf16 %v6157_v9, %v6152_v51  ;;  %v4864_v9 = vmul.f32 %v13257_v8, %v10752_v10 }
 0x497   : > { %6002 = vrot.lane.b32.xlu1 %v5968_v19, %s9047_s10  ;;  %v9005_v19 = vld [vmem:[%s12879_s4 + $0xc0] sm:$0xff]  }
 0x498   : > { %5990 = vrot.lane.b32.xlu0 %v5962_v55, %s9047_s10  ;;  %v12025_v32 = vpop.permute.xlu1 %5091  ;;  %v4860_v55 = vmul.f32 %v13257_v8, %v10526_v47 }
 0x499   : > { %v12098_v36 = vpop.permute.xlu0 %5089 }
 0x49a   : > { %v4877_v48 = vpack.c.bf16 %v4860_v55, %v4856_v15 }
 0x49b   : > { %6006 = vrot.lane.b32.xlu1 %v5970_v18, %s9047_s10  ;;  %v6162_v18 = vmul.f32 %v13250_v37, %v10734_v27  ;;  %v4861_v37 = vmul.f32 %v13256_v34, %v10649_v46  ;;  %v4881_v34 = vpack.c.bf16 %v4868_v49, %v4864_v9 }
 0x49c   : > { %6004 = vrot.lane.b32.xlu0 %v5969_v50, %s9047_s10  ;;  %v12038_v23 = vpop.permute.xlu1 %5095  ;;  %v6167_v50 = vmul.f32 %v13252_v30, %v10657_v44 }
 0x49d   : > { %v6180_v54 = vpack.c.bf16 %v6166_v12, %v6162_v18  ;;  %v13264_v12 = vld [vmem:[#allocation52_spill] sm:$0xff] }
 0x49e   : > { %v6181_v22 = vpack.c.bf16 %v6167_v50, %v6163_v38  ;;  %v6372_v50 = vmul.f32 %v13264_v12, %v10526_v47  ;;  %v6367_v38 = vmul.f32 %v13264_v12, %v10534_v62  ;;  %v6376_v9 = vmul.f32 %v13264_v12, %v10752_v10 }
 0x49f   : > { %6204 = vrot.lane.b32.xlu1 %v6175_v26, %s9055_s21  ;;  %v13258_v26 = vld [vmem:[#allocation15_spill] sm:$0xff] }
 0x4a0   : > { %6000 = vrot.lane.b32.xlu0 %v5967_v11, %s9047_s10  ;;  %v4703_v21 = vpop.permute.xlu1 %4702  ;;  %v4859_v58 = vmul.f32 %v13258_v26, %v10359_v43  ;;  %v4855_v11 = vmul.f32 %v13258_v26, %v10373_v0  ;;  %v4867_v7 = vmul.f32 %v13258_v26, %v10657_v44 }
 0x4a1   : > { %v4714_v31 = vsel %vm4708_vm4, %v11811_v25, %v4703_v21  ;;  %v4874_v25 = vpack.c.bf16 %v4857_v61, %v4853_v59  ;;  %v4715_v30 = vsel %vm4708_vm4, %v4703_v21, %v11826_v39  ;;  %v6164_v61 = vmul.f32 %v13253_v2, %v10752_v10  ;;  %v13260_v59 = vld [vmem:[#allocation64_spill] sm:$0xff] }
 0x4a2   : > { %4733 = vmatprep.subr.bf16.mxu0 %v4714_v31  ;;  %v4876_v21 = vpack.c.bf16 %v4859_v58, %v4855_v11  ;;  %v4863_v31 = vmul.f32 %v13258_v26, %v10663_v52  ;;  %v6371_v5 = vmul.f32 %v13260_v59, %v10359_v43  ;;  %v6366_v55 = vmul.f32 %v13260_v59, %v10373_v0  ;;  %v13265_v26 = vld [vmem:[#allocation24_spill] sm:$0xff] }
 0x4a3   : > { %6208 = vrot.lane.b32.xlu1 %v6177_v63, %s9055_s21  ;;  %4734 = vmatpush1.bf16.msra.mxu0 %v4713_v17  ;;  %v9006_v63 = vld [vmem:[%s12879_s4 + $0xc8] sm:$0xff]   ;;  %v5094_v17 = vpop.permute.xlu0 %5093  ;;  %v6369_v58 = vmul.f32 %v13265_v26, %v10361_v28  ;;  %v6364_v49 = vmul.f32 %v13265_v26, %v10353_v33 }
 0x4a4   : > { %6206 = vrot.lane.b32.xlu0 %v6176_v6, %s9055_s21  ;;  %4898 = vmatprep.subr.bf16.mxu0 %v4875_v56  ;;  %v4707_v13 = vpop.permute.xlu1 %4706  ;;  %v6161_v6 = vmul.f32 %v13255_v16, %v10649_v46  ;;  %v5107_v16 = vsel %vm13259_vm10, %v12098_v36, %v12025_v32  ;;  %v4880_v8 = vpack.c.bf16 %v4867_v7, %v4863_v31  ;;  %v13268_v7 = vld [vmem:[#allocation51_spill] sm:$0xff]  ;;  %vm13283_vm10 = vmmov %vm13280_vm6 }
 0x4a5   : > { %v4716_v41 = vsel %vm4708_vm4, %v11826_v39, %v4707_v13  ;;  %v6168_v39 = vmul.f32 %v13253_v2, %v10741_v1  ;;  %v5109_v20 = vsel %vm13262_vm9, %v5094_v17, %v12038_v23  ;;  %v6388_v15 = vpack.c.bf16 %v6371_v5, %v6366_v55  ;;  %v13263_v13 = vld [vmem:[#allocation27_spill] sm:$0xff]  ;;  %v13269_v5 = vld [vmem:[#allocation53_spill] sm:$0xff]  ;;  %vm13278_vm4 = vmmov %vm13267_vm0 }
 0x4a6   : > { %8192 = vmatmul.mubr.msk.bf16.vlgmr.msra.gmra.mrb[8].mxu0 %vm1940_vm11, %v9005_v19  ;;  %4786 = vmatprep.subr.bf16.mxu1 %v4716_v41  ;;  %v6179_v51 = vpack.c.bf16 %v6165_v60, %v6161_v6  ;;  %v9007_v41 = vld [vmem:[%s12879_s4 + $0xd0] sm:$0xff]   ;;  %v6380_v60 = vmul.f32 %v13264_v12, %v10741_v1  ;;  %v6375_v6 = vmul.f32 %v13260_v59, %v10663_v52  ;;  %v13272_v12 = vld [vmem:[#allocation31_spill] sm:$0xff]  ;;  %vm13284_vm9 = vmmov %vm13280_vm6 }
 0x4a7   : > { %6202 = vrot.lane.b32.xlu1 %v6174_v14, %s9055_s21  ;;  %4787 = vmatpush1.bf16.msra.mxu1 %v4715_v30  ;;  %v6182_v56 = vpack.c.bf16 %v6168_v39, %v6164_v61  ;;  %v9008_v39 = vld [vmem:[%s12879_s4 + $0xd8] sm:$0xff]   ;;  %v6377_v31 = vmul.f32 %v13265_v26, %v10641_v24  ;;  %v6579_v55 = vmul.f32 %v13269_v5, %v10534_v62 }
 0x4a8   : > { %6210 = vrot.lane.b32.xlu0 %v6178_v35, %s9055_s21  ;;  %4899 = vmatpush1.bf16.msra.mxu0 %v4874_v25  ;;  %v4878_v35 = vpack.c.bf16 %v4865_v57, %v4861_v37  ;;  %v6368_v25 = vmul.f32 0.0, %v13263_v13  ;;  %v6389_v37 = vpack.c.bf16 %v6372_v50, %v6367_v38  ;;  %v13271_v13 = vld [vmem:[#allocation28_spill] sm:$0xff]  ;;  %v6580_v50 = vmul.f32 0.0, %v13272_v12 }
 0x4a9   : > { %4900 = vmatprep.subr.bf16.mxu0 %v4879_v53  ;;  %4951 = vmatprep.subr.bf16.mxu1 %v4877_v48  ;;  %v5088_v53 = vpop.permute.xlu0 %5087 }
 0x4aa   : > { %4773 = vmatprep.mubr.bf16.mxu0 %v13177_v40  ;;  %8194 = vmatmul.mubr.msk.bf16.vlgmr.msra.gmra.mrb[8].mxu1 %vm1940_vm11, %v9005_v19  ;;  %v13261_v19 = vld [vmem:[#allocation50_spill] sm:$0xff]  ;;  %v6390_v57 = vpack.c.bf16 %v6368_v25, %v6368_v25  ;;  %v5106_v30 = vsel %vm13266_vm15, %v5088_v53, %v12098_v36  ;;  %v6386_v36 = vpack.c.bf16 %v6369_v58, %v6364_v49  ;;  %vm13286_vm15 = vmmov %vm13280_vm6 }
 0x4ab   : > { %6216 = vrot.lane.b32.xlu1 %v6181_v22, %s9055_s21  ;;  %4952 = vmatpush1.bf16.msra.mxu1 %v4876_v21  ;;  %v6370_v2 = vmul.f32 %v13261_v19, %v10498_v42  ;;  %v6365_v14 = vmul.f32 %v13261_v19, %v10508_v45  ;;  %v6378_v48 = vmul.f32 %v13261_v19, %v10725_v4 }
 0x4ac   : > { %6214 = vrot.lane.b32.xlu0 %v6180_v54, %s9055_s21  ;;  %4901 = vmatpush1.bf16.msra.mxu0 %v4878_v35  ;;  %v6374_v11 = vmul.f32 %v13261_v19, %v10734_v27  ;;  %v6379_v35 = vmul.f32 %v13260_v59, %v10657_v44  ;;  %v5108_v21 = vsel %vm13267_vm0, %v12025_v32, %v5094_v17  ;;  %vm13291_vm0 = vmmov %vm13280_vm6 }
 0x4ad   : > { %4953 = vmatprep.subr.bf16.mxu1 %v4881_v34  ;;  %5128 = vmatprep.subr.bf16.mxu0 %v5107_v16  ;;  %v6387_v18 = vpack.c.bf16 %v6370_v2, %v6365_v14  ;;  %v6582_v34 = vmul.f32 %v13268_v7, %v10498_v42  ;;  %v6577_v32 = vmul.f32 %v13268_v7, %v10508_v45  ;;  %v13270_v2 = vld [vmem:[#allocation65_spill] sm:$0xff] }
 0x4ae   : > { %8193 = vmatmul.mubr.msk.bf16.gmra.mrb[12].mxu0 %vm1940_vm11, %v9006_v63  ;;  %4826 = vmatprep.mubr.bf16.mxu1 %v13177_v40  ;;  %v12171_v54 = vpop.permute.xlu1 %5319  ;;  %v6392_v22 = vpack.c.bf16 %v6378_v48, %v6374_v11  ;;  %v6393_v61 = vpack.c.bf16 %v6379_v35, %v6375_v6  ;;  %v6584_v17 = vmul.f32 %v13269_v5, %v10526_v47  ;;  %v13273_v6 = vld [vmem:[#allocation66_spill] sm:$0xff] }
 0x4af   : > { %6212 = vrot.lane.b32.xlu1 %v6179_v51, %s9055_s21  ;;  %4954 = vmatpush1.bf16.msra.mxu1 %v4880_v8  ;;  %v6373_v51 = vmul.f32 %v13265_v26, %v10649_v46  ;;  %v6599_v59 = vpack.c.bf16 %v6582_v34, %v6577_v32  ;;  %v6583_v8 = vmul.f32 %v13270_v2, %v10359_v43 }
 0x4b0   : > { %6218 = vrot.lane.b32.xlu0 %v6182_v56, %s9055_s21  ;;  %4930 = vmatprep.mubr.bf16.mxu0 %v13177_v40  ;;  %v12207_v56 = vpop.permute.xlu0 %5101  ;;  %v6578_v14 = vmul.f32 %v13270_v2, %v10373_v0  ;;  %v6581_v25 = vmul.f32 %v13271_v13, %v10361_v28  ;;  %v6602_v48 = vpack.c.bf16 %v6580_v50, %v6580_v50 }
 0x4b1   : > { %5181 = vmatprep.subr.bf16.mxu1 %v5109_v20  ;;  %v6391_v19 = vpack.c.bf16 %v6377_v31, %v6373_v51  ;;  %v6587_v58 = vmul.f32 %v13270_v2, %v10663_v52  ;;  %v6586_v11 = vmul.f32 %v13268_v7, %v10734_v27  ;;  %v6585_v35 = vmul.f32 %v13271_v13, %v10649_v46 }
 0x4b2   : > { %8195 = vmatmul.mubr.msk.bf16.gmra.mrb[12].mxu1 %vm1940_vm11, %v9006_v63  ;;  %v6394_v63 = vpack.c.bf16 %v6380_v60, %v6376_v9  ;;  %v6588_v9 = vmul.f32 %v13269_v5, %v10752_v10  ;;  %v6790_v32 = vmul.f32 %v13273_v6, %v10373_v0 }
 0x4b3   : > { %6418 = vrot.lane.b32.xlu1 %v6388_v15, %s9056_s22  ;;  %4983 = vmatprep.mubr.bf16.mxu1 %v13177_v40  ;;  %v6601_v15 = vpack.c.bf16 %v6584_v17, %v6579_v55  ;;  %v13275_v17 = vld [vmem:[#allocation42_spill] sm:$0xff]  ;;  %v13276_v55 = vld [vmem:[#allocation57_spill] sm:$0xff] }
 0x4b4   : > { %6416 = vrot.lane.b32.xlu0 %v6387_v18, %s9056_s22  ;;  %v12195_v16 = vpop.permute.xlu1 %5323  ;;  %v6600_v18 = vpack.c.bf16 %v6583_v8, %v6578_v14  ;;  %v5098_v53 = vpop.permute.xlu0 %5097  ;;  %v6796_v14 = vmul.f32 %v13276_v55, %v10526_v47 }
 0x4b6   : > { %8202 = vmatmul.mubr.msk.bf16.vlgmr.msra.gmra.mrb[8].mxu0 %vm1940_vm11, %v9007_v41 }
 0x4b7   : > { %6422 = vrot.lane.b32.xlu1 %v6390_v57, %s9056_s22  ;;  %5129 = vmatpush1.bf16.msra.mxu0 %v5106_v30  ;;  %v6591_v57 = vmul.f32 %v13270_v2, %v10657_v44 }
 0x4b8   : > { %6420 = vrot.lane.b32.xlu0 %v6389_v37, %s9056_s22  ;;  %4940 = vmatprep.mubr.bf16.mxu0 %v13177_v40  ;;  %v12218_v20 = vpop.permute.xlu1 %5317  ;;  %v6590_v37 = vmul.f32 %v13268_v7, %v10725_v4  ;;  %v12237_v30 = vpop.permute.xlu0 %5321 }
 0x4b9   : > { %v6605_v49 = vpack.c.bf16 %v6591_v57, %v6587_v58  ;;  %v13279_v57 = vld [vmem:[#allocation34_spill] sm:$0xff] }
 0x4ba   : > { %8204 = vmatmul.mubr.msk.bf16.vlgmr.msra.gmra.mrb[8].mxu1 %vm1940_vm11, %v9007_v41  ;;  %v6576_v41 = vmul.f32 %v13271_v13, %v10353_v33  ;;  %v6604_v60 = vpack.c.bf16 %v6590_v37, %v6586_v11  ;;  %v9009_v58 = vld [vmem:[%s12879_s4 + $0xe0] sm:$0xff]   ;;  %v6788_v11 = vmul.f32 %v13279_v57, %v10353_v33 }
 0x4bb   : > { %6426 = vrot.lane.b32.xlu1 %v6392_v22, %s9056_s22  ;;  %5182 = vmatpush1.bf16.msra.mxu1 %v5108_v21  ;;  %v6589_v22 = vmul.f32 %v13271_v13, %v10641_v24 }
 0x4bc   : > { %6414 = vrot.lane.b32.xlu0 %v6386_v36, %s9056_s22  ;;  %4993 = vmatprep.mubr.bf16.mxu1 %v13177_v40  ;;  %v6598_v38 = vpack.c.bf16 %v6581_v25, %v6576_v41  ;;  %v12232_v26 = vpop.permute.xlu1 %5331  ;;  %v6592_v36 = vmul.f32 %v13269_v5, %v10741_v1  ;;  %v12256_v7 = vpop.permute.xlu0 %5325 }
 0x4bd   : > { %v6603_v21 = vpack.c.bf16 %v6589_v22, %v6585_v35 }
 0x4be   : > { %8203 = vmatmul.mubr.msk.bf16.gmra.mrb[12].mxu0 %vm1940_vm11, %v9008_v39  ;;  %v6606_v34 = vpack.c.bf16 %v6592_v36, %v6588_v9 }
 0x4bf   : > { %6430 = vrot.lane.b32.xlu1 %v6394_v63, %s9056_s22  ;;  %5160 = vmatprep.mubr.bf16.mxu0 %v13177_v40  ;;  %v6795_v63 = vmul.f32 %v13273_v6, %v10359_v43 }
 0x4c0   : > { %6428 = vrot.lane.b32.xlu0 %v6393_v61, %s9056_s22  ;;  %v13274_v61 = vld [vmem:[#allocation55_spill] sm:$0xff] }
 0x4c1   : > { %v6794_v31 = vmul.f32 %v13274_v61, %v10498_v42  ;;  %v6789_v51 = vmul.f32 %v13274_v61, %v10508_v45  ;;  %v6812_v5 = vpack.c.bf16 %v6795_v63, %v6790_v32  ;;  %v6798_v37 = vmul.f32 %v13274_v61, %v10734_v27 }
 0x4c2   : > { %8205 = vmatmul.mubr.msk.bf16.gmra.mrb[12].mxu1 %vm1940_vm11, %v9008_v39  ;;  %v12252_v39 = vpop.permute.xlu1 %5327  ;;  %v6803_v63 = vmul.f32 %v13273_v6, %v10657_v44 }
 0x4c3   : > { %6628 = vrot.lane.b32.xlu1 %v6599_v59, %s9054_s20  ;;  %5213 = vmatprep.mubr.bf16.mxu1 %v13177_v40  ;;  %v6811_v8 = vpack.c.bf16 %v6794_v31, %v6789_v51  ;;  %v13285_v51 = vld [vmem:[#allocation56_spill] sm:$0xff] }
 0x4c4   : > { %6424 = vrot.lane.b32.xlu0 %v6391_v19, %s9056_s22  ;;  %v6792_v19 = vmul.f32 0.0, %v13275_v17 }
 0x4c6   : > { %v6814_v25 = vpack.c.bf16 %v6792_v19, %v6792_v19  ;;  %v9010_v19 = vld [vmem:[%s12879_s4 + $0xe8] sm:$0xff]  }
 0x4c7   : > { %6632 = vrot.lane.b32.xlu1 %v6601_v15, %s9054_s20  ;;  %v6791_v15 = vmul.f32 %v13276_v55, %v10534_v62 }
 0x4c8   : > { %6630 = vrot.lane.b32.xlu0 %v6600_v18, %s9054_s20  ;;  %v6802_v18 = vmul.f32 %v13274_v61, %v10725_v4  ;;  %v5336_v61 = vsel %vm13283_vm10, %v12218_v20, %v12171_v54  ;;  %v6801_v20 = vmul.f32 %v13279_v57, %v10641_v24 }
 0x4c9   : > { %v6813_v50 = vpack.c.bf16 %v6796_v14, %v6791_v15 }
 0x4ca   : > { %v6816_v22 = vpack.c.bf16 %v6802_v18, %v6798_v37  ;;  %v13289_v37 = vld [vmem:[#allocation43_spill] sm:$0xff] }
 0x4cb   : > { %6626 = vrot.lane.b32.xlu1 %v6598_v38, %s9054_s20 }
 0x4cc   : > { %6634 = vrot.lane.b32.xlu0 %v6602_v48, %s9054_s20  ;;  %v6793_v48 = vmul.f32 %v13279_v57, %v10361_v28 }
 0x4ce   : > { %v6810_v35 = vpack.c.bf16 %v6793_v48, %v6788_v11 }
 0x4cf   : > { %6640 = vrot.lane.b32.xlu1 %v6605_v49, %s9054_s20 }
 0x4d0   : > { %6638 = vrot.lane.b32.xlu0 %v6604_v60, %s9054_s20  ;;  %v6804_v60 = vmul.f32 %v13276_v55, %v10741_v1 }
 0x4d3   : > { %6636 = vrot.lane.b32.xlu1 %v6603_v21, %s9054_s20 }
 0x4d4   : > { %6642 = vrot.lane.b32.xlu0 %v6606_v34, %s9054_s20  ;;  %v6800_v34 = vmul.f32 %v13276_v55, %v10752_v10  ;;  %v6797_v55 = vmul.f32 %v13279_v57, %v10649_v46 }
 0x4d5   : > { %v12266_v59 = vpop.permute.xlu1 %5551 }
 0x4d6   : > { %v12269_v2 = vpop.permute.xlu0 %5549  ;;  %v6818_v32 = vpack.c.bf16 %v6804_v60, %v6800_v34 }
 0x4d7   : > { %6842 = vrot.lane.b32.xlu1 %v6812_v5, %s9052_s18  ;;  %v7006_v5 = vmul.f32 %v13285_v51, %v10498_v42 }
 0x4d8   : > { %6840 = vrot.lane.b32.xlu0 %v6811_v8, %s9052_s18  ;;  %v5338_v8 = vsel %vm13286_vm15, %v12237_v30, %v12195_v16 }
 0x4d9   : > { %v5100_v13 = vpop.permute.xlu1 %5099 }
 0x4da   : > { %v12279_v12 = vpop.permute.xlu0 %5553  ;;  %v5111_v41 = vsel %vm13277_vm1, %v5100_v13, %v12207_v56  ;;  %v5110_v38 = vsel %vm13278_vm4, %v5098_v53, %v5100_v13  ;;  %v5337_v53 = vsel %vm13280_vm6, %v12171_v54, %v12237_v30  ;;  %v13287_v13 = vld [vmem:[#allocation58_spill] sm:$0xff]  ;;  %vm13292_vm1 = vmmov %vm13291_vm0 }
 0x4db   : > { %6846 = vrot.lane.b32.xlu1 %v6814_v25, %s9052_s18  ;;  %5130 = vmatprep.subr.bf16.mxu0 %v5111_v41  ;;  %v7008_v25 = vmul.f32 %v13287_v13, %v10526_v47  ;;  %v13288_v41 = vld [vmem:[#allocation67_spill] sm:$0xff]  ;;  %vm13293_vm4 = vmmov %vm13291_vm0 }
 0x4dc   : > { %6844 = vrot.lane.b32.xlu0 %v6813_v50, %s9052_s18  ;;  %5131 = vmatpush1.bf16.msra.mxu0 %v5110_v38  ;;  %v6815_v50 = vpack.c.bf16 %v6801_v20, %v6797_v55  ;;  %v7007_v38 = vmul.f32 %v13288_v41, %v10359_v43  ;;  %v7002_v30 = vmul.f32 %v13288_v41, %v10373_v0  ;;  %vm13294_vm6 = vmmov %vm13291_vm0 }
 0x4dd   : > { %5358 = vmatprep.subr.bf16.mxu0 %v5337_v53  ;;  %v5104_v49 = vpop.permute.xlu1 %5103 }
 0x4de   : > { %v12300_v36 = vpop.permute.xlu0 %5547  ;;  %v5113_v9 = vsel %vm13281_vm12, %v5104_v49, %v12038_v23  ;;  %v5112_v21 = vsel %vm13282_vm13, %v12207_v56, %v5104_v49  ;;  %v6799_v23 = vmul.f32 %v13273_v6, %v10663_v52  ;;  %v5339_v56 = vsel %vm13284_vm9, %v12195_v16, %v12256_v7  ;;  %v13290_v49 = vld [vmem:[#allocation44_spill] sm:$0xff] }
 0x4df   : > { %6850 = vrot.lane.b32.xlu1 %v6816_v22, %s9052_s18  ;;  %8212 = vmatmul.mubr.msk.bf16.vlgmr.msra.gmra.mrb[8].mxu0 %vm1940_vm11, %v9009_v58  ;;  %v7001_v6 = vmul.f32 %v13285_v51, %v10508_v45  ;;  %v7003_v16 = vmul.f32 %v13287_v13, %v10534_v62  ;;  %v7024_v11 = vpack.c.bf16 %v7007_v38, %v7002_v30  ;;  %v7004_v22 = vmul.f32 0.0, %v13290_v49  ;;  %v13295_v30 = vld [vmem:[#allocation68_spill] sm:$0xff] }
 0x4e0   : > { %6838 = vrot.lane.b32.xlu0 %v6810_v35, %s9052_s18  ;;  %5183 = vmatprep.subr.bf16.mxu1 %v5113_v9  ;;  %v6817_v54 = vpack.c.bf16 %v6803_v63, %v6799_v23  ;;  %v7000_v9 = vmul.f32 %v13289_v37, %v10353_v33  ;;  %v5567_v23 = vsel %vm419_vm7, %v12269_v2, %v12266_v59 }
 0x4e1   : > { %5184 = vmatpush1.bf16.msra.mxu1 %v5112_v21  ;;  %5359 = vmatpush1.bf16.msra.mxu0 %v5336_v61  ;;  %v12321_v31 = vpop.permute.xlu1 %5555  ;;  %v7023_v15 = vpack.c.bf16 %v7006_v5, %v7001_v6  ;;  %v7025_v48 = vpack.c.bf16 %v7008_v25, %v7003_v16  ;;  %v7015_v21 = vmul.f32 %v13288_v41, %v10657_v44  ;;  %v9012_v16 = vld [vmem:[%s12879_s4 + $0xf8] sm:$0xff]  }
 0x4e2   : > { %v12325_v17 = vpop.permute.xlu0 %5561  ;;  %5411 = vmatprep.subr.bf16.mxu1 %v5339_v56  ;;  %5170 = vmatprep.mubr.bf16.mxu0 %v13177_v40  ;;  %v7026_v56 = vpack.c.bf16 %v7004_v22, %v7004_v22  ;;  %v7011_v5 = vmul.f32 %v13288_v41, %v10663_v52  ;;  %v7010_v6 = vmul.f32 %v13285_v51, %v10734_v27  ;;  %v13297_v22 = vld [vmem:[#allocation61_spill] sm:$0xff] }
 0x4e3   : > { %6854 = vrot.lane.b32.xlu1 %v6818_v32, %s9052_s18  ;;  %v7014_v32 = vmul.f32 %v13285_v51, %v10725_v4  ;;  %v5568_v25 = vsel %vm419_vm7, %v12266_v59, %v12279_v12 }
 0x4e4   : > { %6852 = vrot.lane.b32.xlu0 %v6817_v54, %s9052_s18  ;;  %8214 = vmatmul.mubr.msk.bf16.vlgmr.msra.gmra.mrb[8].mxu1 %vm1940_vm11, %v9009_v58  ;;  %v7005_v58 = vmul.f32 %v13289_v37, %v10361_v28 }
 0x4e5   : > { %5412 = vmatpush1.bf16.msra.mxu1 %v5338_v8  ;;  %v12343_v14 = vpop.permute.xlu1 %5779  ;;  %5223 = vmatprep.mubr.bf16.mxu1 %v13177_v40  ;;  %v5566_v8 = vsel %vm419_vm7, %v12300_v36, %v12269_v2  ;;  %v7028_v51 = vpack.c.bf16 %v7014_v32, %v7010_v6  ;;  %v7016_v2 = vmul.f32 %v13287_v13, %v10741_v1 }
 0x4e6   : > { %v12348_v18 = vpop.permute.xlu0 %5557  ;;  %v7022_v34 = vpack.c.bf16 %v7005_v58, %v7000_v9  ;;  %v7009_v36 = vmul.f32 %v13289_v37, %v10649_v46  ;;  %v13296_v58 = vld [vmem:[#allocation60_spill] sm:$0xff] }
 0x4e7   : > { %7052 = vrot.lane.b32.xlu1 %v7023_v15, %s9050_s16  ;;  %8213 = vmatmul.mubr.msk.bf16.gmra.mrb[12].mxu0 %vm1940_vm11, %v9010_v19  ;;  %v7213_v49 = vmul.f32 %v13296_v58, %v10508_v45 }
 0x4e8   : > { %6848 = vrot.lane.b32.xlu0 %v6815_v50, %s9052_s18  ;;  %5390 = vmatprep.mubr.bf16.mxu0 %v13177_v40  ;;  %v7012_v50 = vmul.f32 %v13287_v13, %v10752_v10 }
 0x4e9   : > { %v12360_v57 = vpop.permute.xlu1 %5783 }
 0x4ea   : > { %v5330_v53 = vpop.permute.xlu0 %5329 }
 0x4eb   : > { %v5340_v60 = vsel %vm13291_vm0, %v12252_v39, %v5330_v53  ;;  %7056 = vrot.lane.b32.xlu1 %v7025_v48, %s9050_s16  ;;  %v5341_v35 = vsel %vm13292_vm1, %v5330_v53, %v12232_v26  ;;  %v9011_v39 = vld [vmem:[%s12879_s4 + $0xf0] sm:$0xff]   ;;  %v7219_v48 = vmul.f32 %v13295_v30, %v10359_v43  ;;  %v7218_v53 = vmul.f32 %v13296_v58, %v10498_v42 }
 0x4ec   : > { %7054 = vrot.lane.b32.xlu0 %v7024_v11, %s9050_s16  ;;  %8215 = vmatmul.mubr.msk.bf16.gmra.mrb[12].mxu1 %vm1940_vm11, %v9010_v19  ;;  %v7029_v19 = vpack.c.bf16 %v7015_v21, %v7011_v5  ;;  %v7214_v11 = vmul.f32 %v13295_v30, %v10373_v0  ;;  %vm13312_vm0 = vcmask 588800  }
 0x4ed   : > { %5360 = vmatprep.subr.bf16.mxu0 %v5341_v35  ;;  %v12376_v63 = vpop.permute.xlu1 %5777  ;;  %5443 = vmatprep.mubr.bf16.mxu1 %v13177_v40 }
 0x4ee   : > { %5361 = vmatpush1.bf16.msra.mxu0 %v5340_v60  ;;  %v5334_v61 = vpop.permute.xlu0 %5333  ;;  %v7216_v60 = vmul.f32 0.0, %v13297_v22  ;;  %v7236_v9 = vpack.c.bf16 %v7219_v48, %v7214_v11  ;;  %v7227_v48 = vmul.f32 %v13295_v30, %v10657_v44 }
 0x4ef   : > { %v5342_v54 = vsel %vm13293_vm4, %v12232_v26, %v5334_v61  ;;  %5588 = vmatprep.subr.bf16.mxu0 %v5567_v23  ;;  %7050 = vrot.lane.b32.xlu1 %v7022_v34, %s9050_s16  ;;  %v5343_v20 = vsel %vm13294_vm6, %v5334_v61, %v12256_v7  ;;  %v5569_v26 = vsel %vm419_vm7, %v12279_v12, %v12321_v31  ;;  %v13298_v23 = vld [vmem:[#allocation62_spill] sm:$0xff]  ;;  %vm13315_vm4 = vmmov %vm13312_vm0 }
 0x4f0   : > { %7058 = vrot.lane.b32.xlu0 %v7026_v56, %s9050_s16  ;;  %5413 = vmatprep.subr.bf16.mxu1 %v5343_v20  ;;  %v7013_v7 = vmul.f32 %v13289_v37, %v10641_v24  ;;  %v7030_v12 = vpack.c.bf16 %v7016_v2, %v7012_v50  ;;  %v7220_v56 = vmul.f32 %v13298_v23, %v10526_v47  ;;  %v13299_v20 = vld [vmem:[#allocation45_spill] sm:$0xff]  ;;  %vm13317_vm6 = vmmov %vm13312_vm0 }
 0x4f1   : > { %8222 = vmatmul.mubr.msk.bf16.vlgmr.msra.gmra.mrb[8].mxu0 %vm1940_vm11, %v9011_v39  ;;  %5414 = vmatpush1.bf16.msra.mxu1 %v5342_v54  ;;  %v12404_v55 = vpop.permute.xlu1 %5791  ;;  %v7215_v32 = vmul.f32 %v13298_v23, %v10534_v62  ;;  %v9013_v54 = vld [vmem:[%s12879_s4 + $0x100] sm:$0xff]   ;;  %v7217_v6 = vmul.f32 %v13299_v20, %v10361_v28  ;;  %v7228_v2 = vmul.f32 %v13298_v23, %v10741_v1 }
 0x4f2   : > { %5589 = vmatpush1.bf16.msra.mxu0 %v5566_v8  ;;  %v12408_v15 = vpop.permute.xlu0 %5781  ;;  %5641 = vmatprep.subr.bf16.mxu1 %v5569_v26  ;;  %v7027_v38 = vpack.c.bf16 %v7013_v7, %v7009_v36  ;;  %v7212_v7 = vmul.f32 %v13299_v20, %v10353_v33  ;;  %v5796_v36 = vsel %vm412_vm5, %v12376_v63, %v12343_v14 }
 0x4f3   : > { %7064 = vrot.lane.b32.xlu1 %v7029_v19, %s9050_s16  ;;  %5400 = vmatprep.mubr.bf16.mxu0 %v13177_v40  ;;  %v7226_v19 = vmul.f32 %v13296_v58, %v10725_v4  ;;  %v7237_v26 = vpack.c.bf16 %v7220_v56, %v7215_v32  ;;  %v5798_v63 = vsel %vm412_vm5, %v12408_v15, %v12360_v57 }
 0x4f4   : > { %7062 = vrot.lane.b32.xlu0 %v7028_v51, %s9050_s16  ;;  %8224 = vmatmul.mubr.msk.bf16.vlgmr.msra.gmra.mrb[8].mxu1 %vm1940_vm11, %v9011_v39  ;;  %v7235_v39 = vpack.c.bf16 %v7218_v53, %v7213_v49  ;;  %v7222_v51 = vmul.f32 %v13296_v58, %v10734_v27  ;;  %v7234_v50 = vpack.c.bf16 %v7217_v6, %v7212_v7  ;;  %v13305_v6 = vld [vmem:[#allocation69_spill] sm:$0xff]  ;;  %v13306_v7 = vld [vmem:[#allocation70_spill] sm:$0xff] }
 0x4f5   : > { %5642 = vmatpush1.bf16.msra.mxu1 %v5568_v25  ;;  %v5560_v41 = vpop.permute.xlu1 %5559  ;;  %5453 = vmatprep.mubr.bf16.mxu1 %v13177_v40  ;;  %v7225_v22 = vmul.f32 %v13299_v20, %v10641_v24 }
 0x4f6   : > { %v12429_v37 = vpop.permute.xlu0 %5785  ;;  %v5570_v59 = vsel %vm419_vm7, %v12348_v18, %v5560_v41  ;;  %v5571_v13 = vsel %vm419_vm7, %v5560_v41, %v12325_v17  ;;  %v5797_v18 = vsel %vm412_vm5, %v12343_v14, %v12408_v15  ;;  %v7240_v41 = vpack.c.bf16 %v7226_v19, %v7222_v51  ;;  %v13301_v15 = vld [vmem:[#allocation72_spill] sm:$0xff] }
 0x4f7   : > { %7060 = vrot.lane.b32.xlu1 %v7027_v38, %s9050_s16  ;;  %5590 = vmatprep.subr.bf16.mxu0 %v5571_v13  ;;  %v7223_v14 = vmul.f32 %v13295_v30, %v10663_v52  ;;  %v7430_v30 = vmul.f32 %v13301_v15, %v10498_v42  ;;  %v7429_v19 = vmul.f32 %v13305_v6, %v10361_v28  ;;  %v7428_v51 = vmul.f32 0.0, %v13306_v7 }
 0x4f8   : > { %7066 = vrot.lane.b32.xlu0 %v7030_v12, %s9050_s16  ;;  %5591 = vmatpush1.bf16.msra.mxu0 %v5570_v59  ;;  %v7224_v59 = vmul.f32 %v13298_v23, %v10752_v10 }
 0x4f9   : > { %8223 = vmatmul.mubr.msk.bf16.gmra.mrb[12].mxu0 %vm1940_vm11, %v9012_v16  ;;  %5818 = vmatprep.subr.bf16.mxu0 %v5797_v18  ;;  %v5564_v35 = vpop.permute.xlu1 %5563  ;;  %v7241_v49 = vpack.c.bf16 %v7227_v48, %v7223_v14  ;;  %v7450_v14 = vpack.c.bf16 %v7428_v51, %v7428_v51 }
 0x4fa   : > { %v5790_v21 = vpop.permute.xlu0 %5789  ;;  %v5572_v34 = vsel %vm419_vm7, %v12325_v17, %v5564_v35  ;;  %v5573_v61 = vsel %vm419_vm7, %v5564_v35, %v12321_v31  ;;  %5620 = vmatprep.mubr.bf16.mxu0 %v13177_v40  ;;  %v7238_v17 = vpack.c.bf16 %v7216_v60, %v7216_v60  ;;  %v5799_v31 = vsel %vm412_vm5, %v12360_v57, %v12429_v37  ;;  %v9014_v57 = vld [vmem:[%s12879_s4 + $0x108] sm:$0xff]  }
 0x4fb   : > { %7266 = vrot.lane.b32.xlu1 %v7236_v9, %s9048_s11  ;;  %5643 = vmatprep.subr.bf16.mxu1 %v5573_v61  ;;  %v5801_v38 = vsel %vm412_vm5, %v5790_v21, %v12404_v55  ;;  %vm13300_vm7 = vcmask 596992   ;;  %v7242_v13 = vpack.c.bf16 %v7228_v2, %v7224_v59  ;;  %v7425_v60 = vmul.f32 %v13301_v15, %v10508_v45 }
 0x4fc   : > { %7264 = vrot.lane.b32.xlu0 %v7235_v39, %s9048_s11  ;;  %8225 = vmatmul.mubr.msk.bf16.gmra.mrb[12].mxu1 %vm1940_vm11, %v9012_v16  ;;  %vm13302_vm12 = vmmov %vm13300_vm7  ;;  %v7221_v9 = vmul.f32 %v13299_v20, %v10649_v46  ;;  %v13303_v39 = vld [vmem:[#allocation5_spill] sm:$0xff]  ;;  %v9015_v20 = vld [vmem:[%s12879_s4 + $0x110] sm:$0xff]   ;;  %v7424_v2 = vmul.f32 %v13305_v6, %v10353_v33 }
 0x4fd   : > { %5644 = vmatpush1.bf16.msra.mxu1 %v5572_v34  ;;  %v5788_v5 = vpop.permute.xlu1 %5787  ;;  %5673 = vmatprep.mubr.bf16.mxu1 %v13177_v40  ;;  %v7447_v34 = vpack.c.bf16 %v7430_v30, %v7425_v60  ;;  %v7432_v61 = vmul.f32 %v13303_v39, %v10526_v47 }
 0x4fe   : > { %v5794_v8 = vpop.permute.xlu0 %5793  ;;  %5871 = vmatprep.subr.bf16.mxu1 %v5799_v31  ;;  %v5800_v58 = vsel %vm412_vm5, %v5788_v5, %v5790_v21  ;;  %v7239_v56 = vpack.c.bf16 %v7225_v22, %v7221_v9 }
 0x4ff   : > { %7270 = vrot.lane.b32.xlu1 %v7238_v17, %s9048_s11  ;;  %v5803_v53 = vsel %vm412_vm5, %v5794_v8, %v12429_v37  ;;  %v5802_v35 = vsel %vm412_vm5, %v12404_v55, %v5794_v8  ;;  %v13304_v55 = vld [vmem:[#allocation73_spill] sm:$0xff]  ;;  %v7427_v17 = vmul.f32 %v13303_v39, %v10534_v62  ;;  %vm13307_vm5 = vmmov %vm13300_vm7 }
 0x500   : > { %7268 = vrot.lane.b32.xlu0 %v7237_v26, %s9048_s11  ;;  %v7431_v32 = vmul.f32 %v13304_v55, %v10359_v43  ;;  %v7426_v31 = vmul.f32 %v13304_v55, %v10373_v0  ;;  %vm13308_vm13 = vmmov %vm13307_vm5  ;;  %v7439_v48 = vmul.f32 %v13304_v55, %v10657_v44 }
 0x501   : > { %8232 = vmatmul.mubr.msk.bf16.vlgmr.msra.gmra.mrb[8].mxu0 %vm1940_vm11, %v9013_v54  ;;  %v12483_v25 = vpop.permute.xlu1 %5994  ;;  %vm13309_vm10 = vmmov %vm13307_vm5 }
 0x502   : > { %5819 = vmatpush1.bf16.msra.mxu0 %v5796_v36  ;;  %v5993_v16 = vpop.permute.xlu0 %5992  ;;  %5630 = vmatprep.mubr.bf16.mxu0 %v13177_v40  ;;  %v7448_v26 = vpack.c.bf16 %v7431_v32, %v7426_v31  ;;  %vm13310_vm9 = vmmov %vm13307_vm5 }
 0x503   : > { %5820 = vmatprep.subr.bf16.mxu0 %v5801_v38  ;;  %7274 = vrot.lane.b32.xlu1 %v7240_v41, %s9048_s11  ;;  %v6009_v12 = vsel %vm13300_vm7, %v5993_v16, %v12483_v25  ;;  %v7446_v38 = vpack.c.bf16 %v7429_v19, %v7424_v2  ;;  %vm13311_vm15 = vmmov %vm13307_vm5  ;;  %v13319_v2 = vld [vmem:[#allocation71_spill] sm:$0xff] }
 0x504   : > { %7262 = vrot.lane.b32.xlu0 %v7234_v50, %s9048_s11  ;;  %8234 = vmatmul.mubr.msk.bf16.vlgmr.msra.gmra.mrb[8].mxu1 %vm1940_vm11, %v9013_v54  ;;  %v7449_v54 = vpack.c.bf16 %v7432_v61, %v7427_v17  ;;  %vm13313_vm1 = vmmov %vm13307_vm5 }
 0x505   : > { %5872 = vmatpush1.bf16.msra.mxu1 %v5798_v63  ;;  %v12505_v11 = vpop.permute.xlu1 %5998  ;;  %5683 = vmatprep.mubr.bf16.mxu1 %v13177_v40  ;;  %v7438_v63 = vmul.f32 %v13301_v15, %v10725_v4  ;;  %vm13318_vm7 = vmmov %vm13312_vm0 }
 0x506   : > { %5821 = vmatpush1.bf16.msra.mxu0 %v5800_v58  ;;  %5873 = vmatprep.subr.bf16.mxu1 %v5803_v53  ;;  %v5997_v18 = vpop.permute.xlu0 %5996  ;;  %v7434_v58 = vmul.f32 %v13301_v15, %v10734_v27  ;;  %v7440_v15 = vmul.f32 %v13303_v39, %v10741_v1 }
 0x507   : > { %6030 = vmatprep.subr.bf16.mxu0 %v6009_v12  ;;  %7278 = vrot.lane.b32.xlu1 %v7242_v13, %s9048_s11  ;;  %v6011_v37 = vsel %vm13302_vm12, %v5997_v18, %v12505_v11  ;;  %v6010_v13 = vsel %vm13310_vm9, %v12483_v25, %v5997_v18  ;;  %v7437_v25 = vmul.f32 %v13305_v6, %v10641_v24  ;;  %vm13320_vm12 = vmmov %vm13312_vm0 }
 0x508   : > { %7276 = vrot.lane.b32.xlu0 %v7241_v49, %s9048_s11  ;;  %v9016_v49 = vld [vmem:[%s12879_s4 + $0x118] sm:$0xff]   ;;  %v7452_v22 = vpack.c.bf16 %v7438_v63, %v7434_v58  ;;  %vm13324_vm9 = vmmov %vm13312_vm0 }
 0x509   : > { %8233 = vmatmul.mubr.msk.bf16.gmra.mrb[12].mxu0 %vm1940_vm11, %v9014_v57  ;;  %5874 = vmatpush1.bf16.msra.mxu1 %v5802_v35  ;;  %v6003_v21 = vpop.permute.xlu1 %6002  ;;  %v7436_v35 = vmul.f32 %v13303_v39, %v10752_v10  ;;  %v7638_v39 = vmul.f32 %v10849_v29, %v10373_v0 }
 0x50a   : > { %6083 = vmatprep.subr.bf16.mxu1 %v6011_v37  ;;  %v5991_v23 = vpop.permute.xlu0 %5990  ;;  %5850 = vmatprep.mubr.bf16.mxu0 %v13177_v40  ;;  %v7433_v37 = vmul.f32 %v13305_v6, %v10649_v46 }
 0x50b   : > { %7476 = vrot.lane.b32.xlu1 %v7447_v34, %s9045_s30  ;;  %v6008_v50 = vsel %vm13308_vm13, %v5991_v23, %v5993_v16  ;;  %v7435_v16 = vmul.f32 %v13304_v55, %v10663_v52  ;;  %v7643_v34 = vmul.f32 %v10849_v29, %v10359_v43  ;;  %v7454_v23 = vpack.c.bf16 %v7440_v15, %v7436_v35  ;;  %vm13322_vm13 = vmmov %vm13312_vm0 }
 0x50c   : > { %7272 = vrot.lane.b32.xlu0 %v7239_v56, %s9048_s11  ;;  %8235 = vmatmul.mubr.msk.bf16.gmra.mrb[12].mxu1 %vm1940_vm11, %v9014_v57  ;;  %v13314_v56 = vld [vmem:[#allocation9_spill] sm:$0xff] }
 0x50d   : > { %v6007_v5 = vpop.permute.xlu1 %6006  ;;  %5903 = vmatprep.mubr.bf16.mxu1 %v13177_v40  ;;  %v7453_v30 = vpack.c.bf16 %v7439_v48, %v7435_v16  ;;  %v7642_v55 = vmul.f32 %v13314_v56, %v10498_v42  ;;  %v7637_v43 = vmul.f32 %v13314_v56, %v10508_v45  ;;  %v7660_v31 = vpack.c.bf16 %v7643_v34, %v7638_v39  ;;  %v9017_v42 = vld [vmem:[%s12879_s4 + $0x120] sm:$0xff]   ;;  %v7851_v34 = vld [vmem:[%s12880_s5 + $0x18] sm:$0xff] }
 0x50e   : > { %v6005_v8 = vpop.permute.xlu0 %6004  ;;  %v6015_v53 = vsel %vm13311_vm15, %v6007_v5, %v12505_v11  ;;  %v7650_v7 = vmul.f32 %v13314_v56, %v10725_v4 }
 0x50f   : > { %7480 = vrot.lane.b32.xlu1 %v7449_v54, %s9045_s30  ;;  %v6013_v36 = vsel %vm13307_vm5, %v6003_v21, %v6005_v8  ;;  %v6014_v60 = vsel %vm13313_vm1, %v6005_v8, %v6007_v5  ;;  %v7640_v5 = vmul.f32 0.0, %v10790_v3  ;;  %v7659_v0 = vpack.c.bf16 %v7642_v55, %v7637_v43  ;;  %vm13321_vm5 = vmmov %vm13312_vm0 }
 0x510   : > { %7478 = vrot.lane.b32.xlu0 %v7448_v26, %s9045_s30 }
 0x511   : > { %8242 = vmatmul.mubr.msk.bf16.vlgmr.msra.gmra.mrb[8].mxu0 %vm1940_vm11, %v9015_v20  ;;  %v12552_v41 = vpop.permute.xlu1 %6204  ;;  %v7662_v26 = vpack.c.bf16 %v7640_v5, %v7640_v5 }
 0x512   : > { %6031 = vmatpush1.bf16.msra.mxu0 %v6008_v50  ;;  %v6001_v59 = vpop.permute.xlu0 %6000  ;;  %5860 = vmatprep.mubr.bf16.mxu0 %v13177_v40 }
 0x513   : > { %6032 = vmatprep.subr.bf16.mxu0 %v6013_v36  ;;  %v6012_v12 = vsel %vm13309_vm10, %v6001_v59, %v6003_v21  ;;  %7474 = vrot.lane.b32.xlu1 %v7446_v38, %s9045_s30  ;;  %v7451_v21 = vpack.c.bf16 %v7437_v25, %v7433_v37  ;;  %v7641_v36 = vmul.f32 %v13319_v2, %v10361_v28  ;;  %v9018_v59 = vld [vmem:[%s12879_s4 + $0x128] sm:$0xff]   ;;  %vm13323_vm10 = vcmask 580608  }
 0x514   : > { %7482 = vrot.lane.b32.xlu0 %v7450_v14, %s9045_s30  ;;  %8244 = vmatmul.mubr.msk.bf16.vlgmr.msra.gmra.mrb[8].mxu1 %vm1940_vm11, %v9015_v20  ;;  %v13316_v20 = vld [vmem:[#allocation6_spill] sm:$0xff]  ;;  %v7636_v38 = vmul.f32 %v13319_v2, %v10353_v33  ;;  %vm13325_vm15 = vmmov %vm13323_vm10 }
 0x515   : > { %6084 = vmatpush1.bf16.msra.mxu1 %v6010_v13  ;;  %v6209_v57 = vpop.permute.xlu1 %6208  ;;  %5913 = vmatprep.mubr.bf16.mxu1 %v13177_v40  ;;  %v7644_v6 = vmul.f32 %v13316_v20, %v10526_v47  ;;  %v7639_v19 = vmul.f32 %v13316_v20, %v10534_v62  ;;  %v7648_v16 = vmul.f32 %v13316_v20, %v10752_v10 }
 0x516   : > { %6033 = vmatpush1.bf16.msra.mxu0 %v6012_v12  ;;  %6085 = vmatprep.subr.bf16.mxu1 %v6015_v53  ;;  %v6207_v18 = vpop.permute.xlu0 %6206  ;;  %v7658_v63 = vpack.c.bf16 %v7641_v36, %v7636_v38  ;;  %v7651_v12 = vmul.f32 %v10849_v29, %v10657_v44  ;;  %v7649_v10 = vmul.f32 %v13319_v2, %v10641_v24  ;;  %v9019_v24 = vld [vmem:[%s12879_s4 + $0x130] sm:$0xff]  }
 0x517   : > { %7488 = vrot.lane.b32.xlu1 %v7453_v30, %s9045_s30  ;;  %v6221_v11 = vsel %vm13312_vm0, %v12552_v41, %v6207_v18  ;;  %v7661_v51 = vpack.c.bf16 %v7644_v6, %v7639_v19  ;;  %v6222_v4 = vsel %vm13322_vm13, %v6207_v18, %v6209_v57  ;;  %vm13326_vm0 = vmmov %vm13323_vm10 }
 0x518   : > { %7486 = vrot.lane.b32.xlu0 %v7452_v22, %s9045_s30  ;;  %6242 = vmatprep.subr.bf16.mxu0 %v6221_v11  ;;  %v7849_v11 = vld [vmem:[%s12880_s5 + $0x8] sm:$0xff]  ;;  %vm13327_vm1 = vmmov %vm13326_vm0 }
 0x519   : > { %8243 = vmatmul.mubr.msk.bf16.gmra.mrb[12].mxu0 %vm1940_vm11, %v9016_v49  ;;  %6086 = vmatpush1.bf16.msra.mxu1 %v6014_v60  ;;  %v6203_v9 = vpop.permute.xlu1 %6202 }
 0x51a   : > { %v6211_v61 = vpop.permute.xlu0 %6210  ;;  %6062 = vmatprep.mubr.bf16.mxu0 %v13177_v40  ;;  %v6220_v8 = vsel %vm13318_vm7, %v6203_v9, %v12552_v41  ;;  %v7646_v41 = vmul.f32 %v13314_v56, %v10734_v27  ;;  %v7652_v27 = vmul.f32 %v13316_v20, %v10741_v1  ;;  %v7647_v1 = vmul.f32 %v10849_v29, %v10663_v52  ;;  %v7848_v29 = vld [vmem:[%s12880_s5] sm:$0xff]  ;;  %vm13330_vm7 = vmmov %vm13326_vm0 }
 0x51b   : > { %7484 = vrot.lane.b32.xlu1 %v7451_v21, %s9045_s30  ;;  %v6223_v32 = vsel %vm13315_vm4, %v6209_v57, %v6211_v61  ;;  %v7645_v52 = vmul.f32 %v13319_v2, %v10649_v46  ;;  %v7850_v46 = vld [vmem:[%s12880_s5 + $0x10] sm:$0xff]  ;;  %vm13328_vm4 = vmmov %vm13326_vm0 }
 0x51c   : > { %7490 = vrot.lane.b32.xlu0 %v7454_v23, %s9045_s30  ;;  %8245 = vmatmul.mubr.msk.bf16.gmra.mrb[12].mxu1 %vm1940_vm11, %v9016_v49  ;;  %v7664_v48 = vpack.c.bf16 %v7650_v7, %v7646_v41  ;;  %v7666_v44 = vpack.c.bf16 %v7652_v27, %v7648_v16  ;;  %v7665_v57 = vpack.c.bf16 %v7651_v12, %v7647_v1  ;;  %s8346_s30 = sshll.u32 %s13349_s25, 7 }
 0x51d   : > { %6295 = vmatprep.subr.bf16.mxu1 %v6223_v32  ;;  %v6217_v17 = vpop.permute.xlu1 %6216  ;;  %6115 = vmatprep.mubr.bf16.mxu1 %v13177_v40  ;;  %v7663_v18 = vpack.c.bf16 %v7649_v10, %v7645_v52  ;;  %s12840_s22 = scalar_lea.vmem %s12881_s6, %s8346_s30 }
 0x51e   : > { %v6215_v54 = vpop.permute.xlu0 %6214 }
 0x51f   : > { %7690 = vrot.lane.b32.xlu1 %v7660_v31, %s9057_s23  ;;  %v6225_v45 = vsel %vm13317_vm6, %v6215_v54, %v6217_v17  ;;  %vm13329_vm6 = vmmov %vm13326_vm0  ;;  %v9021_v31 = vld [vmem:[%s12879_s4 + $0x140] sm:$0xff]  }
 0x520   : > { %7688 = vrot.lane.b32.xlu0 %v7659_v0, %s9057_s23 }
 0x521   : > { %8252 = vmatmul.mubr.msk.bf16.vlgmr.msra.gmra.mrb[8].mxu0 %vm1940_vm11, %v9017_v42  ;;  %v6213_v3 = vpop.permute.xlu1 %6212 }
 0x522   : > { %6243 = vmatpush1.bf16.msra.mxu0 %v6220_v8  ;;  %v6219_v47 = vpop.permute.xlu0 %6218  ;;  %6072 = vmatprep.mubr.bf16.mxu0 %v13177_v40  ;;  %v6224_v62 = vsel %vm13320_vm12, %v6213_v3, %v6215_v54  ;;  %vm13331_vm12 = vmmov %vm13326_vm0  ;;  %v9022_v8 = vld [vmem:[%s12879_s4 + $0x148] sm:$0xff]  }
 0x523   : > { %6244 = vmatprep.subr.bf16.mxu0 %v6225_v45  ;;  %7694 = vrot.lane.b32.xlu1 %v7662_v26, %s9057_s23  ;;  %v6227_v50 = vsel %vm13321_vm5, %v6219_v47, %v6211_v61  ;;  %v6226_v13 = vsel %vm13324_vm9, %v6217_v17, %v6219_v47  ;;  %v9020_v61 = vld [vmem:[%s12879_s4 + $0x138] sm:$0xff]   ;;  %vm13332_vm5 = vcmask 531456  }
 0x524   : > { %7692 = vrot.lane.b32.xlu0 %v7661_v51, %s9057_s23  ;;  %8254 = vmatmul.mubr.msk.bf16.vlgmr.msra.gmra.mrb[8].mxu1 %vm1940_vm11, %v9017_v42  ;;  %vm13333_vm13 = vmmov %vm13332_vm5 }
 0x525   : > { %6296 = vmatpush1.bf16.msra.mxu1 %v6222_v4  ;;  %v6419_v28 = vpop.permute.xlu1 %6418  ;;  %6125 = vmatprep.mubr.bf16.mxu1 %v13177_v40  ;;  %vm13335_vm9 = vmmov %vm13332_vm5 }
 0x526   : > { %6245 = vmatpush1.bf16.msra.mxu0 %v6224_v62  ;;  %6297 = vmatprep.subr.bf16.mxu1 %v6227_v50  ;;  %v6417_v14 = vpop.permute.xlu0 %6416  ;;  %v9023_v50 = vld [vmem:[%s12879_s4 + $0x150] sm:$0xff]  }
 0x527   : > { %7698 = vrot.lane.b32.xlu1 %v7664_v48, %s9057_s23  ;;  %v6433_v33 = vsel %vm13323_vm10, %v6417_v14, %v6419_v28  ;;  %vm13334_vm10 = vmmov %vm13332_vm5 }
 0x528   : > { %7686 = vrot.lane.b32.xlu0 %v7658_v63, %s9057_s23  ;;  %6454 = vmatprep.subr.bf16.mxu0 %v6433_v33 }
 0x529   : > { %8253 = vmatmul.mubr.msk.bf16.gmra.mrb[12].mxu0 %vm1940_vm11, %v9018_v59  ;;  %6298 = vmatpush1.bf16.msra.mxu1 %v6226_v13  ;;  %v6423_v58 = vpop.permute.xlu1 %6422 }
 0x52a   : > { %v6421_v53 = vpop.permute.xlu0 %6420  ;;  %6274 = vmatprep.mubr.bf16.mxu0 %v13177_v40 }
 0x52b   : > { %7702 = vrot.lane.b32.xlu1 %v7666_v44, %s9057_s23  ;;  %v6435_v30 = vsel %vm13325_vm15, %v6421_v53, %v6423_v58  ;;  %v6434_v9 = vsel %vm13329_vm6, %v6419_v28, %v6421_v53  ;;  %vm13336_vm15 = vmmov %vm13332_vm5  ;;  %v9025_v53 = vld [vmem:[%s12879_s4 + $0x160] sm:$0xff]  }
 0x52c   : > { %7700 = vrot.lane.b32.xlu0 %v7665_v57, %s9057_s23  ;;  %8255 = vmatmul.mubr.msk.bf16.gmra.mrb[12].mxu1 %vm1940_vm11, %v9018_v59 }
 0x52d   : > { %6507 = vmatprep.subr.bf16.mxu1 %v6435_v30  ;;  %v6427_v49 = vpop.permute.xlu1 %6426  ;;  %6327 = vmatprep.mubr.bf16.mxu1 %v13177_v40 }
 0x52e   : > { %v6415_v25 = vpop.permute.xlu0 %6414 }
 0x52f   : > { %v6432_v22 = vsel %vm13326_vm0, %v6415_v25, %v6417_v14  ;;  %7854 = vperm.xlu1 %8978, %v7848_v29   ;;  %vm13337_vm0 = vmmov %vm13332_vm5  ;;  %v9024_v14 = vld [vmem:[%s12879_s4 + $0x158] sm:$0xff]  }
 0x530   : > { %7696 = vrot.lane.b32.xlu0 %v7663_v18, %s9057_s23 }
 0x531   : > { %8262 = vmatmul.mubr.msk.bf16.vlgmr.msra.gmra.mrb[8].mxu0 %vm1940_vm11, %v9019_v24  ;;  %v6431_v15 = vpop.permute.xlu1 %6430 }
 0x532   : > { %6455 = vmatpush1.bf16.msra.mxu0 %v6432_v22  ;;  %v6429_v37 = vpop.permute.xlu0 %6428  ;;  %6284 = vmatprep.mubr.bf16.mxu0 %v13177_v40  ;;  %v6439_v35 = vsel %vm13328_vm4, %v6431_v15, %v6423_v58  ;;  %vm13339_vm4 = vmmov %vm13337_vm0 }
 0x533   : > { %7864 = vperm.xlu1 %8978, %v7850_v46   ;;  %v6437_v60 = vsel %vm13327_vm1, %v6427_v49, %v6429_v37  ;;  %v6438_v55 = vsel %vm13331_vm12, %v6429_v37, %v6431_v15  ;;  %vm13338_vm1 = vmmov %vm13337_vm0  ;;  %v9026_v46 = vld [vmem:[%s12879_s4 + $0x168] sm:$0xff]  }
 0x534   : > { %7859 = vperm.xlu0 %8977, %v7849_v11   ;;  %8264 = vmatmul.mubr.msk.bf16.vlgmr.msra.gmra.mrb[8].mxu1 %vm1940_vm11, %v9019_v24 }
 0x535   : > { %6456 = vmatprep.subr.bf16.mxu0 %v6437_v60  ;;  %6508 = vmatpush1.bf16.msra.mxu1 %v6434_v9  ;;  %v6629_v21 = vpop.permute.xlu1 %6628 }
 0x536   : > { %6509 = vmatprep.subr.bf16.mxu1 %v6439_v35  ;;  %v6425_v23 = vpop.permute.xlu0 %6424  ;;  %6337 = vmatprep.mubr.bf16.mxu1 %v13177_v40 }
 0x537   : > { %v6436_v56 = vsel %vm13330_vm7, %v6425_v23, %v6427_v49 }
 0x538   : > { %7869 = vperm.xlu0 %8977, %v7851_v34   ;;  %6457 = vmatpush1.bf16.msra.mxu0 %v6436_v56 }
 0x539   : > { %8263 = vmatmul.mubr.msk.bf16.gmra.mrb[12].mxu0 %vm1940_vm11, %v9020_v61  ;;  %6510 = vmatpush1.bf16.msra.mxu1 %v6438_v55  ;;  %v6633_v32 = vpop.permute.xlu1 %6632 }
 0x53a   : > { %v6631_v39 = vpop.permute.xlu0 %6630  ;;  %6486 = vmatprep.mubr.bf16.mxu0 %v13177_v40 }
 0x53b   : > { %v6645_v43 = vsel %vm13332_vm5, %v6629_v21, %v6631_v39  ;;  %v6646_v45 = vsel %vm13336_vm15, %v6631_v39, %v6633_v32 }
 0x53c   : > { %8265 = vmatmul.mubr.msk.bf16.gmra.mrb[12].mxu1 %vm1940_vm11, %v9020_v61  ;;  %6666 = vmatprep.subr.bf16.mxu0 %v6645_v43  ;;  %v9027_v61 = vld [vmem:[%s12879_s4 + $0x170] sm:$0xff]  }
 0x53d   : > { %v6627_v17 = vpop.permute.xlu1 %6626  ;;  %6539 = vmatprep.mubr.bf16.mxu1 %v13177_v40 }
 0x53e   : > { %v6635_v42 = vpop.permute.xlu0 %6634  ;;  %v6644_v5 = vsel %vm13333_vm13, %v6627_v17, %v6629_v21 }
 0x53f   : > { %v6647_v54 = vsel %vm13334_vm10, %v6633_v32, %v6635_v42 }
 0x540   : > { %6719 = vmatprep.subr.bf16.mxu1 %v6647_v54 }
 0x541   : > { %8272 = vmatmul.mubr.msk.bf16.vlgmr.msra.gmra.mrb[8].mxu0 %vm1940_vm11, %v9021_v31  ;;  %v6641_v0 = vpop.permute.xlu1 %6640 }
 0x542   : > { %6667 = vmatpush1.bf16.msra.mxu0 %v6644_v5  ;;  %v6639_v20 = vpop.permute.xlu0 %6638  ;;  %6496 = vmatprep.mubr.bf16.mxu0 %v13177_v40 }
 0x543   : > { %v6649_v6 = vsel %vm13335_vm9, %v6639_v20, %v6641_v0 }
 0x544   : > { %8274 = vmatmul.mubr.msk.bf16.vlgmr.msra.gmra.mrb[8].mxu1 %vm1940_vm11, %v9021_v31  ;;  %6668 = vmatprep.subr.bf16.mxu0 %v6649_v6  ;;  %v9028_v31 = vld [vmem:[%s12879_s4 + $0x178] sm:$0xff]  }
 0x545   : > { %6720 = vmatpush1.bf16.msra.mxu1 %v6646_v45  ;;  %v6637_v19 = vpop.permute.xlu1 %6636  ;;  %6549 = vmatprep.mubr.bf16.mxu1 %v13177_v40 }
 0x546   : > { %v6643_v3 = vpop.permute.xlu0 %6642  ;;  %v6648_v26 = vsel %vm13337_vm0, %v6637_v19, %v6639_v20 }
 0x547   : > { %v6650_v7 = vsel %vm13338_vm1, %v6641_v0, %v6643_v3  ;;  %6669 = vmatpush1.bf16.msra.mxu0 %v6648_v26  ;;  %v6651_v47 = vsel %vm13339_vm4, %v6643_v3, %v6635_v42 }
 0x548   : > { %6721 = vmatprep.subr.bf16.mxu1 %v6651_v47 }
 0x549   : > { %6722 = vmatpush1.bf16.msra.mxu1 %v6650_v7  ;;  %v6843_v51 = vpop.permute.xlu1 %6842  ;;  %8273 = vmatmul.mubr.msk.bf16.gmra.mrb[12].mxu0 %vm1940_vm11, %v9022_v8 }
 0x54a   : > { %v6841_v2 = vpop.permute.xlu0 %6840  ;;  %6698 = vmatprep.mubr.bf16.mxu0 %v13177_v40 }
 0x54b   : > { %v6857_v36 = vsel %vm369_vm3, %v6841_v2, %v6843_v51 }
 0x54c   : > { %8275 = vmatmul.mubr.msk.bf16.gmra.mrb[12].mxu1 %vm1940_vm11, %v9022_v8  ;;  %6878 = vmatprep.subr.bf16.mxu0 %v6857_v36  ;;  %v9029_v8 = vld [vmem:[%s12879_s4 + $0x180] sm:$0xff]  }
 0x54d   : > { %v6847_v62 = vpop.permute.xlu1 %6846  ;;  %6751 = vmatprep.mubr.bf16.mxu1 %v13177_v40 }
 0x54e   : > { %v6845_v41 = vpop.permute.xlu0 %6844 }
 0x54f   : > { %v6859_v4 = vsel %vm369_vm3, %v6845_v41, %v6847_v62  ;;  %v6858_v59 = vsel %vm369_vm3, %v6843_v51, %v6845_v41 }
 0x550   : > { %6931 = vmatprep.subr.bf16.mxu1 %v6859_v4 }
 0x551   : > { %v6851_v38 = vpop.permute.xlu1 %6850  ;;  %8282 = vmatmul.mubr.msk.bf16.vlgmr.msra.gmra.mrb[8].mxu0 %vm1940_vm11, %v9023_v50 }
 0x552   : > { %v6839_v28 = vpop.permute.xlu0 %6838  ;;  %6708 = vmatprep.mubr.bf16.mxu0 %v13177_v40 }
 0x553   : > { %v6856_v48 = vsel %vm369_vm3, %v6839_v28, %v6841_v2 }
 0x554   : > { %8284 = vmatmul.mubr.msk.bf16.vlgmr.msra.gmra.mrb[8].mxu1 %vm1940_vm11, %v9023_v50  ;;  %6879 = vmatpush1.bf16.msra.mxu0 %v6856_v48  ;;  %v9030_v50 = vld [vmem:[%s12879_s4 + $0x188] sm:$0xff]  }
 0x555   : > { %6932 = vmatpush1.bf16.msra.mxu1 %v6858_v59  ;;  %v6855_v27 = vpop.permute.xlu1 %6854  ;;  %6761 = vmatprep.mubr.bf16.mxu1 %v13177_v40 }
 0x556   : > { %v6853_v63 = vpop.permute.xlu0 %6852  ;;  %v6863_v12 = vsel %vm369_vm3, %v6855_v27, %v6847_v62 }
 0x557   : > { %v6862_v33 = vsel %vm369_vm3, %v6853_v63, %v6855_v27  ;;  %v6861_v16 = vsel %vm369_vm3, %v6851_v38, %v6853_v63  ;;  %6933 = vmatprep.subr.bf16.mxu1 %v6863_v12  ;;  %v9031_v63 = vld [vmem:[%s12879_s4 + $0x190] sm:$0xff]  }
 0x558   : > { %6880 = vmatprep.subr.bf16.mxu0 %v6861_v16 }
 0x559   : > { %6934 = vmatpush1.bf16.msra.mxu1 %v6862_v33  ;;  %v7053_v13 = vpop.permute.xlu1 %7052  ;;  %8283 = vmatmul.mubr.msk.bf16.gmra.mrb[12].mxu0 %vm1940_vm11, %v9024_v14 }
 0x55a   : > { %v6849_v1 = vpop.permute.xlu0 %6848  ;;  %6910 = vmatprep.mubr.bf16.mxu0 %v13177_v40 }
 0x55b   : > { %v6860_v58 = vsel %vm369_vm3, %v6849_v1, %v6851_v38  ;;  %vm13340_vm3 = vcmask 465920  }
 0x55c   : > { %8285 = vmatmul.mubr.msk.bf16.gmra.mrb[12].mxu1 %vm1940_vm11, %v9024_v14  ;;  %6881 = vmatpush1.bf16.msra.mxu0 %v6860_v58  ;;  %vm13342_vm6 = vmmov %vm13340_vm3 }
 0x55d   : > { %v7057_v44 = vpop.permute.xlu1 %7056  ;;  %6963 = vmatprep.mubr.bf16.mxu1 %v13177_v40  ;;  %vm13343_vm7 = vmmov %vm13340_vm3 }
 0x55e   : > { %v7055_v57 = vpop.permute.xlu0 %7054  ;;  %vm13344_vm12 = vmmov %vm13340_vm3 }
 0x55f   : > { %v7069_v10 = vsel %vm360_vm8, %v7053_v13, %v7055_v57  ;;  %v7070_v24 = vsel %vm360_vm8, %v7055_v57, %v7057_v44  ;;  %vm13345_vm5 = vmmov %vm13340_vm3 }
 0x560   : > { %7090 = vmatprep.subr.bf16.mxu0 %v7069_v10  ;;  %vm13346_vm13 = vmmov %vm13340_vm3 }
 0x561   : > { %v7051_v30 = vpop.permute.xlu1 %7050  ;;  %8292 = vmatmul.mubr.msk.bf16.vlgmr.msra.gmra.mrb[8].mxu0 %vm1940_vm11, %v9025_v53  ;;  %vm13347_vm10 = vmmov %vm13340_vm3 }
 0x562   : > { %v7059_v52 = vpop.permute.xlu0 %7058  ;;  %v7068_v29 = vsel %vm360_vm8, %v7051_v30, %v7053_v13  ;;  %6920 = vmatprep.mubr.bf16.mxu0 %v13177_v40 }
 0x563   : > { %7091 = vmatpush1.bf16.msra.mxu0 %v7068_v29  ;;  %v7071_v49 = vsel %vm360_vm8, %v7057_v44, %v7059_v52 }
 0x564   : > { %8294 = vmatmul.mubr.msk.bf16.vlgmr.msra.gmra.mrb[8].mxu1 %vm1940_vm11, %v9025_v53  ;;  %7143 = vmatprep.subr.bf16.mxu1 %v7071_v49  ;;  %v9032_v53 = vld [vmem:[%s12879_s4 + $0x198] sm:$0xff]  }
 0x565   : > { %7144 = vmatpush1.bf16.msra.mxu1 %v7070_v24  ;;  %v7065_v25 = vpop.permute.xlu1 %7064  ;;  %6973 = vmatprep.mubr.bf16.mxu1 %v13177_v40 }
 0x566   : > { %v7063_v18 = vpop.permute.xlu0 %7062 }
 0x567   : > { %v7073_v22 = vsel %vm360_vm8, %v7063_v18, %v7065_v25 }
 0x568   : > { %7092 = vmatprep.subr.bf16.mxu0 %v7073_v22 }
 0x569   : > { %v7061_v15 = vpop.permute.xlu1 %7060  ;;  %8293 = vmatmul.mubr.msk.bf16.gmra.mrb[12].mxu0 %vm1940_vm11, %v9026_v46 }
 0x56a   : > { %v7067_v11 = vpop.permute.xlu0 %7066  ;;  %v7072_v37 = vsel %vm360_vm8, %v7061_v15, %v7063_v18  ;;  %7122 = vmatprep.mubr.bf16.mxu0 %v13177_v40  ;;  %v9033_v18 = vld [vmem:[%s12879_s4 + $0x1a0] sm:$0xff]   ;;  %v9034_v15 = vld [vmem:[%s12879_s4 + $0x1a8] sm:$0xff]  }
 0x56b   : > { %v7074_v60 = vsel %vm360_vm8, %v7065_v25, %v7067_v11  ;;  %7093 = vmatpush1.bf16.msra.mxu0 %v7072_v37  ;;  %v7075_v35 = vsel %vm360_vm8, %v7067_v11, %v7059_v52  ;;  %vm13341_vm8 = vmmov %vm13340_vm3 }
 0x56c   : > { %8295 = vmatmul.mubr.msk.bf16.gmra.mrb[12].mxu1 %vm1940_vm11, %v9026_v46  ;;  %7145 = vmatprep.subr.bf16.mxu1 %v7075_v35 }
 0x56d   : > { %7146 = vmatpush1.bf16.msra.mxu1 %v7074_v60  ;;  %v7267_v9 = vpop.permute.xlu1 %7266  ;;  %7175 = vmatprep.mubr.bf16.mxu1 %v13177_v40 }
 0x56e   : > { %v7265_v21 = vpop.permute.xlu0 %7264 }
 0x56f   : > { %v7281_v34 = vsel %vm13340_vm3, %v7265_v21, %v7267_v9 }
 0x570   : > { %7302 = vmatprep.subr.bf16.mxu0 %v7281_v34 }
 0x571   : > { %v7271_v23 = vpop.permute.xlu1 %7270  ;;  %8302 = vmatmul.mubr.msk.bf16.vlgmr.msra.gmra.mrb[8].mxu0 %vm1940_vm11, %v9027_v61 }
 0x572   : > { %v7269_v56 = vpop.permute.xlu0 %7268  ;;  %7132 = vmatprep.mubr.bf16.mxu0 %v13177_v40 }
 0x573   : > { %v7282_v55 = vsel %vm13341_vm8, %v7267_v9, %v7269_v56  ;;  %v7283_v32 = vsel %vm13342_vm6, %v7269_v56, %v7271_v23 }
 0x574   : > { %8304 = vmatmul.mubr.msk.bf16.vlgmr.msra.gmra.mrb[8].mxu1 %vm1940_vm11, %v9027_v61  ;;  %7355 = vmatprep.subr.bf16.mxu1 %v7283_v32 }
 0x575   : > { %7356 = vmatpush1.bf16.msra.mxu1 %v7282_v55  ;;  %v7275_v39 = vpop.permute.xlu1 %7274  ;;  %7185 = vmatprep.mubr.bf16.mxu1 %v13177_v40 }
 0x576   : > { %v7263_v43 = vpop.permute.xlu0 %7262 }
 0x577   : > { %v7280_v17 = vsel %vm13343_vm7, %v7263_v43, %v7265_v21 }
 0x578   : > { %7303 = vmatpush1.bf16.msra.mxu0 %v7280_v17 }
 0x579   : > { %v7279_v42 = vpop.permute.xlu1 %7278  ;;  %8303 = vmatmul.mubr.msk.bf16.gmra.mrb[12].mxu0 %vm1940_vm11, %v9028_v31 }
 0x57a   : > { %v7277_v5 = vpop.permute.xlu0 %7276  ;;  %v7287_v54 = vsel %vm13344_vm12, %v7279_v42, %v7271_v23  ;;  %7334 = vmatprep.mubr.bf16.mxu0 %v13177_v40 }
 0x57b   : > { %v7286_v0 = vsel %vm13345_vm5, %v7277_v5, %v7279_v42  ;;  %v7285_v20 = vsel %vm13346_vm13, %v7275_v39, %v7277_v5  ;;  %7357 = vmatprep.subr.bf16.mxu1 %v7287_v54 }
 0x57c   : > { %8305 = vmatmul.mubr.msk.bf16.gmra.mrb[12].mxu1 %vm1940_vm11, %v9028_v31  ;;  %7304 = vmatprep.subr.bf16.mxu0 %v7285_v20 }
 0x57d   : > { %7358 = vmatpush1.bf16.msra.mxu1 %v7286_v0  ;;  %v7477_v6 = vpop.permute.xlu1 %7476  ;;  %7387 = vmatprep.mubr.bf16.mxu1 %v13177_v40 }
 0x57e   : > { %v7273_v45 = vpop.permute.xlu0 %7272 }
 0x57f   : > { %v7284_v19 = vsel %vm13347_vm10, %v7273_v45, %v7275_v39 }
 0x580   : > { %7305 = vmatpush1.bf16.msra.mxu0 %v7284_v19 }
 0x581   : > { %v7481_v3 = vpop.permute.xlu1 %7480 }
 0x582   : > { %v7479_v26 = vpop.permute.xlu0 %7478 }
 0x583   : > { %v7493_v7 = vsel %vm342_vm2, %v7477_v6, %v7479_v26  ;;  %8312 = vmatmul.mubr.msk.bf16.vlgmr.msra.gmra.mrb[8].mxu0 %vm1940_vm11, %v9029_v8  ;;  %v7494_v62 = vsel %vm342_vm2, %v7479_v26, %v7481_v3 }
 0x584   : > { %8314 = vmatmul.mubr.msk.bf16.vlgmr.msra.gmra.mrb[8].mxu1 %vm1940_vm11, %v9029_v8  ;;  %7514 = vmatprep.subr.bf16.mxu0 %v7493_v7 }
 0x585   : > { %v7475_v47 = vpop.permute.xlu1 %7474  ;;  %7397 = vmatprep.mubr.bf16.mxu1 %v13177_v40  ;;  %7344 = vmatprep.mubr.bf16.mxu0 %v13177_v40 }
 0x586   : > { %v7483_v51 = vpop.permute.xlu0 %7482  ;;  %v7492_v2 = vsel %vm342_vm2, %v7475_v47, %v7477_v6 }
 0x587   : > { %7515 = vmatpush1.bf16.msra.mxu0 %v7492_v2  ;;  %v7495_v36 = vsel %vm342_vm2, %v7481_v3, %v7483_v51 }
 0x588   : > { %7567 = vmatprep.subr.bf16.mxu1 %v7495_v36 }
 0x589   : > { %7568 = vmatpush1.bf16.msra.mxu1 %v7494_v62  ;;  %v7489_v41 = vpop.permute.xlu1 %7488 }
 0x58a   : > { %v7487_v4 = vpop.permute.xlu0 %7486 }
 0x58b   : > { %v7497_v38 = vsel %vm342_vm2, %v7487_v4, %v7489_v41  ;;  %8313 = vmatmul.mubr.msk.bf16.gmra.mrb[12].mxu0 %vm1940_vm11, %v9030_v50 }
 0x58c   : > { %8315 = vmatmul.mubr.msk.bf16.gmra.mrb[12].mxu1 %vm1940_vm11, %v9030_v50  ;;  %7516 = vmatprep.subr.bf16.mxu0 %v7497_v38 }
 0x58d   : > { %v7485_v28 = vpop.permute.xlu1 %7484  ;;  %7599 = vmatprep.mubr.bf16.mxu1 %v13177_v40  ;;  %7546 = vmatprep.mubr.bf16.mxu0 %v13177_v40 }
 0x58e   : > { %v7491_v48 = vpop.permute.xlu0 %7490  ;;  %v7496_v59 = vsel %vm342_vm2, %v7485_v28, %v7487_v4 }
 0x58f   : > { %v7498_v27 = vsel %vm342_vm2, %v7489_v41, %v7491_v48  ;;  %7517 = vmatpush1.bf16.msra.mxu0 %v7496_v59  ;;  %v7499_v14 = vsel %vm342_vm2, %v7491_v48, %v7483_v51 }
 0x590   : > { %7569 = vmatprep.subr.bf16.mxu1 %v7499_v14 }
 0x591   : > { %7570 = vmatpush1.bf16.msra.mxu1 %v7498_v27  ;;  %v7691_v12 = vpop.permute.xlu1 %7690 }
 0x592   : > { %v7689_v33 = vpop.permute.xlu0 %7688 }
 0x593   : > { %v7705_v16 = vsel %vm333_vm14, %v7689_v33, %v7691_v12  ;;  %8322 = vmatmul.mubr.msk.bf16.vlgmr.msra.gmra.mrb[8].mxu0 %vm1940_vm11, %v9031_v63 }
 0x594   : > { %8324 = vmatmul.mubr.msk.bf16.vlgmr.msra.gmra.mrb[8].mxu1 %vm1940_vm11, %v9031_v63  ;;  %7726 = vmatprep.subr.bf16.mxu0 %v7705_v16 }
 0x595   : > { %v7695_v13 = vpop.permute.xlu1 %7694  ;;  %7609 = vmatprep.mubr.bf16.mxu1 %v13177_v40  ;;  %7556 = vmatprep.mubr.bf16.mxu0 %v13177_v40 }
 0x596   : > { %v7693_v1 = vpop.permute.xlu0 %7692 }
 0x597   : > { %v7706_v58 = vsel %vm333_vm14, %v7691_v12, %v7693_v1  ;;  %v7707_v44 = vsel %vm333_vm14, %v7693_v1, %v7695_v13 }
 0x598   : > { %7779 = vmatprep.subr.bf16.mxu1 %v7707_v44 }
 0x599   : > { %7780 = vmatpush1.bf16.msra.mxu1 %v7706_v58  ;;  %v7699_v57 = vpop.permute.xlu1 %7698 }
 0x59a   : > { %v7687_v10 = vpop.permute.xlu0 %7686 }
 0x59b   : > { %v7704_v30 = vsel %vm333_vm14, %v7687_v10, %v7689_v33  ;;  %8323 = vmatmul.mubr.msk.bf16.gmra.mrb[12].mxu0 %vm1940_vm11, %v9032_v53 }
 0x59c   : > { %8325 = vmatmul.mubr.msk.bf16.gmra.mrb[12].mxu1 %vm1940_vm11, %v9032_v53  ;;  %7727 = vmatpush1.bf16.msra.mxu0 %v7704_v30 }
 0x59d   : > { %v7703_v52 = vpop.permute.xlu1 %7702  ;;  %7811 = vmatprep.mubr.bf16.mxu1 %v13177_v40  ;;  %7758 = vmatprep.mubr.bf16.mxu0 %v13177_v40 }
 0x59e   : > { %v7701_v29 = vpop.permute.xlu0 %7700  ;;  %v7711_v49 = vsel %vm333_vm14, %v7703_v52, %v7695_v13 }
 0x59f   : > { %v7710_v24 = vsel %vm333_vm14, %v7701_v29, %v7703_v52  ;;  %v7709_v25 = vsel %vm333_vm14, %v7699_v57, %v7701_v29  ;;  %7781 = vmatprep.subr.bf16.mxu1 %v7711_v49 }
 0x5a0   : > { %7728 = vmatprep.subr.bf16.mxu0 %v7709_v25  ;;  %7782 = vmatpush1.bf16.msra.mxu1 %v7710_v24 }
 0x5a2   : > { %v7697_v22 = vpop.permute.xlu0 %7696 }
 0x5a3   : > { %v7708_v46 = vsel %vm333_vm14, %v7697_v22, %v7699_v57 }
 0x5a4   : > { %7729 = vmatpush1.bf16.msra.mxu0 %v7708_v46  ;;  %8334 = vmatmul.mubr.msk.bf16.vlgmr.msra.gmra.mrb[8].mxu1 %vm1940_vm11, %v9033_v18 }
 0x5a5   : > { %7821 = vmatprep.mubr.bf16.mxu1 %v13177_v40 }
 0x5a7   : > { %8332 = vmatmul.mubr.msk.bf16.vlgmr.msra.gmra.mrb[8].mxu0 %vm1940_vm11, %v9033_v18 }
 0x5a8   : > { %7768 = vmatprep.mubr.bf16.mxu0 %v13177_v40 }
 0x5ac   : > { %8335 = vmatmul.mubr.msk.bf16.gmra.mrb[12].mxu1 %vm1940_vm11, %v9034_v15 }
 0x5ae   : > { %v7855_v11 = vpop.permute.xlu1 %7854 }
 0x5af   : > { %8333 = vmatmul.mubr.msk.bf16.gmra.mrb[12].mxu0 %vm1940_vm11, %v9034_v15 }
 0x5b2   : > { %v7865_v20 = vpop.permute.xlu1 %7864 }
 0x5b3   : > { %v7860_v9 = vpop.permute.xlu0 %7859 }
 0x5b7   : > { %v7870_v3 = vpop.permute.xlu0 %7869 }
 0x677   : > { %v7813_v37 = vpop.f32.mrb[8].mxu1 }
 0x678   : > { %v7874_v60 = vadd.f32 %v7855_v11, %v7813_v37  ;;  %v7815_v35 = vpop.f32.mrb[9].mxu1 }
 0x679   : > { %v7875_v40 = vadd.f32 %v7855_v11, %v7815_v35  ;;  %v7817_v21 = vpop.f32.mrb[10].mxu1 }
 0x67a   : > { %7890 = vst [vmem:[%s12840_s22 + $0x10] sm:$0xff] %v7874_v60  ;;  %v7878_v34 = vadd.f32 %v7860_v9, %v7817_v21  ;;  %v7760_v61 = vpop.f32.mrb[8].mxu0  ;;  %v7819_v23 = vpop.f32.mrb[11].mxu1 }
 0x67b   : > { %7891 = vst [vmem:[%s12840_s22 + $0x18] sm:$0xff] %v7875_v40  ;;  %v8349_v56 = vpack.c.bf16 %v7875_v40, %v7874_v60  ;;  %v7872_v55 = vadd.f32 %v7855_v11, %v7760_v61  ;;  %v7879_v32 = vadd.f32 %v7860_v9, %v7819_v23  ;;  %v7762_v39 = vpop.f32.mrb[9].mxu0 }
 0x67c   : > { %7894 = vst [vmem:[%s12840_s22 + $0x30] sm:$0xff] %v7878_v34  ;;  %v7873_v43 = vadd.f32 %v7855_v11, %v7762_v39  ;;  %v7764_v17 = vpop.f32.mrb[10].mxu0 }
 0x67d   : > { %7953 = vst [vmem:[%s12847_s27 + $0x8] sm:$0xff] %v8349_v56  ;;  %7888 = vst [vmem:[%s12840_s22] sm:$0xff] %v7872_v55  ;;  %v8351_v31 = vpack.c.bf16 %v7879_v32, %v7878_v34  ;;  %v7876_v42 = vadd.f32 %v7860_v9, %v7764_v17  ;;  %v7766_v5 = vpop.f32.mrb[11].mxu0 }
 0x67e   : > { %7895 = vst [vmem:[%s12840_s22 + $0x38] sm:$0xff] %v7879_v32  ;;  %7889 = vst [vmem:[%s12840_s22 + $0x8] sm:$0xff] %v7873_v43  ;;  %v8348_v54 = vpack.c.bf16 %v7873_v43, %v7872_v55  ;;  %v7877_v0 = vadd.f32 %v7860_v9, %v7766_v5 }
 0x67f   : > { %7955 = vst [vmem:[%s12847_s27 + $0x18] sm:$0xff] %v8351_v31  ;;  %7892 = vst [vmem:[%s12840_s22 + $0x20] sm:$0xff] %v7876_v42  ;;  %v7823_v6 = vpop.f32.mrb[12].mxu1 }
 0x680   : > { %7952 = vst [vmem:[%s12847_s27] sm:$0xff] %v8348_v54  ;;  %7893 = vst [vmem:[%s12840_s22 + $0x28] sm:$0xff] %v7877_v0  ;;  %v8350_v45 = vpack.c.bf16 %v7877_v0, %v7876_v42  ;;  %v7882_v19 = vadd.f32 %v7865_v20, %v7823_v6  ;;  %v7825_v8 = vpop.f32.mrb[13].mxu1 }
 0x681   : > { %v7883_v26 = vadd.f32 %v7865_v20, %v7825_v8  ;;  %v7827_v7 = vpop.f32.mrb[14].mxu1 }
 0x682   : > { %7954 = vst [vmem:[%s12847_s27 + $0x10] sm:$0xff] %v8350_v45  ;;  %7898 = vst [vmem:[%s12840_s22 + $0x50] sm:$0xff] %v7882_v19  ;;  %v7886_v47 = vadd.f32 %v7870_v3, %v7827_v7  ;;  %v7770_v51 = vpop.f32.mrb[12].mxu0  ;;  %v7829_v2 = vpop.f32.mrb[15].mxu1 }
 0x683   : > { %7899 = vst [vmem:[%s12840_s22 + $0x58] sm:$0xff] %v7883_v26  ;;  %v8353_v36 = vpack.c.bf16 %v7883_v26, %v7882_v19  ;;  %v7880_v62 = vadd.f32 %v7865_v20, %v7770_v51  ;;  %v7887_v50 = vadd.f32 %v7870_v3, %v7829_v2  ;;  %v7772_v41 = vpop.f32.mrb[13].mxu0 }
 0x684   : > { %7902 = vst [vmem:[%s12840_s22 + $0x70] sm:$0xff] %v7886_v47  ;;  %v7881_v4 = vadd.f32 %v7865_v20, %v7772_v41  ;;  %v7774_v38 = vpop.f32.mrb[14].mxu0 }
 0x685   : > { %7957 = vst [vmem:[%s12847_s27 + $0x28] sm:$0xff] %v8353_v36  ;;  %7896 = vst [vmem:[%s12840_s22 + $0x40] sm:$0xff] %v7880_v62  ;;  %v8355_v28 = vpack.c.bf16 %v7887_v50, %v7886_v47  ;;  %v7884_v48 = vadd.f32 %v7870_v3, %v7774_v38  ;;  %v7776_v59 = vpop.f32.mrb[15].mxu0 }
 0x686   : > { %7903 = vst [vmem:[%s12840_s22 + $0x78] sm:$0xff] %v7887_v50  ;;  %7897 = vst [vmem:[%s12840_s22 + $0x48] sm:$0xff] %v7881_v4  ;;  %v8352_v27 = vpack.c.bf16 %v7881_v4, %v7880_v62  ;;  %v7885_v14 = vadd.f32 %v7870_v3, %v7776_v59 }
 0x687   : > { %7959 = vst [vmem:[%s12847_s27 + $0x38] sm:$0xff] %v8355_v28  ;;  %7900 = vst [vmem:[%s12840_s22 + $0x60] sm:$0xff] %v7884_v48 }
 0x688   : > { %7956 = vst [vmem:[%s12847_s27 + $0x20] sm:$0xff] %v8352_v27  ;;  %7901 = vst [vmem:[%s12840_s22 + $0x68] sm:$0xff] %v7885_v14  ;;  %v8354_v63 = vpack.c.bf16 %v7885_v14, %v7884_v48 }
 0x68a   : > { %7958 = vst [vmem:[%s12847_s27 + $0x30] sm:$0xff] %v8354_v63 }
 0x68b PF: > { %s18_s24 = sadd.s32 1, %s9042_s24  }
 0x68c   : > { %p15_p4 = scmp.ge.s32.totalorder %s18_s24, 4  }
 0x68e   :  { %17 = sbr.rel (!%p15_p4) target bundleno = 1 (0x1), region = 113 }

</bundles_post_ra>
